<compile_context>
chip_gen: v6e
topology: v6e:2x2x1
jax: 0.10.0
libtpu: 0.0.40
codegen_flags: <defaults>
</compile_context>

<pallas_src>
import jax
import jax.numpy as jnp
from jax.experimental import pallas as pl
from jax.experimental.pallas import tpu as pltpu


def _round_up(x, m):
    return ((x + m - 1) // m) * m


def make_separator_kernel(num_layers, K, BP, N, HP, eps=1e-5):
    """Kernel args (in order):
       x [K*BP, NP] f32, gamma [1, NP] f32, beta [1, NP] f32,
       (w_ih [IP, 4*HP] bf16, w_hh [HP, 4*HP] bf16, b [1, 4*HP] f32) * L,
       fc_w [HP, NSP] bf16, fc_b [1, NSP] f32,
       out [K*BP, NSP] f32,
       scratch: h [BP, HP], c [BP, HP], hbuf [K*BP, HP], seq [K*BP, HP],
                gates [K*BP, 4*HP]   (all f32)
    """
    inv_n = 1.0 / float(N)
    unroll = max(1, min(8, K))          # partial unroll; serial anyway

    def kernel(x_ref, gamma_ref, beta_ref, *rest):
        lstm_refs = rest[:3 * num_layers]
        fc_w_ref = rest[3 * num_layers]
        fc_b_ref = rest[3 * num_layers + 1]
        out_ref = rest[3 * num_layers + 2]
        h_sc = rest[3 * num_layers + 3]
        c_sc = rest[3 * num_layers + 4]
        hbuf_sc = rest[3 * num_layers + 5]
        seq_sc = rest[3 * num_layers + 6]
        gates_sc = rest[3 * num_layers + 7]

        # ---- masked LayerNorm over the true N (padded lanes are zero) ----
        x = x_ref[...]                                       # [K*BP, NP] f32
        mean = jnp.sum(x, axis=-1, keepdims=True) * inv_n
        var = jnp.sum(x * x, axis=-1, keepdims=True) * inv_n - mean * mean
        xn = (x - mean) * jax.lax.rsqrt(var + eps)
        xn = xn * gamma_ref[...] + beta_ref[...]             # padded lanes -> 0

        def run_layer(l):
            w_ih_ref = lstm_refs[3 * l]
            w_hh_ref = lstm_refs[3 * l + 1]
            b_ref = lstm_refs[3 * l + 2]

            # Time-batched input projection: one MXU matmul for all K steps.
            inp = xn if l == 0 else seq_sc[...]
            gates_sc[...] = jnp.dot(
                inp.astype(jnp.bfloat16), w_ih_ref[...],
                preferred_element_type=jnp.float32) + b_ref[...]

            # Fresh state per layer (written before read — no cross-step carry).
            h_sc[...] = jnp.zeros_like(h_sc)
            c_sc[...] = jnp.zeros_like(c_sc)

            def step(t, carry):
                r0 = pl.multiple_of(t * BP, BP)              # sublane-aligned
                g = gates_sc[pl.ds(r0, BP), :] + jnp.dot(
                    h_sc[...].astype(jnp.bfloat16), w_hh_ref[...],
                    preferred_element_type=jnp.float32)      # [BP, 4*HP] f32
                # gate layout (i, f, o, g): one fused sigmoid on [:, :3*HP]
                sig = jax.nn.sigmoid(g[:, :3 * HP])
                i_g = sig[:, 0 * HP:1 * HP]
                f_g = sig[:, 1 * HP:2 * HP]
                o_g = sig[:, 2 * HP:3 * HP]
                g_g = jnp.tanh(g[:, 3 * HP:4 * HP])
                c_new = f_g * c_sc[...] + i_g * g_g
                h_new = o_g * jnp.tanh(c_new)
                h_sc[...] = h_new
                c_sc[...] = c_new
                hbuf_sc[pl.ds(r0, BP), :] = h_new
                return carry

            jax.lax.fori_loop(0, K, step, 0, unroll=unroll)

            # Residual skip connection batched once per layer (not per step).
            if l == 0:
                seq_sc[...] = hbuf_sc[...]
            else:
                seq_sc[...] = seq_sc[...] + hbuf_sc[...]

        for l in range(num_layers):
            run_layer(l)

        # ---- FC + softmax (lane-dense NSP output, exact normalization) ----
        logits = jnp.dot(
            seq_sc[...].astype(jnp.bfloat16), fc_w_ref[...],
            preferred_element_type=jnp.float32) + fc_b_ref[...]
        m = jnp.max(logits, axis=-1, keepdims=True)
        e = jnp.exp(logits - m)
        out_ref[...] = (e / jnp.sum(e, axis=-1, keepdims=True)).astype(out_ref.dtype)

    return kernel


def _pad_gate_blocks_ifog(w, H, HP):
    """[R, 4H] with PyTorch gate order (i,f,g,o) -> [R, 4*HP] laid out (i,f,o,g)."""
    i_b, f_b, g_b, o_b = (w[:, k * H:(k + 1) * H] for k in range(4))
    pad = lambda blk: jnp.pad(blk, ((0, 0), (0, HP - H)))
    return jnp.concatenate([pad(i_b), pad(f_b), pad(o_b), pad(g_b)], axis=1)


def _pad_params(params, num_layers, N, H, NS, NP, HP, NSP):
    """Zero-pad + bf16-cast weights so every block is (8,128)/lane aligned.

    Padding is exact: padded hidden units see zero weights and zero bias, so
    their state stays 0 forever and contributes nothing downstream.  Padded fc
    output lanes get bias -1e30 (kept in f32) so softmax assigns them exactly
    zero probability.  Matmul weights are cast to bf16 (MXU-native); biases,
    LN affine parameters and the fc bias stay f32.
    """
    p = {
        "ln_gamma": jnp.pad(params["ln_gamma"], ((0, 0), (0, NP - N))),
        "ln_beta": jnp.pad(params["ln_beta"], ((0, 0), (0, NP - N))),
        "w_ih": [], "w_hh": [], "b": [],
    }
    for l in range(num_layers):
        w_ih = params["w_ih"][l]
        if l == 0:
            w_ih = jnp.pad(w_ih, ((0, NP - N), (0, 0)))
        else:
            w_ih = jnp.pad(w_ih, ((0, HP - H), (0, 0)))
        w_hh = jnp.pad(params["w_hh"][l], ((0, HP - H), (0, 0)))
        p["w_ih"].append(_pad_gate_blocks_ifog(w_ih, H, HP).astype(jnp.bfloat16))
        p["w_hh"].append(_pad_gate_blocks_ifog(w_hh, H, HP).astype(jnp.bfloat16))
        p["b"].append(_pad_gate_blocks_ifog(params["b"][l], H, HP))      # f32
    p["fc_w"] = jnp.pad(
        params["fc_w"], ((0, HP - H), (0, NSP - NS))).astype(jnp.bfloat16)
    p["fc_b"] = jnp.concatenate(
        [params["fc_b"], jnp.full((1, NSP - NS), -1e30, jnp.float32)], axis=1)
    return p


def separator_forward(mixture_weights, params, num_layers):
    """mixture_weights: [B, N, K] float32 -> masks [B, N*num_spk, K] float32."""
    B, N, K = mixture_weights.shape
    H = params["w_hh"][0].shape[0]
    NS = params["fc_w"].shape[1]

    BP = 8                                   # sublane group per batch block
    G = _round_up(B, BP) // BP               # batch groups ("parallel" grid)
    NP = _round_up(N, 128)                   # lane-aligned LN / layer-0 K dim
    HP = _round_up(H, 128)                   # lane-aligned gate slices
    NSP = _round_up(NS, 128)                 # lane-dense output stores

    pp = _pad_params(params, num_layers, N, H, NS, NP, HP, NSP)

    # [B, N, K] -> group-major, time-major rows: [G*K*BP, NP]
    # (padded batch rows are zeros; they stay finite and are sliced away).
    x = jnp.transpose(mixture_weights, (2, 0, 1))            # [K, B, N]
    x = jnp.pad(x, ((0, 0), (0, G * BP - B), (0, NP - N)))   # [K, G*BP, NP]
    x = x.reshape(K, G, BP, NP).transpose(1, 0, 2, 3)        # [G, K, BP, NP]
    x = x.reshape(G * K * BP, NP)

    in_specs = [
        pl.BlockSpec((K * BP, NP), lambda g: (g, 0)),
        pl.BlockSpec((1, NP), lambda g: (0, 0)),
        pl.BlockSpec((1, NP), lambda g: (0, 0)),
    ]
    args = [x, pp["ln_gamma"], pp["ln_beta"]]
    for l in range(num_layers):
        IP = NP if l == 0 else HP
        in_specs += [
            pl.BlockSpec((IP, 4 * HP), lambda g: (0, 0)),
            pl.BlockSpec((HP, 4 * HP), lambda g: (0, 0)),
            pl.BlockSpec((1, 4 * HP), lambda g: (0, 0)),
        ]
        args += [pp["w_ih"][l], pp["w_hh"][l], pp["b"][l]]
    in_specs += [
        pl.BlockSpec((HP, NSP), lambda g: (0, 0)),
        pl.BlockSpec((1, NSP), lambda g: (0, 0)),
    ]
    args += [pp["fc_w"], pp["fc_b"]]

    out = pl.pallas_call(
        make_separator_kernel(num_layers, K, BP, N, HP),
        out_shape=jax.ShapeDtypeStruct((G * K * BP, NSP), jnp.float32),
        grid=(G,),
        in_specs=in_specs,
        out_specs=pl.BlockSpec((K * BP, NSP), lambda g: (g, 0)),
        scratch_shapes=[
            pltpu.VMEM((BP, HP), jnp.float32),           # h state
            pltpu.VMEM((BP, HP), jnp.float32),           # c state
            pltpu.VMEM((K * BP, HP), jnp.float32),       # current layer outputs
            pltpu.VMEM((K * BP, HP), jnp.float32),       # residual stream
            pltpu.VMEM((K * BP, 4 * HP), jnp.float32),   # pre-projected gates
        ],
        compiler_params=pltpu.CompilerParams(
            # batch groups are independent -> 2nd TensorCore on v7x for B>=16
            dimension_semantics=("parallel",),
        ),
    )(*args)

    # [G*K*BP, NSP] -> [B, NS, K], dropping batch / lane padding.
    out = out.reshape(G, K, BP, NSP).transpose(1, 0, 2, 3).reshape(K, G * BP, NSP)
    out = out[:, :B, :NS]
    return jnp.transpose(out, (1, 2, 0))


def separator_reference(mixture_weights, params, num_layers, eps=1e-5):
    """Pure-JAX (f32) reference mirroring the PyTorch forward."""
    x = jnp.transpose(mixture_weights, (0, 2, 1))  # [B, K, N]
    mean = jnp.mean(x, -1, keepdims=True)
    var = jnp.mean((x - mean) ** 2, -1, keepdims=True)
    xn = (x - mean) / jnp.sqrt(var + eps) * params["ln_gamma"][0] + params["ln_beta"][0]

    H = params["w_hh"][0].shape[0]

    def lstm_layer(inp, w_ih, w_hh, b):
        Bb = inp.shape[0]

        def step(carry, xt):
            h, c = carry
            gates = xt @ w_ih + h @ w_hh + b[0]
            i = jax.nn.sigmoid(gates[:, :H])
            f = jax.nn.sigmoid(gates[:, H:2 * H])
            g = jnp.tanh(gates[:, 2 * H:3 * H])
            o = jax.nn.sigmoid(gates[:, 3 * H:])
            c = f * c + i * g
            h = o * jnp.tanh(c)
            return (h, c), h

        h0 = jnp.zeros((Bb, H), jnp.float32)
        c0 = jnp.zeros((Bb, H), jnp.float32)
        _, hs = jax.lax.scan(step, (h0, c0), jnp.transpose(inp, (1, 0, 2)))
        return jnp.transpose(hs, (1, 0, 2))

    inp = lstm_layer(xn, params["w_ih"][0], params["w_hh"][0], params["b"][0])
    for l in range(1, num_layers):
        out = lstm_layer(inp, params["w_ih"][l], params["w_hh"][l], params["b"][l])
        inp = out + inp
    logits = inp @ params["fc_w"] + params["fc_b"][0]
    masks = jax.nn.softmax(logits, axis=2)
    return jnp.transpose(masks, (0, 2, 1))


def init_params(key, N, num_spk, hidden_size, num_layers):
    params = {
        "ln_gamma": jnp.ones((1, N), jnp.float32),
        "ln_beta": jnp.zeros((1, N), jnp.float32),
        "w_ih": [],
        "w_hh": [],
        "b": [],
    }
    scale = 1.0 / jnp.sqrt(hidden_size)
    for l in range(num_layers):
        I = N if l == 0 else hidden_size
        key, k1, k2, k3 = jax.random.split(key, 4)
        params["w_ih"].append(
            jax.random.uniform(k1, (I, 4 * hidden_size), jnp.float32, -scale, scale))
        params["w_hh"].append(
            jax.random.uniform(k2, (hidden_size, 4 * hidden_size), jnp.float32, -scale, scale))
        # combined bias (b_ih + b_hh in PyTorch)
        params["b"].append(
            jax.random.uniform(k3, (1, 4 * hidden_size), jnp.float32, -scale, scale))
    key, k4, k5 = jax.random.split(key, 3)
    fscale = 1.0 / jnp.sqrt(hidden_size)
    params["fc_w"] = jax.random.uniform(
        k4, (hidden_size, N * num_spk), jnp.float32, -fscale, fscale)
    params["fc_b"] = jax.random.uniform(
        k5, (1, N * num_spk), jnp.float32, -fscale, fscale)
    return params


if __name__ == "__main__":
    # Small, module-consistent shapes.
    B, N, K = 2, 16, 8          # batch, encoded dim, number of segments
    hidden_size = 32
    num_layers = 3
    num_spk = 2

    key = jax.random.PRNGKey(0)
    key, kx, kp = jax.random.split(key, 3)
    mixture_weights = jax.random.normal(kx, (B, N, K), jnp.float32)
    params = init_params(kp, N, num_spk, hidden_size, num_layers)

    masks = separator_forward(mixture_weights, params, num_layers)
    masks = jax.block_until_ready(masks)

    ref = separator_reference(mixture_weights, params, num_layers)
    ref = jax.block_until_ready(ref)

    assert masks.shape == (B, N * num_spk, K), masks.shape
    assert bool(jnp.all(jnp.isfinite(masks)))
    # Exact softmax normalization -> rows sum to 1 along the N*num_spk axis.
    assert jnp.allclose(jnp.sum(masks, axis=1), 1.0, atol=1e-3)
    # Kernel uses bf16 matmul weights/activations (f32 accumulation); the pure
    # f32 reference therefore matches only to bf16-level tolerance.
    assert jnp.allclose(masks, ref, atol=1e-2, rtol=1e-2)

    print("KERNEL_OK")
</pallas_src>

<mosaic_0001>
module attributes {stable_mosaic.version = 11 : i64} {
  func.func @kernel(%arg0: i32, %arg1: memref<64x128xf32, #tpu.memory_space<vmem>>, %arg2: memref<1x128xf32, #tpu.memory_space<vmem>>, %arg3: memref<1x128xf32, #tpu.memory_space<vmem>>, %arg4: memref<128x512xbf16, #tpu.memory_space<vmem>>, %arg5: memref<128x512xbf16, #tpu.memory_space<vmem>>, %arg6: memref<1x512xf32, #tpu.memory_space<vmem>>, %arg7: memref<128x512xbf16, #tpu.memory_space<vmem>>, %arg8: memref<128x512xbf16, #tpu.memory_space<vmem>>, %arg9: memref<1x512xf32, #tpu.memory_space<vmem>>, %arg10: memref<128x512xbf16, #tpu.memory_space<vmem>>, %arg11: memref<128x512xbf16, #tpu.memory_space<vmem>>, %arg12: memref<1x512xf32, #tpu.memory_space<vmem>>, %arg13: memref<128x128xbf16, #tpu.memory_space<vmem>>, %arg14: memref<1x128xf32, #tpu.memory_space<vmem>>, %arg15: memref<64x128xf32, #tpu.memory_space<vmem>>, %arg16: memref<8x128xf32, #tpu.memory_space<vmem>>, %arg17: memref<8x128xf32, #tpu.memory_space<vmem>>, %arg18: memref<64x128xf32, #tpu.memory_space<vmem>>, %arg19: memref<64x128xf32, #tpu.memory_space<vmem>>, %arg20: memref<64x512xf32, #tpu.memory_space<vmem>>) attributes {dimension_semantics = [#tpu.dimension_semantics<parallel>], iteration_bounds = array<i64: 1>, scalar_prefetch = 0 : i64, scratch_operands = 5 : i64, tpu.core_type = #tpu.core_type<tc>, window_params = [{transform_indices = @transform_0, window_bounds = array<i64: 64, 128>}, {pipeline_mode = #tpu.pipeline_mode<synchronous>, transform_indices = @transform_1, window_bounds = array<i64: 1, 128>}, {pipeline_mode = #tpu.pipeline_mode<synchronous>, transform_indices = @transform_2, window_bounds = array<i64: 1, 128>}, {pipeline_mode = #tpu.pipeline_mode<synchronous>, transform_indices = @transform_3, window_bounds = array<i64: 128, 512>}, {pipeline_mode = #tpu.pipeline_mode<synchronous>, transform_indices = @transform_4, window_bounds = array<i64: 128, 512>}, {pipeline_mode = #tpu.pipeline_mode<synchronous>, transform_indices = @transform_5, window_bounds = array<i64: 1, 512>}, {pipeline_mode = #tpu.pipeline_mode<synchronous>, transform_indices = @transform_6, window_bounds = array<i64: 128, 512>}, {pipeline_mode = #tpu.pipeline_mode<synchronous>, transform_indices = @transform_7, window_bounds = array<i64: 128, 512>}, {pipeline_mode = #tpu.pipeline_mode<synchronous>, transform_indices = @transform_8, window_bounds = array<i64: 1, 512>}, {pipeline_mode = #tpu.pipeline_mode<synchronous>, transform_indices = @transform_9, window_bounds = array<i64: 128, 512>}, {pipeline_mode = #tpu.pipeline_mode<synchronous>, transform_indices = @transform_10, window_bounds = array<i64: 128, 512>}, {pipeline_mode = #tpu.pipeline_mode<synchronous>, transform_indices = @transform_11, window_bounds = array<i64: 1, 512>}, {pipeline_mode = #tpu.pipeline_mode<synchronous>, transform_indices = @transform_12, window_bounds = array<i64: 128, 128>}, {pipeline_mode = #tpu.pipeline_mode<synchronous>, transform_indices = @transform_13, window_bounds = array<i64: 1, 128>}, {transform_indices = @transform_14, window_bounds = array<i64: 64, 128>}]} {
    %c0 = arith.constant 0 : index
    %c0_0 = arith.constant 0 : index
    %0 = vector.load %arg1[%c0, %c0_0] : memref<64x128xf32, #tpu.memory_space<vmem>>, vector<64x128xf32>
    %cst = arith.constant dense<0.000000e+00> : vector<64xf32>
    %1 = vector.multi_reduction <add>, %0, %cst [1] : vector<64x128xf32> to vector<64xf32>
    %2 = vector.shape_cast %1 : vector<64xf32> to vector<64x1xf32>
    %cst_1 = arith.constant 6.250000e-02 : f32
    %3 = vector.broadcast %cst_1 : f32 to vector<64x1xf32>
    %4 = arith.mulf %2, %3 : vector<64x1xf32>
    %5 = arith.mulf %0, %0 : vector<64x128xf32>
    %cst_2 = arith.constant dense<0.000000e+00> : vector<64xf32>
    %6 = vector.multi_reduction <add>, %5, %cst_2 [1] : vector<64x128xf32> to vector<64xf32>
    %7 = vector.shape_cast %6 : vector<64xf32> to vector<64x1xf32>
    %cst_3 = arith.constant 6.250000e-02 : f32
    %8 = vector.broadcast %cst_3 : f32 to vector<64x1xf32>
    %9 = arith.mulf %7, %8 : vector<64x1xf32>
    %10 = arith.mulf %4, %4 : vector<64x1xf32>
    %11 = arith.subf %9, %10 : vector<64x1xf32>
    %12 = vector.broadcast %4 : vector<64x1xf32> to vector<64x128xf32>
    %13 = arith.subf %0, %12 : vector<64x128xf32>
    %cst_4 = arith.constant 9.99999974E-6 : f32
    %14 = vector.broadcast %cst_4 : f32 to vector<64x1xf32>
    %15 = arith.addf %11, %14 : vector<64x1xf32>
    %16 = math.rsqrt %15 : vector<64x1xf32>
    %17 = vector.broadcast %16 : vector<64x1xf32> to vector<64x128xf32>
    %18 = arith.mulf %13, %17 : vector<64x128xf32>
    %c0_5 = arith.constant 0 : index
    %c0_6 = arith.constant 0 : index
    %19 = vector.load %arg2[%c0_5, %c0_6] : memref<1x128xf32, #tpu.memory_space<vmem>>, vector<1x128xf32>
    %20 = vector.broadcast %19 : vector<1x128xf32> to vector<64x128xf32>
    %21 = arith.mulf %18, %20 : vector<64x128xf32>
    %c0_7 = arith.constant 0 : index
    %c0_8 = arith.constant 0 : index
    %22 = vector.load %arg3[%c0_7, %c0_8] : memref<1x128xf32, #tpu.memory_space<vmem>>, vector<1x128xf32>
    %23 = vector.broadcast %22 : vector<1x128xf32> to vector<64x128xf32>
    %24 = arith.addf %21, %23 : vector<64x128xf32>
    %25 = arith.truncf %24 : vector<64x128xf32> to vector<64x128xbf16>
    %c0_9 = arith.constant 0 : index
    %c0_10 = arith.constant 0 : index
    %26 = vector.load %arg4[%c0_9, %c0_10] : memref<128x512xbf16, #tpu.memory_space<vmem>>, vector<128x512xbf16>
    %cst_11 = arith.constant dense<0.000000e+00> : vector<64x512xf32>
    %27 = tpu.matmul %25, %26, %cst_11 {dimension_numbers = #tpu.dot_dimension_numbers<[1], [0], [0], [1], [0, 0, 1, 1], [], []>} : vector<64x128xbf16>, vector<128x512xbf16>, vector<64x512xf32> -> vector<64x512xf32>
    %c0_12 = arith.constant 0 : index
    %c0_13 = arith.constant 0 : index
    %28 = vector.load %arg6[%c0_12, %c0_13] : memref<1x512xf32, #tpu.memory_space<vmem>>, vector<1x512xf32>
    %29 = vector.broadcast %28 : vector<1x512xf32> to vector<64x512xf32>
    %30 = arith.addf %27, %29 : vector<64x512xf32>
    %c0_14 = arith.constant 0 : index
    %c0_15 = arith.constant 0 : index
    %31 = vector.load %arg20[%c0_14, %c0_15] : memref<64x512xf32, #tpu.memory_space<vmem>>, vector<64x512xf32>
    tpu.vector_store %arg20[%c0_14, %c0_15], %30 {strides = array<i32>} : memref<64x512xf32, #tpu.memory_space<vmem>>, vector<64x512xf32>,
    %cst_16 = arith.constant 0.000000e+00 : f32
    %32 = vector.broadcast %cst_16 : f32 to vector<8x128xf32>
    %c0_17 = arith.constant 0 : index
    %c0_18 = arith.constant 0 : index
    %33 = vector.load %arg16[%c0_17, %c0_18] : memref<8x128xf32, #tpu.memory_space<vmem>>, vector<8x128xf32>
    tpu.vector_store %arg16[%c0_17, %c0_18], %32 {strides = array<i32>} : memref<8x128xf32, #tpu.memory_space<vmem>>, vector<8x128xf32>,
    %cst_19 = arith.constant 0.000000e+00 : f32
    %34 = vector.broadcast %cst_19 : f32 to vector<8x128xf32>
    %c0_20 = arith.constant 0 : index
    %c0_21 = arith.constant 0 : index
    %35 = vector.load %arg17[%c0_20, %c0_21] : memref<8x128xf32, #tpu.memory_space<vmem>>, vector<8x128xf32>
    tpu.vector_store %arg17[%c0_20, %c0_21], %34 {strides = array<i32>} : memref<8x128xf32, #tpu.memory_space<vmem>>, vector<8x128xf32>,
    %c0_i32 = arith.constant 0 : i32
    %c8_i32 = arith.constant 8 : i32
    %36 = arith.muli %c0_i32, %c8_i32 : i32
    %37 = tpu.assume_multiple %36, 8 : i32
    %38 = arith.index_cast %37 : i32 to index
    %c0_22 = arith.constant 0 : index
    %39 = vector.load %arg20[%38, %c0_22] : memref<64x512xf32, #tpu.memory_space<vmem>>, vector<8x512xf32>
    %c0_23 = arith.constant 0 : index
    %c0_24 = arith.constant 0 : index
    %40 = vector.load %arg16[%c0_23, %c0_24] : memref<8x128xf32, #tpu.memory_space<vmem>>, vector<8x128xf32>
    %41 = arith.truncf %40 : vector<8x128xf32> to vector<8x128xbf16>
    %c0_25 = arith.constant 0 : index
    %c0_26 = arith.constant 0 : index
    %42 = vector.load %arg5[%c0_25, %c0_26] : memref<128x512xbf16, #tpu.memory_space<vmem>>, vector<128x512xbf16>
    %cst_27 = arith.constant dense<0.000000e+00> : vector<8x512xf32>
    %43 = tpu.matmul %41, %42, %cst_27 {dimension_numbers = #tpu.dot_dimension_numbers<[1], [0], [0], [1], [0, 0, 1, 1], [], []>} : vector<8x128xbf16>, vector<128x512xbf16>, vector<8x512xf32> -> vector<8x512xf32>
    %44 = arith.addf %39, %43 : vector<8x512xf32>
    %45 = vector.extract_strided_slice %44 {offsets = [0, 0], sizes = [8, 384], strides = [1, 1]} : vector<8x512xf32> to vector<8x384xf32>
    %46 = arith.negf %45 : vector<8x384xf32>
    %47 = math.exp %46 : vector<8x384xf32>
    %cst_28 = arith.constant 1.000000e+00 : f32
    %48 = vector.broadcast %cst_28 : f32 to vector<8x384xf32>
    %49 = arith.addf %48, %47 : vector<8x384xf32>
    %50 = arith.divf %48, %49 : vector<8x384xf32>
    %51 = vector.extract_strided_slice %50 {offsets = [0, 0], sizes = [8, 128], strides = [1, 1]} : vector<8x384xf32> to vector<8x128xf32>
    %52 = vector.extract_strided_slice %50 {offsets = [0, 128], sizes = [8, 128], strides = [1, 1]} : vector<8x384xf32> to vector<8x128xf32>
    %53 = vector.extract_strided_slice %50 {offsets = [0, 256], sizes = [8, 128], strides = [1, 1]} : vector<8x384xf32> to vector<8x128xf32>
    %54 = vector.extract_strided_slice %44 {offsets = [0, 384], sizes = [8, 128], strides = [1, 1]} : vector<8x512xf32> to vector<8x128xf32>
    %55 = math.tanh %54 : vector<8x128xf32>
    %c0_29 = arith.constant 0 : index
    %c0_30 = arith.constant 0 : index
    %56 = vector.load %arg17[%c0_29, %c0_30] : memref<8x128xf32, #tpu.memory_space<vmem>>, vector<8x128xf32>
    %57 = arith.mulf %52, %56 : vector<8x128xf32>
    %58 = arith.mulf %51, %55 : vector<8x128xf32>
    %59 = arith.addf %57, %58 : vector<8x128xf32>
    %60 = math.tanh %59 : vector<8x128xf32>
    %61 = arith.mulf %53, %60 : vector<8x128xf32>
    %c0_31 = arith.constant 0 : index
    %c0_32 = arith.constant 0 : index
    %62 = vector.load %arg16[%c0_31, %c0_32] : memref<8x128xf32, #tpu.memory_space<vmem>>, vector<8x128xf32>
    tpu.vector_store %arg16[%c0_31, %c0_32], %61 {strides = array<i32>} : memref<8x128xf32, #tpu.memory_space<vmem>>, vector<8x128xf32>,
    %c0_33 = arith.constant 0 : index
    %c0_34 = arith.constant 0 : index
    %63 = vector.load %arg17[%c0_33, %c0_34] : memref<8x128xf32, #tpu.memory_space<vmem>>, vector<8x128xf32>
    tpu.vector_store %arg17[%c0_33, %c0_34], %59 {strides = array<i32>} : memref<8x128xf32, #tpu.memory_space<vmem>>, vector<8x128xf32>,
    %64 = arith.index_cast %37 : i32 to index
    %c0_35 = arith.constant 0 : index
    %65 = vector.load %arg18[%64, %c0_35] : memref<64x128xf32, #tpu.memory_space<vmem>>, vector<8x128xf32>
    tpu.vector_store %arg18[%64, %c0_35], %61 {strides = array<i32>} : memref<64x128xf32, #tpu.memory_space<vmem>>, vector<8x128xf32>,
    %c1_i32 = arith.constant 1 : i32
    %c8_i32_36 = arith.constant 8 : i32
    %66 = arith.muli %c1_i32, %c8_i32_36 : i32
    %67 = tpu.assume_multiple %66, 8 : i32
    %68 = arith.index_cast %67 : i32 to index
    %c0_37 = arith.constant 0 : index
    %69 = vector.load %arg20[%68, %c0_37] : memref<64x512xf32, #tpu.memory_space<vmem>>, vector<8x512xf32>
    %c0_38 = arith.constant 0 : index
    %c0_39 = arith.constant 0 : index
    %70 = vector.load %arg16[%c0_38, %c0_39] : memref<8x128xf32, #tpu.memory_space<vmem>>, vector<8x128xf32>
    %71 = arith.truncf %70 : vector<8x128xf32> to vector<8x128xbf16>
    %c0_40 = arith.constant 0 : index
    %c0_41 = arith.constant 0 : index
    %72 = vector.load %arg5[%c0_40, %c0_41] : memref<128x512xbf16, #tpu.memory_space<vmem>>, vector<128x512xbf16>
    %cst_42 = arith.constant dense<0.000000e+00> : vector<8x512xf32>
    %73 = tpu.matmul %71, %72, %cst_42 {dimension_numbers = #tpu.dot_dimension_numbers<[1], [0], [0], [1], [0, 0, 1, 1], [], []>} : vector<8x128xbf16>, vector<128x512xbf16>, vector<8x512xf32> -> vector<8x512xf32>
    %74 = arith.addf %69, %73 : vector<8x512xf32>
    %75 = vector.extract_strided_slice %74 {offsets = [0, 0], sizes = [8, 384], strides = [1, 1]} : vector<8x512xf32> to vector<8x384xf32>
    %76 = arith.negf %75 : vector<8x384xf32>
    %77 = math.exp %76 : vector<8x384xf32>
    %cst_43 = arith.constant 1.000000e+00 : f32
    %78 = vector.broadcast %cst_43 : f32 to vector<8x384xf32>
    %79 = arith.addf %78, %77 : vector<8x384xf32>
    %80 = arith.divf %78, %79 : vector<8x384xf32>
    %81 = vector.extract_strided_slice %80 {offsets = [0, 0], sizes = [8, 128], strides = [1, 1]} : vector<8x384xf32> to vector<8x128xf32>
    %82 = vector.extract_strided_slice %80 {offsets = [0, 128], sizes = [8, 128], strides = [1, 1]} : vector<8x384xf32> to vector<8x128xf32>
    %83 = vector.extract_strided_slice %80 {offsets = [0, 256], sizes = [8, 128], strides = [1, 1]} : vector<8x384xf32> to vector<8x128xf32>
    %84 = vector.extract_strided_slice %74 {offsets = [0, 384], sizes = [8, 128], strides = [1, 1]} : vector<8x512xf32> to vector<8x128xf32>
    %85 = math.tanh %84 : vector<8x128xf32>
    %c0_44 = arith.constant 0 : index
    %c0_45 = arith.constant 0 : index
    %86 = vector.load %arg17[%c0_44, %c0_45] : memref<8x128xf32, #tpu.memory_space<vmem>>, vector<8x128xf32>
    %87 = arith.mulf %82, %86 : vector<8x128xf32>
    %88 = arith.mulf %81, %85 : vector<8x128xf32>
    %89 = arith.addf %87, %88 : vector<8x128xf32>
    %90 = math.tanh %89 : vector<8x128xf32>
    %91 = arith.mulf %83, %90 : vector<8x128xf32>
    %c0_46 = arith.constant 0 : index
    %c0_47 = arith.constant 0 : index
    %92 = vector.load %arg16[%c0_46, %c0_47] : memref<8x128xf32, #tpu.memory_space<vmem>>, vector<8x128xf32>
    tpu.vector_store %arg16[%c0_46, %c0_47], %91 {strides = array<i32>} : memref<8x128xf32, #tpu.memory_space<vmem>>, vector<8x128xf32>,
    %c0_48 = arith.constant 0 : index
    %c0_49 = arith.constant 0 : index
    %93 = vector.load %arg17[%c0_48, %c0_49] : memref<8x128xf32, #tpu.memory_space<vmem>>, vector<8x128xf32>
    tpu.vector_store %arg17[%c0_48, %c0_49], %89 {strides = array<i32>} : memref<8x128xf32, #tpu.memory_space<vmem>>, vector<8x128xf32>,
    %94 = arith.index_cast %67 : i32 to index
    %c0_50 = arith.constant 0 : index
    %95 = vector.load %arg18[%94, %c0_50] : memref<64x128xf32, #tpu.memory_space<vmem>>, vector<8x128xf32>
    tpu.vector_store %arg18[%94, %c0_50], %91 {strides = array<i32>} : memref<64x128xf32, #tpu.memory_space<vmem>>, vector<8x128xf32>,
    %c2_i32 = arith.constant 2 : i32
    %c8_i32_51 = arith.constant 8 : i32
    %96 = arith.muli %c2_i32, %c8_i32_51 : i32
    %97 = tpu.assume_multiple %96, 8 : i32
    %98 = arith.index_cast %97 : i32 to index
    %c0_52 = arith.constant 0 : index
    %99 = vector.load %arg20[%98, %c0_52] : memref<64x512xf32, #tpu.memory_space<vmem>>, vector<8x512xf32>
    %c0_53 = arith.constant 0 : index
    %c0_54 = arith.constant 0 : index
    %100 = vector.load %arg16[%c0_53, %c0_54] : memref<8x128xf32, #tpu.memory_space<vmem>>, vector<8x128xf32>
    %101 = arith.truncf %100 : vector<8x128xf32> to vector<8x128xbf16>
    %c0_55 = arith.constant 0 : index
    %c0_56 = arith.constant 0 : index
    %102 = vector.load %arg5[%c0_55, %c0_56] : memref<128x512xbf16, #tpu.memory_space<vmem>>, vector<128x512xbf16>
    %cst_57 = arith.constant dense<0.000000e+00> : vector<8x512xf32>
    %103 = tpu.matmul %101, %102, %cst_57 {dimension_numbers = #tpu.dot_dimension_numbers<[1], [0], [0], [1], [0, 0, 1, 1], [], []>} : vector<8x128xbf16>, vector<128x512xbf16>, vector<8x512xf32> -> vector<8x512xf32>
    %104 = arith.addf %99, %103 : vector<8x512xf32>
    %105 = vector.extract_strided_slice %104 {offsets = [0, 0], sizes = [8, 384], strides = [1, 1]} : vector<8x512xf32> to vector<8x384xf32>
    %106 = arith.negf %105 : vector<8x384xf32>
    %107 = math.exp %106 : vector<8x384xf32>
    %cst_58 = arith.constant 1.000000e+00 : f32
    %108 = vector.broadcast %cst_58 : f32 to vector<8x384xf32>
    %109 = arith.addf %108, %107 : vector<8x384xf32>
    %110 = arith.divf %108, %109 : vector<8x384xf32>
    %111 = vector.extract_strided_slice %110 {offsets = [0, 0], sizes = [8, 128], strides = [1, 1]} : vector<8x384xf32> to vector<8x128xf32>
    %112 = vector.extract_strided_slice %110 {offsets = [0, 128], sizes = [8, 128], strides = [1, 1]} : vector<8x384xf32> to vector<8x128xf32>
    %113 = vector.extract_strided_slice %110 {offsets = [0, 256], sizes = [8, 128], strides = [1, 1]} : vector<8x384xf32> to vector<8x128xf32>
    %114 = vector.extract_strided_slice %104 {offsets = [0, 384], sizes = [8, 128], strides = [1, 1]} : vector<8x512xf32> to vector<8x128xf32>
    %115 = math.tanh %114 : vector<8x128xf32>
    %c0_59 = arith.constant 0 : index
    %c0_60 = arith.constant 0 : index
    %116 = vector.load %arg17[%c0_59, %c0_60] : memref<8x128xf32, #tpu.memory_space<vmem>>, vector<8x128xf32>
    %117 = arith.mulf %112, %116 : vector<8x128xf32>
    %118 = arith.mulf %111, %115 : vector<8x128xf32>
    %119 = arith.addf %117, %118 : vector<8x128xf32>
    %120 = math.tanh %119 : vector<8x128xf32>
    %121 = arith.mulf %113, %120 : vector<8x128xf32>
    %c0_61 = arith.constant 0 : index
    %c0_62 = arith.constant 0 : index
    %122 = vector.load %arg16[%c0_61, %c0_62] : memref<8x128xf32, #tpu.memory_space<vmem>>, vector<8x128xf32>
    tpu.vector_store %arg16[%c0_61, %c0_62], %121 {strides = array<i32>} : memref<8x128xf32, #tpu.memory_space<vmem>>, vector<8x128xf32>,
    %c0_63 = arith.constant 0 : index
    %c0_64 = arith.constant 0 : index
    %123 = vector.load %arg17[%c0_63, %c0_64] : memref<8x128xf32, #tpu.memory_space<vmem>>, vector<8x128xf32>
    tpu.vector_store %arg17[%c0_63, %c0_64], %119 {strides = array<i32>} : memref<8x128xf32, #tpu.memory_space<vmem>>, vector<8x128xf32>,
    %124 = arith.index_cast %97 : i32 to index
    %c0_65 = arith.constant 0 : index
    %125 = vector.load %arg18[%124, %c0_65] : memref<64x128xf32, #tpu.memory_space<vmem>>, vector<8x128xf32>
    tpu.vector_store %arg18[%124, %c0_65], %121 {strides = array<i32>} : memref<64x128xf32, #tpu.memory_space<vmem>>, vector<8x128xf32>,
    %c3_i32 = arith.constant 3 : i32
    %c8_i32_66 = arith.constant 8 : i32
    %126 = arith.muli %c3_i32, %c8_i32_66 : i32
    %127 = tpu.assume_multiple %126, 8 : i32
    %128 = arith.index_cast %127 : i32 to index
    %c0_67 = arith.constant 0 : index
    %129 = vector.load %arg20[%128, %c0_67] : memref<64x512xf32, #tpu.memory_space<vmem>>, vector<8x512xf32>
    %c0_68 = arith.constant 0 : index
    %c0_69 = arith.constant 0 : index
    %130 = vector.load %arg16[%c0_68, %c0_69] : memref<8x128xf32, #tpu.memory_space<vmem>>, vector<8x128xf32>
    %131 = arith.truncf %130 : vector<8x128xf32> to vector<8x128xbf16>
    %c0_70 = arith.constant 0 : index
    %c0_71 = arith.constant 0 : index
    %132 = vector.load %arg5[%c0_70, %c0_71] : memref<128x512xbf16, #tpu.memory_space<vmem>>, vector<128x512xbf16>
    %cst_72 = arith.constant dense<0.000000e+00> : vector<8x512xf32>
    %133 = tpu.matmul %131, %132, %cst_72 {dimension_numbers = #tpu.dot_dimension_numbers<[1], [0], [0], [1], [0, 0, 1, 1], [], []>} : vector<8x128xbf16>, vector<128x512xbf16>, vector<8x512xf32> -> vector<8x512xf32>
    %134 = arith.addf %129, %133 : vector<8x512xf32>
    %135 = vector.extract_strided_slice %134 {offsets = [0, 0], sizes = [8, 384], strides = [1, 1]} : vector<8x512xf32> to vector<8x384xf32>
    %136 = arith.negf %135 : vector<8x384xf32>
    %137 = math.exp %136 : vector<8x384xf32>
    %cst_73 = arith.constant 1.000000e+00 : f32
    %138 = vector.broadcast %cst_73 : f32 to vector<8x384xf32>
    %139 = arith.addf %138, %137 : vector<8x384xf32>
    %140 = arith.divf %138, %139 : vector<8x384xf32>
    %141 = vector.extract_strided_slice %140 {offsets = [0, 0], sizes = [8, 128], strides = [1, 1]} : vector<8x384xf32> to vector<8x128xf32>
    %142 = vector.extract_strided_slice %140 {offsets = [0, 128], sizes = [8, 128], strides = [1, 1]} : vector<8x384xf32> to vector<8x128xf32>
    %143 = vector.extract_strided_slice %140 {offsets = [0, 256], sizes = [8, 128], strides = [1, 1]} : vector<8x384xf32> to vector<8x128xf32>
    %144 = vector.extract_strided_slice %134 {offsets = [0, 384], sizes = [8, 128], strides = [1, 1]} : vector<8x512xf32> to vector<8x128xf32>
    %145 = math.tanh %144 : vector<8x128xf32>
    %c0_74 = arith.constant 0 : index
    %c0_75 = arith.constant 0 : index
    %146 = vector.load %arg17[%c0_74, %c0_75] : memref<8x128xf32, #tpu.memory_space<vmem>>, vector<8x128xf32>
    %147 = arith.mulf %142, %146 : vector<8x128xf32>
    %148 = arith.mulf %141, %145 : vector<8x128xf32>
    %149 = arith.addf %147, %148 : vector<8x128xf32>
    %150 = math.tanh %149 : vector<8x128xf32>
    %151 = arith.mulf %143, %150 : vector<8x128xf32>
    %c0_76 = arith.constant 0 : index
    %c0_77 = arith.constant 0 : index
    %152 = vector.load %arg16[%c0_76, %c0_77] : memref<8x128xf32, #tpu.memory_space<vmem>>, vector<8x128xf32>
    tpu.vector_store %arg16[%c0_76, %c0_77], %151 {strides = array<i32>} : memref<8x128xf32, #tpu.memory_space<vmem>>, vector<8x128xf32>,
    %c0_78 = arith.constant 0 : index
    %c0_79 = arith.constant 0 : index
    %153 = vector.load %arg17[%c0_78, %c0_79] : memref<8x128xf32, #tpu.memory_space<vmem>>, vector<8x128xf32>
    tpu.vector_store %arg17[%c0_78, %c0_79], %149 {strides = array<i32>} : memref<8x128xf32, #tpu.memory_space<vmem>>, vector<8x128xf32>,
    %154 = arith.index_cast %127 : i32 to index
    %c0_80 = arith.constant 0 : index
    %155 = vector.load %arg18[%154, %c0_80] : memref<64x128xf32, #tpu.memory_space<vmem>>, vector<8x128xf32>
    tpu.vector_store %arg18[%154, %c0_80], %151 {strides = array<i32>} : memref<64x128xf32, #tpu.memory_space<vmem>>, vector<8x128xf32>,
    %c4_i32 = arith.constant 4 : i32
    %c8_i32_81 = arith.constant 8 : i32
    %156 = arith.muli %c4_i32, %c8_i32_81 : i32
    %157 = tpu.assume_multiple %156, 8 : i32
    %158 = arith.index_cast %157 : i32 to index
    %c0_82 = arith.constant 0 : index
    %159 = vector.load %arg20[%158, %c0_82] : memref<64x512xf32, #tpu.memory_space<vmem>>, vector<8x512xf32>
    %c0_83 = arith.constant 0 : index
    %c0_84 = arith.constant 0 : index
    %160 = vector.load %arg16[%c0_83, %c0_84] : memref<8x128xf32, #tpu.memory_space<vmem>>, vector<8x128xf32>
    %161 = arith.truncf %160 : vector<8x128xf32> to vector<8x128xbf16>
    %c0_85 = arith.constant 0 : index
    %c0_86 = arith.constant 0 : index
    %162 = vector.load %arg5[%c0_85, %c0_86] : memref<128x512xbf16, #tpu.memory_space<vmem>>, vector<128x512xbf16>
    %cst_87 = arith.constant dense<0.000000e+00> : vector<8x512xf32>
    %163 = tpu.matmul %161, %162, %cst_87 {dimension_numbers = #tpu.dot_dimension_numbers<[1], [0], [0], [1], [0, 0, 1, 1], [], []>} : vector<8x128xbf16>, vector<128x512xbf16>, vector<8x512xf32> -> vector<8x512xf32>
    %164 = arith.addf %159, %163 : vector<8x512xf32>
    %165 = vector.extract_strided_slice %164 {offsets = [0, 0], sizes = [8, 384], strides = [1, 1]} : vector<8x512xf32> to vector<8x384xf32>
    %166 = arith.negf %165 : vector<8x384xf32>
    %167 = math.exp %166 : vector<8x384xf32>
    %cst_88 = arith.constant 1.000000e+00 : f32
    %168 = vector.broadcast %cst_88 : f32 to vector<8x384xf32>
    %169 = arith.addf %168, %167 : vector<8x384xf32>
    %170 = arith.divf %168, %169 : vector<8x384xf32>
    %171 = vector.extract_strided_slice %170 {offsets = [0, 0], sizes = [8, 128], strides = [1, 1]} : vector<8x384xf32> to vector<8x128xf32>
    %172 = vector.extract_strided_slice %170 {offsets = [0, 128], sizes = [8, 128], strides = [1, 1]} : vector<8x384xf32> to vector<8x128xf32>
    %173 = vector.extract_strided_slice %170 {offsets = [0, 256], sizes = [8, 128], strides = [1, 1]} : vector<8x384xf32> to vector<8x128xf32>
    %174 = vector.extract_strided_slice %164 {offsets = [0, 384], sizes = [8, 128], strides = [1, 1]} : vector<8x512xf32> to vector<8x128xf32>
    %175 = math.tanh %174 : vector<8x128xf32>
    %c0_89 = arith.constant 0 : index
    %c0_90 = arith.constant 0 : index
    %176 = vector.load %arg17[%c0_89, %c0_90] : memref<8x128xf32, #tpu.memory_space<vmem>>, vector<8x128xf32>
    %177 = arith.mulf %172, %176 : vector<8x128xf32>
    %178 = arith.mulf %171, %175 : vector<8x128xf32>
    %179 = arith.addf %177, %178 : vector<8x128xf32>
    %180 = math.tanh %179 : vector<8x128xf32>
    %181 = arith.mulf %173, %180 : vector<8x128xf32>
    %c0_91 = arith.constant 0 : index
    %c0_92 = arith.constant 0 : index
    %182 = vector.load %arg16[%c0_91, %c0_92] : memref<8x128xf32, #tpu.memory_space<vmem>>, vector<8x128xf32>
    tpu.vector_store %arg16[%c0_91, %c0_92], %181 {strides = array<i32>} : memref<8x128xf32, #tpu.memory_space<vmem>>, vector<8x128xf32>,
    %c0_93 = arith.constant 0 : index
    %c0_94 = arith.constant 0 : index
    %183 = vector.load %arg17[%c0_93, %c0_94] : memref<8x128xf32, #tpu.memory_space<vmem>>, vector<8x128xf32>
    tpu.vector_store %arg17[%c0_93, %c0_94], %179 {strides = array<i32>} : memref<8x128xf32, #tpu.memory_space<vmem>>, vector<8x128xf32>,
    %184 = arith.index_cast %157 : i32 to index
    %c0_95 = arith.constant 0 : index
    %185 = vector.load %arg18[%184, %c0_95] : memref<64x128xf32, #tpu.memory_space<vmem>>, vector<8x128xf32>
    tpu.vector_store %arg18[%184, %c0_95], %181 {strides = array<i32>} : memref<64x128xf32, #tpu.memory_space<vmem>>, vector<8x128xf32>,
    %c5_i32 = arith.constant 5 : i32
    %c8_i32_96 = arith.constant 8 : i32
    %186 = arith.muli %c5_i32, %c8_i32_96 : i32
    %187 = tpu.assume_multiple %186, 8 : i32
    %188 = arith.index_cast %187 : i32 to index
    %c0_97 = arith.constant 0 : index
    %189 = vector.load %arg20[%188, %c0_97] : memref<64x512xf32, #tpu.memory_space<vmem>>, vector<8x512xf32>
    %c0_98 = arith.constant 0 : index
    %c0_99 = arith.constant 0 : index
    %190 = vector.load %arg16[%c0_98, %c0_99] : memref<8x128xf32, #tpu.memory_space<vmem>>, vector<8x128xf32>
    %191 = arith.truncf %190 : vector<8x128xf32> to vector<8x128xbf16>
    %c0_100 = arith.constant 0 : index
    %c0_101 = arith.constant 0 : index
    %192 = vector.load %arg5[%c0_100, %c0_101] : memref<128x512xbf16, #tpu.memory_space<vmem>>, vector<128x512xbf16>
    %cst_102 = arith.constant dense<0.000000e+00> : vector<8x512xf32>
    %193 = tpu.matmul %191, %192, %cst_102 {dimension_numbers = #tpu.dot_dimension_numbers<[1], [0], [0], [1], [0, 0, 1, 1], [], []>} : vector<8x128xbf16>, vector<128x512xbf16>, vector<8x512xf32> -> vector<8x512xf32>
    %194 = arith.addf %189, %193 : vector<8x512xf32>
    %195 = vector.extract_strided_slice %194 {offsets = [0, 0], sizes = [8, 384], strides = [1, 1]} : vector<8x512xf32> to vector<8x384xf32>
    %196 = arith.negf %195 : vector<8x384xf32>
    %197 = math.exp %196 : vector<8x384xf32>
    %cst_103 = arith.constant 1.000000e+00 : f32
    %198 = vector.broadcast %cst_103 : f32 to vector<8x384xf32>
    %199 = arith.addf %198, %197 : vector<8x384xf32>
    %200 = arith.divf %198, %199 : vector<8x384xf32>
    %201 = vector.extract_strided_slice %200 {offsets = [0, 0], sizes = [8, 128], strides = [1, 1]} : vector<8x384xf32> to vector<8x128xf32>
    %202 = vector.extract_strided_slice %200 {offsets = [0, 128], sizes = [8, 128], strides = [1, 1]} : vector<8x384xf32> to vector<8x128xf32>
    %203 = vector.extract_strided_slice %200 {offsets = [0, 256], sizes = [8, 128], strides = [1, 1]} : vector<8x384xf32> to vector<8x128xf32>
    %204 = vector.extract_strided_slice %194 {offsets = [0, 384], sizes = [8, 128], strides = [1, 1]} : vector<8x512xf32> to vector<8x128xf32>
    %205 = math.tanh %204 : vector<8x128xf32>
    %c0_104 = arith.constant 0 : index
    %c0_105 = arith.constant 0 : index
    %206 = vector.load %arg17[%c0_104, %c0_105] : memref<8x128xf32, #tpu.memory_space<vmem>>, vector<8x128xf32>
    %207 = arith.mulf %202, %206 : vector<8x128xf32>
    %208 = arith.mulf %201, %205 : vector<8x128xf32>
    %209 = arith.addf %207, %208 : vector<8x128xf32>
    %210 = math.tanh %209 : vector<8x128xf32>
    %211 = arith.mulf %203, %210 : vector<8x128xf32>
    %c0_106 = arith.constant 0 : index
    %c0_107 = arith.constant 0 : index
    %212 = vector.load %arg16[%c0_106, %c0_107] : memref<8x128xf32, #tpu.memory_space<vmem>>, vector<8x128xf32>
    tpu.vector_store %arg16[%c0_106, %c0_107], %211 {strides = array<i32>} : memref<8x128xf32, #tpu.memory_space<vmem>>, vector<8x128xf32>,
    %c0_108 = arith.constant 0 : index
    %c0_109 = arith.constant 0 : index
    %213 = vector.load %arg17[%c0_108, %c0_109] : memref<8x128xf32, #tpu.memory_space<vmem>>, vector<8x128xf32>
    tpu.vector_store %arg17[%c0_108, %c0_109], %209 {strides = array<i32>} : memref<8x128xf32, #tpu.memory_space<vmem>>, vector<8x128xf32>,
    %214 = arith.index_cast %187 : i32 to index
    %c0_110 = arith.constant 0 : index
    %215 = vector.load %arg18[%214, %c0_110] : memref<64x128xf32, #tpu.memory_space<vmem>>, vector<8x128xf32>
    tpu.vector_store %arg18[%214, %c0_110], %211 {strides = array<i32>} : memref<64x128xf32, #tpu.memory_space<vmem>>, vector<8x128xf32>,
    %c6_i32 = arith.constant 6 : i32
    %c8_i32_111 = arith.constant 8 : i32
    %216 = arith.muli %c6_i32, %c8_i32_111 : i32
    %217 = tpu.assume_multiple %216, 8 : i32
    %218 = arith.index_cast %217 : i32 to index
    %c0_112 = arith.constant 0 : index
    %219 = vector.load %arg20[%218, %c0_112] : memref<64x512xf32, #tpu.memory_space<vmem>>, vector<8x512xf32>
    %c0_113 = arith.constant 0 : index
    %c0_114 = arith.constant 0 : index
    %220 = vector.load %arg16[%c0_113, %c0_114] : memref<8x128xf32, #tpu.memory_space<vmem>>, vector<8x128xf32>
    %221 = arith.truncf %220 : vector<8x128xf32> to vector<8x128xbf16>
    %c0_115 = arith.constant 0 : index
    %c0_116 = arith.constant 0 : index
    %222 = vector.load %arg5[%c0_115, %c0_116] : memref<128x512xbf16, #tpu.memory_space<vmem>>, vector<128x512xbf16>
    %cst_117 = arith.constant dense<0.000000e+00> : vector<8x512xf32>
    %223 = tpu.matmul %221, %222, %cst_117 {dimension_numbers = #tpu.dot_dimension_numbers<[1], [0], [0], [1], [0, 0, 1, 1], [], []>} : vector<8x128xbf16>, vector<128x512xbf16>, vector<8x512xf32> -> vector<8x512xf32>
    %224 = arith.addf %219, %223 : vector<8x512xf32>
    %225 = vector.extract_strided_slice %224 {offsets = [0, 0], sizes = [8, 384], strides = [1, 1]} : vector<8x512xf32> to vector<8x384xf32>
    %226 = arith.negf %225 : vector<8x384xf32>
    %227 = math.exp %226 : vector<8x384xf32>
    %cst_118 = arith.constant 1.000000e+00 : f32
    %228 = vector.broadcast %cst_118 : f32 to vector<8x384xf32>
    %229 = arith.addf %228, %227 : vector<8x384xf32>
    %230 = arith.divf %228, %229 : vector<8x384xf32>
    %231 = vector.extract_strided_slice %230 {offsets = [0, 0], sizes = [8, 128], strides = [1, 1]} : vector<8x384xf32> to vector<8x128xf32>
    %232 = vector.extract_strided_slice %230 {offsets = [0, 128], sizes = [8, 128], strides = [1, 1]} : vector<8x384xf32> to vector<8x128xf32>
    %233 = vector.extract_strided_slice %230 {offsets = [0, 256], sizes = [8, 128], strides = [1, 1]} : vector<8x384xf32> to vector<8x128xf32>
    %234 = vector.extract_strided_slice %224 {offsets = [0, 384], sizes = [8, 128], strides = [1, 1]} : vector<8x512xf32> to vector<8x128xf32>
    %235 = math.tanh %234 : vector<8x128xf32>
    %c0_119 = arith.constant 0 : index
    %c0_120 = arith.constant 0 : index
    %236 = vector.load %arg17[%c0_119, %c0_120] : memref<8x128xf32, #tpu.memory_space<vmem>>, vector<8x128xf32>
    %237 = arith.mulf %232, %236 : vector<8x128xf32>
    %238 = arith.mulf %231, %235 : vector<8x128xf32>
    %239 = arith.addf %237, %238 : vector<8x128xf32>
    %240 = math.tanh %239 : vector<8x128xf32>
    %241 = arith.mulf %233, %240 : vector<8x128xf32>
    %c0_121 = arith.constant 0 : index
    %c0_122 = arith.constant 0 : index
    %242 = vector.load %arg16[%c0_121, %c0_122] : memref<8x128xf32, #tpu.memory_space<vmem>>, vector<8x128xf32>
    tpu.vector_store %arg16[%c0_121, %c0_122], %241 {strides = array<i32>} : memref<8x128xf32, #tpu.memory_space<vmem>>, vector<8x128xf32>,
    %c0_123 = arith.constant 0 : index
    %c0_124 = arith.constant 0 : index
    %243 = vector.load %arg17[%c0_123, %c0_124] : memref<8x128xf32, #tpu.memory_space<vmem>>, vector<8x128xf32>
    tpu.vector_store %arg17[%c0_123, %c0_124], %239 {strides = array<i32>} : memref<8x128xf32, #tpu.memory_space<vmem>>, vector<8x128xf32>,
    %244 = arith.index_cast %217 : i32 to index
    %c0_125 = arith.constant 0 : index
    %245 = vector.load %arg18[%244, %c0_125] : memref<64x128xf32, #tpu.memory_space<vmem>>, vector<8x128xf32>
    tpu.vector_store %arg18[%244, %c0_125], %241 {strides = array<i32>} : memref<64x128xf32, #tpu.memory_space<vmem>>, vector<8x128xf32>,
    %c7_i32 = arith.constant 7 : i32
    %c8_i32_126 = arith.constant 8 : i32
    %246 = arith.muli %c7_i32, %c8_i32_126 : i32
    %247 = tpu.assume_multiple %246, 8 : i32
    %248 = arith.index_cast %247 : i32 to index
    %c0_127 = arith.constant 0 : index
    %249 = vector.load %arg20[%248, %c0_127] : memref<64x512xf32, #tpu.memory_space<vmem>>, vector<8x512xf32>
    %c0_128 = arith.constant 0 : index
    %c0_129 = arith.constant 0 : index
    %250 = vector.load %arg16[%c0_128, %c0_129] : memref<8x128xf32, #tpu.memory_space<vmem>>, vector<8x128xf32>
    %251 = arith.truncf %250 : vector<8x128xf32> to vector<8x128xbf16>
    %c0_130 = arith.constant 0 : index
    %c0_131 = arith.constant 0 : index
    %252 = vector.load %arg5[%c0_130, %c0_131] : memref<128x512xbf16, #tpu.memory_space<vmem>>, vector<128x512xbf16>
    %cst_132 = arith.constant dense<0.000000e+00> : vector<8x512xf32>
    %253 = tpu.matmul %251, %252, %cst_132 {dimension_numbers = #tpu.dot_dimension_numbers<[1], [0], [0], [1], [0, 0, 1, 1], [], []>} : vector<8x128xbf16>, vector<128x512xbf16>, vector<8x512xf32> -> vector<8x512xf32>
    %254 = arith.addf %249, %253 : vector<8x512xf32>
    %255 = vector.extract_strided_slice %254 {offsets = [0, 0], sizes = [8, 384], strides = [1, 1]} : vector<8x512xf32> to vector<8x384xf32>
    %256 = arith.negf %255 : vector<8x384xf32>
    %257 = math.exp %256 : vector<8x384xf32>
    %cst_133 = arith.constant 1.000000e+00 : f32
    %258 = vector.broadcast %cst_133 : f32 to vector<8x384xf32>
    %259 = arith.addf %258, %257 : vector<8x384xf32>
    %260 = arith.divf %258, %259 : vector<8x384xf32>
    %261 = vector.extract_strided_slice %260 {offsets = [0, 0], sizes = [8, 128], strides = [1, 1]} : vector<8x384xf32> to vector<8x128xf32>
    %262 = vector.extract_strided_slice %260 {offsets = [0, 128], sizes = [8, 128], strides = [1, 1]} : vector<8x384xf32> to vector<8x128xf32>
    %263 = vector.extract_strided_slice %260 {offsets = [0, 256], sizes = [8, 128], strides = [1, 1]} : vector<8x384xf32> to vector<8x128xf32>
    %264 = vector.extract_strided_slice %254 {offsets = [0, 384], sizes = [8, 128], strides = [1, 1]} : vector<8x512xf32> to vector<8x128xf32>
    %265 = math.tanh %264 : vector<8x128xf32>
    %c0_134 = arith.constant 0 : index
    %c0_135 = arith.constant 0 : index
    %266 = vector.load %arg17[%c0_134, %c0_135] : memref<8x128xf32, #tpu.memory_space<vmem>>, vector<8x128xf32>
    %267 = arith.mulf %262, %266 : vector<8x128xf32>
    %268 = arith.mulf %261, %265 : vector<8x128xf32>
    %269 = arith.addf %267, %268 : vector<8x128xf32>
    %270 = math.tanh %269 : vector<8x128xf32>
    %271 = arith.mulf %263, %270 : vector<8x128xf32>
    %c0_136 = arith.constant 0 : index
    %c0_137 = arith.constant 0 : index
    %272 = vector.load %arg16[%c0_136, %c0_137] : memref<8x128xf32, #tpu.memory_space<vmem>>, vector<8x128xf32>
    tpu.vector_store %arg16[%c0_136, %c0_137], %271 {strides = array<i32>} : memref<8x128xf32, #tpu.memory_space<vmem>>, vector<8x128xf32>,
    %c0_138 = arith.constant 0 : index
    %c0_139 = arith.constant 0 : index
    %273 = vector.load %arg17[%c0_138, %c0_139] : memref<8x128xf32, #tpu.memory_space<vmem>>, vector<8x128xf32>
    tpu.vector_store %arg17[%c0_138, %c0_139], %269 {strides = array<i32>} : memref<8x128xf32, #tpu.memory_space<vmem>>, vector<8x128xf32>,
    %274 = arith.index_cast %247 : i32 to index
    %c0_140 = arith.constant 0 : index
    %275 = vector.load %arg18[%274, %c0_140] : memref<64x128xf32, #tpu.memory_space<vmem>>, vector<8x128xf32>
    tpu.vector_store %arg18[%274, %c0_140], %271 {strides = array<i32>} : memref<64x128xf32, #tpu.memory_space<vmem>>, vector<8x128xf32>,
    %c8_i32_141 = arith.constant 8 : i32
    %c0_142 = arith.constant 0 : index
    %c0_143 = arith.constant 0 : index
    %276 = vector.load %arg18[%c0_142, %c0_143] : memref<64x128xf32, #tpu.memory_space<vmem>>, vector<64x128xf32>
    %c0_144 = arith.constant 0 : index
    %c0_145 = arith.constant 0 : index
    %277 = vector.load %arg19[%c0_144, %c0_145] : memref<64x128xf32, #tpu.memory_space<vmem>>, vector<64x128xf32>
    tpu.vector_store %arg19[%c0_144, %c0_145], %276 {strides = array<i32>} : memref<64x128xf32, #tpu.memory_space<vmem>>, vector<64x128xf32>,
    %c0_146 = arith.constant 0 : index
    %c0_147 = arith.constant 0 : index
    %278 = vector.load %arg19[%c0_146, %c0_147] : memref<64x128xf32, #tpu.memory_space<vmem>>, vector<64x128xf32>
    %279 = arith.truncf %278 : vector<64x128xf32> to vector<64x128xbf16>
    %c0_148 = arith.constant 0 : index
    %c0_149 = arith.constant 0 : index
    %280 = vector.load %arg7[%c0_148, %c0_149] : memref<128x512xbf16, #tpu.memory_space<vmem>>, vector<128x512xbf16>
    %cst_150 = arith.constant dense<0.000000e+00> : vector<64x512xf32>
    %281 = tpu.matmul %279, %280, %cst_150 {dimension_numbers = #tpu.dot_dimension_numbers<[1], [0], [0], [1], [0, 0, 1, 1], [], []>} : vector<64x128xbf16>, vector<128x512xbf16>, vector<64x512xf32> -> vector<64x512xf32>
    %c0_151 = arith.constant 0 : index
    %c0_152 = arith.constant 0 : index
    %282 = vector.load %arg9[%c0_151, %c0_152] : memref<1x512xf32, #tpu.memory_space<vmem>>, vector<1x512xf32>
    %283 = vector.broadcast %282 : vector<1x512xf32> to vector<64x512xf32>
    %284 = arith.addf %281, %283 : vector<64x512xf32>
    %c0_153 = arith.constant 0 : index
    %c0_154 = arith.constant 0 : index
    %285 = vector.load %arg20[%c0_153, %c0_154] : memref<64x512xf32, #tpu.memory_space<vmem>>, vector<64x512xf32>
    tpu.vector_store %arg20[%c0_153, %c0_154], %284 {strides = array<i32>} : memref<64x512xf32, #tpu.memory_space<vmem>>, vector<64x512xf32>,
    %cst_155 = arith.constant 0.000000e+00 : f32
    %286 = vector.broadcast %cst_155 : f32 to vector<8x128xf32>
    %c0_156 = arith.constant 0 : index
    %c0_157 = arith.constant 0 : index
    %287 = vector.load %arg16[%c0_156, %c0_157] : memref<8x128xf32, #tpu.memory_space<vmem>>, vector<8x128xf32>
    tpu.vector_store %arg16[%c0_156, %c0_157], %286 {strides = array<i32>} : memref<8x128xf32, #tpu.memory_space<vmem>>, vector<8x128xf32>,
    %cst_158 = arith.constant 0.000000e+00 : f32
    %288 = vector.broadcast %cst_158 : f32 to vector<8x128xf32>
    %c0_159 = arith.constant 0 : index
    %c0_160 = arith.constant 0 : index
    %289 = vector.load %arg17[%c0_159, %c0_160] : memref<8x128xf32, #tpu.memory_space<vmem>>, vector<8x128xf32>
    tpu.vector_store %arg17[%c0_159, %c0_160], %288 {strides = array<i32>} : memref<8x128xf32, #tpu.memory_space<vmem>>, vector<8x128xf32>,
    %c0_i32_161 = arith.constant 0 : i32
    %c8_i32_162 = arith.constant 8 : i32
    %290 = arith.muli %c0_i32_161, %c8_i32_162 : i32
    %291 = tpu.assume_multiple %290, 8 : i32
    %292 = arith.index_cast %291 : i32 to index
    %c0_163 = arith.constant 0 : index
    %293 = vector.load %arg20[%292, %c0_163] : memref<64x512xf32, #tpu.memory_space<vmem>>, vector<8x512xf32>
    %c0_164 = arith.constant 0 : index
    %c0_165 = arith.constant 0 : index
    %294 = vector.load %arg16[%c0_164, %c0_165] : memref<8x128xf32, #tpu.memory_space<vmem>>, vector<8x128xf32>
    %295 = arith.truncf %294 : vector<8x128xf32> to vector<8x128xbf16>
    %c0_166 = arith.constant 0 : index
    %c0_167 = arith.constant 0 : index
    %296 = vector.load %arg8[%c0_166, %c0_167] : memref<128x512xbf16, #tpu.memory_space<vmem>>, vector<128x512xbf16>
    %cst_168 = arith.constant dense<0.000000e+00> : vector<8x512xf32>
    %297 = tpu.matmul %295, %296, %cst_168 {dimension_numbers = #tpu.dot_dimension_numbers<[1], [0], [0], [1], [0, 0, 1, 1], [], []>} : vector<8x128xbf16>, vector<128x512xbf16>, vector<8x512xf32> -> vector<8x512xf32>
    %298 = arith.addf %293, %297 : vector<8x512xf32>
    %299 = vector.extract_strided_slice %298 {offsets = [0, 0], sizes = [8, 384], strides = [1, 1]} : vector<8x512xf32> to vector<8x384xf32>
    %300 = arith.negf %299 : vector<8x384xf32>
    %301 = math.exp %300 : vector<8x384xf32>
    %cst_169 = arith.constant 1.000000e+00 : f32
    %302 = vector.broadcast %cst_169 : f32 to vector<8x384xf32>
    %303 = arith.addf %302, %301 : vector<8x384xf32>
    %304 = arith.divf %302, %303 : vector<8x384xf32>
    %305 = vector.extract_strided_slice %304 {offsets = [0, 0], sizes = [8, 128], strides = [1, 1]} : vector<8x384xf32> to vector<8x128xf32>
    %306 = vector.extract_strided_slice %304 {offsets = [0, 128], sizes = [8, 128], strides = [1, 1]} : vector<8x384xf32> to vector<8x128xf32>
    %307 = vector.extract_strided_slice %304 {offsets = [0, 256], sizes = [8, 128], strides = [1, 1]} : vector<8x384xf32> to vector<8x128xf32>
    %308 = vector.extract_strided_slice %298 {offsets = [0, 384], sizes = [8, 128], strides = [1, 1]} : vector<8x512xf32> to vector<8x128xf32>
    %309 = math.tanh %308 : vector<8x128xf32>
    %c0_170 = arith.constant 0 : index
    %c0_171 = arith.constant 0 : index
    %310 = vector.load %arg17[%c0_170, %c0_171] : memref<8x128xf32, #tpu.memory_space<vmem>>, vector<8x128xf32>
    %311 = arith.mulf %306, %310 : vector<8x128xf32>
    %312 = arith.mulf %305, %309 : vector<8x128xf32>
    %313 = arith.addf %311, %312 : vector<8x128xf32>
    %314 = math.tanh %313 : vector<8x128xf32>
    %315 = arith.mulf %307, %314 : vector<8x128xf32>
    %c0_172 = arith.constant 0 : index
    %c0_173 = arith.constant 0 : index
    %316 = vector.load %arg16[%c0_172, %c0_173] : memref<8x128xf32, #tpu.memory_space<vmem>>, vector<8x128xf32>
    tpu.vector_store %arg16[%c0_172, %c0_173], %315 {strides = array<i32>} : memref<8x128xf32, #tpu.memory_space<vmem>>, vector<8x128xf32>,
    %c0_174 = arith.constant 0 : index
    %c0_175 = arith.constant 0 : index
    %317 = vector.load %arg17[%c0_174, %c0_175] : memref<8x128xf32, #tpu.memory_space<vmem>>, vector<8x128xf32>
    tpu.vector_store %arg17[%c0_174, %c0_175], %313 {strides = array<i32>} : memref<8x128xf32, #tpu.memory_space<vmem>>, vector<8x128xf32>,
    %318 = arith.index_cast %291 : i32 to index
    %c0_176 = arith.constant 0 : index
    %319 = vector.load %arg18[%318, %c0_176] : memref<64x128xf32, #tpu.memory_space<vmem>>, vector<8x128xf32>
    tpu.vector_store %arg18[%318, %c0_176], %315 {strides = array<i32>} : memref<64x128xf32, #tpu.memory_space<vmem>>, vector<8x128xf32>,
    %c1_i32_177 = arith.constant 1 : i32
    %c8_i32_178 = arith.constant 8 : i32
    %320 = arith.muli %c1_i32_177, %c8_i32_178 : i32
    %321 = tpu.assume_multiple %320, 8 : i32
    %322 = arith.index_cast %321 : i32 to index
    %c0_179 = arith.constant 0 : index
    %323 = vector.load %arg20[%322, %c0_179] : memref<64x512xf32, #tpu.memory_space<vmem>>, vector<8x512xf32>
    %c0_180 = arith.constant 0 : index
    %c0_181 = arith.constant 0 : index
    %324 = vector.load %arg16[%c0_180, %c0_181] : memref<8x128xf32, #tpu.memory_space<vmem>>, vector<8x128xf32>
    %325 = arith.truncf %324 : vector<8x128xf32> to vector<8x128xbf16>
    %c0_182 = arith.constant 0 : index
    %c0_183 = arith.constant 0 : index
    %326 = vector.load %arg8[%c0_182, %c0_183] : memref<128x512xbf16, #tpu.memory_space<vmem>>, vector<128x512xbf16>
    %cst_184 = arith.constant dense<0.000000e+00> : vector<8x512xf32>
    %327 = tpu.matmul %325, %326, %cst_184 {dimension_numbers = #tpu.dot_dimension_numbers<[1], [0], [0], [1], [0, 0, 1, 1], [], []>} : vector<8x128xbf16>, vector<128x512xbf16>, vector<8x512xf32> -> vector<8x512xf32>
    %328 = arith.addf %323, %327 : vector<8x512xf32>
    %329 = vector.extract_strided_slice %328 {offsets = [0, 0], sizes = [8, 384], strides = [1, 1]} : vector<8x512xf32> to vector<8x384xf32>
    %330 = arith.negf %329 : vector<8x384xf32>
    %331 = math.exp %330 : vector<8x384xf32>
    %cst_185 = arith.constant 1.000000e+00 : f32
    %332 = vector.broadcast %cst_185 : f32 to vector<8x384xf32>
    %333 = arith.addf %332, %331 : vector<8x384xf32>
    %334 = arith.divf %332, %333 : vector<8x384xf32>
    %335 = vector.extract_strided_slice %334 {offsets = [0, 0], sizes = [8, 128], strides = [1, 1]} : vector<8x384xf32> to vector<8x128xf32>
    %336 = vector.extract_strided_slice %334 {offsets = [0, 128], sizes = [8, 128], strides = [1, 1]} : vector<8x384xf32> to vector<8x128xf32>
    %337 = vector.extract_strided_slice %334 {offsets = [0, 256], sizes = [8, 128], strides = [1, 1]} : vector<8x384xf32> to vector<8x128xf32>
    %338 = vector.extract_strided_slice %328 {offsets = [0, 384], sizes = [8, 128], strides = [1, 1]} : vector<8x512xf32> to vector<8x128xf32>
    %339 = math.tanh %338 : vector<8x128xf32>
    %c0_186 = arith.constant 0 : index
    %c0_187 = arith.constant 0 : index
    %340 = vector.load %arg17[%c0_186, %c0_187] : memref<8x128xf32, #tpu.memory_space<vmem>>, vector<8x128xf32>
    %341 = arith.mulf %336, %340 : vector<8x128xf32>
    %342 = arith.mulf %335, %339 : vector<8x128xf32>
    %343 = arith.addf %341, %342 : vector<8x128xf32>
    %344 = math.tanh %343 : vector<8x128xf32>
    %345 = arith.mulf %337, %344 : vector<8x128xf32>
    %c0_188 = arith.constant 0 : index
    %c0_189 = arith.constant 0 : index
    %346 = vector.load %arg16[%c0_188, %c0_189] : memref<8x128xf32, #tpu.memory_space<vmem>>, vector<8x128xf32>
    tpu.vector_store %arg16[%c0_188, %c0_189], %345 {strides = array<i32>} : memref<8x128xf32, #tpu.memory_space<vmem>>, vector<8x128xf32>,
    %c0_190 = arith.constant 0 : index
    %c0_191 = arith.constant 0 : index
    %347 = vector.load %arg17[%c0_190, %c0_191] : memref<8x128xf32, #tpu.memory_space<vmem>>, vector<8x128xf32>
    tpu.vector_store %arg17[%c0_190, %c0_191], %343 {strides = array<i32>} : memref<8x128xf32, #tpu.memory_space<vmem>>, vector<8x128xf32>,
    %348 = arith.index_cast %321 : i32 to index
    %c0_192 = arith.constant 0 : index
    %349 = vector.load %arg18[%348, %c0_192] : memref<64x128xf32, #tpu.memory_space<vmem>>, vector<8x128xf32>
    tpu.vector_store %arg18[%348, %c0_192], %345 {strides = array<i32>} : memref<64x128xf32, #tpu.memory_space<vmem>>, vector<8x128xf32>,
    %c2_i32_193 = arith.constant 2 : i32
    %c8_i32_194 = arith.constant 8 : i32
    %350 = arith.muli %c2_i32_193, %c8_i32_194 : i32
    %351 = tpu.assume_multiple %350, 8 : i32
    %352 = arith.index_cast %351 : i32 to index
    %c0_195 = arith.constant 0 : index
    %353 = vector.load %arg20[%352, %c0_195] : memref<64x512xf32, #tpu.memory_space<vmem>>, vector<8x512xf32>
    %c0_196 = arith.constant 0 : index
    %c0_197 = arith.constant 0 : index
    %354 = vector.load %arg16[%c0_196, %c0_197] : memref<8x128xf32, #tpu.memory_space<vmem>>, vector<8x128xf32>
    %355 = arith.truncf %354 : vector<8x128xf32> to vector<8x128xbf16>
    %c0_198 = arith.constant 0 : index
    %c0_199 = arith.constant 0 : index
    %356 = vector.load %arg8[%c0_198, %c0_199] : memref<128x512xbf16, #tpu.memory_space<vmem>>, vector<128x512xbf16>
    %cst_200 = arith.constant dense<0.000000e+00> : vector<8x512xf32>
    %357 = tpu.matmul %355, %356, %cst_200 {dimension_numbers = #tpu.dot_dimension_numbers<[1], [0], [0], [1], [0, 0, 1, 1], [], []>} : vector<8x128xbf16>, vector<128x512xbf16>, vector<8x512xf32> -> vector<8x512xf32>
    %358 = arith.addf %353, %357 : vector<8x512xf32>
    %359 = vector.extract_strided_slice %358 {offsets = [0, 0], sizes = [8, 384], strides = [1, 1]} : vector<8x512xf32> to vector<8x384xf32>
    %360 = arith.negf %359 : vector<8x384xf32>
    %361 = math.exp %360 : vector<8x384xf32>
    %cst_201 = arith.constant 1.000000e+00 : f32
    %362 = vector.broadcast %cst_201 : f32 to vector<8x384xf32>
    %363 = arith.addf %362, %361 : vector<8x384xf32>
    %364 = arith.divf %362, %363 : vector<8x384xf32>
    %365 = vector.extract_strided_slice %364 {offsets = [0, 0], sizes = [8, 128], strides = [1, 1]} : vector<8x384xf32> to vector<8x128xf32>
    %366 = vector.extract_strided_slice %364 {offsets = [0, 128], sizes = [8, 128], strides = [1, 1]} : vector<8x384xf32> to vector<8x128xf32>
    %367 = vector.extract_strided_slice %364 {offsets = [0, 256], sizes = [8, 128], strides = [1, 1]} : vector<8x384xf32> to vector<8x128xf32>
    %368 = vector.extract_strided_slice %358 {offsets = [0, 384], sizes = [8, 128], strides = [1, 1]} : vector<8x512xf32> to vector<8x128xf32>
    %369 = math.tanh %368 : vector<8x128xf32>
    %c0_202 = arith.constant 0 : index
    %c0_203 = arith.constant 0 : index
    %370 = vector.load %arg17[%c0_202, %c0_203] : memref<8x128xf32, #tpu.memory_space<vmem>>, vector<8x128xf32>
    %371 = arith.mulf %366, %370 : vector<8x128xf32>
    %372 = arith.mulf %365, %369 : vector<8x128xf32>
    %373 = arith.addf %371, %372 : vector<8x128xf32>
    %374 = math.tanh %373 : vector<8x128xf32>
    %375 = arith.mulf %367, %374 : vector<8x128xf32>
    %c0_204 = arith.constant 0 : index
    %c0_205 = arith.constant 0 : index
    %376 = vector.load %arg16[%c0_204, %c0_205] : memref<8x128xf32, #tpu.memory_space<vmem>>, vector<8x128xf32>
    tpu.vector_store %arg16[%c0_204, %c0_205], %375 {strides = array<i32>} : memref<8x128xf32, #tpu.memory_space<vmem>>, vector<8x128xf32>,
    %c0_206 = arith.constant 0 : index
    %c0_207 = arith.constant 0 : index
    %377 = vector.load %arg17[%c0_206, %c0_207] : memref<8x128xf32, #tpu.memory_space<vmem>>, vector<8x128xf32>
    tpu.vector_store %arg17[%c0_206, %c0_207], %373 {strides = array<i32>} : memref<8x128xf32, #tpu.memory_space<vmem>>, vector<8x128xf32>,
    %378 = arith.index_cast %351 : i32 to index
    %c0_208 = arith.constant 0 : index
    %379 = vector.load %arg18[%378, %c0_208] : memref<64x128xf32, #tpu.memory_space<vmem>>, vector<8x128xf32>
    tpu.vector_store %arg18[%378, %c0_208], %375 {strides = array<i32>} : memref<64x128xf32, #tpu.memory_space<vmem>>, vector<8x128xf32>,
    %c3_i32_209 = arith.constant 3 : i32
    %c8_i32_210 = arith.constant 8 : i32
    %380 = arith.muli %c3_i32_209, %c8_i32_210 : i32
    %381 = tpu.assume_multiple %380, 8 : i32
    %382 = arith.index_cast %381 : i32 to index
    %c0_211 = arith.constant 0 : index
    %383 = vector.load %arg20[%382, %c0_211] : memref<64x512xf32, #tpu.memory_space<vmem>>, vector<8x512xf32>
    %c0_212 = arith.constant 0 : index
    %c0_213 = arith.constant 0 : index
    %384 = vector.load %arg16[%c0_212, %c0_213] : memref<8x128xf32, #tpu.memory_space<vmem>>, vector<8x128xf32>
    %385 = arith.truncf %384 : vector<8x128xf32> to vector<8x128xbf16>
    %c0_214 = arith.constant 0 : index
    %c0_215 = arith.constant 0 : index
    %386 = vector.load %arg8[%c0_214, %c0_215] : memref<128x512xbf16, #tpu.memory_space<vmem>>, vector<128x512xbf16>
    %cst_216 = arith.constant dense<0.000000e+00> : vector<8x512xf32>
    %387 = tpu.matmul %385, %386, %cst_216 {dimension_numbers = #tpu.dot_dimension_numbers<[1], [0], [0], [1], [0, 0, 1, 1], [], []>} : vector<8x128xbf16>, vector<128x512xbf16>, vector<8x512xf32> -> vector<8x512xf32>
    %388 = arith.addf %383, %387 : vector<8x512xf32>
    %389 = vector.extract_strided_slice %388 {offsets = [0, 0], sizes = [8, 384], strides = [1, 1]} : vector<8x512xf32> to vector<8x384xf32>
    %390 = arith.negf %389 : vector<8x384xf32>
    %391 = math.exp %390 : vector<8x384xf32>
    %cst_217 = arith.constant 1.000000e+00 : f32
    %392 = vector.broadcast %cst_217 : f32 to vector<8x384xf32>
    %393 = arith.addf %392, %391 : vector<8x384xf32>
    %394 = arith.divf %392, %393 : vector<8x384xf32>
    %395 = vector.extract_strided_slice %394 {offsets = [0, 0], sizes = [8, 128], strides = [1, 1]} : vector<8x384xf32> to vector<8x128xf32>
    %396 = vector.extract_strided_slice %394 {offsets = [0, 128], sizes = [8, 128], strides = [1, 1]} : vector<8x384xf32> to vector<8x128xf32>
    %397 = vector.extract_strided_slice %394 {offsets = [0, 256], sizes = [8, 128], strides = [1, 1]} : vector<8x384xf32> to vector<8x128xf32>
    %398 = vector.extract_strided_slice %388 {offsets = [0, 384], sizes = [8, 128], strides = [1, 1]} : vector<8x512xf32> to vector<8x128xf32>
    %399 = math.tanh %398 : vector<8x128xf32>
    %c0_218 = arith.constant 0 : index
    %c0_219 = arith.constant 0 : index
    %400 = vector.load %arg17[%c0_218, %c0_219] : memref<8x128xf32, #tpu.memory_space<vmem>>, vector<8x128xf32>
    %401 = arith.mulf %396, %400 : vector<8x128xf32>
    %402 = arith.mulf %395, %399 : vector<8x128xf32>
    %403 = arith.addf %401, %402 : vector<8x128xf32>
    %404 = math.tanh %403 : vector<8x128xf32>
    %405 = arith.mulf %397, %404 : vector<8x128xf32>
    %c0_220 = arith.constant 0 : index
    %c0_221 = arith.constant 0 : index
    %406 = vector.load %arg16[%c0_220, %c0_221] : memref<8x128xf32, #tpu.memory_space<vmem>>, vector<8x128xf32>
    tpu.vector_store %arg16[%c0_220, %c0_221], %405 {strides = array<i32>} : memref<8x128xf32, #tpu.memory_space<vmem>>, vector<8x128xf32>,
    %c0_222 = arith.constant 0 : index
    %c0_223 = arith.constant 0 : index
    %407 = vector.load %arg17[%c0_222, %c0_223] : memref<8x128xf32, #tpu.memory_space<vmem>>, vector<8x128xf32>
    tpu.vector_store %arg17[%c0_222, %c0_223], %403 {strides = array<i32>} : memref<8x128xf32, #tpu.memory_space<vmem>>, vector<8x128xf32>,
    %408 = arith.index_cast %381 : i32 to index
    %c0_224 = arith.constant 0 : index
    %409 = vector.load %arg18[%408, %c0_224] : memref<64x128xf32, #tpu.memory_space<vmem>>, vector<8x128xf32>
    tpu.vector_store %arg18[%408, %c0_224], %405 {strides = array<i32>} : memref<64x128xf32, #tpu.memory_space<vmem>>, vector<8x128xf32>,
    %c4_i32_225 = arith.constant 4 : i32
    %c8_i32_226 = arith.constant 8 : i32
    %410 = arith.muli %c4_i32_225, %c8_i32_226 : i32
    %411 = tpu.assume_multiple %410, 8 : i32
    %412 = arith.index_cast %411 : i32 to index
    %c0_227 = arith.constant 0 : index
    %413 = vector.load %arg20[%412, %c0_227] : memref<64x512xf32, #tpu.memory_space<vmem>>, vector<8x512xf32>
    %c0_228 = arith.constant 0 : index
    %c0_229 = arith.constant 0 : index
    %414 = vector.load %arg16[%c0_228, %c0_229] : memref<8x128xf32, #tpu.memory_space<vmem>>, vector<8x128xf32>
    %415 = arith.truncf %414 : vector<8x128xf32> to vector<8x128xbf16>
    %c0_230 = arith.constant 0 : index
    %c0_231 = arith.constant 0 : index
    %416 = vector.load %arg8[%c0_230, %c0_231] : memref<128x512xbf16, #tpu.memory_space<vmem>>, vector<128x512xbf16>
    %cst_232 = arith.constant dense<0.000000e+00> : vector<8x512xf32>
    %417 = tpu.matmul %415, %416, %cst_232 {dimension_numbers = #tpu.dot_dimension_numbers<[1], [0], [0], [1], [0, 0, 1, 1], [], []>} : vector<8x128xbf16>, vector<128x512xbf16>, vector<8x512xf32> -> vector<8x512xf32>
    %418 = arith.addf %413, %417 : vector<8x512xf32>
    %419 = vector.extract_strided_slice %418 {offsets = [0, 0], sizes = [8, 384], strides = [1, 1]} : vector<8x512xf32> to vector<8x384xf32>
    %420 = arith.negf %419 : vector<8x384xf32>
    %421 = math.exp %420 : vector<8x384xf32>
    %cst_233 = arith.constant 1.000000e+00 : f32
    %422 = vector.broadcast %cst_233 : f32 to vector<8x384xf32>
    %423 = arith.addf %422, %421 : vector<8x384xf32>
    %424 = arith.divf %422, %423 : vector<8x384xf32>
    %425 = vector.extract_strided_slice %424 {offsets = [0, 0], sizes = [8, 128], strides = [1, 1]} : vector<8x384xf32> to vector<8x128xf32>
    %426 = vector.extract_strided_slice %424 {offsets = [0, 128], sizes = [8, 128], strides = [1, 1]} : vector<8x384xf32> to vector<8x128xf32>
    %427 = vector.extract_strided_slice %424 {offsets = [0, 256], sizes = [8, 128], strides = [1, 1]} : vector<8x384xf32> to vector<8x128xf32>
    %428 = vector.extract_strided_slice %418 {offsets = [0, 384], sizes = [8, 128], strides = [1, 1]} : vector<8x512xf32> to vector<8x128xf32>
    %429 = math.tanh %428 : vector<8x128xf32>
    %c0_234 = arith.constant 0 : index
    %c0_235 = arith.constant 0 : index
    %430 = vector.load %arg17[%c0_234, %c0_235] : memref<8x128xf32, #tpu.memory_space<vmem>>, vector<8x128xf32>
    %431 = arith.mulf %426, %430 : vector<8x128xf32>
    %432 = arith.mulf %425, %429 : vector<8x128xf32>
    %433 = arith.addf %431, %432 : vector<8x128xf32>
    %434 = math.tanh %433 : vector<8x128xf32>
    %435 = arith.mulf %427, %434 : vector<8x128xf32>
    %c0_236 = arith.constant 0 : index
    %c0_237 = arith.constant 0 : index
    %436 = vector.load %arg16[%c0_236, %c0_237] : memref<8x128xf32, #tpu.memory_space<vmem>>, vector<8x128xf32>
    tpu.vector_store %arg16[%c0_236, %c0_237], %435 {strides = array<i32>} : memref<8x128xf32, #tpu.memory_space<vmem>>, vector<8x128xf32>,
    %c0_238 = arith.constant 0 : index
    %c0_239 = arith.constant 0 : index
    %437 = vector.load %arg17[%c0_238, %c0_239] : memref<8x128xf32, #tpu.memory_space<vmem>>, vector<8x128xf32>
    tpu.vector_store %arg17[%c0_238, %c0_239], %433 {strides = array<i32>} : memref<8x128xf32, #tpu.memory_space<vmem>>, vector<8x128xf32>,
    %438 = arith.index_cast %411 : i32 to index
    %c0_240 = arith.constant 0 : index
    %439 = vector.load %arg18[%438, %c0_240] : memref<64x128xf32, #tpu.memory_space<vmem>>, vector<8x128xf32>
    tpu.vector_store %arg18[%438, %c0_240], %435 {strides = array<i32>} : memref<64x128xf32, #tpu.memory_space<vmem>>, vector<8x128xf32>,
    %c5_i32_241 = arith.constant 5 : i32
    %c8_i32_242 = arith.constant 8 : i32
    %440 = arith.muli %c5_i32_241, %c8_i32_242 : i32
    %441 = tpu.assume_multiple %440, 8 : i32
    %442 = arith.index_cast %441 : i32 to index
    %c0_243 = arith.constant 0 : index
    %443 = vector.load %arg20[%442, %c0_243] : memref<64x512xf32, #tpu.memory_space<vmem>>, vector<8x512xf32>
    %c0_244 = arith.constant 0 : index
    %c0_245 = arith.constant 0 : index
    %444 = vector.load %arg16[%c0_244, %c0_245] : memref<8x128xf32, #tpu.memory_space<vmem>>, vector<8x128xf32>
    %445 = arith.truncf %444 : vector<8x128xf32> to vector<8x128xbf16>
    %c0_246 = arith.constant 0 : index
    %c0_247 = arith.constant 0 : index
    %446 = vector.load %arg8[%c0_246, %c0_247] : memref<128x512xbf16, #tpu.memory_space<vmem>>, vector<128x512xbf16>
    %cst_248 = arith.constant dense<0.000000e+00> : vector<8x512xf32>
    %447 = tpu.matmul %445, %446, %cst_248 {dimension_numbers = #tpu.dot_dimension_numbers<[1], [0], [0], [1], [0, 0, 1, 1], [], []>} : vector<8x128xbf16>, vector<128x512xbf16>, vector<8x512xf32> -> vector<8x512xf32>
    %448 = arith.addf %443, %447 : vector<8x512xf32>
    %449 = vector.extract_strided_slice %448 {offsets = [0, 0], sizes = [8, 384], strides = [1, 1]} : vector<8x512xf32> to vector<8x384xf32>
    %450 = arith.negf %449 : vector<8x384xf32>
    %451 = math.exp %450 : vector<8x384xf32>
    %cst_249 = arith.constant 1.000000e+00 : f32
    %452 = vector.broadcast %cst_249 : f32 to vector<8x384xf32>
    %453 = arith.addf %452, %451 : vector<8x384xf32>
    %454 = arith.divf %452, %453 : vector<8x384xf32>
    %455 = vector.extract_strided_slice %454 {offsets = [0, 0], sizes = [8, 128], strides = [1, 1]} : vector<8x384xf32> to vector<8x128xf32>
    %456 = vector.extract_strided_slice %454 {offsets = [0, 128], sizes = [8, 128], strides = [1, 1]} : vector<8x384xf32> to vector<8x128xf32>
    %457 = vector.extract_strided_slice %454 {offsets = [0, 256], sizes = [8, 128], strides = [1, 1]} : vector<8x384xf32> to vector<8x128xf32>
    %458 = vector.extract_strided_slice %448 {offsets = [0, 384], sizes = [8, 128], strides = [1, 1]} : vector<8x512xf32> to vector<8x128xf32>
    %459 = math.tanh %458 : vector<8x128xf32>
    %c0_250 = arith.constant 0 : index
    %c0_251 = arith.constant 0 : index
    %460 = vector.load %arg17[%c0_250, %c0_251] : memref<8x128xf32, #tpu.memory_space<vmem>>, vector<8x128xf32>
    %461 = arith.mulf %456, %460 : vector<8x128xf32>
    %462 = arith.mulf %455, %459 : vector<8x128xf32>
    %463 = arith.addf %461, %462 : vector<8x128xf32>
    %464 = math.tanh %463 : vector<8x128xf32>
    %465 = arith.mulf %457, %464 : vector<8x128xf32>
    %c0_252 = arith.constant 0 : index
    %c0_253 = arith.constant 0 : index
    %466 = vector.load %arg16[%c0_252, %c0_253] : memref<8x128xf32, #tpu.memory_space<vmem>>, vector<8x128xf32>
    tpu.vector_store %arg16[%c0_252, %c0_253], %465 {strides = array<i32>} : memref<8x128xf32, #tpu.memory_space<vmem>>, vector<8x128xf32>,
    %c0_254 = arith.constant 0 : index
    %c0_255 = arith.constant 0 : index
    %467 = vector.load %arg17[%c0_254, %c0_255] : memref<8x128xf32, #tpu.memory_space<vmem>>, vector<8x128xf32>
    tpu.vector_store %arg17[%c0_254, %c0_255], %463 {strides = array<i32>} : memref<8x128xf32, #tpu.memory_space<vmem>>, vector<8x128xf32>,
    %468 = arith.index_cast %441 : i32 to index
    %c0_256 = arith.constant 0 : index
    %469 = vector.load %arg18[%468, %c0_256] : memref<64x128xf32, #tpu.memory_space<vmem>>, vector<8x128xf32>
    tpu.vector_store %arg18[%468, %c0_256], %465 {strides = array<i32>} : memref<64x128xf32, #tpu.memory_space<vmem>>, vector<8x128xf32>,
    %c6_i32_257 = arith.constant 6 : i32
    %c8_i32_258 = arith.constant 8 : i32
    %470 = arith.muli %c6_i32_257, %c8_i32_258 : i32
    %471 = tpu.assume_multiple %470, 8 : i32
    %472 = arith.index_cast %471 : i32 to index
    %c0_259 = arith.constant 0 : index
    %473 = vector.load %arg20[%472, %c0_259] : memref<64x512xf32, #tpu.memory_space<vmem>>, vector<8x512xf32>
    %c0_260 = arith.constant 0 : index
    %c0_261 = arith.constant 0 : index
    %474 = vector.load %arg16[%c0_260, %c0_261] : memref<8x128xf32, #tpu.memory_space<vmem>>, vector<8x128xf32>
    %475 = arith.truncf %474 : vector<8x128xf32> to vector<8x128xbf16>
    %c0_262 = arith.constant 0 : index
    %c0_263 = arith.constant 0 : index
    %476 = vector.load %arg8[%c0_262, %c0_263] : memref<128x512xbf16, #tpu.memory_space<vmem>>, vector<128x512xbf16>
    %cst_264 = arith.constant dense<0.000000e+00> : vector<8x512xf32>
    %477 = tpu.matmul %475, %476, %cst_264 {dimension_numbers = #tpu.dot_dimension_numbers<[1], [0], [0], [1], [0, 0, 1, 1], [], []>} : vector<8x128xbf16>, vector<128x512xbf16>, vector<8x512xf32> -> vector<8x512xf32>
    %478 = arith.addf %473, %477 : vector<8x512xf32>
    %479 = vector.extract_strided_slice %478 {offsets = [0, 0], sizes = [8, 384], strides = [1, 1]} : vector<8x512xf32> to vector<8x384xf32>
    %480 = arith.negf %479 : vector<8x384xf32>
    %481 = math.exp %480 : vector<8x384xf32>
    %cst_265 = arith.constant 1.000000e+00 : f32
    %482 = vector.broadcast %cst_265 : f32 to vector<8x384xf32>
    %483 = arith.addf %482, %481 : vector<8x384xf32>
    %484 = arith.divf %482, %483 : vector<8x384xf32>
    %485 = vector.extract_strided_slice %484 {offsets = [0, 0], sizes = [8, 128], strides = [1, 1]} : vector<8x384xf32> to vector<8x128xf32>
    %486 = vector.extract_strided_slice %484 {offsets = [0, 128], sizes = [8, 128], strides = [1, 1]} : vector<8x384xf32> to vector<8x128xf32>
    %487 = vector.extract_strided_slice %484 {offsets = [0, 256], sizes = [8, 128], strides = [1, 1]} : vector<8x384xf32> to vector<8x128xf32>
    %488 = vector.extract_strided_slice %478 {offsets = [0, 384], sizes = [8, 128], strides = [1, 1]} : vector<8x512xf32> to vector<8x128xf32>
    %489 = math.tanh %488 : vector<8x128xf32>
    %c0_266 = arith.constant 0 : index
    %c0_267 = arith.constant 0 : index
    %490 = vector.load %arg17[%c0_266, %c0_267] : memref<8x128xf32, #tpu.memory_space<vmem>>, vector<8x128xf32>
    %491 = arith.mulf %486, %490 : vector<8x128xf32>
    %492 = arith.mulf %485, %489 : vector<8x128xf32>
    %493 = arith.addf %491, %492 : vector<8x128xf32>
    %494 = math.tanh %493 : vector<8x128xf32>
    %495 = arith.mulf %487, %494 : vector<8x128xf32>
    %c0_268 = arith.constant 0 : index
    %c0_269 = arith.constant 0 : index
    %496 = vector.load %arg16[%c0_268, %c0_269] : memref<8x128xf32, #tpu.memory_space<vmem>>, vector<8x128xf32>
    tpu.vector_store %arg16[%c0_268, %c0_269], %495 {strides = array<i32>} : memref<8x128xf32, #tpu.memory_space<vmem>>, vector<8x128xf32>,
    %c0_270 = arith.constant 0 : index
    %c0_271 = arith.constant 0 : index
    %497 = vector.load %arg17[%c0_270, %c0_271] : memref<8x128xf32, #tpu.memory_space<vmem>>, vector<8x128xf32>
    tpu.vector_store %arg17[%c0_270, %c0_271], %493 {strides = array<i32>} : memref<8x128xf32, #tpu.memory_space<vmem>>, vector<8x128xf32>,
    %498 = arith.index_cast %471 : i32 to index
    %c0_272 = arith.constant 0 : index
    %499 = vector.load %arg18[%498, %c0_272] : memref<64x128xf32, #tpu.memory_space<vmem>>, vector<8x128xf32>
    tpu.vector_store %arg18[%498, %c0_272], %495 {strides = array<i32>} : memref<64x128xf32, #tpu.memory_space<vmem>>, vector<8x128xf32>,
    %c7_i32_273 = arith.constant 7 : i32
    %c8_i32_274 = arith.constant 8 : i32
    %500 = arith.muli %c7_i32_273, %c8_i32_274 : i32
    %501 = tpu.assume_multiple %500, 8 : i32
    %502 = arith.index_cast %501 : i32 to index
    %c0_275 = arith.constant 0 : index
    %503 = vector.load %arg20[%502, %c0_275] : memref<64x512xf32, #tpu.memory_space<vmem>>, vector<8x512xf32>
    %c0_276 = arith.constant 0 : index
    %c0_277 = arith.constant 0 : index
    %504 = vector.load %arg16[%c0_276, %c0_277] : memref<8x128xf32, #tpu.memory_space<vmem>>, vector<8x128xf32>
    %505 = arith.truncf %504 : vector<8x128xf32> to vector<8x128xbf16>
    %c0_278 = arith.constant 0 : index
    %c0_279 = arith.constant 0 : index
    %506 = vector.load %arg8[%c0_278, %c0_279] : memref<128x512xbf16, #tpu.memory_space<vmem>>, vector<128x512xbf16>
    %cst_280 = arith.constant dense<0.000000e+00> : vector<8x512xf32>
    %507 = tpu.matmul %505, %506, %cst_280 {dimension_numbers = #tpu.dot_dimension_numbers<[1], [0], [0], [1], [0, 0, 1, 1], [], []>} : vector<8x128xbf16>, vector<128x512xbf16>, vector<8x512xf32> -> vector<8x512xf32>
    %508 = arith.addf %503, %507 : vector<8x512xf32>
    %509 = vector.extract_strided_slice %508 {offsets = [0, 0], sizes = [8, 384], strides = [1, 1]} : vector<8x512xf32> to vector<8x384xf32>
    %510 = arith.negf %509 : vector<8x384xf32>
    %511 = math.exp %510 : vector<8x384xf32>
    %cst_281 = arith.constant 1.000000e+00 : f32
    %512 = vector.broadcast %cst_281 : f32 to vector<8x384xf32>
    %513 = arith.addf %512, %511 : vector<8x384xf32>
    %514 = arith.divf %512, %513 : vector<8x384xf32>
    %515 = vector.extract_strided_slice %514 {offsets = [0, 0], sizes = [8, 128], strides = [1, 1]} : vector<8x384xf32> to vector<8x128xf32>
    %516 = vector.extract_strided_slice %514 {offsets = [0, 128], sizes = [8, 128], strides = [1, 1]} : vector<8x384xf32> to vector<8x128xf32>
    %517 = vector.extract_strided_slice %514 {offsets = [0, 256], sizes = [8, 128], strides = [1, 1]} : vector<8x384xf32> to vector<8x128xf32>
    %518 = vector.extract_strided_slice %508 {offsets = [0, 384], sizes = [8, 128], strides = [1, 1]} : vector<8x512xf32> to vector<8x128xf32>
    %519 = math.tanh %518 : vector<8x128xf32>
    %c0_282 = arith.constant 0 : index
    %c0_283 = arith.constant 0 : index
    %520 = vector.load %arg17[%c0_282, %c0_283] : memref<8x128xf32, #tpu.memory_space<vmem>>, vector<8x128xf32>
    %521 = arith.mulf %516, %520 : vector<8x128xf32>
    %522 = arith.mulf %515, %519 : vector<8x128xf32>
    %523 = arith.addf %521, %522 : vector<8x128xf32>
    %524 = math.tanh %523 : vector<8x128xf32>
    %525 = arith.mulf %517, %524 : vector<8x128xf32>
    %c0_284 = arith.constant 0 : index
    %c0_285 = arith.constant 0 : index
    %526 = vector.load %arg16[%c0_284, %c0_285] : memref<8x128xf32, #tpu.memory_space<vmem>>, vector<8x128xf32>
    tpu.vector_store %arg16[%c0_284, %c0_285], %525 {strides = array<i32>} : memref<8x128xf32, #tpu.memory_space<vmem>>, vector<8x128xf32>,
    %c0_286 = arith.constant 0 : index
    %c0_287 = arith.constant 0 : index
    %527 = vector.load %arg17[%c0_286, %c0_287] : memref<8x128xf32, #tpu.memory_space<vmem>>, vector<8x128xf32>
    tpu.vector_store %arg17[%c0_286, %c0_287], %523 {strides = array<i32>} : memref<8x128xf32, #tpu.memory_space<vmem>>, vector<8x128xf32>,
    %528 = arith.index_cast %501 : i32 to index
    %c0_288 = arith.constant 0 : index
    %529 = vector.load %arg18[%528, %c0_288] : memref<64x128xf32, #tpu.memory_space<vmem>>, vector<8x128xf32>
    tpu.vector_store %arg18[%528, %c0_288], %525 {strides = array<i32>} : memref<64x128xf32, #tpu.memory_space<vmem>>, vector<8x128xf32>,
    %c8_i32_289 = arith.constant 8 : i32
    %c0_290 = arith.constant 0 : index
    %c0_291 = arith.constant 0 : index
    %530 = vector.load %arg19[%c0_290, %c0_291] : memref<64x128xf32, #tpu.memory_space<vmem>>, vector<64x128xf32>
    %c0_292 = arith.constant 0 : index
    %c0_293 = arith.constant 0 : index
    %531 = vector.load %arg18[%c0_292, %c0_293] : memref<64x128xf32, #tpu.memory_space<vmem>>, vector<64x128xf32>
    %532 = arith.addf %530, %531 : vector<64x128xf32>
    %c0_294 = arith.constant 0 : index
    %c0_295 = arith.constant 0 : index
    %533 = vector.load %arg19[%c0_294, %c0_295] : memref<64x128xf32, #tpu.memory_space<vmem>>, vector<64x128xf32>
    tpu.vector_store %arg19[%c0_294, %c0_295], %532 {strides = array<i32>} : memref<64x128xf32, #tpu.memory_space<vmem>>, vector<64x128xf32>,
    %c0_296 = arith.constant 0 : index
    %c0_297 = arith.constant 0 : index
    %534 = vector.load %arg19[%c0_296, %c0_297] : memref<64x128xf32, #tpu.memory_space<vmem>>, vector<64x128xf32>
    %535 = arith.truncf %534 : vector<64x128xf32> to vector<64x128xbf16>
    %c0_298 = arith.constant 0 : index
    %c0_299 = arith.constant 0 : index
    %536 = vector.load %arg10[%c0_298, %c0_299] : memref<128x512xbf16, #tpu.memory_space<vmem>>, vector<128x512xbf16>
    %cst_300 = arith.constant dense<0.000000e+00> : vector<64x512xf32>
    %537 = tpu.matmul %535, %536, %cst_300 {dimension_numbers = #tpu.dot_dimension_numbers<[1], [0], [0], [1], [0, 0, 1, 1], [], []>} : vector<64x128xbf16>, vector<128x512xbf16>, vector<64x512xf32> -> vector<64x512xf32>
    %c0_301 = arith.constant 0 : index
    %c0_302 = arith.constant 0 : index
    %538 = vector.load %arg12[%c0_301, %c0_302] : memref<1x512xf32, #tpu.memory_space<vmem>>, vector<1x512xf32>
    %539 = vector.broadcast %538 : vector<1x512xf32> to vector<64x512xf32>
    %540 = arith.addf %537, %539 : vector<64x512xf32>
    %c0_303 = arith.constant 0 : index
    %c0_304 = arith.constant 0 : index
    %541 = vector.load %arg20[%c0_303, %c0_304] : memref<64x512xf32, #tpu.memory_space<vmem>>, vector<64x512xf32>
    tpu.vector_store %arg20[%c0_303, %c0_304], %540 {strides = array<i32>} : memref<64x512xf32, #tpu.memory_space<vmem>>, vector<64x512xf32>,
    %cst_305 = arith.constant 0.000000e+00 : f32
    %542 = vector.broadcast %cst_305 : f32 to vector<8x128xf32>
    %c0_306 = arith.constant 0 : index
    %c0_307 = arith.constant 0 : index
    %543 = vector.load %arg16[%c0_306, %c0_307] : memref<8x128xf32, #tpu.memory_space<vmem>>, vector<8x128xf32>
    tpu.vector_store %arg16[%c0_306, %c0_307], %542 {strides = array<i32>} : memref<8x128xf32, #tpu.memory_space<vmem>>, vector<8x128xf32>,
    %cst_308 = arith.constant 0.000000e+00 : f32
    %544 = vector.broadcast %cst_308 : f32 to vector<8x128xf32>
    %c0_309 = arith.constant 0 : index
    %c0_310 = arith.constant 0 : index
    %545 = vector.load %arg17[%c0_309, %c0_310] : memref<8x128xf32, #tpu.memory_space<vmem>>, vector<8x128xf32>
    tpu.vector_store %arg17[%c0_309, %c0_310], %544 {strides = array<i32>} : memref<8x128xf32, #tpu.memory_space<vmem>>, vector<8x128xf32>,
    %c0_i32_311 = arith.constant 0 : i32
    %c8_i32_312 = arith.constant 8 : i32
    %546 = arith.muli %c0_i32_311, %c8_i32_312 : i32
    %547 = tpu.assume_multiple %546, 8 : i32
    %548 = arith.index_cast %547 : i32 to index
    %c0_313 = arith.constant 0 : index
    %549 = vector.load %arg20[%548, %c0_313] : memref<64x512xf32, #tpu.memory_space<vmem>>, vector<8x512xf32>
    %c0_314 = arith.constant 0 : index
    %c0_315 = arith.constant 0 : index
    %550 = vector.load %arg16[%c0_314, %c0_315] : memref<8x128xf32, #tpu.memory_space<vmem>>, vector<8x128xf32>
    %551 = arith.truncf %550 : vector<8x128xf32> to vector<8x128xbf16>
    %c0_316 = arith.constant 0 : index
    %c0_317 = arith.constant 0 : index
    %552 = vector.load %arg11[%c0_316, %c0_317] : memref<128x512xbf16, #tpu.memory_space<vmem>>, vector<128x512xbf16>
    %cst_318 = arith.constant dense<0.000000e+00> : vector<8x512xf32>
    %553 = tpu.matmul %551, %552, %cst_318 {dimension_numbers = #tpu.dot_dimension_numbers<[1], [0], [0], [1], [0, 0, 1, 1], [], []>} : vector<8x128xbf16>, vector<128x512xbf16>, vector<8x512xf32> -> vector<8x512xf32>
    %554 = arith.addf %549, %553 : vector<8x512xf32>
    %555 = vector.extract_strided_slice %554 {offsets = [0, 0], sizes = [8, 384], strides = [1, 1]} : vector<8x512xf32> to vector<8x384xf32>
    %556 = arith.negf %555 : vector<8x384xf32>
    %557 = math.exp %556 : vector<8x384xf32>
    %cst_319 = arith.constant 1.000000e+00 : f32
    %558 = vector.broadcast %cst_319 : f32 to vector<8x384xf32>
    %559 = arith.addf %558, %557 : vector<8x384xf32>
    %560 = arith.divf %558, %559 : vector<8x384xf32>
    %561 = vector.extract_strided_slice %560 {offsets = [0, 0], sizes = [8, 128], strides = [1, 1]} : vector<8x384xf32> to vector<8x128xf32>
    %562 = vector.extract_strided_slice %560 {offsets = [0, 128], sizes = [8, 128], strides = [1, 1]} : vector<8x384xf32> to vector<8x128xf32>
    %563 = vector.extract_strided_slice %560 {offsets = [0, 256], sizes = [8, 128], strides = [1, 1]} : vector<8x384xf32> to vector<8x128xf32>
    %564 = vector.extract_strided_slice %554 {offsets = [0, 384], sizes = [8, 128], strides = [1, 1]} : vector<8x512xf32> to vector<8x128xf32>
    %565 = math.tanh %564 : vector<8x128xf32>
    %c0_320 = arith.constant 0 : index
    %c0_321 = arith.constant 0 : index
    %566 = vector.load %arg17[%c0_320, %c0_321] : memref<8x128xf32, #tpu.memory_space<vmem>>, vector<8x128xf32>
    %567 = arith.mulf %562, %566 : vector<8x128xf32>
    %568 = arith.mulf %561, %565 : vector<8x128xf32>
    %569 = arith.addf %567, %568 : vector<8x128xf32>
    %570 = math.tanh %569 : vector<8x128xf32>
    %571 = arith.mulf %563, %570 : vector<8x128xf32>
    %c0_322 = arith.constant 0 : index
    %c0_323 = arith.constant 0 : index
    %572 = vector.load %arg16[%c0_322, %c0_323] : memref<8x128xf32, #tpu.memory_space<vmem>>, vector<8x128xf32>
    tpu.vector_store %arg16[%c0_322, %c0_323], %571 {strides = array<i32>} : memref<8x128xf32, #tpu.memory_space<vmem>>, vector<8x128xf32>,
    %c0_324 = arith.constant 0 : index
    %c0_325 = arith.constant 0 : index
    %573 = vector.load %arg17[%c0_324, %c0_325] : memref<8x128xf32, #tpu.memory_space<vmem>>, vector<8x128xf32>
    tpu.vector_store %arg17[%c0_324, %c0_325], %569 {strides = array<i32>} : memref<8x128xf32, #tpu.memory_space<vmem>>, vector<8x128xf32>,
    %574 = arith.index_cast %547 : i32 to index
    %c0_326 = arith.constant 0 : index
    %575 = vector.load %arg18[%574, %c0_326] : memref<64x128xf32, #tpu.memory_space<vmem>>, vector<8x128xf32>
    tpu.vector_store %arg18[%574, %c0_326], %571 {strides = array<i32>} : memref<64x128xf32, #tpu.memory_space<vmem>>, vector<8x128xf32>,
    %c1_i32_327 = arith.constant 1 : i32
    %c8_i32_328 = arith.constant 8 : i32
    %576 = arith.muli %c1_i32_327, %c8_i32_328 : i32
    %577 = tpu.assume_multiple %576, 8 : i32
    %578 = arith.index_cast %577 : i32 to index
    %c0_329 = arith.constant 0 : index
    %579 = vector.load %arg20[%578, %c0_329] : memref<64x512xf32, #tpu.memory_space<vmem>>, vector<8x512xf32>
    %c0_330 = arith.constant 0 : index
    %c0_331 = arith.constant 0 : index
    %580 = vector.load %arg16[%c0_330, %c0_331] : memref<8x128xf32, #tpu.memory_space<vmem>>, vector<8x128xf32>
    %581 = arith.truncf %580 : vector<8x128xf32> to vector<8x128xbf16>
    %c0_332 = arith.constant 0 : index
    %c0_333 = arith.constant 0 : index
    %582 = vector.load %arg11[%c0_332, %c0_333] : memref<128x512xbf16, #tpu.memory_space<vmem>>, vector<128x512xbf16>
    %cst_334 = arith.constant dense<0.000000e+00> : vector<8x512xf32>
    %583 = tpu.matmul %581, %582, %cst_334 {dimension_numbers = #tpu.dot_dimension_numbers<[1], [0], [0], [1], [0, 0, 1, 1], [], []>} : vector<8x128xbf16>, vector<128x512xbf16>, vector<8x512xf32> -> vector<8x512xf32>
    %584 = arith.addf %579, %583 : vector<8x512xf32>
    %585 = vector.extract_strided_slice %584 {offsets = [0, 0], sizes = [8, 384], strides = [1, 1]} : vector<8x512xf32> to vector<8x384xf32>
    %586 = arith.negf %585 : vector<8x384xf32>
    %587 = math.exp %586 : vector<8x384xf32>
    %cst_335 = arith.constant 1.000000e+00 : f32
    %588 = vector.broadcast %cst_335 : f32 to vector<8x384xf32>
    %589 = arith.addf %588, %587 : vector<8x384xf32>
    %590 = arith.divf %588, %589 : vector<8x384xf32>
    %591 = vector.extract_strided_slice %590 {offsets = [0, 0], sizes = [8, 128], strides = [1, 1]} : vector<8x384xf32> to vector<8x128xf32>
    %592 = vector.extract_strided_slice %590 {offsets = [0, 128], sizes = [8, 128], strides = [1, 1]} : vector<8x384xf32> to vector<8x128xf32>
    %593 = vector.extract_strided_slice %590 {offsets = [0, 256], sizes = [8, 128], strides = [1, 1]} : vector<8x384xf32> to vector<8x128xf32>
    %594 = vector.extract_strided_slice %584 {offsets = [0, 384], sizes = [8, 128], strides = [1, 1]} : vector<8x512xf32> to vector<8x128xf32>
    %595 = math.tanh %594 : vector<8x128xf32>
    %c0_336 = arith.constant 0 : index
    %c0_337 = arith.constant 0 : index
    %596 = vector.load %arg17[%c0_336, %c0_337] : memref<8x128xf32, #tpu.memory_space<vmem>>, vector<8x128xf32>
    %597 = arith.mulf %592, %596 : vector<8x128xf32>
    %598 = arith.mulf %591, %595 : vector<8x128xf32>
    %599 = arith.addf %597, %598 : vector<8x128xf32>
    %600 = math.tanh %599 : vector<8x128xf32>
    %601 = arith.mulf %593, %600 : vector<8x128xf32>
    %c0_338 = arith.constant 0 : index
    %c0_339 = arith.constant 0 : index
    %602 = vector.load %arg16[%c0_338, %c0_339] : memref<8x128xf32, #tpu.memory_space<vmem>>, vector<8x128xf32>
    tpu.vector_store %arg16[%c0_338, %c0_339], %601 {strides = array<i32>} : memref<8x128xf32, #tpu.memory_space<vmem>>, vector<8x128xf32>,
    %c0_340 = arith.constant 0 : index
    %c0_341 = arith.constant 0 : index
    %603 = vector.load %arg17[%c0_340, %c0_341] : memref<8x128xf32, #tpu.memory_space<vmem>>, vector<8x128xf32>
    tpu.vector_store %arg17[%c0_340, %c0_341], %599 {strides = array<i32>} : memref<8x128xf32, #tpu.memory_space<vmem>>, vector<8x128xf32>,
    %604 = arith.index_cast %577 : i32 to index
    %c0_342 = arith.constant 0 : index
    %605 = vector.load %arg18[%604, %c0_342] : memref<64x128xf32, #tpu.memory_space<vmem>>, vector<8x128xf32>
    tpu.vector_store %arg18[%604, %c0_342], %601 {strides = array<i32>} : memref<64x128xf32, #tpu.memory_space<vmem>>, vector<8x128xf32>,
    %c2_i32_343 = arith.constant 2 : i32
    %c8_i32_344 = arith.constant 8 : i32
    %606 = arith.muli %c2_i32_343, %c8_i32_344 : i32
    %607 = tpu.assume_multiple %606, 8 : i32
    %608 = arith.index_cast %607 : i32 to index
    %c0_345 = arith.constant 0 : index
    %609 = vector.load %arg20[%608, %c0_345] : memref<64x512xf32, #tpu.memory_space<vmem>>, vector<8x512xf32>
    %c0_346 = arith.constant 0 : index
    %c0_347 = arith.constant 0 : index
    %610 = vector.load %arg16[%c0_346, %c0_347] : memref<8x128xf32, #tpu.memory_space<vmem>>, vector<8x128xf32>
    %611 = arith.truncf %610 : vector<8x128xf32> to vector<8x128xbf16>
    %c0_348 = arith.constant 0 : index
    %c0_349 = arith.constant 0 : index
    %612 = vector.load %arg11[%c0_348, %c0_349] : memref<128x512xbf16, #tpu.memory_space<vmem>>, vector<128x512xbf16>
    %cst_350 = arith.constant dense<0.000000e+00> : vector<8x512xf32>
    %613 = tpu.matmul %611, %612, %cst_350 {dimension_numbers = #tpu.dot_dimension_numbers<[1], [0], [0], [1], [0, 0, 1, 1], [], []>} : vector<8x128xbf16>, vector<128x512xbf16>, vector<8x512xf32> -> vector<8x512xf32>
    %614 = arith.addf %609, %613 : vector<8x512xf32>
    %615 = vector.extract_strided_slice %614 {offsets = [0, 0], sizes = [8, 384], strides = [1, 1]} : vector<8x512xf32> to vector<8x384xf32>
    %616 = arith.negf %615 : vector<8x384xf32>
    %617 = math.exp %616 : vector<8x384xf32>
    %cst_351 = arith.constant 1.000000e+00 : f32
    %618 = vector.broadcast %cst_351 : f32 to vector<8x384xf32>
    %619 = arith.addf %618, %617 : vector<8x384xf32>
    %620 = arith.divf %618, %619 : vector<8x384xf32>
    %621 = vector.extract_strided_slice %620 {offsets = [0, 0], sizes = [8, 128], strides = [1, 1]} : vector<8x384xf32> to vector<8x128xf32>
    %622 = vector.extract_strided_slice %620 {offsets = [0, 128], sizes = [8, 128], strides = [1, 1]} : vector<8x384xf32> to vector<8x128xf32>
    %623 = vector.extract_strided_slice %620 {offsets = [0, 256], sizes = [8, 128], strides = [1, 1]} : vector<8x384xf32> to vector<8x128xf32>
    %624 = vector.extract_strided_slice %614 {offsets = [0, 384], sizes = [8, 128], strides = [1, 1]} : vector<8x512xf32> to vector<8x128xf32>
    %625 = math.tanh %624 : vector<8x128xf32>
    %c0_352 = arith.constant 0 : index
    %c0_353 = arith.constant 0 : index
    %626 = vector.load %arg17[%c0_352, %c0_353] : memref<8x128xf32, #tpu.memory_space<vmem>>, vector<8x128xf32>
    %627 = arith.mulf %622, %626 : vector<8x128xf32>
    %628 = arith.mulf %621, %625 : vector<8x128xf32>
    %629 = arith.addf %627, %628 : vector<8x128xf32>
    %630 = math.tanh %629 : vector<8x128xf32>
    %631 = arith.mulf %623, %630 : vector<8x128xf32>
    %c0_354 = arith.constant 0 : index
    %c0_355 = arith.constant 0 : index
    %632 = vector.load %arg16[%c0_354, %c0_355] : memref<8x128xf32, #tpu.memory_space<vmem>>, vector<8x128xf32>
    tpu.vector_store %arg16[%c0_354, %c0_355], %631 {strides = array<i32>} : memref<8x128xf32, #tpu.memory_space<vmem>>, vector<8x128xf32>,
    %c0_356 = arith.constant 0 : index
    %c0_357 = arith.constant 0 : index
    %633 = vector.load %arg17[%c0_356, %c0_357] : memref<8x128xf32, #tpu.memory_space<vmem>>, vector<8x128xf32>
    tpu.vector_store %arg17[%c0_356, %c0_357], %629 {strides = array<i32>} : memref<8x128xf32, #tpu.memory_space<vmem>>, vector<8x128xf32>,
    %634 = arith.index_cast %607 : i32 to index
    %c0_358 = arith.constant 0 : index
    %635 = vector.load %arg18[%634, %c0_358] : memref<64x128xf32, #tpu.memory_space<vmem>>, vector<8x128xf32>
    tpu.vector_store %arg18[%634, %c0_358], %631 {strides = array<i32>} : memref<64x128xf32, #tpu.memory_space<vmem>>, vector<8x128xf32>,
    %c3_i32_359 = arith.constant 3 : i32
    %c8_i32_360 = arith.constant 8 : i32
    %636 = arith.muli %c3_i32_359, %c8_i32_360 : i32
    %637 = tpu.assume_multiple %636, 8 : i32
    %638 = arith.index_cast %637 : i32 to index
    %c0_361 = arith.constant 0 : index
    %639 = vector.load %arg20[%638, %c0_361] : memref<64x512xf32, #tpu.memory_space<vmem>>, vector<8x512xf32>
    %c0_362 = arith.constant 0 : index
    %c0_363 = arith.constant 0 : index
    %640 = vector.load %arg16[%c0_362, %c0_363] : memref<8x128xf32, #tpu.memory_space<vmem>>, vector<8x128xf32>
    %641 = arith.truncf %640 : vector<8x128xf32> to vector<8x128xbf16>
    %c0_364 = arith.constant 0 : index
    %c0_365 = arith.constant 0 : index
    %642 = vector.load %arg11[%c0_364, %c0_365] : memref<128x512xbf16, #tpu.memory_space<vmem>>, vector<128x512xbf16>
    %cst_366 = arith.constant dense<0.000000e+00> : vector<8x512xf32>
    %643 = tpu.matmul %641, %642, %cst_366 {dimension_numbers = #tpu.dot_dimension_numbers<[1], [0], [0], [1], [0, 0, 1, 1], [], []>} : vector<8x128xbf16>, vector<128x512xbf16>, vector<8x512xf32> -> vector<8x512xf32>
    %644 = arith.addf %639, %643 : vector<8x512xf32>
    %645 = vector.extract_strided_slice %644 {offsets = [0, 0], sizes = [8, 384], strides = [1, 1]} : vector<8x512xf32> to vector<8x384xf32>
    %646 = arith.negf %645 : vector<8x384xf32>
    %647 = math.exp %646 : vector<8x384xf32>
    %cst_367 = arith.constant 1.000000e+00 : f32
    %648 = vector.broadcast %cst_367 : f32 to vector<8x384xf32>
    %649 = arith.addf %648, %647 : vector<8x384xf32>
    %650 = arith.divf %648, %649 : vector<8x384xf32>
    %651 = vector.extract_strided_slice %650 {offsets = [0, 0], sizes = [8, 128], strides = [1, 1]} : vector<8x384xf32> to vector<8x128xf32>
    %652 = vector.extract_strided_slice %650 {offsets = [0, 128], sizes = [8, 128], strides = [1, 1]} : vector<8x384xf32> to vector<8x128xf32>
    %653 = vector.extract_strided_slice %650 {offsets = [0, 256], sizes = [8, 128], strides = [1, 1]} : vector<8x384xf32> to vector<8x128xf32>
    %654 = vector.extract_strided_slice %644 {offsets = [0, 384], sizes = [8, 128], strides = [1, 1]} : vector<8x512xf32> to vector<8x128xf32>
    %655 = math.tanh %654 : vector<8x128xf32>
    %c0_368 = arith.constant 0 : index
    %c0_369 = arith.constant 0 : index
    %656 = vector.load %arg17[%c0_368, %c0_369] : memref<8x128xf32, #tpu.memory_space<vmem>>, vector<8x128xf32>
    %657 = arith.mulf %652, %656 : vector<8x128xf32>
    %658 = arith.mulf %651, %655 : vector<8x128xf32>
    %659 = arith.addf %657, %658 : vector<8x128xf32>
    %660 = math.tanh %659 : vector<8x128xf32>
    %661 = arith.mulf %653, %660 : vector<8x128xf32>
    %c0_370 = arith.constant 0 : index
    %c0_371 = arith.constant 0 : index
    %662 = vector.load %arg16[%c0_370, %c0_371] : memref<8x128xf32, #tpu.memory_space<vmem>>, vector<8x128xf32>
    tpu.vector_store %arg16[%c0_370, %c0_371], %661 {strides = array<i32>} : memref<8x128xf32, #tpu.memory_space<vmem>>, vector<8x128xf32>,
    %c0_372 = arith.constant 0 : index
    %c0_373 = arith.constant 0 : index
    %663 = vector.load %arg17[%c0_372, %c0_373] : memref<8x128xf32, #tpu.memory_space<vmem>>, vector<8x128xf32>
    tpu.vector_store %arg17[%c0_372, %c0_373], %659 {strides = array<i32>} : memref<8x128xf32, #tpu.memory_space<vmem>>, vector<8x128xf32>,
    %664 = arith.index_cast %637 : i32 to index
    %c0_374 = arith.constant 0 : index
    %665 = vector.load %arg18[%664, %c0_374] : memref<64x128xf32, #tpu.memory_space<vmem>>, vector<8x128xf32>
    tpu.vector_store %arg18[%664, %c0_374], %661 {strides = array<i32>} : memref<64x128xf32, #tpu.memory_space<vmem>>, vector<8x128xf32>,
    %c4_i32_375 = arith.constant 4 : i32
    %c8_i32_376 = arith.constant 8 : i32
    %666 = arith.muli %c4_i32_375, %c8_i32_376 : i32
    %667 = tpu.assume_multiple %666, 8 : i32
    %668 = arith.index_cast %667 : i32 to index
    %c0_377 = arith.constant 0 : index
    %669 = vector.load %arg20[%668, %c0_377] : memref<64x512xf32, #tpu.memory_space<vmem>>, vector<8x512xf32>
    %c0_378 = arith.constant 0 : index
    %c0_379 = arith.constant 0 : index
    %670 = vector.load %arg16[%c0_378, %c0_379] : memref<8x128xf32, #tpu.memory_space<vmem>>, vector<8x128xf32>
    %671 = arith.truncf %670 : vector<8x128xf32> to vector<8x128xbf16>
    %c0_380 = arith.constant 0 : index
    %c0_381 = arith.constant 0 : index
    %672 = vector.load %arg11[%c0_380, %c0_381] : memref<128x512xbf16, #tpu.memory_space<vmem>>, vector<128x512xbf16>
    %cst_382 = arith.constant dense<0.000000e+00> : vector<8x512xf32>
    %673 = tpu.matmul %671, %672, %cst_382 {dimension_numbers = #tpu.dot_dimension_numbers<[1], [0], [0], [1], [0, 0, 1, 1], [], []>} : vector<8x128xbf16>, vector<128x512xbf16>, vector<8x512xf32> -> vector<8x512xf32>
    %674 = arith.addf %669, %673 : vector<8x512xf32>
    %675 = vector.extract_strided_slice %674 {offsets = [0, 0], sizes = [8, 384], strides = [1, 1]} : vector<8x512xf32> to vector<8x384xf32>
    %676 = arith.negf %675 : vector<8x384xf32>
    %677 = math.exp %676 : vector<8x384xf32>
    %cst_383 = arith.constant 1.000000e+00 : f32
    %678 = vector.broadcast %cst_383 : f32 to vector<8x384xf32>
    %679 = arith.addf %678, %677 : vector<8x384xf32>
    %680 = arith.divf %678, %679 : vector<8x384xf32>
    %681 = vector.extract_strided_slice %680 {offsets = [0, 0], sizes = [8, 128], strides = [1, 1]} : vector<8x384xf32> to vector<8x128xf32>
    %682 = vector.extract_strided_slice %680 {offsets = [0, 128], sizes = [8, 128], strides = [1, 1]} : vector<8x384xf32> to vector<8x128xf32>
    %683 = vector.extract_strided_slice %680 {offsets = [0, 256], sizes = [8, 128], strides = [1, 1]} : vector<8x384xf32> to vector<8x128xf32>
    %684 = vector.extract_strided_slice %674 {offsets = [0, 384], sizes = [8, 128], strides = [1, 1]} : vector<8x512xf32> to vector<8x128xf32>
    %685 = math.tanh %684 : vector<8x128xf32>
    %c0_384 = arith.constant 0 : index
    %c0_385 = arith.constant 0 : index
    %686 = vector.load %arg17[%c0_384, %c0_385] : memref<8x128xf32, #tpu.memory_space<vmem>>, vector<8x128xf32>
    %687 = arith.mulf %682, %686 : vector<8x128xf32>
    %688 = arith.mulf %681, %685 : vector<8x128xf32>
    %689 = arith.addf %687, %688 : vector<8x128xf32>
    %690 = math.tanh %689 : vector<8x128xf32>
    %691 = arith.mulf %683, %690 : vector<8x128xf32>
    %c0_386 = arith.constant 0 : index
    %c0_387 = arith.constant 0 : index
    %692 = vector.load %arg16[%c0_386, %c0_387] : memref<8x128xf32, #tpu.memory_space<vmem>>, vector<8x128xf32>
    tpu.vector_store %arg16[%c0_386, %c0_387], %691 {strides = array<i32>} : memref<8x128xf32, #tpu.memory_space<vmem>>, vector<8x128xf32>,
    %c0_388 = arith.constant 0 : index
    %c0_389 = arith.constant 0 : index
    %693 = vector.load %arg17[%c0_388, %c0_389] : memref<8x128xf32, #tpu.memory_space<vmem>>, vector<8x128xf32>
    tpu.vector_store %arg17[%c0_388, %c0_389], %689 {strides = array<i32>} : memref<8x128xf32, #tpu.memory_space<vmem>>, vector<8x128xf32>,
    %694 = arith.index_cast %667 : i32 to index
    %c0_390 = arith.constant 0 : index
    %695 = vector.load %arg18[%694, %c0_390] : memref<64x128xf32, #tpu.memory_space<vmem>>, vector<8x128xf32>
    tpu.vector_store %arg18[%694, %c0_390], %691 {strides = array<i32>} : memref<64x128xf32, #tpu.memory_space<vmem>>, vector<8x128xf32>,
    %c5_i32_391 = arith.constant 5 : i32
    %c8_i32_392 = arith.constant 8 : i32
    %696 = arith.muli %c5_i32_391, %c8_i32_392 : i32
    %697 = tpu.assume_multiple %696, 8 : i32
    %698 = arith.index_cast %697 : i32 to index
    %c0_393 = arith.constant 0 : index
    %699 = vector.load %arg20[%698, %c0_393] : memref<64x512xf32, #tpu.memory_space<vmem>>, vector<8x512xf32>
    %c0_394 = arith.constant 0 : index
    %c0_395 = arith.constant 0 : index
    %700 = vector.load %arg16[%c0_394, %c0_395] : memref<8x128xf32, #tpu.memory_space<vmem>>, vector<8x128xf32>
    %701 = arith.truncf %700 : vector<8x128xf32> to vector<8x128xbf16>
    %c0_396 = arith.constant 0 : index
    %c0_397 = arith.constant 0 : index
    %702 = vector.load %arg11[%c0_396, %c0_397] : memref<128x512xbf16, #tpu.memory_space<vmem>>, vector<128x512xbf16>
    %cst_398 = arith.constant dense<0.000000e+00> : vector<8x512xf32>
    %703 = tpu.matmul %701, %702, %cst_398 {dimension_numbers = #tpu.dot_dimension_numbers<[1], [0], [0], [1], [0, 0, 1, 1], [], []>} : vector<8x128xbf16>, vector<128x512xbf16>, vector<8x512xf32> -> vector<8x512xf32>
    %704 = arith.addf %699, %703 : vector<8x512xf32>
    %705 = vector.extract_strided_slice %704 {offsets = [0, 0], sizes = [8, 384], strides = [1, 1]} : vector<8x512xf32> to vector<8x384xf32>
    %706 = arith.negf %705 : vector<8x384xf32>
    %707 = math.exp %706 : vector<8x384xf32>
    %cst_399 = arith.constant 1.000000e+00 : f32
    %708 = vector.broadcast %cst_399 : f32 to vector<8x384xf32>
    %709 = arith.addf %708, %707 : vector<8x384xf32>
    %710 = arith.divf %708, %709 : vector<8x384xf32>
    %711 = vector.extract_strided_slice %710 {offsets = [0, 0], sizes = [8, 128], strides = [1, 1]} : vector<8x384xf32> to vector<8x128xf32>
    %712 = vector.extract_strided_slice %710 {offsets = [0, 128], sizes = [8, 128], strides = [1, 1]} : vector<8x384xf32> to vector<8x128xf32>
    %713 = vector.extract_strided_slice %710 {offsets = [0, 256], sizes = [8, 128], strides = [1, 1]} : vector<8x384xf32> to vector<8x128xf32>
    %714 = vector.extract_strided_slice %704 {offsets = [0, 384], sizes = [8, 128], strides = [1, 1]} : vector<8x512xf32> to vector<8x128xf32>
    %715 = math.tanh %714 : vector<8x128xf32>
    %c0_400 = arith.constant 0 : index
    %c0_401 = arith.constant 0 : index
    %716 = vector.load %arg17[%c0_400, %c0_401] : memref<8x128xf32, #tpu.memory_space<vmem>>, vector<8x128xf32>
    %717 = arith.mulf %712, %716 : vector<8x128xf32>
    %718 = arith.mulf %711, %715 : vector<8x128xf32>
    %719 = arith.addf %717, %718 : vector<8x128xf32>
    %720 = math.tanh %719 : vector<8x128xf32>
    %721 = arith.mulf %713, %720 : vector<8x128xf32>
    %c0_402 = arith.constant 0 : index
    %c0_403 = arith.constant 0 : index
    %722 = vector.load %arg16[%c0_402, %c0_403] : memref<8x128xf32, #tpu.memory_space<vmem>>, vector<8x128xf32>
    tpu.vector_store %arg16[%c0_402, %c0_403], %721 {strides = array<i32>} : memref<8x128xf32, #tpu.memory_space<vmem>>, vector<8x128xf32>,
    %c0_404 = arith.constant 0 : index
    %c0_405 = arith.constant 0 : index
    %723 = vector.load %arg17[%c0_404, %c0_405] : memref<8x128xf32, #tpu.memory_space<vmem>>, vector<8x128xf32>
    tpu.vector_store %arg17[%c0_404, %c0_405], %719 {strides = array<i32>} : memref<8x128xf32, #tpu.memory_space<vmem>>, vector<8x128xf32>,
    %724 = arith.index_cast %697 : i32 to index
    %c0_406 = arith.constant 0 : index
    %725 = vector.load %arg18[%724, %c0_406] : memref<64x128xf32, #tpu.memory_space<vmem>>, vector<8x128xf32>
    tpu.vector_store %arg18[%724, %c0_406], %721 {strides = array<i32>} : memref<64x128xf32, #tpu.memory_space<vmem>>, vector<8x128xf32>,
    %c6_i32_407 = arith.constant 6 : i32
    %c8_i32_408 = arith.constant 8 : i32
    %726 = arith.muli %c6_i32_407, %c8_i32_408 : i32
    %727 = tpu.assume_multiple %726, 8 : i32
    %728 = arith.index_cast %727 : i32 to index
    %c0_409 = arith.constant 0 : index
    %729 = vector.load %arg20[%728, %c0_409] : memref<64x512xf32, #tpu.memory_space<vmem>>, vector<8x512xf32>
    %c0_410 = arith.constant 0 : index
    %c0_411 = arith.constant 0 : index
    %730 = vector.load %arg16[%c0_410, %c0_411] : memref<8x128xf32, #tpu.memory_space<vmem>>, vector<8x128xf32>
    %731 = arith.truncf %730 : vector<8x128xf32> to vector<8x128xbf16>
    %c0_412 = arith.constant 0 : index
    %c0_413 = arith.constant 0 : index
    %732 = vector.load %arg11[%c0_412, %c0_413] : memref<128x512xbf16, #tpu.memory_space<vmem>>, vector<128x512xbf16>
    %cst_414 = arith.constant dense<0.000000e+00> : vector<8x512xf32>
    %733 = tpu.matmul %731, %732, %cst_414 {dimension_numbers = #tpu.dot_dimension_numbers<[1], [0], [0], [1], [0, 0, 1, 1], [], []>} : vector<8x128xbf16>, vector<128x512xbf16>, vector<8x512xf32> -> vector<8x512xf32>
    %734 = arith.addf %729, %733 : vector<8x512xf32>
    %735 = vector.extract_strided_slice %734 {offsets = [0, 0], sizes = [8, 384], strides = [1, 1]} : vector<8x512xf32> to vector<8x384xf32>
    %736 = arith.negf %735 : vector<8x384xf32>
    %737 = math.exp %736 : vector<8x384xf32>
    %cst_415 = arith.constant 1.000000e+00 : f32
    %738 = vector.broadcast %cst_415 : f32 to vector<8x384xf32>
    %739 = arith.addf %738, %737 : vector<8x384xf32>
    %740 = arith.divf %738, %739 : vector<8x384xf32>
    %741 = vector.extract_strided_slice %740 {offsets = [0, 0], sizes = [8, 128], strides = [1, 1]} : vector<8x384xf32> to vector<8x128xf32>
    %742 = vector.extract_strided_slice %740 {offsets = [0, 128], sizes = [8, 128], strides = [1, 1]} : vector<8x384xf32> to vector<8x128xf32>
    %743 = vector.extract_strided_slice %740 {offsets = [0, 256], sizes = [8, 128], strides = [1, 1]} : vector<8x384xf32> to vector<8x128xf32>
    %744 = vector.extract_strided_slice %734 {offsets = [0, 384], sizes = [8, 128], strides = [1, 1]} : vector<8x512xf32> to vector<8x128xf32>
    %745 = math.tanh %744 : vector<8x128xf32>
    %c0_416 = arith.constant 0 : index
    %c0_417 = arith.constant 0 : index
    %746 = vector.load %arg17[%c0_416, %c0_417] : memref<8x128xf32, #tpu.memory_space<vmem>>, vector<8x128xf32>
    %747 = arith.mulf %742, %746 : vector<8x128xf32>
    %748 = arith.mulf %741, %745 : vector<8x128xf32>
    %749 = arith.addf %747, %748 : vector<8x128xf32>
    %750 = math.tanh %749 : vector<8x128xf32>
    %751 = arith.mulf %743, %750 : vector<8x128xf32>
    %c0_418 = arith.constant 0 : index
    %c0_419 = arith.constant 0 : index
    %752 = vector.load %arg16[%c0_418, %c0_419] : memref<8x128xf32, #tpu.memory_space<vmem>>, vector<8x128xf32>
    tpu.vector_store %arg16[%c0_418, %c0_419], %751 {strides = array<i32>} : memref<8x128xf32, #tpu.memory_space<vmem>>, vector<8x128xf32>,
    %c0_420 = arith.constant 0 : index
    %c0_421 = arith.constant 0 : index
    %753 = vector.load %arg17[%c0_420, %c0_421] : memref<8x128xf32, #tpu.memory_space<vmem>>, vector<8x128xf32>
    tpu.vector_store %arg17[%c0_420, %c0_421], %749 {strides = array<i32>} : memref<8x128xf32, #tpu.memory_space<vmem>>, vector<8x128xf32>,
    %754 = arith.index_cast %727 : i32 to index
    %c0_422 = arith.constant 0 : index
    %755 = vector.load %arg18[%754, %c0_422] : memref<64x128xf32, #tpu.memory_space<vmem>>, vector<8x128xf32>
    tpu.vector_store %arg18[%754, %c0_422], %751 {strides = array<i32>} : memref<64x128xf32, #tpu.memory_space<vmem>>, vector<8x128xf32>,
    %c7_i32_423 = arith.constant 7 : i32
    %c8_i32_424 = arith.constant 8 : i32
    %756 = arith.muli %c7_i32_423, %c8_i32_424 : i32
    %757 = tpu.assume_multiple %756, 8 : i32
    %758 = arith.index_cast %757 : i32 to index
    %c0_425 = arith.constant 0 : index
    %759 = vector.load %arg20[%758, %c0_425] : memref<64x512xf32, #tpu.memory_space<vmem>>, vector<8x512xf32>
    %c0_426 = arith.constant 0 : index
    %c0_427 = arith.constant 0 : index
    %760 = vector.load %arg16[%c0_426, %c0_427] : memref<8x128xf32, #tpu.memory_space<vmem>>, vector<8x128xf32>
    %761 = arith.truncf %760 : vector<8x128xf32> to vector<8x128xbf16>
    %c0_428 = arith.constant 0 : index
    %c0_429 = arith.constant 0 : index
    %762 = vector.load %arg11[%c0_428, %c0_429] : memref<128x512xbf16, #tpu.memory_space<vmem>>, vector<128x512xbf16>
    %cst_430 = arith.constant dense<0.000000e+00> : vector<8x512xf32>
    %763 = tpu.matmul %761, %762, %cst_430 {dimension_numbers = #tpu.dot_dimension_numbers<[1], [0], [0], [1], [0, 0, 1, 1], [], []>} : vector<8x128xbf16>, vector<128x512xbf16>, vector<8x512xf32> -> vector<8x512xf32>
    %764 = arith.addf %759, %763 : vector<8x512xf32>
    %765 = vector.extract_strided_slice %764 {offsets = [0, 0], sizes = [8, 384], strides = [1, 1]} : vector<8x512xf32> to vector<8x384xf32>
    %766 = arith.negf %765 : vector<8x384xf32>
    %767 = math.exp %766 : vector<8x384xf32>
    %cst_431 = arith.constant 1.000000e+00 : f32
    %768 = vector.broadcast %cst_431 : f32 to vector<8x384xf32>
    %769 = arith.addf %768, %767 : vector<8x384xf32>
    %770 = arith.divf %768, %769 : vector<8x384xf32>
    %771 = vector.extract_strided_slice %770 {offsets = [0, 0], sizes = [8, 128], strides = [1, 1]} : vector<8x384xf32> to vector<8x128xf32>
    %772 = vector.extract_strided_slice %770 {offsets = [0, 128], sizes = [8, 128], strides = [1, 1]} : vector<8x384xf32> to vector<8x128xf32>
    %773 = vector.extract_strided_slice %770 {offsets = [0, 256], sizes = [8, 128], strides = [1, 1]} : vector<8x384xf32> to vector<8x128xf32>
    %774 = vector.extract_strided_slice %764 {offsets = [0, 384], sizes = [8, 128], strides = [1, 1]} : vector<8x512xf32> to vector<8x128xf32>
    %775 = math.tanh %774 : vector<8x128xf32>
    %c0_432 = arith.constant 0 : index
    %c0_433 = arith.constant 0 : index
    %776 = vector.load %arg17[%c0_432, %c0_433] : memref<8x128xf32, #tpu.memory_space<vmem>>, vector<8x128xf32>
    %777 = arith.mulf %772, %776 : vector<8x128xf32>
    %778 = arith.mulf %771, %775 : vector<8x128xf32>
    %779 = arith.addf %777, %778 : vector<8x128xf32>
    %780 = math.tanh %779 : vector<8x128xf32>
    %781 = arith.mulf %773, %780 : vector<8x128xf32>
    %c0_434 = arith.constant 0 : index
    %c0_435 = arith.constant 0 : index
    %782 = vector.load %arg16[%c0_434, %c0_435] : memref<8x128xf32, #tpu.memory_space<vmem>>, vector<8x128xf32>
    tpu.vector_store %arg16[%c0_434, %c0_435], %781 {strides = array<i32>} : memref<8x128xf32, #tpu.memory_space<vmem>>, vector<8x128xf32>,
    %c0_436 = arith.constant 0 : index
    %c0_437 = arith.constant 0 : index
    %783 = vector.load %arg17[%c0_436, %c0_437] : memref<8x128xf32, #tpu.memory_space<vmem>>, vector<8x128xf32>
    tpu.vector_store %arg17[%c0_436, %c0_437], %779 {strides = array<i32>} : memref<8x128xf32, #tpu.memory_space<vmem>>, vector<8x128xf32>,
    %784 = arith.index_cast %757 : i32 to index
    %c0_438 = arith.constant 0 : index
    %785 = vector.load %arg18[%784, %c0_438] : memref<64x128xf32, #tpu.memory_space<vmem>>, vector<8x128xf32>
    tpu.vector_store %arg18[%784, %c0_438], %781 {strides = array<i32>} : memref<64x128xf32, #tpu.memory_space<vmem>>, vector<8x128xf32>,
    %c8_i32_439 = arith.constant 8 : i32
    %c0_440 = arith.constant 0 : index
    %c0_441 = arith.constant 0 : index
    %786 = vector.load %arg19[%c0_440, %c0_441] : memref<64x128xf32, #tpu.memory_space<vmem>>, vector<64x128xf32>
    %c0_442 = arith.constant 0 : index
    %c0_443 = arith.constant 0 : index
    %787 = vector.load %arg18[%c0_442, %c0_443] : memref<64x128xf32, #tpu.memory_space<vmem>>, vector<64x128xf32>
    %788 = arith.addf %786, %787 : vector<64x128xf32>
    %c0_444 = arith.constant 0 : index
    %c0_445 = arith.constant 0 : index
    %789 = vector.load %arg19[%c0_444, %c0_445] : memref<64x128xf32, #tpu.memory_space<vmem>>, vector<64x128xf32>
    tpu.vector_store %arg19[%c0_444, %c0_445], %788 {strides = array<i32>} : memref<64x128xf32, #tpu.memory_space<vmem>>, vector<64x128xf32>,
    %c0_446 = arith.constant 0 : index
    %c0_447 = arith.constant 0 : index
    %790 = vector.load %arg19[%c0_446, %c0_447] : memref<64x128xf32, #tpu.memory_space<vmem>>, vector<64x128xf32>
    %791 = arith.truncf %790 : vector<64x128xf32> to vector<64x128xbf16>
    %c0_448 = arith.constant 0 : index
    %c0_449 = arith.constant 0 : index
    %792 = vector.load %arg13[%c0_448, %c0_449] : memref<128x128xbf16, #tpu.memory_space<vmem>>, vector<128x128xbf16>
    %cst_450 = arith.constant dense<0.000000e+00> : vector<64x128xf32>
    %793 = tpu.matmul %791, %792, %cst_450 {dimension_numbers = #tpu.dot_dimension_numbers<[1], [0], [0], [1], [0, 0, 1, 1], [], []>} : vector<64x128xbf16>, vector<128x128xbf16>, vector<64x128xf32> -> vector<64x128xf32>
    %c0_451 = arith.constant 0 : index
    %c0_452 = arith.constant 0 : index
    %794 = vector.load %arg14[%c0_451, %c0_452] : memref<1x128xf32, #tpu.memory_space<vmem>>, vector<1x128xf32>
    %795 = vector.broadcast %794 : vector<1x128xf32> to vector<64x128xf32>
    %796 = arith.addf %793, %795 : vector<64x128xf32>
    %cst_453 = arith.constant dense<0xFF800000> : vector<64xf32>
    %797 = vector.multi_reduction <maximumf>, %796, %cst_453 [1] : vector<64x128xf32> to vector<64xf32>
    %798 = vector.shape_cast %797 : vector<64xf32> to vector<64x1xf32>
    %799 = vector.broadcast %798 : vector<64x1xf32> to vector<64x128xf32>
    %800 = arith.subf %796, %799 : vector<64x128xf32>
    %801 = math.exp %800 : vector<64x128xf32>
    %cst_454 = arith.constant dense<0.000000e+00> : vector<64xf32>
    %802 = vector.multi_reduction <add>, %801, %cst_454 [1] : vector<64x128xf32> to vector<64xf32>
    %803 = vector.shape_cast %802 : vector<64xf32> to vector<64x1xf32>
    %804 = vector.broadcast %803 : vector<64x1xf32> to vector<64x128xf32>
    %805 = arith.divf %801, %804 : vector<64x128xf32>
    %c0_455 = arith.constant 0 : index
    %c0_456 = arith.constant 0 : index
    %806 = vector.load %arg15[%c0_455, %c0_456] : memref<64x128xf32, #tpu.memory_space<vmem>>, vector<64x128xf32>
    tpu.vector_store %arg15[%c0_455, %c0_456], %805 {strides = array<i32>} : memref<64x128xf32, #tpu.memory_space<vmem>>, vector<64x128xf32>,
    return
  }
  func.func @transform_0(%arg0: i32) -> (i32, i32) {
    %c0_i32 = arith.constant 0 : i32
    %c0_i32_0 = arith.constant 0 : i32
    return %arg0, %c0_i32 : i32, i32
  }
  func.func @transform_1(%arg0: i32) -> (i32, i32) {
    %c0_i32 = arith.constant 0 : i32
    %c0_i32_0 = arith.constant 0 : i32
    %c0_i32_1 = arith.constant 0 : i32
    return %c0_i32, %c0_i32_0 : i32, i32
  }
  func.func @transform_2(%arg0: i32) -> (i32, i32) {
    %c0_i32 = arith.constant 0 : i32
    %c0_i32_0 = arith.constant 0 : i32
    %c0_i32_1 = arith.constant 0 : i32
    return %c0_i32, %c0_i32_0 : i32, i32
  }
  func.func @transform_3(%arg0: i32) -> (i32, i32) {
    %c0_i32 = arith.constant 0 : i32
    %c0_i32_0 = arith.constant 0 : i32
    %c0_i32_1 = arith.constant 0 : i32
    return %c0_i32, %c0_i32_0 : i32, i32
  }
  func.func @transform_4(%arg0: i32) -> (i32, i32) {
    %c0_i32 = arith.constant 0 : i32
    %c0_i32_0 = arith.constant 0 : i32
    %c0_i32_1 = arith.constant 0 : i32
    return %c0_i32, %c0_i32_0 : i32, i32
  }
  func.func @transform_5(%arg0: i32) -> (i32, i32) {
    %c0_i32 = arith.constant 0 : i32
    %c0_i32_0 = arith.constant 0 : i32
    %c0_i32_1 = arith.constant 0 : i32
    return %c0_i32, %c0_i32_0 : i32, i32
  }
  func.func @transform_6(%arg0: i32) -> (i32, i32) {
    %c0_i32 = arith.constant 0 : i32
    %c0_i32_0 = arith.constant 0 : i32
    %c0_i32_1 = arith.constant 0 : i32
    return %c0_i32, %c0_i32_0 : i32, i32
  }
  func.func @transform_7(%arg0: i32) -> (i32, i32) {
    %c0_i32 = arith.constant 0 : i32
    %c0_i32_0 = arith.constant 0 : i32
    %c0_i32_1 = arith.constant 0 : i32
    return %c0_i32, %c0_i32_0 : i32, i32
  }
  func.func @transform_8(%arg0: i32) -> (i32, i32) {
    %c0_i32 = arith.constant 0 : i32
    %c0_i32_0 = arith.constant 0 : i32
    %c0_i32_1 = arith.constant 0 : i32
    return %c0_i32, %c0_i32_0 : i32, i32
  }
  func.func @transform_9(%arg0: i32) -> (i32, i32) {
    %c0_i32 = arith.constant 0 : i32
    %c0_i32_0 = arith.constant 0 : i32
    %c0_i32_1 = arith.constant 0 : i32
    return %c0_i32, %c0_i32_0 : i32, i32
  }
  func.func @transform_10(%arg0: i32) -> (i32, i32) {
    %c0_i32 = arith.constant 0 : i32
    %c0_i32_0 = arith.constant 0 : i32
    %c0_i32_1 = arith.constant 0 : i32
    return %c0_i32, %c0_i32_0 : i32, i32
  }
  func.func @transform_11(%arg0: i32) -> (i32, i32) {
    %c0_i32 = arith.constant 0 : i32
    %c0_i32_0 = arith.constant 0 : i32
    %c0_i32_1 = arith.constant 0 : i32
    return %c0_i32, %c0_i32_0 : i32, i32
  }
  func.func @transform_12(%arg0: i32) -> (i32, i32) {
    %c0_i32 = arith.constant 0 : i32
    %c0_i32_0 = arith.constant 0 : i32
    %c0_i32_1 = arith.constant 0 : i32
    return %c0_i32, %c0_i32_0 : i32, i32
  }
  func.func @transform_13(%arg0: i32) -> (i32, i32) {
    %c0_i32 = arith.constant 0 : i32
    %c0_i32_0 = arith.constant 0 : i32
    %c0_i32_1 = arith.constant 0 : i32
    return %c0_i32, %c0_i32_0 : i32, i32
  }
  func.func @transform_14(%arg0: i32) -> (i32, i32) {
    %c0_i32 = arith.constant 0 : i32
    %c0_i32_0 = arith.constant 0 : i32
    return %arg0, %c0_i32 : i32, i32
  }
}

</mosaic_0001>

<bundles_post_ra>
// kernel: tpu_custom_call.1
= control target key start
LH: loop header
LB: loop body
LE: loop exit
PB: predicated region body
PF: predicated region fallthrough
CT: control target
= control target key end

     0   :  { %19 = vsyncpa [#allocation8], 0  ;;  %s13586_s0 = inlined_call_operand.hbm [shape: f32[64,128], index: 0, kind: input, shape index: {}]   ;;  %s13587_s1 = inlined_call_operand.hbm [shape: f32[1,128], index: 1, kind: input, shape index: {}]   ;;  %s13588_s2 = inlined_call_operand.hbm [shape: f32[1,128], index: 2, kind: input, shape index: {}]   ;;  %s13589_s3 = inlined_call_operand.hbm [shape: bf16[128,512], index: 3, kind: input, shape index: {}]   ;;  %s13590_s4 = inlined_call_operand.hbm [shape: bf16[128,512], index: 4, kind: input, shape index: {}]   ;;  %s13591_s5 = inlined_call_operand.vmem [shape: f32[1,512], index: 5, kind: input, shape index: {}]   ;;  %s13592_s6 = inlined_call_operand.hbm [shape: bf16[128,512], index: 6, kind: input, shape index: {}]   ;;  %s13593_s7 = inlined_call_operand.hbm [shape: bf16[128,512], index: 7, kind: input, shape index: {}]   ;;  %s13594_s8 = inlined_call_operand.vmem [shape: f32[1,512], index: 8, kind: input, shape index: {}]   ;;  %s13595_s9 = inlined_call_operand.hbm [shape: bf16[128,512], index: 9, kind: input, shape index: {}]   ;;  %s13596_s10 = inlined_call_operand.hbm [shape: bf16[128,512], index: 10, kind: input, shape index: {}]   ;;  %s13597_s11 = inlined_call_operand.vmem [shape: f32[1,512], index: 11, kind: input, shape index: {}]   ;;  %s13598_s12 = inlined_call_operand.hbm [shape: bf16[128,128], index: 12, kind: input, shape index: {}]   ;;  %s13599_s13 = inlined_call_operand.vmem [shape: f32[1,128], index: 13, kind: input, shape index: {}]   ;;  %s13600_s14 = inlined_call_operand.hbm [shape: f32[64,128], index: 14, kind: output, shape index: {}]  }
   0x1   :  { %20 = vsyncpa [#allocation11], 0 }
   0x2   :  { %21 = vsyncpa [#allocation14], 0 }
   0x3   :  { %22 = vsyncpa [#allocation17], 0 }
   0x4   :  { %23 = vsyncpa [#allocation20], 0 }
   0x5   :  { %24 = vsyncpa [#allocation23], 0 }
   0x6   :  { %25 = vsyncpa [#allocation9], 0  ;;  %s11531_s29 = smov [#allocation10]   ;;  %s11532_s15 = smov [#allocation13]  }
   0x7   :  { %s44_s30 = sshll.u32 %s11531_s29, 4  ;;  %s63_s16 = sshll.u32 %s11532_s15, 4  ;;  %s45_s30 = int_to_ptr.vmem [resolvable:$true] %s44_s30  ;;  %s64_s16 = int_to_ptr.vmem [resolvable:$true] %s63_s16 }
   0x8   :  { %s11305_s17 = scalar_lea.vmem %s45_s30, 16  ;;  %s11309_s18 = scalar_lea.vmem %s45_s30, 32 }
   0x9   :  { %p11306_p0 = scmp.ne.s32.totalorder %s45_s30, %s11305_s17  ;;  %p11310_p1 = scmp.lt.s32.totalorder %s45_s30, %s45_s30 }
   0xa   :  { %p11311_p2 = scmp.lt.s32.totalorder %s11309_s18, %s11305_s17 }
   0xc   :  { %p11312_p3 = por %p11311_p2, %p11310_p1 }
   0xe   :  { %p11313_p4 = pnand %p11312_p3, %p11306_p0 }
  0x10   :  { %11316 = shalt.err (!%p11313_p4)
}
  0x11   :  { %47 = dma.hbm_to_vmem [thread:$0]  %s13587_s1, 16, %s45_s30, [#allocation11]  }
  0x12   :  { %s11325_s21 = scalar_lea.vmem %s64_s16, 4096  ;;  %p11330_p6 = scmp.lt.s32.totalorder %s64_s16, %s64_s16 }
  0x13   :  { %p11326_p5 = scmp.ne.s32.totalorder %s64_s16, %s11325_s21  ;;  %p11331_p7 = scmp.lt.s32.totalorder %s11325_s21, %s11325_s21 }
  0x15   :  { %p11332_p8 = por %p11331_p7, %p11330_p6 }
  0x17   :  { %p11333_p9 = pnand %p11332_p8, %p11326_p5 }
  0x19   :  { %11336 = shalt.err (!%p11333_p9)
}
  0x1a   :  { %s11533_s22 = smov 256   ;;  %s11534_s23 = smov 16  }
  0x1b   :  { %69 = dma.hbm_to_vmem [thread:$0]  %s13589_s3, 4096, %s64_s16, [#allocation14], %s11533_s22, %s11533_s22, %s11534_s23  }
  0x1c   :  { %s11535_s26 = smov [#allocation16]   ;;  %s11536_s28 = smov [#allocation19]  }
  0x1d   :  { %s89_s27 = sshll.u32 %s11535_s26, 4  ;;  %s115_s1 = sshll.u32 %s11536_s28, 4  ;;  %s90_s27 = int_to_ptr.vmem [resolvable:$true] %s89_s27  ;;  %s116_s1 = int_to_ptr.vmem [resolvable:$true] %s115_s1 }
  0x1e   :  { %s11345_s29 = scalar_lea.vmem %s90_s27, 4096  ;;  %p11350_p11 = scmp.lt.s32.totalorder %s90_s27, %s90_s27 }
  0x1f   :  { %p11346_p10 = scmp.ne.s32.totalorder %s90_s27, %s11345_s29  ;;  %p11351_p12 = scmp.lt.s32.totalorder %s11345_s29, %s11345_s29 }
  0x21   :  { %p11352_p13 = por %p11351_p12, %p11350_p11 }
  0x23   :  { %p11353_p0 = pnand %p11352_p13, %p11346_p10 }
  0x25   :  { %11356 = shalt.err (!%p11353_p0)
}
  0x26   :  { %95 = dma.hbm_to_vmem [thread:$0]  %s13592_s6, 4096, %s90_s27, [#allocation17], %s11533_s22, %s11533_s22, %s11534_s23  }
  0x27   :  { %s11365_s3 = scalar_lea.vmem %s116_s1, 4096  ;;  %p11370_p2 = scmp.lt.s32.totalorder %s116_s1, %s116_s1 }
  0x28   :  { %p11366_p1 = scmp.ne.s32.totalorder %s116_s1, %s11365_s3  ;;  %p11371_p3 = scmp.lt.s32.totalorder %s11365_s3, %s11365_s3 }
  0x2a   :  { %p11372_p4 = por %p11371_p3, %p11370_p2 }
  0x2c   :  { %p11373_p5 = pnand %p11372_p4, %p11366_p1 }
  0x2e   :  { %11376 = shalt.err (!%p11373_p5)
}
  0x2f   :  { %121 = dma.hbm_to_vmem [thread:$0]  %s13595_s9, 4096, %s116_s1, [#allocation20], %s11533_s22, %s11533_s22, %s11534_s23  }
  0x30   :  { %s11537_s18 = smov [#allocation7]  }
  0x31   :  { %s31_s19 = sshll.u32 %s11537_s18, 4  ;;  %s32_s19 = int_to_ptr.vmem [resolvable:$true] %s31_s19 }
  0x32   :  { %s11385_s20 = scalar_lea.vmem %s32_s19, 1024  ;;  %p11390_p7 = scmp.lt.s32.totalorder %s32_s19, %s32_s19 }
  0x33   :  { %p11386_p6 = scmp.ne.s32.totalorder %s32_s19, %s11385_s20  ;;  %p11391_p8 = scmp.lt.s32.totalorder %s11385_s20, %s11385_s20 }
  0x35   :  { %p11392_p9 = por %p11391_p8, %p11390_p7 }
  0x37   :  { %p11393_p10 = pnand %p11392_p9, %p11386_p6 }
  0x39   :  { %11396 = shalt.err (!%p11393_p10)
}
  0x3a   :  { %s11538_s6 = smov 128   ;;  %s11539_s21 = smov 8  }
  0x3b   :  { %37 = dma.hbm_to_vmem [thread:$0]  %s13586_s0, 1024, %s32_s19, [#allocation8], %s11538_s6, %s11538_s6, %s11539_s21  }
  0x3c   :  { %s11540_s9 = smov [#allocation12]   ;;  %s11541_s27 = smov [#allocation15]  }
  0x3d   :  { %s54_s26 = sshll.u32 %s11540_s9, 4  ;;  %s75_s28 = sshll.u32 %s11541_s27, 4  ;;  %s55_s26 = int_to_ptr.vmem [resolvable:$true] %s54_s26  ;;  %s76_s28 = int_to_ptr.vmem [resolvable:$true] %s75_s28 }
  0x3e   :  { %s11405_s1 = scalar_lea.vmem %s55_s26, 16  ;;  %s11409_s29 = scalar_lea.vmem %s55_s26, 32 }
  0x3f   :  { %p11406_p11 = scmp.ne.s32.totalorder %s55_s26, %s11405_s1  ;;  %p11410_p12 = scmp.lt.s32.totalorder %s55_s26, %s55_s26 }
  0x40   :  { %p11411_p13 = scmp.lt.s32.totalorder %s11409_s29, %s11405_s1 }
  0x42   :  { %p11412_p0 = por %p11411_p13, %p11410_p12 }
  0x44   :  { %p11413_p1 = pnand %p11412_p0, %p11406_p11 }
  0x46   :  { %11416 = shalt.err (!%p11413_p1)
}
  0x47   :  { %57 = dma.hbm_to_vmem [thread:$0]  %s13588_s2, 16, %s55_s26, [#allocation11]  }
  0x48   :  { %s11425_s3 = scalar_lea.vmem %s76_s28, 4096  ;;  %p11430_p3 = scmp.lt.s32.totalorder %s76_s28, %s76_s28 }
  0x49   :  { %p11426_p2 = scmp.ne.s32.totalorder %s76_s28, %s11425_s3  ;;  %p11431_p4 = scmp.lt.s32.totalorder %s11425_s3, %s11425_s3 }
  0x4b   :  { %p11432_p5 = por %p11431_p4, %p11430_p3 }
  0x4d   :  { %p11433_p6 = pnand %p11432_p5, %p11426_p2 }
  0x4f   :  { %11436 = shalt.err (!%p11433_p6)
}
  0x50   :  { %81 = dma.hbm_to_vmem [thread:$0]  %s13590_s4, 4096, %s76_s28, [#allocation14], %s11533_s22, %s11533_s22, %s11534_s23  }
  0x51   :  { %s11542_s17 = smov [#allocation18]   ;;  %s11543_s19 = smov [#allocation21]  }
  0x52   :  { %s101_s18 = sshll.u32 %s11542_s17, 4  ;;  %s127_s2 = sshll.u32 %s11543_s19, 4  ;;  %s102_s18 = int_to_ptr.vmem [resolvable:$true] %s101_s18  ;;  %s128_s2 = int_to_ptr.vmem [resolvable:$true] %s127_s2 }
  0x53   :  { %s11445_s20 = scalar_lea.vmem %s102_s18, 4096  ;;  %p11450_p8 = scmp.lt.s32.totalorder %s102_s18, %s102_s18 }
  0x54   :  { %p11446_p7 = scmp.ne.s32.totalorder %s102_s18, %s11445_s20  ;;  %p11451_p9 = scmp.lt.s32.totalorder %s11445_s20, %s11445_s20 }
  0x56   :  { %p11452_p10 = por %p11451_p9, %p11450_p8 }
  0x58   :  { %p11453_p11 = pnand %p11452_p10, %p11446_p7 }
  0x5a   :  { %11456 = shalt.err (!%p11453_p11)
}
  0x5b   :  { %107 = dma.hbm_to_vmem [thread:$0]  %s13593_s7, 4096, %s102_s18, [#allocation17], %s11533_s22, %s11533_s22, %s11534_s23  }
  0x5c   :  { %s11465_s4 = scalar_lea.vmem %s128_s2, 4096  ;;  %p11470_p13 = scmp.lt.s32.totalorder %s128_s2, %s128_s2 }
  0x5d   :  { %p11466_p12 = scmp.ne.s32.totalorder %s128_s2, %s11465_s4  ;;  %p11471_p0 = scmp.lt.s32.totalorder %s11465_s4, %s11465_s4 }
  0x5f   :  { %p11472_p1 = por %p11471_p0, %p11470_p13 }
  0x61   :  { %p11473_p2 = pnand %p11472_p1, %p11466_p12 }
  0x63   :  { %11476 = shalt.err (!%p11473_p2)
}
  0x64   :  { %133 = dma.hbm_to_vmem [thread:$0]  %s13596_s10, 4096, %s128_s2, [#allocation20], %s11533_s22, %s11533_s22, %s11534_s23  }
  0x65   :  { %s11544_s27 = smov [#allocation22]  }
  0x66   :  { %s141_s28 = sshll.u32 %s11544_s27, 4  ;;  %s142_s28 = int_to_ptr.vmem [resolvable:$true] %s141_s28 }
  0x67   :  { %s11485_s1 = scalar_lea.vmem %s142_s28, 1024  ;;  %p11490_p4 = scmp.lt.s32.totalorder %s142_s28, %s142_s28 }
  0x68   :  { %p11486_p3 = scmp.ne.s32.totalorder %s142_s28, %s11485_s1  ;;  %p11491_p5 = scmp.lt.s32.totalorder %s11485_s1, %s11485_s1 }
  0x6a   :  { %p11492_p6 = por %p11491_p5, %p11490_p4 }
  0x6c   :  { %p11493_p7 = pnand %p11492_p6, %p11486_p3 }
  0x6e   :  { %11496 = shalt.err (!%p11493_p7)
}
  0x6f   :  { %s11545_s7 = smov 64   ;;  %s11546_s29 = smov 4  }
  0x70   :  { %147 = dma.hbm_to_vmem [thread:$0]  %s13598_s12, 1024, %s142_s28, [#allocation23], %s11545_s7, %s11545_s7, %s11546_s29  }
  0x71   :  { %11517 = dma.done.wait [#allocation8], 1024  }
  0x72   :  { %11518 = vsyncadd [#allocation8], 4294966272 }
  0x73   :  { %11519 = dma.done.wait [#allocation11], 32  }
  0x74   :  { %11520 = vsyncadd [#allocation11], 4294967264 }
  0x75   :  { %11521 = dma.done.wait [#allocation14], 8192  }
  0x76   :  { %11522 = vsyncadd [#allocation14], 4294959104 }
  0x77   :  { %11523 = dma.done.wait [#allocation17], 8192  }
  0x78   :  { %11524 = vsyncadd [#allocation17], 4294959104 }
  0x79   :  { %11525 = dma.done.wait [#allocation20], 8192  }
  0x7a   :  { %11526 = vsyncadd [#allocation20], 4294959104 }
  0x7b   :  { %11527 = dma.done.wait [#allocation23], 1024  }
  0x7c   :  { %11528 = vsyncadd [#allocation23], 4294966272  ;;  %v11676_v0 = vld [vmem:[#allocation7] sm:$0xff]  ;;  %v11678_v1 = vld [vmem:[#allocation7 + $0x8] sm:$0xff]  ;;  %v13603_v49 = vmov 0   ;;  %v13601_v50 = vmov 0.0|0.0  }
  0x7d   :  { %189 = vadd.xlane.f32.xlu0 %v11676_v0  ;;  %v213_v2 = vmul.f32 %v11676_v0, %v11676_v0  ;;  %v214_v3 = vmul.f32 %v11678_v1, %v11678_v1  ;;  %v11685_v4 = vld [vmem:[#allocation7 + $0x10] sm:$0xff]  ;;  %v11688_v5 = vld [vmem:[#allocation7 + $0x18] sm:$0xff]  ;;  %v11696_v9 = vld [vmem:[#allocation7 + $0x20] sm:$0xff]  ;;  %573 = vmatprep.mubr.bf16.mxu1 %v13603_v49 }
  0x7e   :  { %v215_v6 = vmul.f32 %v11685_v4, %v11685_v4  ;;  %v216_v7 = vmul.f32 %v11688_v5, %v11688_v5  ;;  %v10391_v8 = vld [vmem:[#allocation13 + $0xe4] ss:$16 sps:$4 sm:$0xff]   ;;  %v10393_v10 = vld [vmem:[#allocation13 + $0xe0] ss:$16 sps:$4 sm:$0xff]   ;;  %v217_v16 = vmul.f32 %v11696_v9, %v11696_v9  ;;  %v10440_v48 = vld [vmem:[#allocation13 + $0xec] ss:$16 sps:$4 sm:$0xff]   ;;  %954 = vmatprep.mubr.bf16.mxu0 %v13603_v49 }
  0x7f   :  { %221 = vadd.xlane.f32.xlu1 %v213_v2  ;;  %541 = vmatprep.subr.bf16.mxu1 %v10391_v8  ;;  %v11698_v11 = vld [vmem:[#allocation15 + $0xe4] ss:$16 sps:$4 sm:$0xff]   ;;  %v11702_v13 = vld [vmem:[#allocation15 + $0xe0] ss:$16 sps:$4 sm:$0xff]  }
  0x80   :  { %v11700_v12 = vld [vmem:[#allocation7 + $0x28] sm:$0xff]  ;;  %542 = vmatpush1.bf16.msra.mxu1 %v10393_v10  ;;  %922 = vmatprep.subr.bf16.mxu0 %v11698_v11  ;;  %v10399_v15 = vld [vmem:[#allocation13 + $0xc0] ss:$16 sps:$4 sm:$0xff]   ;;  %v11722_v24 = vld [vmem:[#allocation7 + $0x38] sm:$0xff] }
  0x81   :  { %191 = vadd.xlane.f32.xlu0 %v11678_v1  ;;  %v10396_v14 = vld [vmem:[#allocation13 + $0xc4] ss:$16 sps:$4 sm:$0xff]   ;;  %923 = vmatpush1.bf16.msra.mxu0 %v11702_v13  ;;  %v11711_v18 = vld [vmem:[#allocation15 + $0xc0] ss:$16 sps:$4 sm:$0xff]   ;;  %v218_v19 = vmul.f32 %v11700_v12, %v11700_v12  ;;  %v220_v31 = vmul.f32 %v11722_v24, %v11722_v24 }
  0x82   :  { %543 = vmatprep.subr.bf16.mxu1 %v10396_v14  ;;  %v11709_v17 = vld [vmem:[#allocation15 + $0xc4] ss:$16 sps:$4 sm:$0xff]   ;;  %v11717_v21 = vld [vmem:[#allocation7 + $0x30] sm:$0xff] }
  0x83   :  { %223 = vadd.xlane.f32.xlu1 %v214_v3  ;;  %924 = vmatprep.subr.bf16.mxu0 %v11709_v17  ;;  %v10402_v20 = vld [vmem:[#allocation13 + $0xa4] ss:$16 sps:$4 sm:$0xff]   ;;  %v10405_v22 = vld [vmem:[#allocation13 + $0xa0] ss:$16 sps:$4 sm:$0xff]   ;;  %v219_v28 = vmul.f32 %v11717_v21, %v11717_v21 }
  0x84   :  { %544 = vmatpush1.bf16.msra.mxu1 %v10399_v15  ;;  %v11720_v23 = vld [vmem:[#allocation15 + $0xa4] ss:$16 sps:$4 sm:$0xff]   ;;  %v10410_v25 = vld [vmem:[#allocation15 + $0xa0] ss:$16 sps:$4 sm:$0xff]  }
  0x85   :  { %193 = vadd.xlane.f32.xlu0 %v11685_v4  ;;  %925 = vmatpush1.bf16.msra.mxu0 %v11711_v18  ;;  %v10408_v26 = vld [vmem:[#allocation13 + $0x84] ss:$16 sps:$4 sm:$0xff]   ;;  %v10411_v27 = vld [vmem:[#allocation13 + $0x80] ss:$16 sps:$4 sm:$0xff]  }
  0x86   :  { %545 = vmatprep.subr.bf16.mxu1 %v10402_v20  ;;  %926 = vmatprep.subr.bf16.mxu0 %v11720_v23  ;;  %v10412_v29 = vld [vmem:[#allocation15 + $0x84] ss:$16 sps:$4 sm:$0xff]   ;;  %v10416_v30 = vld [vmem:[#allocation15 + $0x80] ss:$16 sps:$4 sm:$0xff]  }
  0x87   :  { %195 = vadd.xlane.f32.xlu1 %v11688_v5  ;;  %v10414_v32 = vld [vmem:[#allocation13 + $0x64] ss:$16 sps:$4 sm:$0xff]   ;;  %v10417_v33 = vld [vmem:[#allocation13 + $0x60] ss:$16 sps:$4 sm:$0xff]  }
  0x88   :  { %546 = vmatpush1.bf16.msra.mxu1 %v10405_v22  ;;  %v10418_v34 = vld [vmem:[#allocation15 + $0x64] ss:$16 sps:$4 sm:$0xff]   ;;  %v10422_v35 = vld [vmem:[#allocation15 + $0x60] ss:$16 sps:$4 sm:$0xff]  }
  0x89   :  { %225 = vadd.xlane.f32.xlu0 %v215_v6  ;;  %927 = vmatpush1.bf16.msra.mxu0 %v10410_v25  ;;  %v10420_v36 = vld [vmem:[#allocation13 + $0x44] ss:$16 sps:$4 sm:$0xff]   ;;  %v10423_v37 = vld [vmem:[#allocation13 + $0x40] ss:$16 sps:$4 sm:$0xff]  }
  0x8a   :  { %547 = vmatprep.subr.bf16.mxu1 %v10408_v26  ;;  %928 = vmatprep.subr.bf16.mxu0 %v10412_v29  ;;  %v10424_v38 = vld [vmem:[#allocation15 + $0x44] ss:$16 sps:$4 sm:$0xff]   ;;  %v10428_v39 = vld [vmem:[#allocation15 + $0x40] ss:$16 sps:$4 sm:$0xff]  }
  0x8b   :  { %227 = vadd.xlane.f32.xlu1 %v216_v7  ;;  %v10426_v40 = vld [vmem:[#allocation13 + $0x24] ss:$16 sps:$4 sm:$0xff]   ;;  %v10429_v41 = vld [vmem:[#allocation13 + $0x20] ss:$16 sps:$4 sm:$0xff]  }
  0x8c   :  { %548 = vmatpush1.bf16.msra.mxu1 %v10411_v27  ;;  %v10430_v42 = vld [vmem:[#allocation15 + $0x24] ss:$16 sps:$4 sm:$0xff]   ;;  %v10434_v43 = vld [vmem:[#allocation15 + $0x20] ss:$16 sps:$4 sm:$0xff]  }
  0x8d   :  { %197 = vadd.xlane.f32.xlu0 %v11696_v9  ;;  %929 = vmatpush1.bf16.msra.mxu0 %v10416_v30  ;;  %v10432_v44 = vld [vmem:[#allocation13 + $0x4] ss:$16 sps:$4 sm:$0xff]   ;;  %v10435_v45 = vld [vmem:[#allocation13] ss:$16 sps:$4 sm:$0xff]  }
  0x8e   :  { %549 = vmatprep.subr.bf16.mxu1 %v10414_v32  ;;  %930 = vmatprep.subr.bf16.mxu0 %v10418_v34  ;;  %v10436_v46 = vld [vmem:[#allocation15 + $0x4] ss:$16 sps:$4 sm:$0xff]   ;;  %v10441_v47 = vld [vmem:[#allocation15] ss:$16 sps:$4 sm:$0xff]  }
  0x8f   :  { %199 = vadd.xlane.f32.xlu1 %v11700_v12 }
  0x90   :  { %550 = vmatpush1.bf16.msra.mxu1 %v10417_v33 }
  0x91   :  { %229 = vadd.xlane.f32.xlu0 %v217_v16  ;;  %931 = vmatpush1.bf16.msra.mxu0 %v10422_v35 }
  0x92   :  { %551 = vmatprep.subr.bf16.mxu1 %v10420_v36  ;;  %932 = vmatprep.subr.bf16.mxu0 %v10424_v38 }
  0x93   :  { %231 = vadd.xlane.f32.xlu1 %v218_v19 }
  0x94   :  { %552 = vmatpush1.bf16.msra.mxu1 %v10423_v37 }
  0x95   :  { %201 = vadd.xlane.f32.xlu0 %v11717_v21  ;;  %933 = vmatpush1.bf16.msra.mxu0 %v10428_v39 }
  0x96   :  { %553 = vmatprep.subr.bf16.mxu1 %v10426_v40  ;;  %934 = vmatprep.subr.bf16.mxu0 %v10430_v42 }
  0x97   :  { %203 = vadd.xlane.f32.xlu1 %v11722_v24 }
  0x98   :  { %554 = vmatpush1.bf16.msra.mxu1 %v10429_v41  ;;  %v11759_v41 = vld [vmem:[#allocation10] ss:$0 sm:$0xff] }
  0x99   :  { %233 = vadd.xlane.f32.xlu0 %v219_v28  ;;  %935 = vmatpush1.bf16.msra.mxu0 %v10434_v43 }
  0x9a   :  { %555 = vmatprep.subr.bf16.mxu1 %v10432_v44  ;;  %936 = vmatprep.subr.bf16.mxu0 %v10436_v46 }
  0x9b   :  { %235 = vadd.xlane.f32.xlu1 %v220_v31 }
  0x9c   :  { %556 = vmatpush1.bf16.msra.mxu1 %v10435_v45 }
  0x9d   :  { %937 = vmatpush1.bf16.msra.mxu0 %v10441_v47  ;;  %614 = vmatprep.subr.bf16.mxu1 %v10440_v48 }
  0x9e   :  { %1237 = vmatprep.subr.bf16.mxu0 %v11698_v11 }
  0xa0   :  { %955 = vmatmul.mubr.bf16.vlgmr.msra.gmra.mxu0 %v13601_v50 }
  0xa1   :  { %1238 = vmatpush1.bf16.msra.mxu0 %v11702_v13  ;;  %1269 = vmatprep.mubr.bf16.mxu0 %v13603_v49 }
  0xa2   :  { %1239 = vmatprep.subr.bf16.mxu0 %v11709_v17 }
  0xa5   :  { %1240 = vmatpush1.bf16.msra.mxu0 %v11711_v18 }
  0xa6   :  { %1241 = vmatprep.subr.bf16.mxu0 %v11720_v23 }
  0xa9   :  { %1242 = vmatpush1.bf16.msra.mxu0 %v10410_v25 }
  0xaa   :  { %1243 = vmatprep.subr.bf16.mxu0 %v10412_v29 }
  0xad   :  { %1244 = vmatpush1.bf16.msra.mxu0 %v10416_v30 }
  0xae   :  { %1245 = vmatprep.subr.bf16.mxu0 %v10418_v34 }
  0xb1   :  { %1246 = vmatpush1.bf16.msra.mxu0 %v10422_v35 }
  0xb2   :  { %1247 = vmatprep.subr.bf16.mxu0 %v10424_v38 }
  0xb5   :  { %1248 = vmatpush1.bf16.msra.mxu0 %v10428_v39 }
  0xb6   :  { %1249 = vmatprep.subr.bf16.mxu0 %v10430_v42 }
  0xb9   :  { %1250 = vmatpush1.bf16.msra.mxu0 %v10434_v43 }
  0xba   :  { %1251 = vmatprep.subr.bf16.mxu0 %v10436_v46 }
  0xbd   :  { %1252 = vmatpush1.bf16.msra.mxu0 %v10441_v47 }
 0x106   :  { %v190_v51 = vpop.xlane.xlu0 %189 }
 0x107   :  { %v205_v52 = vmul.f32 0.0625, %v190_v51 }
 0x108   :  { %v222_v53 = vpop.xlane.xlu1 %221 }
 0x109   :  { %v245_v54 = vmul.f32 %v205_v52, %v205_v52  ;;  %v237_v55 = vmul.f32 0.0625, %v222_v53  ;;  %v261_v31 = vsub.f32 %v11676_v0, %v205_v52  ;;  %v11767_v53 = vld [vmem:[#allocation12] ss:$0 sm:$0xff] }
 0x10a   :  { %v192_v56 = vpop.xlane.xlu0 %191 }
 0x10b   :  { %v253_v57 = vsub.f32 %v237_v55, %v245_v54  ;;  %v206_v58 = vmul.f32 0.0625, %v192_v56 }
 0x10c   :  { %v224_v59 = vpop.xlane.xlu1 %223 }
 0x10d   :  { %v269_v60 = vadd.f32 1e-05, %v253_v57  ;;  %v246_v61 = vmul.f32 %v206_v58, %v206_v58  ;;  %v238_v62 = vmul.f32 0.0625, %v224_v59  ;;  %v262_v43 = vsub.f32 %v11678_v1, %v206_v58 }
 0x10e   :  { %v194_v63 = vpop.xlane.xlu0 %193 }
 0x10f   :  { %10855 = vrsqrt.f32 %v269_v60  ;;  %v254_v2 = vsub.f32 %v238_v62, %v246_v61  ;;  %v11740_v3 = vmul.f32 0.0625, %v194_v63 }
 0x110   :  { %v196_v6 = vpop.xlane.xlu1 %195 }
 0x111   :  { %v270_v7 = vadd.f32 1e-05, %v254_v2  ;;  %v247_v8 = vmul.f32 %v11740_v3, %v11740_v3  ;;  %v11744_v10 = vmul.f32 0.0625, %v196_v6  ;;  %v263_v1 = vsub.f32 %v11685_v4, %v11740_v3  ;;  %v10438_v6 = vld [vmem:[#allocation13 + $0xe8] ss:$16 sps:$4 sm:$0xff]  }
 0x112   :  { %v226_v11 = vpop.xlane.xlu0 %225  ;;  %v10444_v4 = vld [vmem:[#allocation13 + $0xcc] ss:$16 sps:$4 sm:$0xff]  }
 0x113   :  { %10857 = vrsqrt.f32 %v270_v7  ;;  %v239_v13 = vmul.f32 0.0625, %v226_v11  ;;  %v248_v15 = vmul.f32 %v11744_v10, %v11744_v10  ;;  %v264_v62 = vsub.f32 %v11688_v5, %v11744_v10  ;;  %v10447_v10 = vld [vmem:[#allocation13 + $0xac] ss:$16 sps:$4 sm:$0xff]  }
 0x114   :  { %v228_v14 = vpop.xlane.xlu1 %227 }
 0x115   :  { %v255_v16 = vsub.f32 %v239_v13, %v247_v8  ;;  %v240_v17 = vmul.f32 0.0625, %v228_v14 }
 0x116   :  { %v198_v18 = vpop.xlane.xlu0 %197 }
 0x117   :  { %v271_v19 = vadd.f32 1e-05, %v255_v16  ;;  %v256_v20 = vsub.f32 %v240_v17, %v248_v15  ;;  %v11748_v22 = vmul.f32 0.0625, %v198_v18  ;;  %v10442_v15 = vld [vmem:[#allocation13 + $0xc8] ss:$16 sps:$4 sm:$0xff]  }
 0x118   :  { %v200_v23 = vpop.xlane.xlu1 %199 }
 0x119   :  { %10859 = vrsqrt.f32 %v271_v19  ;;  %v272_v25 = vadd.f32 1e-05, %v256_v20  ;;  %v249_v26 = vmul.f32 %v11748_v22, %v11748_v22  ;;  %v11752_v27 = vmul.f32 0.0625, %v200_v23  ;;  %v10445_v23 = vld [vmem:[#allocation13 + $0xa8] ss:$16 sps:$4 sm:$0xff]  }
 0x11a   :  { %v230_v28 = vpop.xlane.xlu0 %229  ;;  %v265_v16 = vsub.f32 %v11696_v9, %v11748_v22  ;;  %v10448_v9 = vld [vmem:[#allocation13 + $0x88] ss:$16 sps:$4 sm:$0xff]  }
 0x11b   :  { %10861 = vrsqrt.f32 %v272_v25  ;;  %v241_v29 = vmul.f32 0.0625, %v230_v28  ;;  %v250_v33 = vmul.f32 %v11752_v27, %v11752_v27  ;;  %v266_v20 = vsub.f32 %v11700_v12, %v11752_v27 }
 0x11c   :  { %v10856_v30 = vpop.eup %10855  ;;  %v232_v32 = vpop.xlane.xlu1 %231 }
 0x11d   :  { %v257_v34 = vsub.f32 %v241_v29, %v249_v26  ;;  %v242_v35 = vmul.f32 0.0625, %v232_v32  ;;  %v285_v37 = vmul.f32 %v10856_v30, %v261_v31  ;;  %v10450_v29 = vld [vmem:[#allocation13 + $0x8c] ss:$16 sps:$4 sm:$0xff]  }
 0x11e   :  { %v202_v36 = vpop.xlane.xlu0 %201  ;;  %v10453_v32 = vld [vmem:[#allocation13 + $0x6c] ss:$16 sps:$4 sm:$0xff]  }
 0x11f   :  { %v273_v38 = vadd.f32 1e-05, %v257_v34  ;;  %v258_v39 = vsub.f32 %v242_v35, %v250_v33  ;;  %v11757_v40 = vmul.f32 0.0625, %v202_v36  ;;  %v300_v51 = vmul.f32 %v11759_v41, %v285_v37  ;;  %v10451_v36 = vld [vmem:[#allocation13 + $0x68] ss:$16 sps:$4 sm:$0xff]  }
 0x120   :  { %v10858_v42 = vpop.eup %10857  ;;  %v204_v44 = vpop.xlane.xlu1 %203 }
 0x121   :  { %10863 = vrsqrt.f32 %v273_v38  ;;  %v274_v0 = vadd.f32 1e-05, %v258_v39  ;;  %v251_v45 = vmul.f32 %v11757_v40, %v11757_v40  ;;  %v11764_v46 = vmul.f32 0.0625, %v204_v44 }
 0x122   :  { %v234_v47 = vpop.xlane.xlu0 %233  ;;  %v286_v48 = vmul.f32 %v10858_v42, %v262_v43  ;;  %v315_v60 = vadd.f32 %v11767_v53, %v300_v51  ;;  %v267_v12 = vsub.f32 %v11717_v21, %v11757_v40  ;;  %v10456_v42 = vld [vmem:[#allocation13 + $0x4c] ss:$16 sps:$4 sm:$0xff]   ;;  %v10454_v21 = vld [vmem:[#allocation13 + $0x48] ss:$16 sps:$4 sm:$0xff]  }
 0x123   :  { %10865 = vrsqrt.f32 %v274_v0  ;;  %v243_v52 = vmul.f32 0.0625, %v234_v47  ;;  %v252_v56 = vmul.f32 %v11764_v46, %v11764_v46  ;;  %v268_v35 = vsub.f32 %v11722_v24, %v11764_v46  ;;  %v10459_v0 = vld [vmem:[#allocation13 + $0x2c] ss:$16 sps:$4 sm:$0xff]   ;;  %v10457_v46 = vld [vmem:[#allocation13 + $0x28] ss:$16 sps:$4 sm:$0xff]  }
 0x124   :  { %v236_v54 = vpop.xlane.xlu1 %235  ;;  %v301_v55 = vmul.f32 %v11759_v41, %v286_v48  ;;  %v10462_v48 = vld [vmem:[#allocation13 + $0xc] ss:$16 sps:$4 sm:$0xff]   ;;  %v10460_v51 = vld [vmem:[#allocation13 + $0x8] ss:$16 sps:$4 sm:$0xff]  }
 0x125   :  { %v259_v57 = vsub.f32 %v243_v52, %v251_v45  ;;  %v244_v58 = vmul.f32 0.0625, %v236_v54  ;;  %v11805_v52 = vld [vmem:[#allocation15 + $0xec] ss:$16 sps:$4 sm:$0xff]  }
 0x126   :  { %v10860_v59 = vpop.eup %10859  ;;  %v316_v61 = vadd.f32 %v11767_v53, %v301_v55  ;;  %v11810_v54 = vld [vmem:[#allocation15 + $0xcc] ss:$16 sps:$4 sm:$0xff]  }
 0x127   :  { %v275_v63 = vadd.f32 1e-05, %v259_v57  ;;  %v260_v2 = vsub.f32 %v244_v58, %v252_v56  ;;  %v287_v7 = vmul.f32 %v10860_v59, %v263_v1  ;;  %v11818_v55 = vld [vmem:[#allocation15 + $0xac] ss:$16 sps:$4 sm:$0xff]   ;;  %v11821_v1 = vld [vmem:[#allocation15 + $0xa8] ss:$16 sps:$4 sm:$0xff]  }
 0x128   :  { %v10862_v8 = vpop.eup %10861  ;;  %v11778_v11 = vpack.c.bf16 %v316_v61, %v315_v60  ;;  %v11824_v56 = vld [vmem:[#allocation15 + $0x8c] ss:$16 sps:$4 sm:$0xff]   ;;  %v11827_v57 = vld [vmem:[#allocation15 + $0x88] ss:$16 sps:$4 sm:$0xff]  }
 0x129   :  { %10867 = vrsqrt.f32 %v275_v63  ;;  %v276_v3 = vadd.f32 1e-05, %v260_v2  ;;  %v288_v13 = vmul.f32 %v10862_v8, %v264_v62  ;;  %v302_v14 = vmul.f32 %v11759_v41, %v287_v7  ;;  %v11831_v58 = vld [vmem:[#allocation15 + $0x6c] ss:$16 sps:$4 sm:$0xff]   ;;  %v11834_v59 = vld [vmem:[#allocation15 + $0x68] ss:$16 sps:$4 sm:$0xff]  }
 0x12a   :  { %574 = vmatmul.mubr.bf16.vlgmr.msra.gmra.mxu1 %v11778_v11  ;;  %v11837_v60 = vld [vmem:[#allocation15 + $0x4c] ss:$16 sps:$4 sm:$0xff]   ;;  %v11840_v61 = vld [vmem:[#allocation15 + $0x48] ss:$16 sps:$4 sm:$0xff]  }
 0x12b   :  { %10869 = vrsqrt.f32 %v276_v3  ;;  %615 = vmatpush1.bf16.msra.mxu1 %v10438_v6  ;;  %583 = vmatprep.mubr.bf16.mxu1 %v13603_v49  ;;  %v303_v5 = vmul.f32 %v11759_v41, %v288_v13  ;;  %v317_v17 = vadd.f32 %v11767_v53, %v302_v14  ;;  %v11844_v62 = vld [vmem:[#allocation15 + $0x2c] ss:$16 sps:$4 sm:$0xff]   ;;  %v11847_v63 = vld [vmem:[#allocation15 + $0x28] ss:$16 sps:$4 sm:$0xff]   ;;  %v361_v3 = vlaneseq }
 0x12c   :  { %616 = vmatprep.subr.bf16.mxu1 %v10444_v4  ;;  %v11850_v2 = vld [vmem:[#allocation15 + $0xc] ss:$16 sps:$4 sm:$0xff]   ;;  %v11853_v6 = vld [vmem:[#allocation15 + $0x8] ss:$16 sps:$4 sm:$0xff]  }
 0x12d   :  { %v318_v18 = vadd.f32 %v11767_v53, %v303_v5  ;;  %v362_v13 = vshrl.u32 %v361_v3, 7 }
 0x12e   :  { %v10864_v19 = vpop.eup %10863 }
 0x12f   :  { %617 = vmatpush1.bf16.msra.mxu1 %v10442_v15  ;;  %v324_v25 = vpack.c.bf16 %v318_v18, %v317_v17  ;;  %v289_v26 = vmul.f32 %v10864_v19, %v265_v16  ;;  %v11877_v14 = vsub.s32 0, %v362_v13  ;;  %v359_v15 = vld [vmem:[%s13591_s5] sm:$0xf]  ;;  %v11883_v18 = vsub.s32 1, %v362_v13 }
 0x130   :  { %v10866_v28 = vpop.eup %10865  ;;  %618 = vmatprep.subr.bf16.mxu1 %v10447_v10 }
 0x131   :  { %v290_v30 = vmul.f32 %v10866_v28, %v266_v20  ;;  %v304_v31 = vmul.f32 %v11759_v41, %v289_v26  ;;  %13631 = vst [vmem:[#allocation32_spill] sm:$0xff] %v11877_v14  ;;  %v364_v16 = vrot.slane %v359_v15, %v11877_v14  ;;  %13632 = vst [vmem:[#allocation33_spill] sm:$0xff] %v11883_v18 }
 0x132   :  { %584 = vmatmul.mubr.bf16.gmra.mxu1 %v324_v25 }
 0x133   :  { %619 = vmatpush1.bf16.msra.mxu1 %v10445_v23  ;;  %593 = vmatprep.mubr.bf16.mxu1 %v13603_v49  ;;  %v305_v22 = vmul.f32 %v11759_v41, %v290_v30  ;;  %v319_v27 = vadd.f32 %v11767_v53, %v304_v31 }
 0x134   :  { %620 = vmatprep.subr.bf16.mxu1 %v10450_v29 }
 0x135   :  { %v320_v33 = vadd.f32 %v11767_v53, %v305_v22 }
 0x136   :  { %v10868_v34 = vpop.eup %10867 }
 0x137   :  { %621 = vmatpush1.bf16.msra.mxu1 %v10448_v9  ;;  %v325_v37 = vpack.c.bf16 %v320_v33, %v319_v27  ;;  %v291_v38 = vmul.f32 %v10868_v34, %v267_v12 }
 0x138   :  { %v10870_v39 = vpop.eup %10869  ;;  %622 = vmatprep.subr.bf16.mxu1 %v10453_v32 }
 0x139   :  { %v292_v43 = vmul.f32 %v10870_v39, %v268_v35  ;;  %v306_v44 = vmul.f32 %v11759_v41, %v291_v38 }
 0x13a   :  { %594 = vmatmul.mubr.bf16.gmra.mxu1 %v325_v37 }
 0x13b   :  { %623 = vmatpush1.bf16.msra.mxu1 %v10451_v36  ;;  %603 = vmatprep.mubr.bf16.mxu1 %v13603_v49  ;;  %v307_v40 = vmul.f32 %v11759_v41, %v292_v43  ;;  %v321_v24 = vadd.f32 %v11767_v53, %v306_v44  ;;  %v11807_v41 = vld [vmem:[#allocation15 + $0xe8] ss:$16 sps:$4 sm:$0xff]  }
 0x13c   :  { %624 = vmatprep.subr.bf16.mxu1 %v10456_v42 }
 0x13d   :  { %v322_v45 = vadd.f32 %v11767_v53, %v307_v40  ;;  %v11814_v53 = vld [vmem:[#allocation15 + $0xc8] ss:$16 sps:$4 sm:$0xff]  }
 0x13f   :  { %625 = vmatpush1.bf16.msra.mxu1 %v10454_v21  ;;  %v326_v47 = vpack.c.bf16 %v322_v45, %v321_v24  ;;  %v11919_v21 = vsub.s32 2, %v362_v13 }
 0x140   :  { %626 = vmatprep.subr.bf16.mxu1 %v10459_v0 }
 0x141   :  { %13637 = vst [vmem:[#allocation38_spill] sm:$0xff] %v11919_v21  ;;  %v372_v45 = vrot.slane %v359_v15, %v11919_v21 }
 0x142   :  { %604 = vmatmul.mubr.bf16.gmra.mxu1 %v326_v47 }
 0x143   :  { %627 = vmatpush1.bf16.msra.mxu1 %v10457_v46  ;;  %646 = vmatprep.mubr.bf16.mxu1 %v13603_v49 }
 0x144   :  { %628 = vmatprep.subr.bf16.mxu1 %v10462_v48  ;;  %v11923_v48 = vsub.s32 3, %v362_v13 }
 0x146   :  { %13638 = vst [vmem:[#allocation39_spill] sm:$0xff] %v11923_v48 }
 0x147   :  { %629 = vmatpush1.bf16.msra.mxu1 %v10460_v51 }
 0x148   :  { %963 = vmatprep.subr.bf16.mxu1 %v11805_v52 }
 0x14a   :  { %647 = vmatmul.mubr.bf16.vlgmr.msra.gmra.mxu1 %v11778_v11 }
 0x14b   :  { %964 = vmatpush1.bf16.msra.mxu1 %v11807_v41  ;;  %656 = vmatprep.mubr.bf16.mxu1 %v13603_v49 }
 0x14c   :  { %965 = vmatprep.subr.bf16.mxu1 %v11810_v54 }
 0x14f   :  { %966 = vmatpush1.bf16.msra.mxu1 %v11814_v53 }
 0x150   :  { %967 = vmatprep.subr.bf16.mxu1 %v11818_v55 }
 0x152   :  { %657 = vmatmul.mubr.bf16.gmra.mxu1 %v324_v25  ;;  %v11890_v25 = vrot.slane %v359_v15, %v11883_v18 }
 0x153   :  { %968 = vmatpush1.bf16.msra.mxu1 %v11821_v1  ;;  %666 = vmatprep.mubr.bf16.mxu1 %v13603_v49 }
 0x154   :  { %969 = vmatprep.subr.bf16.mxu1 %v11824_v56 }
 0x157   :  { %970 = vmatpush1.bf16.msra.mxu1 %v11827_v57 }
 0x158   :  { %971 = vmatprep.subr.bf16.mxu1 %v11831_v58 }
 0x15a   :  { %667 = vmatmul.mubr.bf16.gmra.mxu1 %v325_v37 }
 0x15b   :  { %972 = vmatpush1.bf16.msra.mxu1 %v11834_v59  ;;  %676 = vmatprep.mubr.bf16.mxu1 %v13603_v49 }
 0x15c   :  { %973 = vmatprep.subr.bf16.mxu1 %v11837_v60 }
 0x15f   :  { %974 = vmatpush1.bf16.msra.mxu1 %v11840_v61 }
 0x160   :  { %975 = vmatprep.subr.bf16.mxu1 %v11844_v62  ;;  %v956_v7 = vpop.f32.mrf.mxu0 }
 0x162   :  { %677 = vmatmul.mubr.bf16.gmra.mxu1 %v326_v47  ;;  %v958_v8 = vpop.f32.mrf.mxu0 }
 0x163   :  { %976 = vmatpush1.bf16.msra.mxu1 %v11847_v63  ;;  %995 = vmatprep.mubr.bf16.mxu1 %v13603_v49 }
 0x164   :  { %977 = vmatprep.subr.bf16.mxu1 %v11850_v2  ;;  %v960_v11 = vpop.f32.mrf.mxu0 }
 0x166   :  { %v961_v4 = vpop.f32.mrf.mxu0 }
 0x167   :  { %978 = vmatpush1.bf16.msra.mxu1 %v11853_v6 }
 0x168   :  { %1278 = vmatprep.subr.bf16.mxu1 %v11805_v52 }
 0x16a   :  { %996 = vmatmul.mubr.bf16.vlgmr.msra.gmra.mxu1 %v13601_v50 }
 0x16b   :  { %1279 = vmatpush1.bf16.msra.mxu1 %v11807_v41  ;;  %1310 = vmatprep.mubr.bf16.mxu1 %v13603_v49 }
 0x16c   :  { %1280 = vmatprep.subr.bf16.mxu1 %v11810_v54 }
 0x16f   :  { %1281 = vmatpush1.bf16.msra.mxu1 %v11814_v53 }
 0x170   :  { %1282 = vmatprep.subr.bf16.mxu1 %v11818_v55 }
 0x173   :  { %1283 = vmatpush1.bf16.msra.mxu1 %v11821_v1 }
 0x174   :  { %1284 = vmatprep.subr.bf16.mxu1 %v11824_v56 }
 0x177   :  { %1285 = vmatpush1.bf16.msra.mxu1 %v11827_v57 }
 0x178   :  { %1286 = vmatprep.subr.bf16.mxu1 %v11831_v58 }
 0x17b   :  { %1287 = vmatpush1.bf16.msra.mxu1 %v11834_v59 }
 0x17c   :  { %1288 = vmatprep.subr.bf16.mxu1 %v11837_v60 }
 0x17f   :  { %1289 = vmatpush1.bf16.msra.mxu1 %v11840_v61 }
 0x180   :  { %1290 = vmatprep.subr.bf16.mxu1 %v11844_v62 }
 0x183   :  { %1291 = vmatpush1.bf16.msra.mxu1 %v11847_v63 }
 0x184   :  { %1292 = vmatprep.subr.bf16.mxu1 %v11850_v2 }
 0x187   :  { %1293 = vmatpush1.bf16.msra.mxu1 %v11853_v6 }
 0x188   :  { %1594 = vmatprep.subr.bf16.mxu1 %v11805_v52 }
 0x1ea   :  { %v575_v5 = vpop.f32.mrf.mxu1 }
 0x1eb   :  { %v576_v24 = vadd.f32 %v575_v5, %v364_v16 }
 0x1ec   :  { %v577_v10 = vpop.f32.mrf.mxu1 }
 0x1ed   :  { %v578_v46 = vadd.f32 %v577_v10, %v11890_v25  ;;  %v1004_v4 = vadd.f32 %v956_v7, %v576_v24 }
 0x1ee   :  { %v579_v17 = vpop.f32.mrf.mxu1 }
 0x1ef   :  { %v11885_v19 = vadd.f32 %v579_v17, %v364_v16  ;;  %v1005_v3 = vadd.f32 %v958_v8, %v578_v46 }
 0x1f0   :  { %v11887_v20 = vpop.f32.mrf.mxu1 }
 0x1f1   :  { %v9456_v10 = vmul.f32 -1.442695, %v1005_v3 }
 0x1f2   :  { %v585_v23 = vpop.f32.mrf.mxu1 }
 0x1f3   :  { %v11892_v26 = vadd.f32 %v585_v23, %v364_v16  ;;  %v11930_v23 = vrot.slane %v359_v15, %v11923_v48 }
 0x1f4   :  { %v587_v28 = vpop.f32.mrf.mxu1 }
 0x1f5   :  { %v11895_v29 = vadd.f32 %v587_v28, %v11890_v25 }
 0x1f6   :  { %v589_v30 = vpop.f32.mrf.mxu1 }
 0x1f7   :  { %v11897_v31 = vadd.f32 %v589_v30, %v364_v16 }
 0x1f8   :  { %v11899_v9 = vpop.f32.mrf.mxu1 }
 0x1fa   :  { %v595_v22 = vpop.f32.mrf.mxu1 }
 0x1fb   :  { %v11901_v32 = vadd.f32 %v595_v22, %v364_v16 }
 0x1fc   :  { %v597_v12 = vpop.f32.mrf.mxu1 }
 0x1fd   :  { %v11904_v27 = vadd.f32 %v597_v12, %v11890_v25 }
 0x1fe   :  { %v599_v33 = vpop.f32.mrf.mxu1 }
 0x1ff   :  { %v11906_v34 = vadd.f32 %v599_v33, %v364_v16 }
 0x200   :  { %v11908_v35 = vpop.f32.mrf.mxu1 }
 0x202   :  { %v605_v36 = vpop.f32.mrf.mxu1 }
 0x203   :  { %v11910_v37 = vadd.f32 %v605_v36, %v364_v16 }
 0x204   :  { %v607_v38 = vpop.f32.mrf.mxu1 }
 0x205   :  { %13633 = vst [vmem:[#allocation34_spill] sm:$0xff] %v11910_v37  ;;  %v11913_v39 = vadd.f32 %v607_v38, %v11890_v25 }
 0x206   :  { %v609_v42 = vpop.f32.mrf.mxu1 }
 0x207   :  { %13634 = vst [vmem:[#allocation35_spill] sm:$0xff] %v11913_v39  ;;  %v11915_v43 = vadd.f32 %v609_v42, %v364_v16  ;;  %v9455_v16 = vmul.f32 -1.442695, %v1004_v4 }
 0x208   :  { %v11917_v44 = vpop.f32.mrf.mxu1 }
 0x209   :  { %13635 = vst [vmem:[#allocation36_spill] sm:$0xff] %v11915_v43  ;;  %13636 = vst [vmem:[#allocation37_spill] sm:$0xff] %v11917_v44  ;;  %10871 = vpow2.f32 %v9455_v16 }
 0x20a   :  { %v648_v40 = vpop.f32.mrf.mxu1  ;;  %10873 = vpow2.f32 %v9456_v10 }
 0x20c   :  { %v650_v0 = vpop.f32.mrf.mxu1 }
 0x20d   :  { %v651_v50 = vadd.f32 %v650_v0, %v11930_v23 }
 0x20e   :  { %v652_v47 = vpop.f32.mrf.mxu1 }
 0x20f   :  { %v11925_v51 = vadd.f32 %v652_v47, %v372_v45 }
 0x210   :  { %v11927_v11 = vpop.f32.mrf.mxu1 }
 0x212   :  { %v658_v17 = vpop.f32.mrf.mxu1 }
 0x213   :  { %v11932_v28 = vadd.f32 %v658_v17, %v372_v45 }
 0x214   :  { %v660_v5 = vpop.f32.mrf.mxu1 }
 0x215   :  { %v11935_v30 = vadd.f32 %v660_v5, %v11930_v23 }
 0x216   :  { %v662_v13 = vpop.f32.mrf.mxu1  ;;  %v10872_v3 = vpop.eup %10871 }
 0x217   :  { %v11937_v22 = vadd.f32 %v662_v13, %v372_v45  ;;  %v10874_v5 = vpop.eup %10873  ;;  %v1017_v13 = vadd.f32 1.0, %v10872_v3 }
 0x218   :  { %v11939_v12 = vpop.f32.mrf.mxu1 }
 0x219   :  { %10875 = vrcp.f32 %v1017_v13  ;;  %v11997_v13 = vld [vmem:[#allocation15 + $0xa4] ss:$16 sps:$4 sm:$0xff]  }
 0x21a   :  { %v668_v7 = vpop.f32.mrf.mxu1 }
 0x21b   :  { %v11941_v8 = vadd.f32 %v668_v7, %v372_v45  ;;  %v649_v7 = vadd.f32 %v648_v40, %v372_v45 }
 0x21c   :  { %v670_v15 = vpop.f32.mrf.mxu1 }
 0x21d   :  { %v11944_v33 = vadd.f32 %v670_v15, %v11930_v23  ;;  %v1018_v15 = vadd.f32 1.0, %v10874_v5 }
 0x21e   :  { %v672_v36 = vpop.f32.mrf.mxu1 }
 0x21f   :  { %v11946_v38 = vadd.f32 %v672_v36, %v372_v45  ;;  %10877 = vrcp.f32 %v1018_v15  ;;  %v11288_v15 = vld [vmem:[#allocation15 + $0x80] ss:$16 sps:$4 sm:$0xff]  }
 0x220   :  { %v11948_v42 = vpop.f32.mrf.mxu1 }
 0x222   :  { %v678_v24 = vpop.f32.mrf.mxu1 }
 0x223   :  { %v11950_v46 = vadd.f32 %v678_v24, %v372_v45 }
 0x224   :  { %v680_v47 = vpop.f32.mrf.mxu1 }
 0x225   :  { %13639 = vst [vmem:[#allocation40_spill] sm:$0xff] %v11950_v46  ;;  %v11953_v4 = vadd.f32 %v680_v47, %v11930_v23 }
 0x226   :  { %v682_v17 = vpop.f32.mrf.mxu1 }
 0x227   :  { %13640 = vst [vmem:[#allocation41_spill] sm:$0xff] %v11953_v4  ;;  %v11955_v16 = vadd.f32 %v682_v17, %v372_v45  ;;  %v10876_v17 = vpop.eup %10875 }
 0x228   :  { %v11957_v10 = vpop.f32.mrf.mxu1 }
 0x229   :  { %13641 = vst [vmem:[#allocation42_spill] sm:$0xff] %v11955_v16  ;;  %13642 = vst [vmem:[#allocation43_spill] sm:$0xff] %v11957_v10 }
 0x22a   :  { %v997_v36 = vpop.f32.mrf.mxu1 }
 0x22b   :  { %v1006_v49 = vadd.f32 %v997_v36, %v649_v7  ;;  %v11999_v7 = vld [vmem:[#allocation15 + $0xa0] ss:$16 sps:$4 sm:$0xff]   ;;  %v11289_v36 = vld [vmem:[#allocation15 + $0x64] ss:$16 sps:$4 sm:$0xff]  }
 0x22c   :  { %v999_v24 = vpop.f32.mrf.mxu1  ;;  %v10878_v14 = vpop.eup %10877 }
 0x22d   :  { %v9457_v48 = vmul.f32 -1.442695, %v1006_v49  ;;  %v1007_v21 = vadd.f32 %v999_v24, %v651_v50  ;;  %v1028_v40 = vmul.f32 0.0, %v10878_v14  ;;  %v11985_v14 = vld [vmem:[#allocation15 + $0xe4] ss:$16 sps:$4 sm:$0xff]  }
 0x22e   :  { %v1001_v47 = vpop.f32.mrf.mxu1  ;;  %1553 = vmatprep.subr.bf16.mxu0 %v11985_v14  ;;  %v11290_v24 = vld [vmem:[#allocation15 + $0x60] ss:$16 sps:$4 sm:$0xff]  }
 0x22f   :  { %10879 = vpow2.f32 %v9457_v48  ;;  %v11987_v48 = vld [vmem:[#allocation15 + $0xe0] ss:$16 sps:$4 sm:$0xff]   ;;  %v11291_v47 = vld [vmem:[#allocation15 + $0x44] ss:$16 sps:$4 sm:$0xff]  }
 0x230   :  { %10881 = vtanh.f32 %v1007_v21  ;;  %v1002_v18 = vpop.f32.mrf.mxu1 }
 0x231   :  { %v13644_v18 = vmov 0  }
 0x23c   :  { %v10880_v16 = vpop.eup %10879 }
 0x23d   :  { %v10882_v10 = vpop.eup %10881  ;;  %v1019_v3 = vadd.f32 1.0, %v10880_v16  ;;  %v11991_v16 = vld [vmem:[#allocation15 + $0xc4] ss:$16 sps:$4 sm:$0xff]  }
 0x23e   :  { %v1029_v45 = vmul.f32 %v10882_v10, %v10876_v17  ;;  %v11993_v10 = vld [vmem:[#allocation15 + $0xc0] ss:$16 sps:$4 sm:$0xff]  }
 0x23f   :  { %10883 = vrcp.f32 %v1019_v3  ;;  %v11292_v17 = vld [vmem:[#allocation15 + $0x40] ss:$16 sps:$4 sm:$0xff]   ;;  %v11293_v3 = vld [vmem:[#allocation15 + $0x24] ss:$16 sps:$4 sm:$0xff]  }
 0x240   :  { %v11960_v5 = vadd.f32 %v1029_v45, %v1028_v40  ;;  %v11294_v40 = vld [vmem:[#allocation15 + $0x20] ss:$16 sps:$4 sm:$0xff]   ;;  %v11295_v45 = vld [vmem:[#allocation15 + $0x4] ss:$16 sps:$4 sm:$0xff]  }
 0x242   :  { %10885 = vtanh.f32 %v11960_v5 }
 0x24c   :  { %v10884_v0 = vpop.eup %10883 }
 0x24f   :  { %v10886_v49 = vpop.eup %10885 }
 0x250   :  { %v11963_v50 = vmul.f32 %v10886_v49, %v10884_v0  ;;  %v11296_v0 = vld [vmem:[#allocation15] ss:$16 sps:$4 sm:$0xff]  }
 0x252   :  { %13643 = vst [vmem:[#allocation44_spill] sm:$0xff] %v11963_v50  ;;  %v1044_v21 = vpack.c.bf16 %v11963_v50, %v11963_v50  ;;  %v655_v50 = vadd.f32 %v11927_v11, %v11930_v23 }
 0x254   :  { %1270 = vmatmul.mubr.bf16.vlgmr.msra.gmra.mxu0 %v1044_v21  ;;  %1311 = vmatmul.mubr.bf16.vlgmr.msra.gmra.mxu1 %v1044_v21 }
 0x255   :  { %1595 = vmatpush1.bf16.msra.mxu1 %v11807_v41  ;;  %1585 = vmatprep.mubr.bf16.mxu0 %v13644_v18 }
 0x256   :  { %1596 = vmatprep.subr.bf16.mxu1 %v11810_v54  ;;  %1626 = vmatprep.mubr.bf16.mxu1 %v13644_v18 }
 0x257   :  { %1554 = vmatpush1.bf16.msra.mxu0 %v11987_v48 }
 0x258   :  { %1555 = vmatprep.subr.bf16.mxu0 %v11991_v16 }
 0x259   :  { %1597 = vmatpush1.bf16.msra.mxu1 %v11814_v53 }
 0x25a   :  { %1598 = vmatprep.subr.bf16.mxu1 %v11818_v55 }
 0x25b   :  { %1556 = vmatpush1.bf16.msra.mxu0 %v11993_v10 }
 0x25c   :  { %1557 = vmatprep.subr.bf16.mxu0 %v11997_v13 }
 0x25d   :  { %1599 = vmatpush1.bf16.msra.mxu1 %v11821_v1 }
 0x25e   :  { %1600 = vmatprep.subr.bf16.mxu1 %v11824_v56 }
 0x25f   :  { %1558 = vmatpush1.bf16.msra.mxu0 %v11999_v7 }
 0x261   :  { %1601 = vmatpush1.bf16.msra.mxu1 %v11827_v57 }
 0x262   :  { %1602 = vmatprep.subr.bf16.mxu1 %v11831_v58 }
 0x265   :  { %1603 = vmatpush1.bf16.msra.mxu1 %v11834_v59 }
 0x266   :  { %1604 = vmatprep.subr.bf16.mxu1 %v11837_v60 }
 0x269   :  { %1605 = vmatpush1.bf16.msra.mxu1 %v11840_v61 }
 0x26a   :  { %1606 = vmatprep.subr.bf16.mxu1 %v11844_v62 }
 0x26d   :  { %1607 = vmatpush1.bf16.msra.mxu1 %v11847_v63 }
 0x26e   :  { %1608 = vmatprep.subr.bf16.mxu1 %v11850_v2 }
 0x271   :  { %1609 = vmatpush1.bf16.msra.mxu1 %v11853_v6 }
 0x272   :  { %1910 = vmatprep.subr.bf16.mxu1 %v11805_v52  ;;  %v11287_v52 = vld [vmem:[#allocation15 + $0x84] ss:$16 sps:$4 sm:$0xff]  }
 0x273   :  { %1559 = vmatprep.subr.bf16.mxu0 %v11287_v52  ;;  %v582_v52 = vadd.f32 %v11887_v20, %v11890_v25 }
 0x274   :  { %1560 = vmatpush1.bf16.msra.mxu0 %v11288_v15 }
 0x275   :  { %1561 = vmatprep.subr.bf16.mxu0 %v11289_v36 }
 0x278   :  { %1562 = vmatpush1.bf16.msra.mxu0 %v11290_v24 }
 0x279   :  { %1563 = vmatprep.subr.bf16.mxu0 %v11291_v47 }
 0x27c   :  { %1564 = vmatpush1.bf16.msra.mxu0 %v11292_v17 }
 0x27d   :  { %1565 = vmatprep.subr.bf16.mxu0 %v11293_v3 }
 0x280   :  { %1566 = vmatpush1.bf16.msra.mxu0 %v11294_v40 }
 0x281   :  { %1567 = vmatprep.subr.bf16.mxu0 %v11295_v45 }
 0x284   :  { %1568 = vmatpush1.bf16.msra.mxu0 %v11296_v0 }
 0x285   :  { %1869 = vmatprep.subr.bf16.mxu0 %v11985_v14 }
 0x314   :  { %v1271_v49 = vpop.f32.mrf.mxu0  ;;  %v1312_v21 = vpop.f32.mrf.mxu1 }
 0x315   :  { %v1319_v15 = vadd.f32 %v1271_v49, %v11885_v19  ;;  %v1321_v0 = vadd.f32 %v1312_v21, %v11925_v51 }
 0x316   :  { %v1273_v36 = vpop.f32.mrf.mxu0  ;;  %v1314_v24 = vpop.f32.mrf.mxu1 }
 0x317   :  { %v9490_v47 = vmul.f32 -1.442695, %v1319_v15  ;;  %v1320_v17 = vadd.f32 %v1273_v36, %v582_v52  ;;  %v9492_v4 = vmul.f32 -1.442695, %v1321_v0  ;;  %v1322_v20 = vadd.f32 %v1314_v24, %v655_v50 }
 0x318   :  { %v1275_v3 = vpop.f32.mrf.mxu0  ;;  %v1316_v43 = vpop.f32.mrf.mxu1 }
 0x319   :  { %10887 = vpow2.f32 %v9490_v47  ;;  %v9491_v40 = vmul.f32 -1.442695, %v1320_v17 }
 0x31a   :  { %v1276_v45 = vpop.f32.mrf.mxu0  ;;  %v1317_v44 = vpop.f32.mrf.mxu1 }
 0x31b   :  { %10889 = vpow2.f32 %v9491_v40 }
 0x31c   :  { %10891 = vpow2.f32 %v9492_v4 }
 0x31d   :  { %10893 = vtanh.f32 %v1322_v20 }
 0x326   :  { %v10888_v46 = vpop.eup %10887 }
 0x327   :  { %v1332_v19 = vadd.f32 1.0, %v10888_v46 }
 0x328   :  { %v10890_v49 = vpop.eup %10889 }
 0x329   :  { %10895 = vrcp.f32 %v1332_v19  ;;  %v1333_v52 = vadd.f32 1.0, %v10890_v49  ;;  %v10892_v43 = vpop.eup %10891 }
 0x32a   :  { %v10894_v15 = vpop.eup %10893  ;;  %v1334_v17 = vadd.f32 1.0, %v10892_v43 }
 0x32b   :  { %10897 = vrcp.f32 %v1333_v52 }
 0x32c   :  { %10899 = vrcp.f32 %v1334_v17 }
 0x336   :  { %v10896_v36 = vpop.eup %10895 }
 0x337   :  { %v1344_v44 = vmul.f32 %v10896_v36, %v10894_v15 }
 0x338   :  { %v10898_v47 = vpop.eup %10897 }
 0x339   :  { %v1343_v51 = vmul.f32 %v10898_v47, %v11960_v5  ;;  %v10900_v11 = vpop.eup %10899 }
 0x33b   :  { %v12011_v21 = vadd.f32 %v1344_v44, %v1343_v51 }
 0x33d   :  { %10901 = vtanh.f32 %v12011_v21 }
 0x34a   :  { %v10902_v46 = vpop.eup %10901 }
 0x34b   :  { %v12014_v4 = vmul.f32 %v10902_v46, %v10900_v11 }
 0x34d   :  { %13645 = vst [vmem:[#allocation45_spill] sm:$0xff] %v12014_v4  ;;  %v1360_v50 = vpack.c.bf16 %v12014_v4, %v12014_v4  ;;  %v665_v4 = vadd.f32 %v11939_v12, %v11930_v23 }
 0x34f   :  { %1586 = vmatmul.mubr.bf16.vlgmr.msra.gmra.mxu0 %v1360_v50  ;;  %1627 = vmatmul.mubr.bf16.vlgmr.msra.gmra.mxu1 %v1360_v50 }
 0x350   :  { %1870 = vmatpush1.bf16.msra.mxu0 %v11987_v48  ;;  %1911 = vmatpush1.bf16.msra.mxu1 %v11807_v41  ;;  %v12040_v41 = vld [vmem:[#allocation15 + $0x84] ss:$16 sps:$4 sm:$0xff]  }
 0x351   :  { %1871 = vmatprep.subr.bf16.mxu0 %v11991_v16  ;;  %1912 = vmatprep.subr.bf16.mxu1 %v11810_v54  ;;  %v12042_v54 = vld [vmem:[#allocation15 + $0x80] ss:$16 sps:$4 sm:$0xff]  }
 0x352   :  { %1901 = vmatprep.mubr.bf16.mxu0 %v13644_v18  ;;  %1942 = vmatprep.mubr.bf16.mxu1 %v13644_v18 }
 0x354   :  { %1872 = vmatpush1.bf16.msra.mxu0 %v11993_v10  ;;  %1913 = vmatpush1.bf16.msra.mxu1 %v11814_v53  ;;  %v12044_v53 = vld [vmem:[#allocation15 + $0x64] ss:$16 sps:$4 sm:$0xff]  }
 0x355   :  { %1873 = vmatprep.subr.bf16.mxu0 %v11997_v13  ;;  %1914 = vmatprep.subr.bf16.mxu1 %v11818_v55  ;;  %v12048_v55 = vld [vmem:[#allocation15 + $0x60] ss:$16 sps:$4 sm:$0xff]  }
 0x358   :  { %1874 = vmatpush1.bf16.msra.mxu0 %v11999_v7  ;;  %1915 = vmatpush1.bf16.msra.mxu1 %v11821_v1  ;;  %v12051_v1 = vld [vmem:[#allocation15 + $0x44] ss:$16 sps:$4 sm:$0xff]  }
 0x359   :  { %1916 = vmatprep.subr.bf16.mxu1 %v11824_v56  ;;  %1875 = vmatprep.subr.bf16.mxu0 %v12040_v41  ;;  %v12054_v56 = vld [vmem:[#allocation15 + $0x40] ss:$16 sps:$4 sm:$0xff]  }
 0x35c   :  { %1917 = vmatpush1.bf16.msra.mxu1 %v11827_v57  ;;  %1876 = vmatpush1.bf16.msra.mxu0 %v12042_v54  ;;  %v12057_v57 = vld [vmem:[#allocation15 + $0x24] ss:$16 sps:$4 sm:$0xff]  }
 0x35d   :  { %1918 = vmatprep.subr.bf16.mxu1 %v11831_v58  ;;  %1877 = vmatprep.subr.bf16.mxu0 %v12044_v53  ;;  %v12060_v58 = vld [vmem:[#allocation15 + $0x20] ss:$16 sps:$4 sm:$0xff]  }
 0x360   :  { %1919 = vmatpush1.bf16.msra.mxu1 %v11834_v59  ;;  %1878 = vmatpush1.bf16.msra.mxu0 %v12048_v55  ;;  %v12063_v59 = vld [vmem:[#allocation15 + $0x4] ss:$16 sps:$4 sm:$0xff]  }
 0x361   :  { %1920 = vmatprep.subr.bf16.mxu1 %v11837_v60  ;;  %1879 = vmatprep.subr.bf16.mxu0 %v12051_v1  ;;  %v12066_v60 = vld [vmem:[#allocation15] ss:$16 sps:$4 sm:$0xff]  }
 0x364   :  { %1921 = vmatpush1.bf16.msra.mxu1 %v11840_v61  ;;  %1880 = vmatpush1.bf16.msra.mxu0 %v12054_v56 }
 0x365   :  { %1922 = vmatprep.subr.bf16.mxu1 %v11844_v62  ;;  %1881 = vmatprep.subr.bf16.mxu0 %v12057_v57 }
 0x368   :  { %1923 = vmatpush1.bf16.msra.mxu1 %v11847_v63  ;;  %1882 = vmatpush1.bf16.msra.mxu0 %v12060_v58 }
 0x369   :  { %1924 = vmatprep.subr.bf16.mxu1 %v11850_v2  ;;  %1883 = vmatprep.subr.bf16.mxu0 %v12063_v59 }
 0x36c   :  { %1925 = vmatpush1.bf16.msra.mxu1 %v11853_v6  ;;  %1884 = vmatpush1.bf16.msra.mxu0 %v12066_v60 }
 0x36d   :  { %2185 = vmatprep.subr.bf16.mxu0 %v11985_v14 }
 0x40f   :  { %v1587_v61 = vpop.f32.mrf.mxu0  ;;  %v1628_v62 = vpop.f32.mrf.mxu1 }
 0x410   :  { %v1635_v63 = vadd.f32 %v1587_v61, %v11892_v26  ;;  %v1637_v19 = vadd.f32 %v1628_v62, %v11932_v28 }
 0x411   :  { %v1589_v2 = vpop.f32.mrf.mxu0  ;;  %v1630_v6 = vpop.f32.mrf.mxu1 }
 0x412   :  { %v9525_v5 = vmul.f32 -1.442695, %v1635_v63  ;;  %v1636_v24 = vadd.f32 %v1589_v2, %v11895_v29  ;;  %v9527_v49 = vmul.f32 -1.442695, %v1637_v19  ;;  %v1638_v52 = vadd.f32 %v1630_v6, %v11935_v30  ;;  %v12103_v63 = vld [vmem:[#allocation15 + $0xe8] ss:$16 sps:$4 sm:$0xff]  }
 0x413   :  { %v1591_v3 = vpop.f32.mrf.mxu0  ;;  %v1632_v40 = vpop.f32.mrf.mxu1  ;;  %v12107_v2 = vld [vmem:[#allocation15 + $0xcc] ss:$16 sps:$4 sm:$0xff]   ;;  %v12109_v6 = vld [vmem:[#allocation15 + $0xc8] ss:$16 sps:$4 sm:$0xff]  }
 0x414   :  { %10903 = vpow2.f32 %v9525_v5  ;;  %v9526_v45 = vmul.f32 -1.442695, %v1636_v24  ;;  %v12113_v5 = vld [vmem:[#allocation15 + $0xac] ss:$16 sps:$4 sm:$0xff]   ;;  %v12115_v24 = vld [vmem:[#allocation15 + $0xa8] ss:$16 sps:$4 sm:$0xff]  }
 0x415   :  { %v1592_v0 = vpop.f32.mrf.mxu0  ;;  %v1633_v20 = vpop.f32.mrf.mxu1  ;;  %v12121_v3 = vld [vmem:[#allocation15 + $0x88] ss:$16 sps:$4 sm:$0xff]   ;;  %v12123_v40 = vld [vmem:[#allocation15 + $0x6c] ss:$16 sps:$4 sm:$0xff]  }
 0x416   :  { %10905 = vpow2.f32 %v9526_v45  ;;  %v12127_v45 = vld [vmem:[#allocation15 + $0x68] ss:$16 sps:$4 sm:$0xff]   ;;  %v12130_v0 = vld [vmem:[#allocation15 + $0x4c] ss:$16 sps:$4 sm:$0xff]  }
 0x417   :  { %10907 = vpow2.f32 %v9527_v49  ;;  %v12133_v20 = vld [vmem:[#allocation15 + $0x48] ss:$16 sps:$4 sm:$0xff]   ;;  %v12136_v19 = vld [vmem:[#allocation15 + $0x2c] ss:$16 sps:$4 sm:$0xff]  }
 0x418   :  { %10909 = vtanh.f32 %v1638_v52  ;;  %v12139_v49 = vld [vmem:[#allocation15 + $0x28] ss:$16 sps:$4 sm:$0xff]   ;;  %v12142_v52 = vld [vmem:[#allocation15 + $0xc] ss:$16 sps:$4 sm:$0xff]  }
 0x421   :  { %v10904_v43 = vpop.eup %10903 }
 0x422   :  { %v1648_v15 = vadd.f32 1.0, %v10904_v43  ;;  %v12145_v43 = vld [vmem:[#allocation15 + $0x8] ss:$16 sps:$4 sm:$0xff]  }
 0x423   :  { %v10906_v26 = vpop.eup %10905 }
 0x424   :  { %10911 = vrcp.f32 %v1648_v15  ;;  %v1649_v36 = vadd.f32 1.0, %v10906_v26  ;;  %v10908_v29 = vpop.eup %10907 }
 0x425   :  { %v10910_v44 = vpop.eup %10909  ;;  %v1650_v11 = vadd.f32 1.0, %v10908_v29 }
 0x426   :  { %10913 = vrcp.f32 %v1649_v36  ;;  %v592_v36 = vadd.f32 %v11899_v9, %v11890_v25 }
 0x427   :  { %10915 = vrcp.f32 %v1650_v11 }
 0x431   :  { %v10912_v47 = vpop.eup %10911 }
 0x432   :  { %v1660_v17 = vmul.f32 %v10912_v47, %v10910_v44 }
 0x433   :  { %v10914_v51 = vpop.eup %10913 }
 0x434   :  { %v1659_v46 = vmul.f32 %v10914_v51, %v12011_v21  ;;  %v10916_v30 = vpop.eup %10915  ;;  %v12101_v21 = vld [vmem:[#allocation15 + $0xec] ss:$16 sps:$4 sm:$0xff]  }
 0x435   :  { %2226 = vmatprep.subr.bf16.mxu1 %v12101_v21 }
 0x436   :  { %v12076_v28 = vadd.f32 %v1660_v17, %v1659_v46 }
 0x438   :  { %10917 = vtanh.f32 %v12076_v28 }
 0x445   :  { %v10918_v50 = vpop.eup %10917 }
 0x446   :  { %v12079_v61 = vmul.f32 %v10918_v50, %v10916_v30 }
 0x448   :  { %13646 = vst [vmem:[#allocation46_spill] sm:$0xff] %v12079_v61  ;;  %v1676_v62 = vpack.c.bf16 %v12079_v61, %v12079_v61 }
 0x44a   :  { %1902 = vmatmul.mubr.bf16.vlgmr.msra.gmra.mxu0 %v1676_v62  ;;  %1943 = vmatmul.mubr.bf16.vlgmr.msra.gmra.mxu1 %v1676_v62 }
 0x44b   :  { %2186 = vmatpush1.bf16.msra.mxu0 %v11987_v48  ;;  %2217 = vmatprep.mubr.bf16.mxu0 %v13644_v18 }
 0x44c   :  { %2187 = vmatprep.subr.bf16.mxu0 %v11991_v16  ;;  %2258 = vmatprep.mubr.bf16.mxu1 %v13644_v18 }
 0x44d   :  { %2227 = vmatpush1.bf16.msra.mxu1 %v12103_v63 }
 0x44e   :  { %2228 = vmatprep.subr.bf16.mxu1 %v12107_v2 }
 0x44f   :  { %2188 = vmatpush1.bf16.msra.mxu0 %v11993_v10 }
 0x450   :  { %2189 = vmatprep.subr.bf16.mxu0 %v11997_v13 }
 0x451   :  { %2229 = vmatpush1.bf16.msra.mxu1 %v12109_v6 }
 0x452   :  { %2230 = vmatprep.subr.bf16.mxu1 %v12113_v5 }
 0x453   :  { %2190 = vmatpush1.bf16.msra.mxu0 %v11999_v7 }
 0x454   :  { %2191 = vmatprep.subr.bf16.mxu0 %v12040_v41 }
 0x455   :  { %2231 = vmatpush1.bf16.msra.mxu1 %v12115_v24 }
 0x457   :  { %2192 = vmatpush1.bf16.msra.mxu0 %v12042_v54 }
 0x458   :  { %2193 = vmatprep.subr.bf16.mxu0 %v12044_v53 }
 0x45b   :  { %2194 = vmatpush1.bf16.msra.mxu0 %v12048_v55 }
 0x45c   :  { %2195 = vmatprep.subr.bf16.mxu0 %v12051_v1 }
 0x45f   :  { %2196 = vmatpush1.bf16.msra.mxu0 %v12054_v56 }
 0x460   :  { %2197 = vmatprep.subr.bf16.mxu0 %v12057_v57 }
 0x463   :  { %2198 = vmatpush1.bf16.msra.mxu0 %v12060_v58 }
 0x464   :  { %2199 = vmatprep.subr.bf16.mxu0 %v12063_v59 }
 0x467   :  { %2200 = vmatpush1.bf16.msra.mxu0 %v12066_v60 }
 0x468   :  { %2501 = vmatprep.subr.bf16.mxu0 %v11985_v14  ;;  %v12119_v14 = vld [vmem:[#allocation15 + $0x8c] ss:$16 sps:$4 sm:$0xff]  }
 0x469   :  { %2232 = vmatprep.subr.bf16.mxu1 %v12119_v14 }
 0x46a   :  { %2233 = vmatpush1.bf16.msra.mxu1 %v12121_v3 }
 0x46b   :  { %2234 = vmatprep.subr.bf16.mxu1 %v12123_v40 }
 0x46e   :  { %2235 = vmatpush1.bf16.msra.mxu1 %v12127_v45 }
 0x46f   :  { %2236 = vmatprep.subr.bf16.mxu1 %v12130_v0 }
 0x472   :  { %2237 = vmatpush1.bf16.msra.mxu1 %v12133_v20 }
 0x473   :  { %2238 = vmatprep.subr.bf16.mxu1 %v12136_v19 }
 0x476   :  { %2239 = vmatpush1.bf16.msra.mxu1 %v12139_v49 }
 0x477   :  { %2240 = vmatprep.subr.bf16.mxu1 %v12142_v52 }
 0x47a   :  { %2241 = vmatpush1.bf16.msra.mxu1 %v12145_v43 }
 0x47b   :  { %2542 = vmatprep.subr.bf16.mxu1 %v12101_v21 }
 0x50a   :  { %v1903_v15 = vpop.f32.mrf.mxu0  ;;  %v1944_v26 = vpop.f32.mrf.mxu1 }
 0x50b   :  { %v1951_v29 = vadd.f32 %v1903_v15, %v11897_v31  ;;  %v1953_v61 = vadd.f32 %v1944_v26, %v11937_v22 }
 0x50c   :  { %v1905_v44 = vpop.f32.mrf.mxu0  ;;  %v1946_v47 = vpop.f32.mrf.mxu1 }
 0x50d   :  { %v9560_v17 = vmul.f32 -1.442695, %v1951_v29  ;;  %v1952_v51 = vadd.f32 %v1905_v44, %v592_v36  ;;  %v9562_v39 = vmul.f32 -1.442695, %v1953_v61  ;;  %v1954_v9 = vadd.f32 %v1946_v47, %v665_v4 }
 0x50e   :  { %v1907_v11 = vpop.f32.mrf.mxu0  ;;  %v1948_v46 = vpop.f32.mrf.mxu1 }
 0x50f   :  { %10919 = vpow2.f32 %v9560_v17  ;;  %v9561_v30 = vmul.f32 -1.442695, %v1952_v51 }
 0x510   :  { %v1908_v50 = vpop.f32.mrf.mxu0  ;;  %v1949_v62 = vpop.f32.mrf.mxu1 }
 0x511   :  { %10921 = vpow2.f32 %v9561_v30 }
 0x512   :  { %10923 = vpow2.f32 %v9562_v39 }
 0x513   :  { %10925 = vtanh.f32 %v1954_v9 }
 0x51c   :  { %v10920_v37 = vpop.eup %10919 }
 0x51d   :  { %v1964_v31 = vadd.f32 1.0, %v10920_v37 }
 0x51e   :  { %v10922_v15 = vpop.eup %10921 }
 0x51f   :  { %10927 = vrcp.f32 %v1964_v31  ;;  %v1965_v36 = vadd.f32 1.0, %v10922_v15  ;;  %v10924_v29 = vpop.eup %10923 }
 0x520   :  { %v10926_v44 = vpop.eup %10925  ;;  %v1966_v46 = vadd.f32 1.0, %v10924_v29 }
 0x521   :  { %10929 = vrcp.f32 %v1965_v36 }
 0x522   :  { %10931 = vrcp.f32 %v1966_v46 }
 0x52c   :  { %v10928_v17 = vpop.eup %10927 }
 0x52d   :  { %v1976_v51 = vmul.f32 %v10928_v17, %v10926_v44 }
 0x52e   :  { %v10930_v11 = vpop.eup %10929 }
 0x52f   :  { %v1975_v22 = vmul.f32 %v10930_v11, %v12076_v28  ;;  %v10932_v37 = vpop.eup %10931 }
 0x531   :  { %v12157_v26 = vadd.f32 %v1976_v51, %v1975_v22 }
 0x533   :  { %10933 = vtanh.f32 %v12157_v26 }
 0x540   :  { %v10934_v39 = vpop.eup %10933 }
 0x541   :  { %v12160_v12 = vmul.f32 %v10934_v39, %v10932_v37 }
 0x543   :  { %13647 = vst [vmem:[#allocation47_spill] sm:$0xff] %v12160_v12  ;;  %v1992_v4 = vpack.c.bf16 %v12160_v12, %v12160_v12 }
 0x545   :  { %2218 = vmatmul.mubr.bf16.vlgmr.msra.gmra.mxu0 %v1992_v4  ;;  %2259 = vmatmul.mubr.bf16.vlgmr.msra.gmra.mxu1 %v1992_v4 }
 0x546   :  { %2502 = vmatpush1.bf16.msra.mxu0 %v11987_v48  ;;  %2543 = vmatpush1.bf16.msra.mxu1 %v12103_v63 }
 0x547   :  { %2503 = vmatprep.subr.bf16.mxu0 %v11991_v16  ;;  %2544 = vmatprep.subr.bf16.mxu1 %v12107_v2 }
 0x548   :  { %2533 = vmatprep.mubr.bf16.mxu0 %v13644_v18  ;;  %2574 = vmatprep.mubr.bf16.mxu1 %v13644_v18 }
 0x54a   :  { %2504 = vmatpush1.bf16.msra.mxu0 %v11993_v10  ;;  %2545 = vmatpush1.bf16.msra.mxu1 %v12109_v6 }
 0x54b   :  { %2505 = vmatprep.subr.bf16.mxu0 %v11997_v13  ;;  %2546 = vmatprep.subr.bf16.mxu1 %v12113_v5 }
 0x54e   :  { %2506 = vmatpush1.bf16.msra.mxu0 %v11999_v7  ;;  %2547 = vmatpush1.bf16.msra.mxu1 %v12115_v24 }
 0x54f   :  { %2507 = vmatprep.subr.bf16.mxu0 %v12040_v41  ;;  %2548 = vmatprep.subr.bf16.mxu1 %v12119_v14 }
 0x552   :  { %2508 = vmatpush1.bf16.msra.mxu0 %v12042_v54  ;;  %2549 = vmatpush1.bf16.msra.mxu1 %v12121_v3 }
 0x553   :  { %2509 = vmatprep.subr.bf16.mxu0 %v12044_v53  ;;  %2550 = vmatprep.subr.bf16.mxu1 %v12123_v40 }
 0x556   :  { %2510 = vmatpush1.bf16.msra.mxu0 %v12048_v55  ;;  %2551 = vmatpush1.bf16.msra.mxu1 %v12127_v45 }
 0x557   :  { %2511 = vmatprep.subr.bf16.mxu0 %v12051_v1  ;;  %2552 = vmatprep.subr.bf16.mxu1 %v12130_v0 }
 0x55a   :  { %2512 = vmatpush1.bf16.msra.mxu0 %v12054_v56  ;;  %2553 = vmatpush1.bf16.msra.mxu1 %v12133_v20 }
 0x55b   :  { %2513 = vmatprep.subr.bf16.mxu0 %v12057_v57  ;;  %2554 = vmatprep.subr.bf16.mxu1 %v12136_v19 }
 0x55e   :  { %2514 = vmatpush1.bf16.msra.mxu0 %v12060_v58  ;;  %2555 = vmatpush1.bf16.msra.mxu1 %v12139_v49 }
 0x55f   :  { %2515 = vmatprep.subr.bf16.mxu0 %v12063_v59  ;;  %2556 = vmatprep.subr.bf16.mxu1 %v12142_v52 }
 0x562   :  { %2516 = vmatpush1.bf16.msra.mxu0 %v12066_v60  ;;  %2557 = vmatpush1.bf16.msra.mxu1 %v12145_v43 }
 0x563   :  { %2858 = vmatprep.subr.bf16.mxu1 %v12101_v21 }
 0x605   :  { %v2219_v48 = vpop.f32.mrf.mxu0  ;;  %v2260_v16 = vpop.f32.mrf.mxu1 }
 0x606   :  { %v2267_v10 = vadd.f32 %v2219_v48, %v11901_v32  ;;  %v2269_v31 = vadd.f32 %v2260_v16, %v11941_v8 }
 0x607   :  { %v2221_v13 = vpop.f32.mrf.mxu0  ;;  %v2262_v7 = vpop.f32.mrf.mxu1 }
 0x608   :  { %v9595_v28 = vmul.f32 -1.442695, %v2267_v10  ;;  %v2268_v61 = vadd.f32 %v2221_v13, %v11904_v27  ;;  %v9597_v15 = vmul.f32 -1.442695, %v2269_v31  ;;  %v2270_v36 = vadd.f32 %v2262_v7, %v11944_v33  ;;  %v12227_v10 = vld [vmem:[#allocation15 + $0xe0] ss:$16 sps:$4 sm:$0xff]  }
 0x609   :  { %v2223_v47 = vpop.f32.mrf.mxu0  ;;  %v2264_v30 = vpop.f32.mrf.mxu1  ;;  %v12230_v13 = vld [vmem:[#allocation15 + $0xc4] ss:$16 sps:$4 sm:$0xff]   ;;  %v12232_v7 = vld [vmem:[#allocation15 + $0xc0] ss:$16 sps:$4 sm:$0xff]  }
 0x60a   :  { %10935 = vpow2.f32 %v9595_v28  ;;  %v9596_v50 = vmul.f32 -1.442695, %v2268_v61  ;;  %v12236_v28 = vld [vmem:[#allocation15 + $0xa4] ss:$16 sps:$4 sm:$0xff]   ;;  %v12238_v61 = vld [vmem:[#allocation15 + $0xa0] ss:$16 sps:$4 sm:$0xff]  }
 0x60b   :  { %v2224_v62 = vpop.f32.mrf.mxu0  ;;  %v2265_v9 = vpop.f32.mrf.mxu1 }
 0x60c   :  { %10937 = vpow2.f32 %v9596_v50  ;;  %v675_v62 = vadd.f32 %v11948_v42, %v11930_v23 }
 0x60d   :  { %10939 = vpow2.f32 %v9597_v15 }
 0x60e   :  { %10941 = vtanh.f32 %v2270_v36 }
 0x617   :  { %v10936_v29 = vpop.eup %10935 }
 0x618   :  { %v2280_v44 = vadd.f32 1.0, %v10936_v29 }
 0x619   :  { %v10938_v32 = vpop.eup %10937 }
 0x61a   :  { %10943 = vrcp.f32 %v2280_v44  ;;  %v2281_v17 = vadd.f32 1.0, %v10938_v32  ;;  %v10940_v27 = vpop.eup %10939 }
 0x61b   :  { %v10942_v51 = vpop.eup %10941  ;;  %v2282_v37 = vadd.f32 1.0, %v10940_v27 }
 0x61c   :  { %10945 = vrcp.f32 %v2281_v17 }
 0x61d   :  { %10947 = vrcp.f32 %v2282_v37 }
 0x627   :  { %v10944_v11 = vpop.eup %10943 }
 0x628   :  { %v2292_v46 = vmul.f32 %v10944_v11, %v10942_v51 }
 0x629   :  { %v10946_v22 = vpop.eup %10945 }
 0x62a   :  { %v2291_v39 = vmul.f32 %v10946_v22, %v12157_v26  ;;  %v10948_v33 = vpop.eup %10947  ;;  %v10537_v26 = vld [vmem:[#allocation15 + $0xe4] ss:$16 sps:$4 sm:$0xff]  }
 0x62b   :  { %2817 = vmatprep.subr.bf16.mxu0 %v10537_v26 }
 0x62c   :  { %v12202_v8 = vadd.f32 %v2292_v46, %v2291_v39 }
 0x62e   :  { %10949 = vtanh.f32 %v12202_v8 }
 0x63b   :  { %v10950_v4 = vpop.eup %10949 }
 0x63c   :  { %v12205_v48 = vmul.f32 %v10950_v4, %v10948_v33 }
 0x63e   :  { %13648 = vst [vmem:[#allocation48_spill] sm:$0xff] %v12205_v48  ;;  %v2308_v16 = vpack.c.bf16 %v12205_v48, %v12205_v48 }
 0x640   :  { %2534 = vmatmul.mubr.bf16.vlgmr.msra.gmra.mxu0 %v2308_v16  ;;  %2575 = vmatmul.mubr.bf16.vlgmr.msra.gmra.mxu1 %v2308_v16  ;;  %v13651_v16 = vld [vmem:[#allocation35_spill] sm:$0xff] }
 0x641   :  { %2859 = vmatpush1.bf16.msra.mxu1 %v12103_v63  ;;  %2849 = vmatprep.mubr.bf16.mxu0 %v13644_v18 }
 0x642   :  { %2860 = vmatprep.subr.bf16.mxu1 %v12107_v2  ;;  %2890 = vmatprep.mubr.bf16.mxu1 %v13644_v18 }
 0x643   :  { %2818 = vmatpush1.bf16.msra.mxu0 %v12227_v10 }
 0x644   :  { %2819 = vmatprep.subr.bf16.mxu0 %v12230_v13 }
 0x645   :  { %2861 = vmatpush1.bf16.msra.mxu1 %v12109_v6 }
 0x646   :  { %2862 = vmatprep.subr.bf16.mxu1 %v12113_v5 }
 0x647   :  { %2820 = vmatpush1.bf16.msra.mxu0 %v12232_v7 }
 0x648   :  { %2821 = vmatprep.subr.bf16.mxu0 %v12236_v28 }
 0x649   :  { %2863 = vmatpush1.bf16.msra.mxu1 %v12115_v24 }
 0x64a   :  { %2864 = vmatprep.subr.bf16.mxu1 %v12119_v14 }
 0x64b   :  { %2822 = vmatpush1.bf16.msra.mxu0 %v12238_v61 }
 0x64c   :  { %2823 = vmatprep.subr.bf16.mxu0 %v12040_v41 }
 0x64d   :  { %2865 = vmatpush1.bf16.msra.mxu1 %v12121_v3 }
 0x64e   :  { %2866 = vmatprep.subr.bf16.mxu1 %v12123_v40 }
 0x64f   :  { %2824 = vmatpush1.bf16.msra.mxu0 %v12042_v54  ;;  %v602_v54 = vadd.f32 %v11908_v35, %v11890_v25 }
 0x650   :  { %2825 = vmatprep.subr.bf16.mxu0 %v12044_v53 }
 0x651   :  { %2867 = vmatpush1.bf16.msra.mxu1 %v12127_v45 }
 0x652   :  { %2868 = vmatprep.subr.bf16.mxu1 %v12130_v0 }
 0x653   :  { %2826 = vmatpush1.bf16.msra.mxu0 %v12048_v55 }
 0x654   :  { %2827 = vmatprep.subr.bf16.mxu0 %v12051_v1 }
 0x655   :  { %2869 = vmatpush1.bf16.msra.mxu1 %v12133_v20 }
 0x656   :  { %2870 = vmatprep.subr.bf16.mxu1 %v12136_v19 }
 0x657   :  { %2828 = vmatpush1.bf16.msra.mxu0 %v12054_v56 }
 0x658   :  { %2829 = vmatprep.subr.bf16.mxu0 %v12057_v57 }
 0x659   :  { %2871 = vmatpush1.bf16.msra.mxu1 %v12139_v49 }
 0x65a   :  { %2872 = vmatprep.subr.bf16.mxu1 %v12142_v52 }
 0x65b   :  { %2830 = vmatpush1.bf16.msra.mxu0 %v12060_v58 }
 0x65c   :  { %2831 = vmatprep.subr.bf16.mxu0 %v12063_v59 }
 0x65d   :  { %2873 = vmatpush1.bf16.msra.mxu1 %v12145_v43 }
 0x65e   :  { %3174 = vmatprep.subr.bf16.mxu1 %v12101_v21 }
 0x65f   :  { %2832 = vmatpush1.bf16.msra.mxu0 %v12066_v60 }
 0x660   :  { %3133 = vmatprep.subr.bf16.mxu0 %v10537_v26 }
 0x700   :  { %v2535_v41 = vpop.f32.mrf.mxu0  ;;  %v2576_v21 = vpop.f32.mrf.mxu1 }
 0x701   :  { %v2583_v53 = vadd.f32 %v2535_v41, %v11906_v34  ;;  %v2585_v60 = vadd.f32 %v2576_v21, %v11946_v38  ;;  %v13652_v41 = vld [vmem:[#allocation40_spill] sm:$0xff] }
 0x702   :  { %v2537_v55 = vpop.f32.mrf.mxu0  ;;  %v2578_v1 = vpop.f32.mrf.mxu1 }
 0x703   :  { %v9630_v47 = vmul.f32 -1.442695, %v2583_v53  ;;  %v2584_v56 = vadd.f32 %v2537_v55, %v602_v54  ;;  %v9632_v9 = vmul.f32 -1.442695, %v2585_v60  ;;  %v2586_v35 = vadd.f32 %v2578_v1, %v675_v62  ;;  %v13653_v53 = vld [vmem:[#allocation41_spill] sm:$0xff] }
 0x704   :  { %v2539_v30 = vpop.f32.mrf.mxu0  ;;  %v2580_v57 = vpop.f32.mrf.mxu1 }
 0x705   :  { %10951 = vpow2.f32 %v9630_v47  ;;  %v9631_v58 = vmul.f32 -1.442695, %v2584_v56 }
 0x706   :  { %v2540_v50 = vpop.f32.mrf.mxu0  ;;  %v2581_v59 = vpop.f32.mrf.mxu1 }
 0x707   :  { %10953 = vpow2.f32 %v9631_v58 }
 0x708   :  { %10955 = vpow2.f32 %v9632_v9 }
 0x709   :  { %10957 = vtanh.f32 %v2586_v35 }
 0x712   :  { %v10952_v31 = vpop.eup %10951 }
 0x713   :  { %v2596_v34 = vadd.f32 1.0, %v10952_v31 }
 0x714   :  { %v10954_v15 = vpop.eup %10953 }
 0x715   :  { %10959 = vrcp.f32 %v2596_v34  ;;  %v2597_v36 = vadd.f32 1.0, %v10954_v15  ;;  %v10956_v29 = vpop.eup %10955 }
 0x716   :  { %v10958_v44 = vpop.eup %10957  ;;  %v2598_v51 = vadd.f32 1.0, %v10956_v29  ;;  %v10562_v29 = vld [vmem:[#allocation16 + $0xe8] ss:$16 sps:$4 sm:$0xff]  }
 0x717   :  { %10961 = vrcp.f32 %v2597_v36  ;;  %v10559_v36 = vld [vmem:[#allocation16 + $0xe0] ss:$16 sps:$4 sm:$0xff]  }
 0x718   :  { %10963 = vrcp.f32 %v2598_v51  ;;  %v10568_v51 = vld [vmem:[#allocation16 + $0xc8] ss:$16 sps:$4 sm:$0xff]  }
 0x722   :  { %v10960_v32 = vpop.eup %10959 }
 0x723   :  { %v2608_v17 = vmul.f32 %v10960_v32, %v10958_v44  ;;  %v10567_v32 = vld [vmem:[#allocation16 + $0xc4] ss:$16 sps:$4 sm:$0xff]  }
 0x724   :  { %v10962_v27 = vpop.eup %10961 }
 0x725   :  { %v2607_v38 = vmul.f32 %v10962_v27, %v12202_v8  ;;  %v10964_v42 = vpop.eup %10963  ;;  %v10565_v27 = vld [vmem:[#allocation16 + $0xc0] ss:$16 sps:$4 sm:$0xff]  }
 0x727   :  { %v12259_v11 = vadd.f32 %v2608_v17, %v2607_v38  ;;  %v10570_v17 = vld [vmem:[#allocation16 + $0xcc] ss:$16 sps:$4 sm:$0xff]   ;;  %v10573_v38 = vld [vmem:[#allocation16 + $0xa4] ss:$16 sps:$4 sm:$0xff]  }
 0x729   :  { %10965 = vtanh.f32 %v12259_v11 }
 0x736   :  { %v10966_v46 = vpop.eup %10965 }
 0x737   :  { %v12262_v22 = vmul.f32 %v10966_v46, %v10964_v42  ;;  %v10571_v42 = vld [vmem:[#allocation16 + $0xa0] ss:$16 sps:$4 sm:$0xff]   ;;  %v10574_v46 = vld [vmem:[#allocation16 + $0xa8] ss:$16 sps:$4 sm:$0xff]  }
 0x739   :  { %13649 = vst [vmem:[#allocation49_spill] sm:$0xff] %v12262_v22  ;;  %v2624_v37 = vpack.c.bf16 %v12262_v22, %v12262_v22 }
 0x73b   :  { %2850 = vmatmul.mubr.bf16.vlgmr.msra.gmra.mxu0 %v2624_v37  ;;  %2891 = vmatmul.mubr.bf16.vlgmr.msra.gmra.mxu1 %v2624_v37  ;;  %v10579_v37 = vld [vmem:[#allocation16 + $0x84] ss:$16 sps:$4 sm:$0xff]  }
 0x73c   :  { %3134 = vmatpush1.bf16.msra.mxu0 %v12227_v10  ;;  %3175 = vmatpush1.bf16.msra.mxu1 %v12103_v63  ;;  %v10546_v63 = vld [vmem:[#allocation15 + $0x84] ss:$16 sps:$4 sm:$0xff]  }
 0x73d   :  { %3135 = vmatprep.subr.bf16.mxu0 %v12230_v13  ;;  %3176 = vmatprep.subr.bf16.mxu1 %v12107_v2  ;;  %v10544_v2 = vld [vmem:[#allocation15 + $0x80] ss:$16 sps:$4 sm:$0xff]  }
 0x73e   :  { %3165 = vmatprep.mubr.bf16.mxu0 %v13644_v18  ;;  %3206 = vmatprep.mubr.bf16.mxu1 %v13644_v18 }
 0x740   :  { %3136 = vmatpush1.bf16.msra.mxu0 %v12232_v7  ;;  %3177 = vmatpush1.bf16.msra.mxu1 %v12109_v6  ;;  %v10549_v6 = vld [vmem:[#allocation15 + $0x64] ss:$16 sps:$4 sm:$0xff]  }
 0x741   :  { %3137 = vmatprep.subr.bf16.mxu0 %v12236_v28  ;;  %3178 = vmatprep.subr.bf16.mxu1 %v12113_v5  ;;  %v10547_v5 = vld [vmem:[#allocation15 + $0x60] ss:$16 sps:$4 sm:$0xff]  }
 0x744   :  { %3138 = vmatpush1.bf16.msra.mxu0 %v12238_v61  ;;  %3179 = vmatpush1.bf16.msra.mxu1 %v12115_v24  ;;  %v10552_v24 = vld [vmem:[#allocation15 + $0x44] ss:$16 sps:$4 sm:$0xff]  }
 0x745   :  { %3180 = vmatprep.subr.bf16.mxu1 %v12119_v14  ;;  %3139 = vmatprep.subr.bf16.mxu0 %v10546_v63  ;;  %v10564_v14 = vld [vmem:[#allocation16 + $0xec] ss:$16 sps:$4 sm:$0xff]  }
 0x746   :  { %v10582_v63 = vld [vmem:[#allocation16 + $0x8c] ss:$16 sps:$4 sm:$0xff]  }
 0x748   :  { %3181 = vmatpush1.bf16.msra.mxu1 %v12121_v3  ;;  %3140 = vmatpush1.bf16.msra.mxu0 %v10544_v2  ;;  %v10550_v3 = vld [vmem:[#allocation15 + $0x40] ss:$16 sps:$4 sm:$0xff]  }
 0x749   :  { %3182 = vmatprep.subr.bf16.mxu1 %v12123_v40  ;;  %3141 = vmatprep.subr.bf16.mxu0 %v10549_v6  ;;  %v10555_v40 = vld [vmem:[#allocation15 + $0x24] ss:$16 sps:$4 sm:$0xff]   ;;  %v10577_v2 = vld [vmem:[#allocation16 + $0x80] ss:$16 sps:$4 sm:$0xff]   ;;  %v10580_v6 = vld [vmem:[#allocation16 + $0x88] ss:$16 sps:$4 sm:$0xff]  }
 0x74c   :  { %3183 = vmatpush1.bf16.msra.mxu1 %v12127_v45  ;;  %3142 = vmatpush1.bf16.msra.mxu0 %v10547_v5  ;;  %v10553_v45 = vld [vmem:[#allocation15 + $0x20] ss:$16 sps:$4 sm:$0xff]   ;;  %v10585_v5 = vld [vmem:[#allocation16 + $0x64] ss:$16 sps:$4 sm:$0xff]  }
 0x74d   :  { %3184 = vmatprep.subr.bf16.mxu1 %v12130_v0  ;;  %3143 = vmatprep.subr.bf16.mxu0 %v10552_v24  ;;  %v10558_v0 = vld [vmem:[#allocation15 + $0x4] ss:$16 sps:$4 sm:$0xff]   ;;  %v10588_v24 = vld [vmem:[#allocation16 + $0x6c] ss:$16 sps:$4 sm:$0xff]  }
 0x750   :  { %3185 = vmatpush1.bf16.msra.mxu1 %v12133_v20  ;;  %3144 = vmatpush1.bf16.msra.mxu0 %v10550_v3  ;;  %v10556_v20 = vld [vmem:[#allocation15] ss:$16 sps:$4 sm:$0xff]   ;;  %v10586_v3 = vld [vmem:[#allocation16 + $0x68] ss:$16 sps:$4 sm:$0xff]  }
 0x751   :  { %3186 = vmatprep.subr.bf16.mxu1 %v12136_v19  ;;  %3145 = vmatprep.subr.bf16.mxu0 %v10555_v40  ;;  %v10561_v19 = vld [vmem:[#allocation16 + $0xe4] ss:$16 sps:$4 sm:$0xff]  }
 0x752   :  { %v10591_v40 = vld [vmem:[#allocation16 + $0x44] ss:$16 sps:$4 sm:$0xff]  }
 0x754   :  { %3187 = vmatpush1.bf16.msra.mxu1 %v12139_v49  ;;  %3146 = vmatpush1.bf16.msra.mxu0 %v10553_v45  ;;  %v10594_v45 = vld [vmem:[#allocation16 + $0x4c] ss:$16 sps:$4 sm:$0xff]  }
 0x755   :  { %3188 = vmatprep.subr.bf16.mxu1 %v12142_v52  ;;  %3147 = vmatprep.subr.bf16.mxu0 %v10558_v0  ;;  %v10589_v0 = vld [vmem:[#allocation16 + $0x40] ss:$16 sps:$4 sm:$0xff]  }
 0x758   :  { %3189 = vmatpush1.bf16.msra.mxu1 %v12145_v43  ;;  %3148 = vmatpush1.bf16.msra.mxu0 %v10556_v20  ;;  %v13650_v43 = vld [vmem:[#allocation34_spill] sm:$0xff]  ;;  %v10592_v20 = vld [vmem:[#allocation16 + $0x48] ss:$16 sps:$4 sm:$0xff]  }
 0x759   :  { %3563 = vmatprep.subr.bf16.mxu1 %v10564_v14  ;;  %3490 = vmatprep.subr.bf16.mxu0 %v10561_v19  ;;  %v10583_v14 = vld [vmem:[#allocation16 + $0x60] ss:$16 sps:$4 sm:$0xff]   ;;  %v10597_v19 = vld [vmem:[#allocation16 + $0x24] ss:$16 sps:$4 sm:$0xff]  }
 0x7fb   :  { %v2851_v49 = vpop.f32.mrf.mxu0  ;;  %v2892_v52 = vpop.f32.mrf.mxu1 }
 0x7fc   :  { %v2899_v39 = vadd.f32 %v2851_v49, %v13650_v43  ;;  %v2901_v21 = vadd.f32 %v2892_v52, %v13652_v41  ;;  %v10600_v49 = vld [vmem:[#allocation16 + $0x2c] ss:$16 sps:$4 sm:$0xff]   ;;  %v10595_v52 = vld [vmem:[#allocation16 + $0x20] ss:$16 sps:$4 sm:$0xff]   ;;  %v10598_v43 = vld [vmem:[#allocation16 + $0x28] ss:$16 sps:$4 sm:$0xff]  }
 0x7fd   :  { %v2853_v8 = vpop.f32.mrf.mxu0  ;;  %v2894_v33 = vpop.f32.mrf.mxu1  ;;  %v12316_v41 = vld [vmem:[#allocation18 + $0xec] ss:$16 sps:$4 sm:$0xff]  }
 0x7fe   :  { %v9665_v4 = vmul.f32 -1.442695, %v2899_v39  ;;  %v2900_v26 = vadd.f32 %v2853_v8, %v13651_v16  ;;  %v9667_v54 = vmul.f32 -1.442695, %v2901_v21  ;;  %v2902_v55 = vadd.f32 %v2894_v33, %v13653_v53  ;;  %v10603_v39 = vld [vmem:[#allocation16 + $0x4] ss:$16 sps:$4 sm:$0xff]  }
 0x7ff   :  { %v2855_v10 = vpop.f32.mrf.mxu0  ;;  %v2896_v13 = vpop.f32.mrf.mxu1  ;;  %v10606_v8 = vld [vmem:[#allocation16 + $0xc] ss:$16 sps:$4 sm:$0xff]   ;;  %v10601_v33 = vld [vmem:[#allocation16] ss:$16 sps:$4 sm:$0xff]   ;;  %v12326_v53 = vld [vmem:[#allocation18 + $0xc4] ss:$16 sps:$4 sm:$0xff]  }
 0x800   :  { %10967 = vpow2.f32 %v9665_v4  ;;  %v9666_v7 = vmul.f32 -1.442695, %v2900_v26  ;;  %v10604_v4 = vld [vmem:[#allocation16 + $0x8] ss:$16 sps:$4 sm:$0xff]   ;;  %v13655_v16 = vld [vmem:[#allocation44_spill] sm:$0xff]  ;;  %v13657_v13 = vld [vmem:[#allocation46_spill] sm:$0xff] }
 0x801   :  { %v2856_v28 = vpop.f32.mrf.mxu0  ;;  %v2897_v61 = vpop.f32.mrf.mxu1  ;;  %v13656_v26 = vld [vmem:[#allocation45_spill] sm:$0xff]  ;;  %v12318_v21 = vld [vmem:[#allocation18 + $0xe0] ss:$16 sps:$4 sm:$0xff]  }
 0x802   :  { %10969 = vpow2.f32 %v9666_v7  ;;  %v3272_v10 = vpack.c.bf16 %v13656_v26, %v13655_v16  ;;  %v3273_v7 = vpack.c.bf16 %v12160_v12, %v13657_v13  ;;  %v3274_v28 = vpack.c.bf16 %v12262_v22, %v12205_v48  ;;  %v12314_v61 = vld [vmem:[#allocation18 + $0xe4] ss:$16 sps:$4 sm:$0xff]  }
 0x803   :  { %10971 = vpow2.f32 %v9667_v54  ;;  %v12320_v54 = vld [vmem:[#allocation18 + $0xe8] ss:$16 sps:$4 sm:$0xff]   ;;  %v13682_v16 = vld [vmem:[#allocation32_spill] sm:$0xff] }
 0x804   :  { %10973 = vtanh.f32 %v2902_v55  ;;  %v12328_v55 = vld [vmem:[#allocation18 + $0xcc] ss:$16 sps:$4 sm:$0xff]  }
 0x80d   :  { %v10968_v1 = vpop.eup %10967 }
 0x80e   :  { %v2912_v47 = vadd.f32 1.0, %v10968_v1  ;;  %v12330_v1 = vld [vmem:[#allocation18 + $0xc0] ss:$16 sps:$4 sm:$0xff]  }
 0x80f   :  { %v10970_v56 = vpop.eup %10969 }
 0x810   :  { %10975 = vrcp.f32 %v2912_v47  ;;  %v2913_v30 = vadd.f32 1.0, %v10970_v56  ;;  %v10972_v57 = vpop.eup %10971  ;;  %v12332_v47 = vld [vmem:[#allocation18 + $0xc8] ss:$16 sps:$4 sm:$0xff]   ;;  %v12338_v56 = vld [vmem:[#allocation18 + $0xa0] ss:$16 sps:$4 sm:$0xff]  }
 0x811   :  { %v10974_v58 = vpop.eup %10973  ;;  %v2914_v62 = vadd.f32 1.0, %v10972_v57  ;;  %v12342_v57 = vld [vmem:[#allocation18 + $0xac] ss:$16 sps:$4 sm:$0xff]  }
 0x812   :  { %10977 = vrcp.f32 %v2913_v30  ;;  %v12340_v30 = vld [vmem:[#allocation18 + $0xa4] ss:$16 sps:$4 sm:$0xff]  }
 0x813   :  { %10979 = vrcp.f32 %v2914_v62  ;;  %v12357_v62 = vld [vmem:[#allocation18 + $0x88] ss:$16 sps:$4 sm:$0xff]  }
 0x81d   :  { %v10976_v50 = vpop.eup %10975 }
 0x81e   :  { %v2924_v59 = vmul.f32 %v10976_v50, %v10974_v58  ;;  %v12345_v58 = vld [vmem:[#allocation18 + $0xa8] ss:$16 sps:$4 sm:$0xff]   ;;  %v12350_v50 = vld [vmem:[#allocation18 + $0x80] ss:$16 sps:$4 sm:$0xff]  }
 0x81f   :  { %v10978_v60 = vpop.eup %10977 }
 0x820   :  { %v2923_v9 = vmul.f32 %v10978_v60, %v12259_v11  ;;  %v10980_v31 = vpop.eup %10979  ;;  %v10576_v11 = vld [vmem:[#allocation16 + $0xac] ss:$16 sps:$4 sm:$0xff]  }
 0x821   :  { %v12354_v60 = vld [vmem:[#allocation18 + $0x8c] ss:$16 sps:$4 sm:$0xff]  }
 0x822   :  { %v12293_v35 = vadd.f32 %v2924_v59, %v2923_v9  ;;  %v12352_v59 = vld [vmem:[#allocation18 + $0x84] ss:$16 sps:$4 sm:$0xff]   ;;  %v12362_v9 = vld [vmem:[#allocation18 + $0x60] ss:$16 sps:$4 sm:$0xff]  }
 0x824   :  { %10981 = vtanh.f32 %v12293_v35 }
 0x831   :  { %v10982_v34 = vpop.eup %10981 }
 0x832   :  { %v12296_v15 = vmul.f32 %v10982_v34, %v10980_v31  ;;  %v12364_v31 = vld [vmem:[#allocation18 + $0x64] ss:$16 sps:$4 sm:$0xff]   ;;  %v12366_v34 = vld [vmem:[#allocation18 + $0x6c] ss:$16 sps:$4 sm:$0xff]  }
 0x834   :  { %13654 = vst [vmem:[#allocation34_spill] sm:$0xff] %v12296_v15  ;;  %v2940_v44 = vpack.c.bf16 %v12296_v15, %v12296_v15 }
 0x836   :  { %3166 = vmatmul.mubr.bf16.vlgmr.msra.gmra.mxu0 %v2940_v44  ;;  %3207 = vmatmul.mubr.bf16.vlgmr.msra.gmra.mxu1 %v2940_v44  ;;  %v12376_v44 = vld [vmem:[#allocation18 + $0x44] ss:$16 sps:$4 sm:$0xff]  }
 0x837   :  { %3491 = vmatpush1.bf16.msra.mxu0 %v10559_v36  ;;  %3564 = vmatpush1.bf16.msra.mxu1 %v10562_v29  ;;  %v12369_v36 = vld [vmem:[#allocation18 + $0x68] ss:$16 sps:$4 sm:$0xff]   ;;  %v12374_v29 = vld [vmem:[#allocation18 + $0x40] ss:$16 sps:$4 sm:$0xff]  }
 0x838   :  { %3492 = vmatprep.subr.bf16.mxu0 %v10567_v32  ;;  %3565 = vmatprep.subr.bf16.mxu1 %v10570_v17  ;;  %v12378_v32 = vld [vmem:[#allocation18 + $0x48] ss:$16 sps:$4 sm:$0xff]   ;;  %v12380_v17 = vld [vmem:[#allocation18 + $0x4c] ss:$16 sps:$4 sm:$0xff]  }
 0x839   :  { %3522 = vmatprep.mubr.bf16.mxu0 %v13644_v18  ;;  %3595 = vmatprep.mubr.bf16.mxu1 %v13644_v18 }
 0x83b   :  { %3493 = vmatpush1.bf16.msra.mxu0 %v10565_v27  ;;  %3566 = vmatpush1.bf16.msra.mxu1 %v10568_v51  ;;  %v12382_v27 = vld [vmem:[#allocation18 + $0x24] ss:$16 sps:$4 sm:$0xff]   ;;  %v12388_v51 = vld [vmem:[#allocation18 + $0x20] ss:$16 sps:$4 sm:$0xff]  }
 0x83c   :  { %3494 = vmatprep.subr.bf16.mxu0 %v10573_v38  ;;  %3567 = vmatprep.subr.bf16.mxu1 %v10576_v11  ;;  %v12390_v38 = vld [vmem:[#allocation18 + $0x28] ss:$16 sps:$4 sm:$0xff]   ;;  %v12392_v11 = vld [vmem:[#allocation18 + $0x2c] ss:$16 sps:$4 sm:$0xff]  }
 0x83f   :  { %3495 = vmatpush1.bf16.msra.mxu0 %v10571_v42  ;;  %3568 = vmatpush1.bf16.msra.mxu1 %v10574_v46  ;;  %v12395_v42 = vld [vmem:[#allocation18 + $0x4] ss:$16 sps:$4 sm:$0xff]   ;;  %v12397_v46 = vld [vmem:[#allocation18 + $0xc] ss:$16 sps:$4 sm:$0xff]  }
 0x840   :  { %3496 = vmatprep.subr.bf16.mxu0 %v10579_v37  ;;  %3569 = vmatprep.subr.bf16.mxu1 %v10582_v63  ;;  %v12402_v37 = vld [vmem:[#allocation18] ss:$16 sps:$4 sm:$0xff]   ;;  %v12404_v63 = vld [vmem:[#allocation18 + $0x8] ss:$16 sps:$4 sm:$0xff]  }
 0x843   :  { %3497 = vmatpush1.bf16.msra.mxu0 %v10577_v2  ;;  %3570 = vmatpush1.bf16.msra.mxu1 %v10580_v6 }
 0x844   :  { %3498 = vmatprep.subr.bf16.mxu0 %v10585_v5  ;;  %3571 = vmatprep.subr.bf16.mxu1 %v10588_v24  ;;  %v13658_v5 = vld [vmem:[#allocation37_spill] sm:$0xff] }
 0x845   :  { %v612_v24 = vadd.f32 %v13658_v5, %v11890_v25 }
 0x847   :  { %3499 = vmatpush1.bf16.msra.mxu0 %v10583_v14  ;;  %3572 = vmatpush1.bf16.msra.mxu1 %v10586_v3  ;;  %v13659_v14 = vld [vmem:[#allocation36_spill] sm:$0xff] }
 0x848   :  { %3500 = vmatprep.subr.bf16.mxu0 %v10591_v40  ;;  %3573 = vmatprep.subr.bf16.mxu1 %v10594_v45 }
 0x84b   :  { %3501 = vmatpush1.bf16.msra.mxu0 %v10589_v0  ;;  %3574 = vmatpush1.bf16.msra.mxu1 %v10592_v20 }
 0x84c   :  { %3502 = vmatprep.subr.bf16.mxu0 %v10597_v19  ;;  %3575 = vmatprep.subr.bf16.mxu1 %v10600_v49 }
 0x84f   :  { %3503 = vmatpush1.bf16.msra.mxu0 %v10595_v52  ;;  %3576 = vmatpush1.bf16.msra.mxu1 %v10598_v43 }
 0x850   :  { %3504 = vmatprep.subr.bf16.mxu0 %v10603_v39  ;;  %3577 = vmatprep.subr.bf16.mxu1 %v10606_v8  ;;  %v13660_v8 = vld [vmem:[#allocation42_spill] sm:$0xff] }
 0x853   :  { %3505 = vmatpush1.bf16.msra.mxu0 %v10601_v33  ;;  %3578 = vmatpush1.bf16.msra.mxu1 %v10604_v4  ;;  %v13661_v4 = vld [vmem:[#allocation43_spill] sm:$0xff] }
 0x854   :  { %3868 = vmatprep.subr.bf16.mxu0 %v12314_v61  ;;  %3909 = vmatprep.subr.bf16.mxu1 %v12316_v41 }
 0x856   :  { %3523 = vmatmul.mubr.bf16.vlgmr.msra.gmra.mxu0 %v3272_v10  ;;  %3596 = vmatmul.mubr.bf16.vlgmr.msra.gmra.mxu1 %v3272_v10  ;;  %v685_v10 = vadd.f32 %v13661_v4, %v11930_v23 }
 0x857   :  { %3532 = vmatprep.mubr.bf16.mxu0 %v13644_v18  ;;  %3605 = vmatprep.mubr.bf16.mxu1 %v13644_v18 }
 0x858   :  { %3869 = vmatpush1.bf16.msra.mxu0 %v12318_v21  ;;  %3910 = vmatpush1.bf16.msra.mxu1 %v12320_v54 }
 0x859   :  { %3870 = vmatprep.subr.bf16.mxu0 %v12326_v53  ;;  %3911 = vmatprep.subr.bf16.mxu1 %v12328_v55 }
 0x85c   :  { %3871 = vmatpush1.bf16.msra.mxu0 %v12330_v1  ;;  %3912 = vmatpush1.bf16.msra.mxu1 %v12332_v47 }
 0x85d   :  { %3872 = vmatprep.subr.bf16.mxu0 %v12340_v30  ;;  %3913 = vmatprep.subr.bf16.mxu1 %v12342_v57 }
 0x85e   :  { %3533 = vmatmul.mubr.bf16.gmra.mxu0 %v3273_v7  ;;  %3606 = vmatmul.mubr.bf16.gmra.mxu1 %v3273_v7 }
 0x85f   :  { %3542 = vmatprep.mubr.bf16.mxu0 %v13644_v18  ;;  %3615 = vmatprep.mubr.bf16.mxu1 %v13644_v18 }
 0x860   :  { %3873 = vmatpush1.bf16.msra.mxu0 %v12338_v56  ;;  %3914 = vmatpush1.bf16.msra.mxu1 %v12345_v58 }
 0x861   :  { %3874 = vmatprep.subr.bf16.mxu0 %v12352_v59  ;;  %3915 = vmatprep.subr.bf16.mxu1 %v12354_v60 }
 0x864   :  { %3875 = vmatpush1.bf16.msra.mxu0 %v12350_v50  ;;  %3916 = vmatpush1.bf16.msra.mxu1 %v12357_v62 }
 0x865   :  { %3876 = vmatprep.subr.bf16.mxu0 %v12364_v31  ;;  %3917 = vmatprep.subr.bf16.mxu1 %v12366_v34 }
 0x866   :  { %3543 = vmatmul.mubr.bf16.gmra.mxu0 %v3274_v28  ;;  %3616 = vmatmul.mubr.bf16.gmra.mxu1 %v3274_v28 }
 0x867   :  { %3552 = vmatprep.mubr.bf16.mxu0 %v13644_v18  ;;  %3625 = vmatprep.mubr.bf16.mxu1 %v13644_v18 }
 0x868   :  { %3877 = vmatpush1.bf16.msra.mxu0 %v12362_v9  ;;  %3918 = vmatpush1.bf16.msra.mxu1 %v12369_v36 }
 0x869   :  { %3878 = vmatprep.subr.bf16.mxu0 %v12376_v44  ;;  %3919 = vmatprep.subr.bf16.mxu1 %v12380_v17 }
 0x86c   :  { %3879 = vmatpush1.bf16.msra.mxu0 %v12374_v29  ;;  %3920 = vmatpush1.bf16.msra.mxu1 %v12378_v32 }
 0x86d   :  { %3880 = vmatprep.subr.bf16.mxu0 %v12382_v27  ;;  %3921 = vmatprep.subr.bf16.mxu1 %v12392_v11 }
 0x870   :  { %3881 = vmatpush1.bf16.msra.mxu0 %v12388_v51  ;;  %3922 = vmatpush1.bf16.msra.mxu1 %v12390_v38 }
 0x871   :  { %3882 = vmatprep.subr.bf16.mxu0 %v12395_v42  ;;  %3923 = vmatprep.subr.bf16.mxu1 %v12397_v46 }
 0x874   :  { %3883 = vmatpush1.bf16.msra.mxu0 %v12402_v37  ;;  %3924 = vmatpush1.bf16.msra.mxu1 %v12404_v63 }
 0x875   :  { %4180 = vmatprep.subr.bf16.mxu0 %v12314_v61  ;;  %4221 = vmatprep.subr.bf16.mxu1 %v12316_v41 }
 0x8f6   :  { %v3167_v2 = vpop.f32.mrf.mxu0  ;;  %v3208_v6 = vpop.f32.mrf.mxu1 }
 0x8f7   :  { %v3215_v3 = vadd.f32 %v3167_v2, %v13659_v14  ;;  %v3217_v33 = vadd.f32 %v3208_v6, %v13660_v8 }
 0x8f8   :  { %v3169_v40 = vpop.f32.mrf.mxu0  ;;  %v3210_v45 = vpop.f32.mrf.mxu1 }
 0x8f9   :  { %v9700_v0 = vmul.f32 -1.442695, %v3215_v3  ;;  %v3216_v20 = vadd.f32 %v3169_v40, %v612_v24  ;;  %v9702_v7 = vmul.f32 -1.442695, %v3217_v33  ;;  %v3218_v25 = vadd.f32 %v3210_v45, %v685_v10 }
 0x8fa   :  { %v3171_v19 = vpop.f32.mrf.mxu0  ;;  %v3212_v49 = vpop.f32.mrf.mxu1 }
 0x8fb   :  { %10983 = vpow2.f32 %v9700_v0  ;;  %v9701_v52 = vmul.f32 -1.442695, %v3216_v20 }
 0x8fc   :  { %v3172_v43 = vpop.f32.mrf.mxu0  ;;  %v3213_v39 = vpop.f32.mrf.mxu1 }
 0x8fd   :  { %10985 = vpow2.f32 %v9701_v52  ;;  %v13663_v39 = vmov 0.0|0.0  }
 0x8fe   :  { %10987 = vpow2.f32 %v9702_v7 }
 0x8ff   :  { %10989 = vtanh.f32 %v3218_v25 }
 0x908   :  { %v10984_v28 = vpop.eup %10983 }
 0x909   :  { %v3228_v2 = vadd.f32 1.0, %v10984_v28 }
 0x90a   :  { %v10986_v5 = vpop.eup %10985 }
 0x90b   :  { %10991 = vrcp.f32 %v3228_v2  ;;  %v3229_v24 = vadd.f32 1.0, %v10986_v5  ;;  %v10988_v14 = vpop.eup %10987 }
 0x90c   :  { %v10990_v3 = vpop.eup %10989  ;;  %v3230_v19 = vadd.f32 1.0, %v10988_v14 }
 0x90d   :  { %10993 = vrcp.f32 %v3229_v24 }
 0x90e   :  { %10995 = vrcp.f32 %v3230_v19 }
 0x916   :  { %v3597_v8 = vpop.f32.mrf.mxu1 }
 0x918   :  { %v10992_v40 = vpop.eup %10991  ;;  %v3599_v4 = vpop.f32.mrf.mxu1 }
 0x919   :  { %v3240_v0 = vmul.f32 %v10992_v40, %v10990_v3 }
 0x91a   :  { %v10994_v20 = vpop.eup %10993  ;;  %v12463_v7 = vpop.f32.mrf.mxu1 }
 0x91b   :  { %v3239_v6 = vmul.f32 %v10994_v20, %v12293_v35  ;;  %v10996_v23 = vpop.eup %10995  ;;  %v3524_v35 = vpop.f32.mrf.mxu0 }
 0x91c   :  { %v12467_v28 = vpop.f32.mrf.mxu1 }
 0x91d   :  { %v3241_v49 = vadd.f32 %v3240_v0, %v3239_v6  ;;  %v3526_v33 = vpop.f32.mrf.mxu0 }
 0x91e   :  { %v12471_v5 = vpop.f32.mrf.mxu1 }
 0x91f   :  { %10997 = vtanh.f32 %v3241_v49  ;;  %v12461_v10 = vpop.f32.mrf.mxu0  ;;  %13664 = vst [vmem:[#allocation40_spill] sm:$0xff] %v12471_v5 }
 0x920   :  { %v12475_v14 = vpop.f32.mrf.mxu1 }
 0x921   :  { %v12465_v25 = vpop.f32.mrf.mxu0  ;;  %13665 = vst [vmem:[#allocation41_spill] sm:$0xff] %v12475_v14  ;;  %v13689_v14 = vld [vmem:[#allocation39_spill] sm:$0xff] }
 0x922   :  { %v12479_v40 = vpop.f32.mrf.mxu1 }
 0x923   :  { %v12469_v2 = vpop.f32.mrf.mxu0  ;;  %13667 = vst [vmem:[#allocation36_spill] sm:$0xff] %v12479_v40 }
 0x924   :  { %v12483_v20 = vpop.f32.mrf.mxu1 }
 0x925   :  { %v12473_v24 = vpop.f32.mrf.mxu0  ;;  %13669 = vst [vmem:[#allocation43_spill] sm:$0xff] %v12483_v20 }
 0x926   :  { %v12487_v6 = vpop.f32.mrf.mxu1 }
 0x927   :  { %v12477_v3 = vpop.f32.mrf.mxu0  ;;  %13671 = vst [vmem:[#allocation51_spill] sm:$0xff] %v12487_v6 }
 0x928   :  { %13666 = vst [vmem:[#allocation37_spill] sm:$0xff] %v12477_v3 }
 0x929   :  { %v12481_v0 = vpop.f32.mrf.mxu0 }
 0x92a   :  { %13668 = vst [vmem:[#allocation42_spill] sm:$0xff] %v12481_v0  ;;  %v13688_v0 = vld [vmem:[#allocation38_spill] sm:$0xff] }
 0x92b   :  { %v12485_v19 = vpop.f32.mrf.mxu0 }
 0x92c   :  { %v10998_v45 = vpop.eup %10997  ;;  %13670 = vst [vmem:[#allocation50_spill] sm:$0xff] %v12485_v19 }
 0x92d   :  { %v12419_v52 = vmul.f32 %v10998_v45, %v10996_v23  ;;  %v12489_v49 = vpop.f32.mrf.mxu0  ;;  %v12491_v23 = vpop.f32.mrf.mxu1 }
 0x92e   :  { %13672 = vst [vmem:[#allocation52_spill] sm:$0xff] %v12489_v49  ;;  %13673 = vst [vmem:[#allocation53_spill] sm:$0xff] %v12491_v23 }
 0x92f   :  { %13662 = vst [vmem:[#allocation35_spill] sm:$0xff] %v12419_v52  ;;  %v3275_v43 = vpack.c.bf16 %v12419_v52, %v12296_v15  ;;  %v12493_v45 = vpop.f32.mrf.mxu0  ;;  %v3308_v15 = vld [vmem:[%s13594_s8] sm:$0xf] }
 0x930   :  { %13674 = vst [vmem:[#allocation54_spill] sm:$0xff] %v12493_v45  ;;  %v12513_v26 = vrot.slane %v3308_v15, %v13682_v16  ;;  %v12529_v3 = vrot.slane %v3308_v15, %v13688_v0  ;;  %v12533_v5 = vrot.slane %v3308_v15, %v13689_v14 }
 0x931   :  { %3553 = vmatmul.mubr.bf16.gmra.mxu0 %v3275_v43  ;;  %3626 = vmatmul.mubr.bf16.gmra.mxu1 %v3275_v43  ;;  %v12495_v43 = vpop.f32.mrf.mxu1 }
 0x932   :  { %3900 = vmatprep.mubr.bf16.mxu0 %v13644_v18  ;;  %3941 = vmatprep.mubr.bf16.mxu1 %v13644_v18  ;;  %13675 = vst [vmem:[#allocation55_spill] sm:$0xff] %v12495_v43 }
 0x933   :  { %v12499_v52 = vpop.f32.mrf.mxu1 }
 0x934   :  { %13677 = vst [vmem:[#allocation57_spill] sm:$0xff] %v12499_v52  ;;  %v13685_v52 = vld [vmem:[#allocation33_spill] sm:$0xff] }
 0x935   :  { %v12520_v45 = vrot.slane %v3308_v15, %v13685_v52 }
 0x939   :  { %3901 = vmatmul.mubr.bf16.vlgmr.msra.gmra.mxu0 %v13663_v39  ;;  %3942 = vmatmul.mubr.bf16.vlgmr.msra.gmra.mxu1 %v13663_v39  ;;  %v12497_v39 = vpop.f32.mrf.mxu0 }
 0x93a   :  { %4181 = vmatpush1.bf16.msra.mxu0 %v12318_v21  ;;  %4222 = vmatpush1.bf16.msra.mxu1 %v12320_v54  ;;  %13676 = vst [vmem:[#allocation56_spill] sm:$0xff] %v12497_v39 }
 0x93b   :  { %4182 = vmatprep.subr.bf16.mxu0 %v12326_v53  ;;  %4223 = vmatprep.subr.bf16.mxu1 %v12328_v55 }
 0x93c   :  { %4212 = vmatprep.mubr.bf16.mxu0 %v13644_v18  ;;  %4253 = vmatprep.mubr.bf16.mxu1 %v13644_v18 }
 0x93e   :  { %4183 = vmatpush1.bf16.msra.mxu0 %v12330_v1  ;;  %4224 = vmatpush1.bf16.msra.mxu1 %v12332_v47 }
 0x93f   :  { %4184 = vmatprep.subr.bf16.mxu0 %v12340_v30  ;;  %4225 = vmatprep.subr.bf16.mxu1 %v12342_v57 }
 0x942   :  { %4185 = vmatpush1.bf16.msra.mxu0 %v12338_v56  ;;  %4226 = vmatpush1.bf16.msra.mxu1 %v12345_v58 }
 0x943   :  { %4186 = vmatprep.subr.bf16.mxu0 %v12352_v59  ;;  %4227 = vmatprep.subr.bf16.mxu1 %v12354_v60 }
 0x946   :  { %4187 = vmatpush1.bf16.msra.mxu0 %v12350_v50  ;;  %4228 = vmatpush1.bf16.msra.mxu1 %v12357_v62 }
 0x947   :  { %4188 = vmatprep.subr.bf16.mxu0 %v12364_v31  ;;  %4229 = vmatprep.subr.bf16.mxu1 %v12366_v34 }
 0x94a   :  { %4189 = vmatpush1.bf16.msra.mxu0 %v12362_v9  ;;  %4230 = vmatpush1.bf16.msra.mxu1 %v12369_v36 }
 0x94b   :  { %4190 = vmatprep.subr.bf16.mxu0 %v12376_v44  ;;  %4231 = vmatprep.subr.bf16.mxu1 %v12380_v17 }
 0x94e   :  { %4191 = vmatpush1.bf16.msra.mxu0 %v12374_v29  ;;  %4232 = vmatpush1.bf16.msra.mxu1 %v12378_v32 }
 0x94f   :  { %4192 = vmatprep.subr.bf16.mxu0 %v12382_v27  ;;  %4233 = vmatprep.subr.bf16.mxu1 %v12392_v11 }
 0x952   :  { %4193 = vmatpush1.bf16.msra.mxu0 %v12388_v51  ;;  %4234 = vmatpush1.bf16.msra.mxu1 %v12390_v38 }
 0x953   :  { %4194 = vmatprep.subr.bf16.mxu0 %v12395_v42  ;;  %4235 = vmatprep.subr.bf16.mxu1 %v12397_v46 }
 0x956   :  { %4195 = vmatpush1.bf16.msra.mxu0 %v12402_v37  ;;  %4236 = vmatpush1.bf16.msra.mxu1 %v12404_v63 }
 0x957   :  { %4492 = vmatprep.subr.bf16.mxu0 %v12314_v61  ;;  %4533 = vmatprep.subr.bf16.mxu1 %v12316_v41 }
 0x9f1   :  { %v12504_v48 = vpop.f32.mrf.mxu0  ;;  %v12506_v22 = vpop.f32.mrf.mxu1 }
 0x9f2   :  { %13678 = vst [vmem:[#allocation58_spill] sm:$0xff] %v12504_v48  ;;  %13679 = vst [vmem:[#allocation59_spill] sm:$0xff] %v12506_v22  ;;  %v3525_v22 = vadd.f32 %v3524_v35, %v12513_v26  ;;  %v3598_v35 = vadd.f32 %v3597_v8, %v12529_v3 }
 0x9f3   :  { %v12508_v13 = vpop.f32.mrf.mxu0  ;;  %v12510_v12 = vpop.f32.mrf.mxu1 }
 0x9f4   :  { %13680 = vst [vmem:[#allocation60_spill] sm:$0xff] %v12508_v13  ;;  %13681 = vst [vmem:[#allocation61_spill] sm:$0xff] %v12510_v12  ;;  %v3527_v12 = vadd.f32 %v3526_v33, %v12520_v45 }
 0x9f5   :  { %v12515_v43 = vpop.f32.mrf.mxu0  ;;  %v12517_v39 = vpop.f32.mrf.mxu1 }
 0x9f6   :  { %13683 = vst [vmem:[#allocation62_spill] sm:$0xff] %v12515_v43  ;;  %13684 = vst [vmem:[#allocation63_spill] sm:$0xff] %v12517_v39 }
 0x9f7   :  { %v12522_v23 = vpop.f32.mrf.mxu0  ;;  %v12524_v6 = vpop.f32.mrf.mxu1 }
 0x9f8   :  { %13686 = vst [vmem:[#allocation64_spill] sm:$0xff] %v12522_v23  ;;  %13687 = vst [vmem:[#allocation65_spill] sm:$0xff] %v12524_v6 }
 0x9f9   :  { %v3902_v48 = vpop.f32.mrf.mxu0  ;;  %v3943_v13 = vpop.f32.mrf.mxu1 }
 0x9fa   :  { %v3950_v49 = vadd.f32 %v3902_v48, %v3525_v22  ;;  %v3952_v48 = vadd.f32 %v3943_v13, %v3598_v35  ;;  %v3600_v22 = vadd.f32 %v3599_v4, %v12533_v5 }
 0x9fb   :  { %v3904_v16 = vpop.f32.mrf.mxu0  ;;  %v3945_v19 = vpop.f32.mrf.mxu1 }
 0x9fc   :  { %v9767_v20 = vmul.f32 -1.442695, %v3950_v49  ;;  %v3951_v43 = vadd.f32 %v3904_v16, %v3527_v12  ;;  %v9769_v33 = vmul.f32 -1.442695, %v3952_v48  ;;  %v3953_v16 = vadd.f32 %v3945_v19, %v3600_v22 }
 0x9fd   :  { %v3906_v40 = vpop.f32.mrf.mxu0  ;;  %v3947_v39 = vpop.f32.mrf.mxu1  ;;  %v3529_v22 = vadd.f32 %v12461_v10, %v12513_v26 }
 0x9fe   :  { %10999 = vpow2.f32 %v9767_v20  ;;  %v9768_v52 = vmul.f32 -1.442695, %v3951_v43 }
 0x9ff   :  { %v3907_v23 = vpop.f32.mrf.mxu0  ;;  %v3948_v6 = vpop.f32.mrf.mxu1 }
 0xa00   :  { %11001 = vpow2.f32 %v9768_v52 }
 0xa01   :  { %11003 = vpow2.f32 %v9769_v33 }
 0xa0b   :  { %v11000_v12 = vpop.eup %10999 }
 0xa0c   :  { %v3963_v39 = vadd.f32 1.0, %v11000_v12 }
 0xa0d   :  { %v11002_v40 = vpop.eup %11001 }
 0xa0e   :  { %11005 = vrcp.f32 %v3963_v39  ;;  %v3964_v20 = vadd.f32 1.0, %v11002_v40  ;;  %v11004_v6 = vpop.eup %11003 }
 0xa0f   :  { %11007 = vtanh.f32 %v3953_v16  ;;  %v3965_v23 = vadd.f32 1.0, %v11004_v6  ;;  %v3531_v16 = vadd.f32 %v12465_v25, %v12520_v45 }
 0xa10   :  { %11009 = vrcp.f32 %v3964_v20 }
 0xa11   :  { %11011 = vrcp.f32 %v3965_v23 }
 0xa1b   :  { %v11006_v52 = vpop.eup %11005 }
 0xa1c   :  { %v11008_v49 = vpop.eup %11007 }
 0xa1d   :  { %v11010_v8 = vpop.eup %11009  ;;  %v3975_v43 = vmul.f32 %v11008_v49, %v11006_v52 }
 0xa1e   :  { %v3974_v15 = vmul.f32 0.0, %v11010_v8  ;;  %v11012_v4 = vpop.eup %11011 }
 0xa20   :  { %v12536_v13 = vadd.f32 %v3975_v43, %v3974_v15  ;;  %v3604_v43 = vadd.f32 %v12467_v28, %v12533_v5 }
 0xa22   :  { %11013 = vtanh.f32 %v12536_v13 }
 0xa2f   :  { %v11014_v19 = vpop.eup %11013 }
 0xa30   :  { %v12539_v35 = vmul.f32 %v11014_v19, %v11012_v4 }
 0xa32   :  { %v3987_v48 = vpack.c.bf16 %v12539_v35, %v12539_v35 }
 0xa34   :  { %4213 = vmatmul.mubr.bf16.vlgmr.msra.gmra.mxu0 %v3987_v48  ;;  %4254 = vmatmul.mubr.bf16.vlgmr.msra.gmra.mxu1 %v3987_v48 }
 0xa35   :  { %4493 = vmatpush1.bf16.msra.mxu0 %v12318_v21  ;;  %4534 = vmatpush1.bf16.msra.mxu1 %v12320_v54 }
 0xa36   :  { %4494 = vmatprep.subr.bf16.mxu0 %v12326_v53  ;;  %4535 = vmatprep.subr.bf16.mxu1 %v12328_v55 }
 0xa37   :  { %4524 = vmatprep.mubr.bf16.mxu0 %v13644_v18  ;;  %4565 = vmatprep.mubr.bf16.mxu1 %v13644_v18 }
 0xa39   :  { %4495 = vmatpush1.bf16.msra.mxu0 %v12330_v1  ;;  %4536 = vmatpush1.bf16.msra.mxu1 %v12332_v47 }
 0xa3a   :  { %4496 = vmatprep.subr.bf16.mxu0 %v12340_v30  ;;  %4537 = vmatprep.subr.bf16.mxu1 %v12342_v57 }
 0xa3d   :  { %4497 = vmatpush1.bf16.msra.mxu0 %v12338_v56  ;;  %4538 = vmatpush1.bf16.msra.mxu1 %v12345_v58 }
 0xa3e   :  { %4498 = vmatprep.subr.bf16.mxu0 %v12352_v59  ;;  %4539 = vmatprep.subr.bf16.mxu1 %v12354_v60 }
 0xa41   :  { %4499 = vmatpush1.bf16.msra.mxu0 %v12350_v50  ;;  %4540 = vmatpush1.bf16.msra.mxu1 %v12357_v62 }
 0xa42   :  { %4500 = vmatprep.subr.bf16.mxu0 %v12364_v31  ;;  %4541 = vmatprep.subr.bf16.mxu1 %v12366_v34 }
 0xa45   :  { %4501 = vmatpush1.bf16.msra.mxu0 %v12362_v9  ;;  %4542 = vmatpush1.bf16.msra.mxu1 %v12369_v36 }
 0xa46   :  { %4502 = vmatprep.subr.bf16.mxu0 %v12376_v44  ;;  %4543 = vmatprep.subr.bf16.mxu1 %v12380_v17 }
 0xa49   :  { %4503 = vmatpush1.bf16.msra.mxu0 %v12374_v29  ;;  %4544 = vmatpush1.bf16.msra.mxu1 %v12378_v32 }
 0xa4a   :  { %4504 = vmatprep.subr.bf16.mxu0 %v12382_v27  ;;  %4545 = vmatprep.subr.bf16.mxu1 %v12392_v11 }
 0xa4d   :  { %4505 = vmatpush1.bf16.msra.mxu0 %v12388_v51  ;;  %4546 = vmatpush1.bf16.msra.mxu1 %v12390_v38 }
 0xa4e   :  { %4506 = vmatprep.subr.bf16.mxu0 %v12395_v42  ;;  %4547 = vmatprep.subr.bf16.mxu1 %v12397_v46 }
 0xa51   :  { %4507 = vmatpush1.bf16.msra.mxu0 %v12402_v37  ;;  %4548 = vmatpush1.bf16.msra.mxu1 %v12404_v63 }
 0xa52   :  { %4804 = vmatprep.subr.bf16.mxu0 %v12314_v61  ;;  %4845 = vmatprep.subr.bf16.mxu1 %v12316_v41  ;;  %v3602_v41 = vadd.f32 %v12463_v7, %v12529_v3 }
 0xaf4   :  { %v4214_v33 = vpop.f32.mrf.mxu0  ;;  %v4255_v12 = vpop.f32.mrf.mxu1 }
 0xaf5   :  { %v4262_v39 = vadd.f32 %v4214_v33, %v3529_v22  ;;  %v4264_v10 = vadd.f32 %v4255_v12, %v3602_v41 }
 0xaf6   :  { %v4216_v40 = vpop.f32.mrf.mxu0  ;;  %v4257_v20 = vpop.f32.mrf.mxu1 }
 0xaf7   :  { %v9802_v6 = vmul.f32 -1.442695, %v4262_v39  ;;  %v4263_v52 = vadd.f32 %v4216_v40, %v3531_v16  ;;  %v9804_v25 = vmul.f32 -1.442695, %v4264_v10  ;;  %v4265_v4 = vadd.f32 %v4257_v20, %v3604_v43  ;;  %v12643_v43 = vld [vmem:[#allocation18 + $0xe4] ss:$16 sps:$4 sm:$0xff]  }
 0xaf8   :  { %v4218_v49 = vpop.f32.mrf.mxu0  ;;  %v4259_v8 = vpop.f32.mrf.mxu1 }
 0xaf9   :  { %11015 = vpow2.f32 %v9802_v6  ;;  %v9803_v23 = vmul.f32 -1.442695, %v4263_v52 }
 0xafa   :  { %v4219_v61 = vpop.f32.mrf.mxu0  ;;  %v4260_v15 = vpop.f32.mrf.mxu1 }
 0xafb   :  { %11017 = vpow2.f32 %v9803_v23 }
 0xafc   :  { %11019 = vpow2.f32 %v9804_v25  ;;  %v12645_v25 = vld [vmem:[#allocation18 + $0xec] ss:$16 sps:$4 sm:$0xff]  }
 0xafd   :  { %11021 = vtanh.f32 %v4265_v4  ;;  %v12647_v4 = vld [vmem:[#allocation18 + $0xe0] ss:$16 sps:$4 sm:$0xff]  }
 0xb06   :  { %v11016_v19 = vpop.eup %11015 }
 0xb07   :  { %v4275_v48 = vadd.f32 1.0, %v11016_v19  ;;  %v12649_v19 = vld [vmem:[#allocation18 + $0xe8] ss:$16 sps:$4 sm:$0xff]  }
 0xb08   :  { %v11018_v22 = vpop.eup %11017 }
 0xb09   :  { %11023 = vrcp.f32 %v4275_v48  ;;  %v4276_v33 = vadd.f32 1.0, %v11018_v22  ;;  %v11020_v16 = vpop.eup %11019  ;;  %v12655_v48 = vld [vmem:[#allocation18 + $0xc4] ss:$16 sps:$4 sm:$0xff]   ;;  %v12657_v22 = vld [vmem:[#allocation18 + $0xcc] ss:$16 sps:$4 sm:$0xff]  }
 0xb0a   :  { %v11022_v39 = vpop.eup %11021  ;;  %v4277_v7 = vadd.f32 1.0, %v11020_v16  ;;  %v12661_v16 = vld [vmem:[#allocation18 + $0xc8] ss:$16 sps:$4 sm:$0xff]  }
 0xb0b   :  { %11025 = vrcp.f32 %v4276_v33  ;;  %v12659_v33 = vld [vmem:[#allocation18 + $0xc0] ss:$16 sps:$4 sm:$0xff]  }
 0xb0c   :  { %11027 = vrcp.f32 %v4277_v7  ;;  %v12679_v7 = vld [vmem:[#allocation18 + $0x84] ss:$16 sps:$4 sm:$0xff]  }
 0xb16   :  { %v11024_v40 = vpop.eup %11023 }
 0xb17   :  { %v4287_v6 = vmul.f32 %v11024_v40, %v11022_v39  ;;  %v12667_v39 = vld [vmem:[#allocation18 + $0xa4] ss:$16 sps:$4 sm:$0xff]   ;;  %v12669_v40 = vld [vmem:[#allocation18 + $0xac] ss:$16 sps:$4 sm:$0xff]  }
 0xb18   :  { %v11026_v52 = vpop.eup %11025 }
 0xb19   :  { %v4286_v12 = vmul.f32 %v11026_v52, %v12536_v13  ;;  %v11028_v28 = vpop.eup %11027  ;;  %v12673_v52 = vld [vmem:[#allocation18 + $0xa8] ss:$16 sps:$4 sm:$0xff]  }
 0xb1b   :  { %v12586_v49 = vadd.f32 %v4287_v6, %v4286_v12  ;;  %v12671_v6 = vld [vmem:[#allocation18 + $0xa0] ss:$16 sps:$4 sm:$0xff]   ;;  %v12681_v12 = vld [vmem:[#allocation18 + $0x8c] ss:$16 sps:$4 sm:$0xff]  }
 0xb1d   :  { %11029 = vtanh.f32 %v12586_v49 }
 0xb2a   :  { %v11030_v20 = vpop.eup %11029 }
 0xb2b   :  { %v12589_v8 = vmul.f32 %v11030_v20, %v11028_v28  ;;  %v12685_v28 = vld [vmem:[#allocation18 + $0x88] ss:$16 sps:$4 sm:$0xff]   ;;  %v12689_v20 = vld [vmem:[#allocation18 + $0x64] ss:$16 sps:$4 sm:$0xff]  }
 0xb2d   :  { %v4299_v23 = vpack.c.bf16 %v12589_v8, %v12589_v8 }
 0xb2f   :  { %4525 = vmatmul.mubr.bf16.vlgmr.msra.gmra.mxu0 %v4299_v23  ;;  %4566 = vmatmul.mubr.bf16.vlgmr.msra.gmra.mxu1 %v4299_v23  ;;  %v12691_v23 = vld [vmem:[#allocation18 + $0x6c] ss:$16 sps:$4 sm:$0xff]  }
 0xb30   :  { %4805 = vmatpush1.bf16.msra.mxu0 %v12318_v21  ;;  %4846 = vmatpush1.bf16.msra.mxu1 %v12320_v54  ;;  %v3535_v21 = vadd.f32 %v12469_v2, %v12513_v26 }
 0xb31   :  { %4806 = vmatprep.subr.bf16.mxu0 %v12326_v53  ;;  %4847 = vmatprep.subr.bf16.mxu1 %v12328_v55  ;;  %v3537_v55 = vadd.f32 %v12473_v24, %v12520_v45 }
 0xb32   :  { %4836 = vmatprep.mubr.bf16.mxu0 %v13644_v18  ;;  %4877 = vmatprep.mubr.bf16.mxu1 %v13644_v18 }
 0xb34   :  { %4807 = vmatpush1.bf16.msra.mxu0 %v12330_v1  ;;  %4848 = vmatpush1.bf16.msra.mxu1 %v12332_v47 }
 0xb35   :  { %4808 = vmatprep.subr.bf16.mxu0 %v12340_v30  ;;  %4849 = vmatprep.subr.bf16.mxu1 %v12342_v57 }
 0xb38   :  { %4809 = vmatpush1.bf16.msra.mxu0 %v12338_v56  ;;  %4850 = vmatpush1.bf16.msra.mxu1 %v12345_v58 }
 0xb39   :  { %4810 = vmatprep.subr.bf16.mxu0 %v12352_v59  ;;  %4851 = vmatprep.subr.bf16.mxu1 %v12354_v60 }
 0xb3c   :  { %4811 = vmatpush1.bf16.msra.mxu0 %v12350_v50  ;;  %4852 = vmatpush1.bf16.msra.mxu1 %v12357_v62 }
 0xb3d   :  { %4812 = vmatprep.subr.bf16.mxu0 %v12364_v31  ;;  %4853 = vmatprep.subr.bf16.mxu1 %v12366_v34 }
 0xb40   :  { %4813 = vmatpush1.bf16.msra.mxu0 %v12362_v9  ;;  %4854 = vmatpush1.bf16.msra.mxu1 %v12369_v36  ;;  %v13690_v9 = vld [vmem:[#allocation40_spill] sm:$0xff]  ;;  %v13691_v36 = vld [vmem:[#allocation41_spill] sm:$0xff] }
 0xb41   :  { %4814 = vmatprep.subr.bf16.mxu0 %v12376_v44  ;;  %4855 = vmatprep.subr.bf16.mxu1 %v12380_v17  ;;  %v3608_v31 = vadd.f32 %v13690_v9, %v12529_v3  ;;  %v13692_v9 = vld [vmem:[#allocation37_spill] sm:$0xff] }
 0xb44   :  { %4815 = vmatpush1.bf16.msra.mxu0 %v12374_v29  ;;  %4856 = vmatpush1.bf16.msra.mxu1 %v12378_v32  ;;  %v3610_v29 = vadd.f32 %v13691_v36, %v12533_v5 }
 0xb45   :  { %4816 = vmatprep.subr.bf16.mxu0 %v12382_v27  ;;  %4857 = vmatprep.subr.bf16.mxu1 %v12392_v11 }
 0xb48   :  { %4817 = vmatpush1.bf16.msra.mxu0 %v12388_v51  ;;  %4858 = vmatpush1.bf16.msra.mxu1 %v12390_v38 }
 0xb49   :  { %4818 = vmatprep.subr.bf16.mxu0 %v12395_v42  ;;  %4859 = vmatprep.subr.bf16.mxu1 %v12397_v46 }
 0xb4c   :  { %4819 = vmatpush1.bf16.msra.mxu0 %v12402_v37  ;;  %4860 = vmatpush1.bf16.msra.mxu1 %v12404_v63 }
 0xb4d   :  { %5116 = vmatprep.subr.bf16.mxu0 %v12643_v43  ;;  %5157 = vmatprep.subr.bf16.mxu1 %v12645_v25 }
 0xbef   :  { %v4526_v54 = vpop.f32.mrf.mxu0  ;;  %v4567_v53 = vpop.f32.mrf.mxu1 }
 0xbf0   :  { %v4574_v1 = vadd.f32 %v4526_v54, %v3535_v21  ;;  %v4576_v34 = vadd.f32 %v4567_v53, %v3608_v31  ;;  %v12695_v21 = vld [vmem:[#allocation18 + $0x60] ss:$16 sps:$4 sm:$0xff]   ;;  %v12697_v54 = vld [vmem:[#allocation18 + $0x68] ss:$16 sps:$4 sm:$0xff]   ;;  %v12701_v53 = vld [vmem:[#allocation18 + $0x44] ss:$16 sps:$4 sm:$0xff]   ;;  %v3539_v31 = vadd.f32 %v13692_v9, %v12513_v26 }
 0xbf1   :  { %v4528_v47 = vpop.f32.mrf.mxu0  ;;  %v4569_v56 = vpop.f32.mrf.mxu1 }
 0xbf2   :  { %v9837_v30 = vmul.f32 -1.442695, %v4574_v1  ;;  %v4575_v57 = vadd.f32 %v4528_v47, %v3537_v55  ;;  %v9839_v44 = vmul.f32 -1.442695, %v4576_v34  ;;  %v4577_v32 = vadd.f32 %v4569_v56, %v3610_v29  ;;  %v12703_v55 = vld [vmem:[#allocation18 + $0x4c] ss:$16 sps:$4 sm:$0xff]  }
 0xbf3   :  { %v4530_v58 = vpop.f32.mrf.mxu0  ;;  %v4571_v50 = vpop.f32.mrf.mxu1  ;;  %v12707_v1 = vld [vmem:[#allocation18 + $0x40] ss:$16 sps:$4 sm:$0xff]   ;;  %v12709_v47 = vld [vmem:[#allocation18 + $0x48] ss:$16 sps:$4 sm:$0xff]   ;;  %v12713_v56 = vld [vmem:[#allocation18 + $0x24] ss:$16 sps:$4 sm:$0xff]  }
 0xbf4   :  { %11031 = vpow2.f32 %v9837_v30  ;;  %v9838_v59 = vmul.f32 -1.442695, %v4575_v57  ;;  %v12715_v30 = vld [vmem:[#allocation18 + $0x2c] ss:$16 sps:$4 sm:$0xff]   ;;  %v12719_v57 = vld [vmem:[#allocation18 + $0x20] ss:$16 sps:$4 sm:$0xff]  }
 0xbf5   :  { %v4531_v60 = vpop.f32.mrf.mxu0  ;;  %v4572_v62 = vpop.f32.mrf.mxu1  ;;  %v12721_v58 = vld [vmem:[#allocation18 + $0x28] ss:$16 sps:$4 sm:$0xff]   ;;  %v12725_v50 = vld [vmem:[#allocation18 + $0x4] ss:$16 sps:$4 sm:$0xff]  }
 0xbf6   :  { %11033 = vpow2.f32 %v9838_v59  ;;  %v12727_v59 = vld [vmem:[#allocation18 + $0xc] ss:$16 sps:$4 sm:$0xff]   ;;  %v12731_v60 = vld [vmem:[#allocation18] ss:$16 sps:$4 sm:$0xff]   ;;  %v12733_v62 = vld [vmem:[#allocation18 + $0x8] ss:$16 sps:$4 sm:$0xff]  }
 0xbf7   :  { %11035 = vpow2.f32 %v9839_v44  ;;  %v13693_v29 = vld [vmem:[#allocation42_spill] sm:$0xff] }
 0xbf8   :  { %11037 = vtanh.f32 %v4577_v32  ;;  %v3541_v44 = vadd.f32 %v13693_v29, %v12520_v45 }
 0xc01   :  { %v11032_v17 = vpop.eup %11031 }
 0xc02   :  { %v4587_v27 = vadd.f32 1.0, %v11032_v17 }
 0xc03   :  { %v11034_v51 = vpop.eup %11033 }
 0xc04   :  { %11039 = vrcp.f32 %v4587_v27  ;;  %v4588_v38 = vadd.f32 1.0, %v11034_v51  ;;  %v11036_v11 = vpop.eup %11035 }
 0xc05   :  { %v11038_v42 = vpop.eup %11037  ;;  %v4589_v2 = vadd.f32 1.0, %v11036_v11 }
 0xc06   :  { %11041 = vrcp.f32 %v4588_v38 }
 0xc07   :  { %11043 = vrcp.f32 %v4589_v2  ;;  %v13694_v2 = vld [vmem:[#allocation36_spill] sm:$0xff] }
 0xc11   :  { %v11040_v46 = vpop.eup %11039 }
 0xc12   :  { %v4599_v37 = vmul.f32 %v11040_v46, %v11038_v42 }
 0xc13   :  { %v11042_v63 = vpop.eup %11041 }
 0xc14   :  { %v4598_v24 = vmul.f32 %v11042_v63, %v12586_v49  ;;  %v11044_v61 = vpop.eup %11043  ;;  %v12683_v49 = vld [vmem:[#allocation18 + $0x80] ss:$16 sps:$4 sm:$0xff]  }
 0xc16   :  { %v12634_v13 = vadd.f32 %v4599_v37, %v4598_v24  ;;  %v3612_v24 = vadd.f32 %v13694_v2, %v12529_v3 }
 0xc18   :  { %11045 = vtanh.f32 %v12634_v13 }
 0xc25   :  { %v11046_v15 = vpop.eup %11045 }
 0xc26   :  { %v12637_v41 = vmul.f32 %v11046_v15, %v11044_v61  ;;  %v13695_v15 = vld [vmem:[#allocation43_spill] sm:$0xff] }
 0xc28   :  { %v4611_v10 = vpack.c.bf16 %v12637_v41, %v12637_v41 }
 0xc2a   :  { %4837 = vmatmul.mubr.bf16.vlgmr.msra.gmra.mxu0 %v4611_v10  ;;  %4878 = vmatmul.mubr.bf16.vlgmr.msra.gmra.mxu1 %v4611_v10  ;;  %v3614_v10 = vadd.f32 %v13695_v15, %v12533_v5 }
 0xc2b   :  { %5148 = vmatprep.mubr.bf16.mxu0 %v13644_v18  ;;  %5189 = vmatprep.mubr.bf16.mxu1 %v13644_v18 }
 0xc2c   :  { %5117 = vmatpush1.bf16.msra.mxu0 %v12647_v4  ;;  %5158 = vmatpush1.bf16.msra.mxu1 %v12649_v19 }
 0xc2d   :  { %5118 = vmatprep.subr.bf16.mxu0 %v12655_v48  ;;  %5159 = vmatprep.subr.bf16.mxu1 %v12657_v22 }
 0xc30   :  { %5119 = vmatpush1.bf16.msra.mxu0 %v12659_v33  ;;  %5160 = vmatpush1.bf16.msra.mxu1 %v12661_v16 }
 0xc31   :  { %5120 = vmatprep.subr.bf16.mxu0 %v12667_v39  ;;  %5161 = vmatprep.subr.bf16.mxu1 %v12669_v40 }
 0xc34   :  { %5121 = vmatpush1.bf16.msra.mxu0 %v12671_v6  ;;  %5162 = vmatpush1.bf16.msra.mxu1 %v12673_v52 }
 0xc35   :  { %5122 = vmatprep.subr.bf16.mxu0 %v12679_v7  ;;  %5163 = vmatprep.subr.bf16.mxu1 %v12681_v12 }
 0xc38   :  { %5123 = vmatpush1.bf16.msra.mxu0 %v12683_v49  ;;  %5164 = vmatpush1.bf16.msra.mxu1 %v12685_v28 }
 0xc39   :  { %5124 = vmatprep.subr.bf16.mxu0 %v12689_v20  ;;  %5165 = vmatprep.subr.bf16.mxu1 %v12691_v23 }
 0xc3c   :  { %5125 = vmatpush1.bf16.msra.mxu0 %v12695_v21  ;;  %5166 = vmatpush1.bf16.msra.mxu1 %v12697_v54 }
 0xc3d   :  { %5126 = vmatprep.subr.bf16.mxu0 %v12701_v53  ;;  %5167 = vmatprep.subr.bf16.mxu1 %v12703_v55 }
 0xc40   :  { %5127 = vmatpush1.bf16.msra.mxu0 %v12707_v1  ;;  %5168 = vmatpush1.bf16.msra.mxu1 %v12709_v47 }
 0xc41   :  { %5128 = vmatprep.subr.bf16.mxu0 %v12713_v56  ;;  %5169 = vmatprep.subr.bf16.mxu1 %v12715_v30 }
 0xc44   :  { %5129 = vmatpush1.bf16.msra.mxu0 %v12719_v57  ;;  %5170 = vmatpush1.bf16.msra.mxu1 %v12721_v58 }
 0xc45   :  { %5130 = vmatprep.subr.bf16.mxu0 %v12725_v50  ;;  %5171 = vmatprep.subr.bf16.mxu1 %v12727_v59 }
 0xc48   :  { %5131 = vmatpush1.bf16.msra.mxu0 %v12731_v60  ;;  %5172 = vmatpush1.bf16.msra.mxu1 %v12733_v62 }
 0xc49   :  { %5428 = vmatprep.subr.bf16.mxu0 %v12643_v43  ;;  %5469 = vmatprep.subr.bf16.mxu1 %v12645_v25 }
 0xcea   :  { %v4838_v34 = vpop.f32.mrf.mxu0  ;;  %v4879_v36 = vpop.f32.mrf.mxu1 }
 0xceb   :  { %v4886_v32 = vadd.f32 %v4838_v34, %v3539_v31  ;;  %v4888_v61 = vadd.f32 %v4879_v36, %v3612_v24 }
 0xcec   :  { %v4840_v17 = vpop.f32.mrf.mxu0  ;;  %v4881_v27 = vpop.f32.mrf.mxu1 }
 0xced   :  { %v9872_v51 = vmul.f32 -1.442695, %v4886_v32  ;;  %v4887_v38 = vadd.f32 %v4840_v17, %v3541_v44  ;;  %v9874_v9 = vmul.f32 -1.442695, %v4888_v61  ;;  %v4889_v31 = vadd.f32 %v4881_v27, %v3614_v10 }
 0xcee   :  { %v4842_v11 = vpop.f32.mrf.mxu0  ;;  %v4883_v42 = vpop.f32.mrf.mxu1 }
 0xcef   :  { %11047 = vpow2.f32 %v9872_v51  ;;  %v9873_v46 = vmul.f32 -1.442695, %v4887_v38 }
 0xcf0   :  { %v4843_v37 = vpop.f32.mrf.mxu0  ;;  %v4884_v63 = vpop.f32.mrf.mxu1 }
 0xcf1   :  { %11049 = vpow2.f32 %v9873_v46 }
 0xcf2   :  { %11051 = vpow2.f32 %v9874_v9  ;;  %v13697_v9 = vld [vmem:[#allocation52_spill] sm:$0xff] }
 0xcf3   :  { %11053 = vtanh.f32 %v4889_v31  ;;  %v3547_v31 = vadd.f32 %v13697_v9, %v12520_v45 }
 0xcfc   :  { %v11048_v34 = vpop.eup %11047 }
 0xcfd   :  { %v4899_v29 = vadd.f32 1.0, %v11048_v34 }
 0xcfe   :  { %v11050_v44 = vpop.eup %11049 }
 0xcff   :  { %11055 = vrcp.f32 %v4899_v29  ;;  %v4900_v32 = vadd.f32 1.0, %v11050_v44  ;;  %v11052_v17 = vpop.eup %11051 }
 0xd00   :  { %v11054_v51 = vpop.eup %11053  ;;  %v4901_v46 = vadd.f32 1.0, %v11052_v17 }
 0xd01   :  { %11057 = vrcp.f32 %v4900_v32 }
 0xd02   :  { %11059 = vrcp.f32 %v4901_v46 }
 0xd0c   :  { %v11056_v38 = vpop.eup %11055 }
 0xd0d   :  { %v4911_v11 = vmul.f32 %v11056_v38, %v11054_v51 }
 0xd0e   :  { %v11058_v42 = vpop.eup %11057 }
 0xd0f   :  { %v4910_v36 = vmul.f32 %v11058_v42, %v12634_v13  ;;  %v11060_v27 = vpop.eup %11059  ;;  %v13696_v13 = vld [vmem:[#allocation50_spill] sm:$0xff] }
 0xd10   :  { %v3545_v61 = vadd.f32 %v13696_v13, %v12513_v26 }
 0xd11   :  { %v12750_v37 = vadd.f32 %v4911_v11, %v4910_v36  ;;  %v13698_v36 = vld [vmem:[#allocation51_spill] sm:$0xff] }
 0xd13   :  { %11061 = vtanh.f32 %v12750_v37 }
 0xd20   :  { %v11062_v63 = vpop.eup %11061 }
 0xd21   :  { %v12753_v2 = vmul.f32 %v11062_v63, %v11060_v27  ;;  %v3618_v27 = vadd.f32 %v13698_v36, %v12529_v3 }
 0xd23   :  { %v4923_v24 = vpack.c.bf16 %v12753_v2, %v12753_v2 }
 0xd25   :  { %5149 = vmatmul.mubr.bf16.vlgmr.msra.gmra.mxu0 %v4923_v24  ;;  %5190 = vmatmul.mubr.bf16.vlgmr.msra.gmra.mxu1 %v4923_v24  ;;  %v13699_v24 = vld [vmem:[#allocation53_spill] sm:$0xff] }
 0xd26   :  { %5429 = vmatpush1.bf16.msra.mxu0 %v12647_v4  ;;  %5470 = vmatpush1.bf16.msra.mxu1 %v12649_v19  ;;  %v3620_v13 = vadd.f32 %v13699_v24, %v12533_v5 }
 0xd27   :  { %5430 = vmatprep.subr.bf16.mxu0 %v12655_v48  ;;  %5471 = vmatprep.subr.bf16.mxu1 %v12657_v22 }
 0xd28   :  { %5460 = vmatprep.mubr.bf16.mxu0 %v13644_v18  ;;  %5501 = vmatprep.mubr.bf16.mxu1 %v13644_v18 }
 0xd2a   :  { %5431 = vmatpush1.bf16.msra.mxu0 %v12659_v33  ;;  %5472 = vmatpush1.bf16.msra.mxu1 %v12661_v16 }
 0xd2b   :  { %5432 = vmatprep.subr.bf16.mxu0 %v12667_v39  ;;  %5473 = vmatprep.subr.bf16.mxu1 %v12669_v40 }
 0xd2e   :  { %5433 = vmatpush1.bf16.msra.mxu0 %v12671_v6  ;;  %5474 = vmatpush1.bf16.msra.mxu1 %v12673_v52 }
 0xd2f   :  { %5434 = vmatprep.subr.bf16.mxu0 %v12679_v7  ;;  %5475 = vmatprep.subr.bf16.mxu1 %v12681_v12 }
 0xd32   :  { %5435 = vmatpush1.bf16.msra.mxu0 %v12683_v49  ;;  %5476 = vmatpush1.bf16.msra.mxu1 %v12685_v28 }
 0xd33   :  { %5436 = vmatprep.subr.bf16.mxu0 %v12689_v20  ;;  %5477 = vmatprep.subr.bf16.mxu1 %v12691_v23 }
 0xd36   :  { %5437 = vmatpush1.bf16.msra.mxu0 %v12695_v21  ;;  %5478 = vmatpush1.bf16.msra.mxu1 %v12697_v54 }
 0xd37   :  { %5438 = vmatprep.subr.bf16.mxu0 %v12701_v53  ;;  %5479 = vmatprep.subr.bf16.mxu1 %v12703_v55 }
 0xd3a   :  { %5439 = vmatpush1.bf16.msra.mxu0 %v12707_v1  ;;  %5480 = vmatpush1.bf16.msra.mxu1 %v12709_v47 }
 0xd3b   :  { %5440 = vmatprep.subr.bf16.mxu0 %v12713_v56  ;;  %5481 = vmatprep.subr.bf16.mxu1 %v12715_v30 }
 0xd3e   :  { %5441 = vmatpush1.bf16.msra.mxu0 %v12719_v57  ;;  %5482 = vmatpush1.bf16.msra.mxu1 %v12721_v58 }
 0xd3f   :  { %5442 = vmatprep.subr.bf16.mxu0 %v12725_v50  ;;  %5483 = vmatprep.subr.bf16.mxu1 %v12727_v59 }
 0xd42   :  { %5443 = vmatpush1.bf16.msra.mxu0 %v12731_v60  ;;  %5484 = vmatpush1.bf16.msra.mxu1 %v12733_v62 }
 0xd43   :  { %5740 = vmatprep.subr.bf16.mxu0 %v12643_v43  ;;  %5781 = vmatprep.subr.bf16.mxu1 %v12645_v25 }
 0xde5   :  { %v5150_v15 = vpop.f32.mrf.mxu0  ;;  %v5191_v10 = vpop.f32.mrf.mxu1 }
 0xde6   :  { %v5198_v34 = vadd.f32 %v5150_v15, %v3545_v61  ;;  %v5200_v63 = vadd.f32 %v5191_v10, %v3618_v27 }
 0xde7   :  { %v5152_v29 = vpop.f32.mrf.mxu0  ;;  %v5193_v44 = vpop.f32.mrf.mxu1 }
 0xde8   :  { %v9907_v32 = vmul.f32 -1.442695, %v5198_v34  ;;  %v5199_v17 = vadd.f32 %v5152_v29, %v3547_v31  ;;  %v9909_v9 = vmul.f32 -1.442695, %v5200_v63  ;;  %v5201_v61 = vadd.f32 %v5193_v44, %v3620_v13  ;;  %v13701_v13 = vld [vmem:[#allocation56_spill] sm:$0xff] }
 0xde9   :  { %v5154_v51 = vpop.f32.mrf.mxu0  ;;  %v5195_v38 = vpop.f32.mrf.mxu1 }
 0xdea   :  { %11063 = vpow2.f32 %v9907_v32  ;;  %v9908_v11 = vmul.f32 -1.442695, %v5199_v17 }
 0xdeb   :  { %v5155_v42 = vpop.f32.mrf.mxu0  ;;  %v5196_v46 = vpop.f32.mrf.mxu1 }
 0xdec   :  { %11065 = vpow2.f32 %v9908_v11 }
 0xded   :  { %11067 = vpow2.f32 %v9909_v9  ;;  %v3551_v9 = vadd.f32 %v13701_v13, %v12520_v45 }
 0xdee   :  { %11069 = vtanh.f32 %v5201_v61 }
 0xdf7   :  { %v11064_v15 = vpop.eup %11063 }
 0xdf8   :  { %v5211_v14 = vadd.f32 1.0, %v11064_v15 }
 0xdf9   :  { %v11066_v31 = vpop.eup %11065 }
 0xdfa   :  { %11071 = vrcp.f32 %v5211_v14  ;;  %v5212_v34 = vadd.f32 1.0, %v11066_v31  ;;  %v11068_v29 = vpop.eup %11067 }
 0xdfb   :  { %v11070_v32 = vpop.eup %11069  ;;  %v5213_v11 = vadd.f32 1.0, %v11068_v29 }
 0xdfc   :  { %11073 = vrcp.f32 %v5212_v34 }
 0xdfd   :  { %11075 = vrcp.f32 %v5213_v11 }
 0xe07   :  { %v11072_v17 = vpop.eup %11071 }
 0xe08   :  { %v5223_v51 = vmul.f32 %v11072_v17, %v11070_v32 }
 0xe09   :  { %v11074_v38 = vpop.eup %11073 }
 0xe0a   :  { %v5222_v10 = vmul.f32 %v11074_v38, %v12750_v37  ;;  %v11076_v44 = vpop.eup %11075  ;;  %v13700_v37 = vld [vmem:[#allocation54_spill] sm:$0xff] }
 0xe0b   :  { %v3549_v27 = vadd.f32 %v13700_v37, %v12513_v26 }
 0xe0c   :  { %v12800_v42 = vadd.f32 %v5223_v51, %v5222_v10 }
 0xe0e   :  { %11077 = vtanh.f32 %v12800_v42 }
 0xe1b   :  { %v11078_v46 = vpop.eup %11077 }
 0xe1c   :  { %v12803_v36 = vmul.f32 %v11078_v46, %v11076_v44  ;;  %v13703_v44 = vld [vmem:[#allocation57_spill] sm:$0xff] }
 0xe1d   :  { %v3624_v46 = vadd.f32 %v13703_v44, %v12533_v5 }
 0xe1e   :  { %v5235_v14 = vpack.c.bf16 %v12803_v36, %v12803_v36 }
 0xe20   :  { %5461 = vmatmul.mubr.bf16.vlgmr.msra.gmra.mxu0 %v5235_v14  ;;  %5502 = vmatmul.mubr.bf16.vlgmr.msra.gmra.mxu1 %v5235_v14 }
 0xe21   :  { %5741 = vmatpush1.bf16.msra.mxu0 %v12647_v4  ;;  %5782 = vmatpush1.bf16.msra.mxu1 %v12649_v19 }
 0xe22   :  { %5742 = vmatprep.subr.bf16.mxu0 %v12655_v48  ;;  %5783 = vmatprep.subr.bf16.mxu1 %v12657_v22 }
 0xe23   :  { %5772 = vmatprep.mubr.bf16.mxu0 %v13644_v18  ;;  %5813 = vmatprep.mubr.bf16.mxu1 %v13644_v18 }
 0xe25   :  { %5743 = vmatpush1.bf16.msra.mxu0 %v12659_v33  ;;  %5784 = vmatpush1.bf16.msra.mxu1 %v12661_v16 }
 0xe26   :  { %5744 = vmatprep.subr.bf16.mxu0 %v12667_v39  ;;  %5785 = vmatprep.subr.bf16.mxu1 %v12669_v40 }
 0xe29   :  { %5745 = vmatpush1.bf16.msra.mxu0 %v12671_v6  ;;  %5786 = vmatpush1.bf16.msra.mxu1 %v12673_v52 }
 0xe2a   :  { %5746 = vmatprep.subr.bf16.mxu0 %v12679_v7  ;;  %5787 = vmatprep.subr.bf16.mxu1 %v12681_v12 }
 0xe2d   :  { %5747 = vmatpush1.bf16.msra.mxu0 %v12683_v49  ;;  %5788 = vmatpush1.bf16.msra.mxu1 %v12685_v28 }
 0xe2e   :  { %5748 = vmatprep.subr.bf16.mxu0 %v12689_v20  ;;  %5789 = vmatprep.subr.bf16.mxu1 %v12691_v23 }
 0xe31   :  { %5749 = vmatpush1.bf16.msra.mxu0 %v12695_v21  ;;  %5790 = vmatpush1.bf16.msra.mxu1 %v12697_v54 }
 0xe32   :  { %5750 = vmatprep.subr.bf16.mxu0 %v12701_v53  ;;  %5791 = vmatprep.subr.bf16.mxu1 %v12703_v55 }
 0xe35   :  { %5751 = vmatpush1.bf16.msra.mxu0 %v12707_v1  ;;  %5792 = vmatpush1.bf16.msra.mxu1 %v12709_v47 }
 0xe36   :  { %5752 = vmatprep.subr.bf16.mxu0 %v12713_v56  ;;  %5793 = vmatprep.subr.bf16.mxu1 %v12715_v30 }
 0xe39   :  { %5753 = vmatpush1.bf16.msra.mxu0 %v12719_v57  ;;  %5794 = vmatpush1.bf16.msra.mxu1 %v12721_v58 }
 0xe3a   :  { %5754 = vmatprep.subr.bf16.mxu0 %v12725_v50  ;;  %5795 = vmatprep.subr.bf16.mxu1 %v12727_v59 }
 0xe3d   :  { %5755 = vmatpush1.bf16.msra.mxu0 %v12731_v60  ;;  %5796 = vmatpush1.bf16.msra.mxu1 %v12733_v62 }
 0xe3e   :  { %6052 = vmatprep.subr.bf16.mxu0 %v12643_v43  ;;  %6093 = vmatprep.subr.bf16.mxu1 %v12645_v25  ;;  %v13702_v25 = vld [vmem:[#allocation55_spill] sm:$0xff] }
 0xe3f   :  { %v3622_v11 = vadd.f32 %v13702_v25, %v12529_v3 }
 0xee0   :  { %v5462_v63 = vpop.f32.mrf.mxu0  ;;  %v5503_v24 = vpop.f32.mrf.mxu1 }
 0xee1   :  { %v5510_v61 = vadd.f32 %v5462_v63, %v3549_v27  ;;  %v5512_v10 = vadd.f32 %v5503_v24, %v3622_v11 }
 0xee2   :  { %v5464_v15 = vpop.f32.mrf.mxu0  ;;  %v5505_v31 = vpop.f32.mrf.mxu1 }
 0xee3   :  { %v9942_v34 = vmul.f32 -1.442695, %v5510_v61  ;;  %v5511_v29 = vadd.f32 %v5464_v15, %v3551_v9  ;;  %v9944_v14 = vmul.f32 -1.442695, %v5512_v10  ;;  %v5513_v27 = vadd.f32 %v5505_v31, %v3624_v46 }
 0xee4   :  { %v5466_v32 = vpop.f32.mrf.mxu0  ;;  %v5507_v17 = vpop.f32.mrf.mxu1 }
 0xee5   :  { %11079 = vpow2.f32 %v9942_v34  ;;  %v9943_v51 = vmul.f32 -1.442695, %v5511_v29 }
 0xee6   :  { %v5467_v43 = vpop.f32.mrf.mxu0  ;;  %v5508_v38 = vpop.f32.mrf.mxu1 }
 0xee7   :  { %11081 = vpow2.f32 %v9943_v51 }
 0xee8   :  { %11083 = vpow2.f32 %v9944_v14 }
 0xef2   :  { %v11080_v37 = vpop.eup %11079 }
 0xef3   :  { %v5523_v63 = vadd.f32 1.0, %v11080_v37 }
 0xef4   :  { %v11082_v13 = vpop.eup %11081 }
 0xef5   :  { %11085 = vrcp.f32 %v5523_v63  ;;  %v5524_v9 = vadd.f32 1.0, %v11082_v13  ;;  %v11084_v61 = vpop.eup %11083 }
 0xef6   :  { %11087 = vtanh.f32 %v5513_v27  ;;  %v5525_v32 = vadd.f32 1.0, %v11084_v61  ;;  %v10706_v61 = vld [vmem:[#allocation19 + $0xe8] ss:$16 sps:$4 sm:$0xff]  }
 0xef7   :  { %11089 = vrcp.f32 %v5524_v9  ;;  %v10703_v9 = vld [vmem:[#allocation19 + $0xe0] ss:$16 sps:$4 sm:$0xff]  }
 0xef8   :  { %11091 = vrcp.f32 %v5525_v32  ;;  %v10709_v32 = vld [vmem:[#allocation19 + $0xc0] ss:$16 sps:$4 sm:$0xff]  }
 0xf02   :  { %v11086_v15 = vpop.eup %11085 }
 0xf03   :  { %v11088_v34 = vpop.eup %11087 }
 0xf04   :  { %v11090_v29 = vpop.eup %11089  ;;  %v5535_v17 = vmul.f32 %v11088_v34, %v11086_v15  ;;  %v10711_v34 = vld [vmem:[#allocation19 + $0xc4] ss:$16 sps:$4 sm:$0xff]  }
 0xf05   :  { %v5534_v24 = vmul.f32 %v11090_v29, %v12800_v42  ;;  %v11092_v31 = vpop.eup %11091  ;;  %v10714_v29 = vld [vmem:[#allocation19 + $0xcc] ss:$16 sps:$4 sm:$0xff]  }
 0xf07   :  { %v12850_v51 = vadd.f32 %v5535_v17, %v5534_v24  ;;  %v10712_v24 = vld [vmem:[#allocation19 + $0xc8] ss:$16 sps:$4 sm:$0xff]   ;;  %v10717_v17 = vld [vmem:[#allocation19 + $0xa4] ss:$16 sps:$4 sm:$0xff]  }
 0xf09   :  { %11093 = vtanh.f32 %v12850_v51 }
 0xf16   :  { %v11094_v43 = vpop.eup %11093 }
 0xf17   :  { %v12853_v38 = vmul.f32 %v11094_v43, %v11092_v31  ;;  %v10715_v31 = vld [vmem:[#allocation19 + $0xa0] ss:$16 sps:$4 sm:$0xff]   ;;  %v10718_v43 = vld [vmem:[#allocation19 + $0xa8] ss:$16 sps:$4 sm:$0xff]  }
 0xf19   :  { %v5547_v25 = vpack.c.bf16 %v12853_v38, %v12853_v38 }
 0xf1b   :  { %5773 = vmatmul.mubr.bf16.vlgmr.msra.gmra.mxu0 %v5547_v25  ;;  %5814 = vmatmul.mubr.bf16.vlgmr.msra.gmra.mxu1 %v5547_v25  ;;  %v10723_v25 = vld [vmem:[#allocation19 + $0x84] ss:$16 sps:$4 sm:$0xff]  }
 0xf1c   :  { %6053 = vmatpush1.bf16.msra.mxu0 %v12647_v4  ;;  %6094 = vmatpush1.bf16.msra.mxu1 %v12649_v19  ;;  %v10705_v4 = vld [vmem:[#allocation19 + $0xe4] ss:$16 sps:$4 sm:$0xff]   ;;  %v10708_v19 = vld [vmem:[#allocation19 + $0xec] ss:$16 sps:$4 sm:$0xff]  }
 0xf1d   :  { %6054 = vmatprep.subr.bf16.mxu0 %v12655_v48  ;;  %6095 = vmatprep.subr.bf16.mxu1 %v12657_v22  ;;  %v13704_v48 = vld [vmem:[#allocation58_spill] sm:$0xff] }
 0xf1e   :  { %6084 = vmatprep.mubr.bf16.mxu0 %v13644_v18  ;;  %6125 = vmatprep.mubr.bf16.mxu1 %v13644_v18  ;;  %v3555_v22 = vadd.f32 %v13704_v48, %v12513_v26  ;;  %v10724_v48 = vld [vmem:[#allocation19 + $0x88] ss:$16 sps:$4 sm:$0xff]  }
 0xf20   :  { %6055 = vmatpush1.bf16.msra.mxu0 %v12659_v33  ;;  %6096 = vmatpush1.bf16.msra.mxu1 %v12661_v16 }
 0xf21   :  { %6056 = vmatprep.subr.bf16.mxu0 %v12667_v39  ;;  %6097 = vmatprep.subr.bf16.mxu1 %v12669_v40  ;;  %v13705_v39 = vld [vmem:[#allocation60_spill] sm:$0xff] }
 0xf22   :  { %v3557_v40 = vadd.f32 %v13705_v39, %v12520_v45  ;;  %v10730_v39 = vld [vmem:[#allocation19 + $0x68] ss:$16 sps:$4 sm:$0xff]  }
 0xf24   :  { %6057 = vmatpush1.bf16.msra.mxu0 %v12671_v6  ;;  %6098 = vmatpush1.bf16.msra.mxu1 %v12673_v52 }
 0xf25   :  { %6058 = vmatprep.subr.bf16.mxu0 %v12679_v7  ;;  %6099 = vmatprep.subr.bf16.mxu1 %v12681_v12 }
 0xf28   :  { %6059 = vmatpush1.bf16.msra.mxu0 %v12683_v49  ;;  %6100 = vmatpush1.bf16.msra.mxu1 %v12685_v28 }
 0xf29   :  { %6060 = vmatprep.subr.bf16.mxu0 %v12689_v20  ;;  %6101 = vmatprep.subr.bf16.mxu1 %v12691_v23 }
 0xf2c   :  { %6061 = vmatpush1.bf16.msra.mxu0 %v12695_v21  ;;  %6102 = vmatpush1.bf16.msra.mxu1 %v12697_v54 }
 0xf2d   :  { %6062 = vmatprep.subr.bf16.mxu0 %v12701_v53  ;;  %6103 = vmatprep.subr.bf16.mxu1 %v12703_v55  ;;  %v13706_v53 = vld [vmem:[#allocation59_spill] sm:$0xff] }
 0xf2e   :  { %v3628_v55 = vadd.f32 %v13706_v53, %v12529_v3  ;;  %v10748_v53 = vld [vmem:[#allocation19 + $0x8] ss:$16 sps:$4 sm:$0xff]  }
 0xf30   :  { %6063 = vmatpush1.bf16.msra.mxu0 %v12707_v1  ;;  %6104 = vmatpush1.bf16.msra.mxu1 %v12709_v47  ;;  %v13707_v47 = vld [vmem:[#allocation61_spill] sm:$0xff] }
 0xf31   :  { %6064 = vmatprep.subr.bf16.mxu0 %v12713_v56  ;;  %6105 = vmatprep.subr.bf16.mxu1 %v12715_v30  ;;  %v3630_v56 = vadd.f32 %v13707_v47, %v12533_v5  ;;  %v13709_v47 = vld [vmem:[#allocation44_spill] sm:$0xff] }
 0xf34   :  { %6065 = vmatpush1.bf16.msra.mxu0 %v12719_v57  ;;  %6106 = vmatpush1.bf16.msra.mxu1 %v12721_v58 }
 0xf35   :  { %6066 = vmatprep.subr.bf16.mxu0 %v12725_v50  ;;  %6107 = vmatprep.subr.bf16.mxu1 %v12727_v59 }
 0xf38   :  { %6067 = vmatpush1.bf16.msra.mxu0 %v12731_v60  ;;  %6108 = vmatpush1.bf16.msra.mxu1 %v12733_v62 }
 0xf39   :  { %6424 = vmatprep.subr.bf16.mxu0 %v10705_v4  ;;  %6497 = vmatprep.subr.bf16.mxu1 %v10708_v19  ;;  %v10726_v4 = vld [vmem:[#allocation19 + $0x8c] ss:$16 sps:$4 sm:$0xff]   ;;  %v10721_v19 = vld [vmem:[#allocation19 + $0x80] ss:$16 sps:$4 sm:$0xff]  }
 0xfdb   :  { %v5774_v33 = vpop.f32.mrf.mxu0  ;;  %v5815_v16 = vpop.f32.mrf.mxu1 }
 0xfdc   :  { %v5822_v6 = vadd.f32 %v5774_v33, %v3555_v22  ;;  %v5824_v1 = vadd.f32 %v5815_v16, %v3628_v55  ;;  %v10729_v22 = vld [vmem:[#allocation19 + $0x64] ss:$16 sps:$4 sm:$0xff]   ;;  %v10732_v33 = vld [vmem:[#allocation19 + $0x6c] ss:$16 sps:$4 sm:$0xff]   ;;  %v10727_v16 = vld [vmem:[#allocation19 + $0x60] ss:$16 sps:$4 sm:$0xff]  }
 0xfdd   :  { %v5776_v52 = vpop.f32.mrf.mxu0  ;;  %v5817_v7 = vpop.f32.mrf.mxu1  ;;  %v13708_v55 = vld [vmem:[#allocation45_spill] sm:$0xff] }
 0xfde   :  { %v9977_v12 = vmul.f32 -1.442695, %v5822_v6  ;;  %v5823_v49 = vadd.f32 %v5776_v52, %v3557_v40  ;;  %v9979_v30 = vmul.f32 -1.442695, %v5824_v1  ;;  %v5825_v57 = vadd.f32 %v5817_v7, %v3630_v56  ;;  %v10735_v40 = vld [vmem:[#allocation19 + $0x44] ss:$16 sps:$4 sm:$0xff]  }
 0xfdf   :  { %v5778_v28 = vpop.f32.mrf.mxu0  ;;  %v5819_v20 = vpop.f32.mrf.mxu1  ;;  %v10738_v6 = vld [vmem:[#allocation19 + $0x4c] ss:$16 sps:$4 sm:$0xff]   ;;  %v10733_v52 = vld [vmem:[#allocation19 + $0x40] ss:$16 sps:$4 sm:$0xff]   ;;  %v10736_v7 = vld [vmem:[#allocation19 + $0x48] ss:$16 sps:$4 sm:$0xff]   ;;  %v12909_v1 = vadd.f32 %v12589_v8, %v13708_v55  ;;  %v12913_v56 = vadd.f32 %v12539_v35, %v13709_v47 }
 0xfe0   :  { %11095 = vpow2.f32 %v9977_v12  ;;  %v9978_v23 = vmul.f32 -1.442695, %v5823_v49  ;;  %v10741_v12 = vld [vmem:[#allocation19 + $0x24] ss:$16 sps:$4 sm:$0xff]   ;;  %v10744_v49 = vld [vmem:[#allocation19 + $0x2c] ss:$16 sps:$4 sm:$0xff]  }
 0xfe1   :  { %v5779_v21 = vpop.f32.mrf.mxu0  ;;  %v5820_v54 = vpop.f32.mrf.mxu1  ;;  %v10739_v28 = vld [vmem:[#allocation19 + $0x20] ss:$16 sps:$4 sm:$0xff]   ;;  %v10742_v20 = vld [vmem:[#allocation19 + $0x28] ss:$16 sps:$4 sm:$0xff]  }
 0xfe2   :  { %11097 = vpow2.f32 %v9978_v23  ;;  %v10747_v23 = vld [vmem:[#allocation19 + $0x4] ss:$16 sps:$4 sm:$0xff]   ;;  %v10750_v21 = vld [vmem:[#allocation19 + $0xc] ss:$16 sps:$4 sm:$0xff]   ;;  %v10745_v54 = vld [vmem:[#allocation19] ss:$16 sps:$4 sm:$0xff]  }
 0xfe3   :  { %11099 = vpow2.f32 %v9979_v30  ;;  %v6206_v30 = vpack.c.bf16 %v12909_v1, %v12913_v56  ;;  %v13712_v8 = vld [vmem:[#allocation46_spill] sm:$0xff] }
 0xfe4   :  { %11101 = vtanh.f32 %v5825_v57  ;;  %v13710_v57 = vld [vmem:[#allocation47_spill] sm:$0xff] }
 0xfed   :  { %v11096_v58 = vpop.eup %11095 }
 0xfee   :  { %v5835_v50 = vadd.f32 1.0, %v11096_v58  ;;  %v12921_v58 = vadd.f32 %v12753_v2, %v13710_v57 }
 0xfef   :  { %v11098_v59 = vpop.eup %11097 }
 0xff0   :  { %11103 = vrcp.f32 %v5835_v50  ;;  %v5836_v60 = vadd.f32 1.0, %v11098_v59  ;;  %v11100_v62 = vpop.eup %11099  ;;  %13711 = vst [vmem:[#allocation38_spill] sm:$0xff] %v12921_v58  ;;  %v12925_v50 = vadd.f32 %v12637_v41, %v13712_v8  ;;  %v13714_v59 = vld [vmem:[#allocation49_spill] sm:$0xff] }
 0xff1   :  { %v11102_v42 = vpop.eup %11101  ;;  %v5837_v46 = vadd.f32 1.0, %v11100_v62  ;;  %v13716_v62 = vld [vmem:[#allocation48_spill] sm:$0xff] }
 0xff2   :  { %11105 = vrcp.f32 %v5836_v60  ;;  %13713 = vst [vmem:[#allocation40_spill] sm:$0xff] %v12925_v50  ;;  %v6207_v35 = vpack.c.bf16 %v12921_v58, %v12925_v50  ;;  %v12933_v60 = vadd.f32 %v12853_v38, %v13714_v59  ;;  %v12937_v2 = vadd.f32 %v12803_v36, %v13716_v62  ;;  %v12949_v38 = vld [vmem:[#allocation21 + $0xe8] ss:$16 sps:$4 sm:$0xff]   ;;  %v12955_v36 = vld [vmem:[#allocation21 + $0xc0] ss:$16 sps:$4 sm:$0xff]  }
 0xff3   :  { %11107 = vrcp.f32 %v5837_v46  ;;  %v12959_v46 = vld [vmem:[#allocation21 + $0xcc] ss:$16 sps:$4 sm:$0xff]  }
 0xff4   :  { %13715 = vst [vmem:[#allocation41_spill] sm:$0xff] %v12933_v60  ;;  %13717 = vst [vmem:[#allocation37_spill] sm:$0xff] %v12937_v2  ;;  %v6208_v41 = vpack.c.bf16 %v12933_v60, %v12937_v2  ;;  %v13720_v62 = vld [vmem:[#allocation63_spill] sm:$0xff] }
 0xffd   :  { %v11104_v11 = vpop.eup %11103 }
 0xffe   :  { %v5847_v10 = vmul.f32 %v11104_v11, %v11102_v42  ;;  %v12943_v42 = vld [vmem:[#allocation21 + $0xe4] ss:$16 sps:$4 sm:$0xff]   ;;  %v12945_v11 = vld [vmem:[#allocation21 + $0xec] ss:$16 sps:$4 sm:$0xff]  }
 0xfff   :  { %v11106_v44 = vpop.eup %11105 }
0x1000   :  { %v5846_v14 = vmul.f32 %v11106_v44, %v12850_v51  ;;  %v11108_v27 = vpop.eup %11107  ;;  %v10720_v51 = vld [vmem:[#allocation19 + $0xac] ss:$16 sps:$4 sm:$0xff]   ;;  %v12957_v44 = vld [vmem:[#allocation21 + $0xc4] ss:$16 sps:$4 sm:$0xff]  }
0x1002   :  { %v12898_v37 = vadd.f32 %v5847_v10, %v5846_v14  ;;  %v12947_v10 = vld [vmem:[#allocation21 + $0xe0] ss:$16 sps:$4 sm:$0xff]   ;;  %v12962_v14 = vld [vmem:[#allocation21 + $0xc8] ss:$16 sps:$4 sm:$0xff]  }
0x1004   :  { %11109 = vtanh.f32 %v12898_v37 }
0x1011   :  { %v11110_v63 = vpop.eup %11109 }
0x1012   :  { %v12901_v13 = vmul.f32 %v11110_v63, %v11108_v27  ;;  %v12967_v27 = vld [vmem:[#allocation21 + $0xa0] ss:$16 sps:$4 sm:$0xff]   ;;  %v12969_v63 = vld [vmem:[#allocation21 + $0xa4] ss:$16 sps:$4 sm:$0xff]  }
0x1014   :  { %v5859_v15 = vpack.c.bf16 %v12901_v13, %v12901_v13 }
0x1016   :  { %6085 = vmatmul.mubr.bf16.vlgmr.msra.gmra.mxu0 %v5859_v15  ;;  %6126 = vmatmul.mubr.bf16.vlgmr.msra.gmra.mxu1 %v5859_v15  ;;  %v12979_v15 = vld [vmem:[#allocation21 + $0x80] ss:$16 sps:$4 sm:$0xff]  }
0x1017   :  { %6425 = vmatpush1.bf16.msra.mxu0 %v10703_v9  ;;  %6498 = vmatpush1.bf16.msra.mxu1 %v10706_v61  ;;  %v12971_v9 = vld [vmem:[#allocation21 + $0xac] ss:$16 sps:$4 sm:$0xff]   ;;  %v12974_v61 = vld [vmem:[#allocation21 + $0xa8] ss:$16 sps:$4 sm:$0xff]  }
0x1018   :  { %6426 = vmatprep.subr.bf16.mxu0 %v10711_v34  ;;  %6499 = vmatprep.subr.bf16.mxu1 %v10714_v29  ;;  %v12981_v34 = vld [vmem:[#allocation21 + $0x84] ss:$16 sps:$4 sm:$0xff]   ;;  %v12983_v29 = vld [vmem:[#allocation21 + $0x8c] ss:$16 sps:$4 sm:$0xff]  }
0x1019   :  { %6456 = vmatprep.mubr.bf16.mxu0 %v13644_v18  ;;  %6529 = vmatprep.mubr.bf16.mxu1 %v13644_v18 }
0x101b   :  { %6427 = vmatpush1.bf16.msra.mxu0 %v10709_v32  ;;  %6500 = vmatpush1.bf16.msra.mxu1 %v10712_v24  ;;  %v12986_v32 = vld [vmem:[#allocation21 + $0x88] ss:$16 sps:$4 sm:$0xff]   ;;  %v12991_v24 = vld [vmem:[#allocation21 + $0x60] ss:$16 sps:$4 sm:$0xff]  }
0x101c   :  { %6428 = vmatprep.subr.bf16.mxu0 %v10717_v17  ;;  %6501 = vmatprep.subr.bf16.mxu1 %v10720_v51  ;;  %v12993_v17 = vld [vmem:[#allocation21 + $0x64] ss:$16 sps:$4 sm:$0xff]   ;;  %v12995_v51 = vld [vmem:[#allocation21 + $0x6c] ss:$16 sps:$4 sm:$0xff]  }
0x101f   :  { %6429 = vmatpush1.bf16.msra.mxu0 %v10715_v31  ;;  %6502 = vmatpush1.bf16.msra.mxu1 %v10718_v43  ;;  %v12998_v31 = vld [vmem:[#allocation21 + $0x68] ss:$16 sps:$4 sm:$0xff]   ;;  %v13000_v43 = vld [vmem:[#allocation21 + $0x44] ss:$16 sps:$4 sm:$0xff]  }
0x1020   :  { %6430 = vmatprep.subr.bf16.mxu0 %v10723_v25  ;;  %6503 = vmatprep.subr.bf16.mxu1 %v10726_v4  ;;  %v13003_v25 = vld [vmem:[#allocation21 + $0x4c] ss:$16 sps:$4 sm:$0xff]   ;;  %v13007_v4 = vld [vmem:[#allocation21 + $0x40] ss:$16 sps:$4 sm:$0xff]  }
0x1023   :  { %6431 = vmatpush1.bf16.msra.mxu0 %v10721_v19  ;;  %6504 = vmatpush1.bf16.msra.mxu1 %v10724_v48  ;;  %v13009_v19 = vld [vmem:[#allocation21 + $0x48] ss:$16 sps:$4 sm:$0xff]   ;;  %v13013_v48 = vld [vmem:[#allocation21 + $0x24] ss:$16 sps:$4 sm:$0xff]  }
0x1024   :  { %6432 = vmatprep.subr.bf16.mxu0 %v10729_v22  ;;  %6505 = vmatprep.subr.bf16.mxu1 %v10732_v33  ;;  %v13017_v22 = vld [vmem:[#allocation21 + $0x20] ss:$16 sps:$4 sm:$0xff]   ;;  %v13019_v33 = vld [vmem:[#allocation21 + $0x28] ss:$16 sps:$4 sm:$0xff]  }
0x1027   :  { %6433 = vmatpush1.bf16.msra.mxu0 %v10727_v16  ;;  %6506 = vmatpush1.bf16.msra.mxu1 %v10730_v39  ;;  %v13021_v16 = vld [vmem:[#allocation21 + $0x2c] ss:$16 sps:$4 sm:$0xff]   ;;  %v13024_v39 = vld [vmem:[#allocation21 + $0x4] ss:$16 sps:$4 sm:$0xff]  }
0x1028   :  { %6434 = vmatprep.subr.bf16.mxu0 %v10735_v40  ;;  %6507 = vmatprep.subr.bf16.mxu1 %v10738_v6  ;;  %v13026_v40 = vld [vmem:[#allocation21 + $0xc] ss:$16 sps:$4 sm:$0xff]   ;;  %v13031_v6 = vld [vmem:[#allocation21] ss:$16 sps:$4 sm:$0xff]  }
0x102b   :  { %6435 = vmatpush1.bf16.msra.mxu0 %v10733_v52  ;;  %6508 = vmatpush1.bf16.msra.mxu1 %v10736_v7  ;;  %v13033_v52 = vld [vmem:[#allocation21 + $0x8] ss:$16 sps:$4 sm:$0xff]   ;;  %v13718_v7 = vld [vmem:[#allocation62_spill] sm:$0xff] }
0x102c   :  { %6436 = vmatprep.subr.bf16.mxu0 %v10741_v12  ;;  %6509 = vmatprep.subr.bf16.mxu1 %v10744_v49  ;;  %v3559_v12 = vadd.f32 %v13718_v7, %v12513_v26  ;;  %v3632_v26 = vadd.f32 %v13720_v62, %v12529_v3  ;;  %v13721_v7 = vld [vmem:[#allocation65_spill] sm:$0xff]  ;;  %v13724_v62 = vld [vmem:[#allocation35_spill] sm:$0xff] }
0x102d   :  { %v3634_v60 = vadd.f32 %v13721_v7, %v12533_v5 }
0x102f   :  { %6437 = vmatpush1.bf16.msra.mxu0 %v10739_v28  ;;  %6510 = vmatpush1.bf16.msra.mxu1 %v10742_v20  ;;  %v13719_v20 = vld [vmem:[#allocation64_spill] sm:$0xff] }
0x1030   :  { %6438 = vmatprep.subr.bf16.mxu0 %v10747_v23  ;;  %6511 = vmatprep.subr.bf16.mxu1 %v10750_v21  ;;  %v3561_v23 = vadd.f32 %v13719_v20, %v12520_v45 }
0x1033   :  { %6439 = vmatpush1.bf16.msra.mxu0 %v10745_v54  ;;  %6512 = vmatpush1.bf16.msra.mxu1 %v10748_v53 }
0x1034   :  { %6802 = vmatprep.subr.bf16.mxu0 %v12943_v42  ;;  %6843 = vmatprep.subr.bf16.mxu1 %v12945_v11 }
0x1036   :  { %6457 = vmatmul.mubr.bf16.vlgmr.msra.gmra.mxu0 %v6206_v30  ;;  %6530 = vmatmul.mubr.bf16.vlgmr.msra.gmra.mxu1 %v6206_v30 }
0x1037   :  { %6466 = vmatprep.mubr.bf16.mxu0 %v13644_v18  ;;  %6539 = vmatprep.mubr.bf16.mxu1 %v13644_v18 }
0x1038   :  { %6803 = vmatpush1.bf16.msra.mxu0 %v12947_v10  ;;  %6844 = vmatpush1.bf16.msra.mxu1 %v12949_v38 }
0x1039   :  { %6804 = vmatprep.subr.bf16.mxu0 %v12957_v44  ;;  %6845 = vmatprep.subr.bf16.mxu1 %v12959_v46 }
0x103c   :  { %6805 = vmatpush1.bf16.msra.mxu0 %v12955_v36  ;;  %6846 = vmatpush1.bf16.msra.mxu1 %v12962_v14 }
0x103d   :  { %6806 = vmatprep.subr.bf16.mxu0 %v12969_v63  ;;  %6847 = vmatprep.subr.bf16.mxu1 %v12971_v9 }
0x103e   :  { %6467 = vmatmul.mubr.bf16.gmra.mxu0 %v6207_v35  ;;  %6540 = vmatmul.mubr.bf16.gmra.mxu1 %v6207_v35 }
0x103f   :  { %6476 = vmatprep.mubr.bf16.mxu0 %v13644_v18  ;;  %6549 = vmatprep.mubr.bf16.mxu1 %v13644_v18 }
0x1040   :  { %6807 = vmatpush1.bf16.msra.mxu0 %v12967_v27  ;;  %6848 = vmatpush1.bf16.msra.mxu1 %v12974_v61 }
0x1041   :  { %6808 = vmatprep.subr.bf16.mxu0 %v12981_v34  ;;  %6849 = vmatprep.subr.bf16.mxu1 %v12983_v29 }
0x1044   :  { %6809 = vmatpush1.bf16.msra.mxu0 %v12979_v15  ;;  %6850 = vmatpush1.bf16.msra.mxu1 %v12986_v32 }
0x1045   :  { %6810 = vmatprep.subr.bf16.mxu0 %v12993_v17  ;;  %6851 = vmatprep.subr.bf16.mxu1 %v12995_v51 }
0x1046   :  { %6477 = vmatmul.mubr.bf16.gmra.mxu0 %v6208_v41  ;;  %6550 = vmatmul.mubr.bf16.gmra.mxu1 %v6208_v41 }
0x1047   :  { %6486 = vmatprep.mubr.bf16.mxu0 %v13644_v18  ;;  %6559 = vmatprep.mubr.bf16.mxu1 %v13644_v18 }
0x1048   :  { %6811 = vmatpush1.bf16.msra.mxu0 %v12991_v24  ;;  %6852 = vmatpush1.bf16.msra.mxu1 %v12998_v31 }
0x1049   :  { %6812 = vmatprep.subr.bf16.mxu0 %v13000_v43  ;;  %6853 = vmatprep.subr.bf16.mxu1 %v13003_v25 }
0x104c   :  { %6813 = vmatpush1.bf16.msra.mxu0 %v13007_v4  ;;  %6854 = vmatpush1.bf16.msra.mxu1 %v13009_v19 }
0x104d   :  { %6814 = vmatprep.subr.bf16.mxu0 %v13013_v48  ;;  %6855 = vmatprep.subr.bf16.mxu1 %v13021_v16 }
0x1050   :  { %6815 = vmatpush1.bf16.msra.mxu0 %v13017_v22  ;;  %6856 = vmatpush1.bf16.msra.mxu1 %v13019_v33 }
0x1051   :  { %6816 = vmatprep.subr.bf16.mxu0 %v13024_v39  ;;  %6857 = vmatprep.subr.bf16.mxu1 %v13026_v40 }
0x1054   :  { %6817 = vmatpush1.bf16.msra.mxu0 %v13031_v6  ;;  %6858 = vmatpush1.bf16.msra.mxu1 %v13033_v52 }
0x1055   :  { %7114 = vmatprep.subr.bf16.mxu0 %v12943_v42  ;;  %7155 = vmatprep.subr.bf16.mxu1 %v12945_v11 }
0x10d6   :  { %v6086_v49 = vpop.f32.mrf.mxu0  ;;  %v6127_v28 = vpop.f32.mrf.mxu1 }
0x10d7   :  { %v6134_v21 = vadd.f32 %v6086_v49, %v3559_v12  ;;  %v6136_v41 = vadd.f32 %v6127_v28, %v3632_v26 }
0x10d8   :  { %v6088_v54 = vpop.f32.mrf.mxu0  ;;  %v6129_v53 = vpop.f32.mrf.mxu1 }
0x10d9   :  { %v10012_v55 = vmul.f32 -1.442695, %v6134_v21  ;;  %v6135_v47 = vadd.f32 %v6088_v54, %v3561_v23  ;;  %v10014_v45 = vmul.f32 -1.442695, %v6136_v41  ;;  %v6137_v12 = vadd.f32 %v6129_v53, %v3634_v60 }
0x10da   :  { %v6090_v30 = vpop.f32.mrf.mxu0  ;;  %v6131_v57 = vpop.f32.mrf.mxu1 }
0x10db   :  { %11111 = vpow2.f32 %v10012_v55  ;;  %v10013_v8 = vmul.f32 -1.442695, %v6135_v47 }
0x10dc   :  { %v6091_v35 = vpop.f32.mrf.mxu0  ;;  %v6132_v59 = vpop.f32.mrf.mxu1 }
0x10dd   :  { %11113 = vpow2.f32 %v10013_v8  ;;  %v13722_v35 = vld [vmem:[#allocation34_spill] sm:$0xff] }
0x10de   :  { %11115 = vpow2.f32 %v10014_v45  ;;  %v13052_v59 = vadd.f32 %v12901_v13, %v13722_v35 }
0x10df   :  { %11117 = vtanh.f32 %v6137_v12 }
0x10e0   :  { %13723 = vst [vmem:[#allocation42_spill] sm:$0xff] %v13052_v59 }
0x10e8   :  { %v11112_v49 = vpop.eup %11111 }
0x10e9   :  { %v6147_v20 = vadd.f32 1.0, %v11112_v49 }
0x10ea   :  { %v11114_v23 = vpop.eup %11113 }
0x10eb   :  { %11119 = vrcp.f32 %v6147_v20  ;;  %v6148_v21 = vadd.f32 1.0, %v11114_v23  ;;  %v11116_v54 = vpop.eup %11115 }
0x10ec   :  { %v11118_v55 = vpop.eup %11117  ;;  %v6149_v3 = vadd.f32 1.0, %v11116_v54 }
0x10ed   :  { %11121 = vrcp.f32 %v6148_v21 }
0x10ee   :  { %11123 = vrcp.f32 %v6149_v3 }
0x10f6   :  { %v6458_v13 = vpop.f32.mrf.mxu0  ;;  %v6531_v7 = vpop.f32.mrf.mxu1 }
0x10f8   :  { %v11120_v47 = vpop.eup %11119  ;;  %v6460_v45 = vpop.f32.mrf.mxu0 }
0x10f9   :  { %v6159_v30 = vmul.f32 %v11120_v47, %v11118_v55  ;;  %v6533_v12 = vpop.f32.mrf.mxu1 }
0x10fa   :  { %v11122_v57 = vpop.eup %11121  ;;  %v13097_v49 = vpop.f32.mrf.mxu0 }
0x10fb   :  { %v6158_v28 = vmul.f32 %v11122_v57, %v12898_v37  ;;  %v11124_v5 = vpop.eup %11123  ;;  %v13726_v37 = vmov 0.0|0.0   ;;  %v13099_v20 = vpop.f32.mrf.mxu1 }
0x10fc   :  { %v13101_v23 = vpop.f32.mrf.mxu0 }
0x10fd   :  { %v6160_v8 = vadd.f32 %v6159_v30, %v6158_v28  ;;  %v13103_v21 = vpop.f32.mrf.mxu1 }
0x10fe   :  { %v13105_v54 = vpop.f32.mrf.mxu0 }
0x10ff   :  { %11125 = vtanh.f32 %v6160_v8  ;;  %13727 = vst [vmem:[#allocation43_spill] sm:$0xff] %v13105_v54  ;;  %v13107_v55 = vpop.f32.mrf.mxu1 }
0x1100   :  { %13728 = vst [vmem:[#allocation50_spill] sm:$0xff] %v13107_v55  ;;  %v13109_v47 = vpop.f32.mrf.mxu0 }
0x1101   :  { %13729 = vst [vmem:[#allocation52_spill] sm:$0xff] %v13109_v47  ;;  %v13111_v30 = vpop.f32.mrf.mxu1  ;;  %v13753_v47 = vld [vmem:[#allocation39_spill] sm:$0xff] }
0x1102   :  { %13730 = vst [vmem:[#allocation51_spill] sm:$0xff] %v13111_v30  ;;  %v13113_v57 = vpop.f32.mrf.mxu0 }
0x1103   :  { %13731 = vst [vmem:[#allocation53_spill] sm:$0xff] %v13113_v57  ;;  %v13115_v3 = vpop.f32.mrf.mxu1 }
0x1104   :  { %13732 = vst [vmem:[#allocation54_spill] sm:$0xff] %v13115_v3  ;;  %v13117_v28 = vpop.f32.mrf.mxu0 }
0x1105   :  { %13733 = vst [vmem:[#allocation56_spill] sm:$0xff] %v13117_v28  ;;  %v13119_v8 = vpop.f32.mrf.mxu1 }
0x1106   :  { %13734 = vst [vmem:[#allocation55_spill] sm:$0xff] %v13119_v8 }
0x110c   :  { %v11126_v60 = vpop.eup %11125 }
0x110d   :  { %v6162_v53 = vmul.f32 %v11126_v60, %v11124_v5  ;;  %v13121_v5 = vpop.f32.mrf.mxu0  ;;  %v13123_v60 = vpop.f32.mrf.mxu1 }
0x110e   :  { %13735 = vst [vmem:[#allocation57_spill] sm:$0xff] %v13121_v5  ;;  %13736 = vst [vmem:[#allocation58_spill] sm:$0xff] %v13123_v60 }
0x110f   :  { %v13055_v26 = vadd.f32 %v6162_v53, %v13724_v62  ;;  %v13125_v53 = vpop.f32.mrf.mxu0  ;;  %v13127_v35 = vpop.f32.mrf.mxu1 }
0x1110   :  { %13737 = vst [vmem:[#allocation60_spill] sm:$0xff] %v13125_v53  ;;  %13738 = vst [vmem:[#allocation59_spill] sm:$0xff] %v13127_v35  ;;  %v13747_v35 = vld [vmem:[#allocation32_spill] sm:$0xff] }
0x1111   :  { %13725 = vst [vmem:[#allocation36_spill] sm:$0xff] %v13055_v26  ;;  %v6209_v41 = vpack.c.bf16 %v13055_v26, %v13052_v59  ;;  %v13129_v62 = vpop.f32.mrf.mxu0  ;;  %v6242_v59 = vld [vmem:[%s13597_s11] sm:$0xf] }
0x1112   :  { %13739 = vst [vmem:[#allocation61_spill] sm:$0xff] %v13129_v62  ;;  %v13149_v62 = vrot.slane %v6242_v59, %v13747_v35  ;;  %v13165_v55 = vrot.slane %v6242_v59, %v13688_v0  ;;  %v13169_v54 = vrot.slane %v6242_v59, %v13753_v47 }
0x1113   :  { %6487 = vmatmul.mubr.bf16.gmra.mxu0 %v6209_v41  ;;  %6560 = vmatmul.mubr.bf16.gmra.mxu1 %v6209_v41  ;;  %v13131_v41 = vpop.f32.mrf.mxu1 }
0x1114   :  { %6834 = vmatprep.mubr.bf16.mxu0 %v13644_v18  ;;  %6875 = vmatprep.mubr.bf16.mxu1 %v13644_v18  ;;  %13740 = vst [vmem:[#allocation45_spill] sm:$0xff] %v13131_v41 }
0x1115   :  { %v13135_v26 = vpop.f32.mrf.mxu1 }
0x1116   :  { %13742 = vst [vmem:[#allocation47_spill] sm:$0xff] %v13135_v26  ;;  %v13750_v26 = vld [vmem:[#allocation33_spill] sm:$0xff] }
0x1117   :  { %v13156_v58 = vrot.slane %v6242_v59, %v13750_v26 }
0x111b   :  { %6835 = vmatmul.mubr.bf16.vlgmr.msra.gmra.mxu0 %v13726_v37  ;;  %6876 = vmatmul.mubr.bf16.vlgmr.msra.gmra.mxu1 %v13726_v37  ;;  %v13133_v37 = vpop.f32.mrf.mxu0 }
0x111c   :  { %7115 = vmatpush1.bf16.msra.mxu0 %v12947_v10  ;;  %7156 = vmatpush1.bf16.msra.mxu1 %v12949_v38  ;;  %13741 = vst [vmem:[#allocation44_spill] sm:$0xff] %v13133_v37 }
0x111d   :  { %7116 = vmatprep.subr.bf16.mxu0 %v12957_v44  ;;  %7157 = vmatprep.subr.bf16.mxu1 %v12959_v46 }
0x111e   :  { %7146 = vmatprep.mubr.bf16.mxu0 %v13644_v18  ;;  %7187 = vmatprep.mubr.bf16.mxu1 %v13644_v18 }
0x1120   :  { %7117 = vmatpush1.bf16.msra.mxu0 %v12955_v36  ;;  %7158 = vmatpush1.bf16.msra.mxu1 %v12962_v14 }
0x1121   :  { %7118 = vmatprep.subr.bf16.mxu0 %v12969_v63  ;;  %7159 = vmatprep.subr.bf16.mxu1 %v12971_v9 }
0x1124   :  { %7119 = vmatpush1.bf16.msra.mxu0 %v12967_v27  ;;  %7160 = vmatpush1.bf16.msra.mxu1 %v12974_v61 }
0x1125   :  { %7120 = vmatprep.subr.bf16.mxu0 %v12981_v34  ;;  %7161 = vmatprep.subr.bf16.mxu1 %v12983_v29 }
0x1128   :  { %7121 = vmatpush1.bf16.msra.mxu0 %v12979_v15  ;;  %7162 = vmatpush1.bf16.msra.mxu1 %v12986_v32 }
0x1129   :  { %7122 = vmatprep.subr.bf16.mxu0 %v12993_v17  ;;  %7163 = vmatprep.subr.bf16.mxu1 %v12995_v51 }
0x112c   :  { %7123 = vmatpush1.bf16.msra.mxu0 %v12991_v24  ;;  %7164 = vmatpush1.bf16.msra.mxu1 %v12998_v31 }
0x112d   :  { %7124 = vmatprep.subr.bf16.mxu0 %v13000_v43  ;;  %7165 = vmatprep.subr.bf16.mxu1 %v13003_v25 }
0x1130   :  { %7125 = vmatpush1.bf16.msra.mxu0 %v13007_v4  ;;  %7166 = vmatpush1.bf16.msra.mxu1 %v13009_v19 }
0x1131   :  { %7126 = vmatprep.subr.bf16.mxu0 %v13013_v48  ;;  %7167 = vmatprep.subr.bf16.mxu1 %v13021_v16 }
0x1134   :  { %7127 = vmatpush1.bf16.msra.mxu0 %v13017_v22  ;;  %7168 = vmatpush1.bf16.msra.mxu1 %v13019_v33 }
0x1135   :  { %7128 = vmatprep.subr.bf16.mxu0 %v13024_v39  ;;  %7169 = vmatprep.subr.bf16.mxu1 %v13026_v40 }
0x1138   :  { %7129 = vmatpush1.bf16.msra.mxu0 %v13031_v6  ;;  %7170 = vmatpush1.bf16.msra.mxu1 %v13033_v52 }
0x1139   :  { %7426 = vmatprep.subr.bf16.mxu0 %v12943_v42  ;;  %7467 = vmatprep.subr.bf16.mxu1 %v12945_v11 }
0x11d3   :  { %v13140_v2 = vpop.f32.mrf.mxu0  ;;  %v13142_v5 = vpop.f32.mrf.mxu1 }
0x11d4   :  { %13743 = vst [vmem:[#allocation46_spill] sm:$0xff] %v13140_v2  ;;  %13744 = vst [vmem:[#allocation49_spill] sm:$0xff] %v13142_v5  ;;  %v6459_v5 = vadd.f32 %v6458_v13, %v13149_v62  ;;  %v6532_v13 = vadd.f32 %v6531_v7, %v13165_v55 }
0x11d5   :  { %v13144_v60 = vpop.f32.mrf.mxu0  ;;  %v13146_v53 = vpop.f32.mrf.mxu1 }
0x11d6   :  { %13745 = vst [vmem:[#allocation48_spill] sm:$0xff] %v13144_v60  ;;  %13746 = vst [vmem:[#allocation62_spill] sm:$0xff] %v13146_v53  ;;  %v6461_v53 = vadd.f32 %v6460_v45, %v13156_v58  ;;  %v6534_v45 = vadd.f32 %v6533_v12, %v13169_v54 }
0x11d7   :  { %v13151_v41 = vpop.f32.mrf.mxu0  ;;  %v13153_v37 = vpop.f32.mrf.mxu1 }
0x11d8   :  { %13748 = vst [vmem:[#allocation64_spill] sm:$0xff] %v13151_v41  ;;  %13749 = vst [vmem:[#allocation63_spill] sm:$0xff] %v13153_v37 }
0x11d9   :  { %v13158_v50 = vpop.f32.mrf.mxu0  ;;  %v13160_v8 = vpop.f32.mrf.mxu1 }
0x11da   :  { %13751 = vst [vmem:[#allocation65_spill] sm:$0xff] %v13158_v50  ;;  %13752 = vst [vmem:[#allocation34_spill] sm:$0xff] %v13160_v8 }
0x11db   :  { %v6836_v2 = vpop.f32.mrf.mxu0  ;;  %v6877_v60 = vpop.f32.mrf.mxu1 }
0x11dc   :  { %v6884_v3 = vadd.f32 %v6836_v2, %v6459_v5  ;;  %v6886_v2 = vadd.f32 %v6877_v60, %v6532_v13  ;;  %v6463_v13 = vadd.f32 %v13097_v49, %v13149_v62 }
0x11dd   :  { %v6838_v35 = vpop.f32.mrf.mxu0  ;;  %v6879_v28 = vpop.f32.mrf.mxu1 }
0x11de   :  { %v10079_v57 = vmul.f32 -1.442695, %v6884_v3  ;;  %v6885_v41 = vadd.f32 %v6838_v35, %v6461_v53  ;;  %v10081_v3 = vmul.f32 -1.442695, %v6886_v2 }
0x11df   :  { %v6840_v30 = vpop.f32.mrf.mxu0  ;;  %v6881_v37 = vpop.f32.mrf.mxu1 }
0x11e0   :  { %11127 = vpow2.f32 %v10079_v57  ;;  %v10080_v26 = vmul.f32 -1.442695, %v6885_v41  ;;  %v6887_v30 = vadd.f32 %v6879_v28, %v6534_v45 }
0x11e1   :  { %v6841_v50 = vpop.f32.mrf.mxu0  ;;  %v6882_v8 = vpop.f32.mrf.mxu1 }
0x11e2   :  { %11129 = vpow2.f32 %v10080_v26 }
0x11e3   :  { %11131 = vpow2.f32 %v10081_v3  ;;  %v6465_v3 = vadd.f32 %v13101_v23, %v13156_v58 }
0x11ed   :  { %v11128_v5 = vpop.eup %11127 }
0x11ee   :  { %v6897_v53 = vadd.f32 1.0, %v11128_v5 }
0x11ef   :  { %v11130_v57 = vpop.eup %11129 }
0x11f0   :  { %11133 = vrcp.f32 %v6897_v53  ;;  %v6898_v0 = vadd.f32 1.0, %v11130_v57  ;;  %v11132_v50 = vpop.eup %11131 }
0x11f1   :  { %11135 = vtanh.f32 %v6887_v30  ;;  %v6899_v37 = vadd.f32 1.0, %v11132_v50 }
0x11f2   :  { %11137 = vrcp.f32 %v6898_v0 }
0x11f3   :  { %11139 = vrcp.f32 %v6899_v37  ;;  %v6538_v37 = vadd.f32 %v13103_v21, %v13169_v54 }
0x11fd   :  { %v11134_v8 = vpop.eup %11133 }
0x11fe   :  { %v11136_v41 = vpop.eup %11135 }
0x11ff   :  { %v11138_v7 = vpop.eup %11137  ;;  %v6909_v47 = vmul.f32 %v11136_v41, %v11134_v8 }
0x1200   :  { %v6908_v59 = vmul.f32 0.0, %v11138_v7  ;;  %v11140_v12 = vpop.eup %11139 }
0x1202   :  { %v13172_v60 = vadd.f32 %v6909_v47, %v6908_v59 }
0x1204   :  { %11141 = vtanh.f32 %v13172_v60 }
0x1211   :  { %v11142_v28 = vpop.eup %11141 }
0x1212   :  { %v13175_v35 = vmul.f32 %v11142_v28, %v11140_v12 }
0x1214   :  { %v6921_v26 = vpack.c.bf16 %v13175_v35, %v13175_v35 }
0x1216   :  { %7147 = vmatmul.mubr.bf16.vlgmr.msra.gmra.mxu0 %v6921_v26  ;;  %7188 = vmatmul.mubr.bf16.vlgmr.msra.gmra.mxu1 %v6921_v26 }
0x1217   :  { %7427 = vmatpush1.bf16.msra.mxu0 %v12947_v10  ;;  %7468 = vmatpush1.bf16.msra.mxu1 %v12949_v38 }
0x1218   :  { %7428 = vmatprep.subr.bf16.mxu0 %v12957_v44  ;;  %7469 = vmatprep.subr.bf16.mxu1 %v12959_v46 }
0x1219   :  { %7458 = vmatprep.mubr.bf16.mxu0 %v13644_v18  ;;  %7499 = vmatprep.mubr.bf16.mxu1 %v13644_v18 }
0x121b   :  { %7429 = vmatpush1.bf16.msra.mxu0 %v12955_v36  ;;  %7470 = vmatpush1.bf16.msra.mxu1 %v12962_v14 }
0x121c   :  { %7430 = vmatprep.subr.bf16.mxu0 %v12969_v63  ;;  %7471 = vmatprep.subr.bf16.mxu1 %v12971_v9 }
0x121f   :  { %7431 = vmatpush1.bf16.msra.mxu0 %v12967_v27  ;;  %7472 = vmatpush1.bf16.msra.mxu1 %v12974_v61 }
0x1220   :  { %7432 = vmatprep.subr.bf16.mxu0 %v12981_v34  ;;  %7473 = vmatprep.subr.bf16.mxu1 %v12983_v29 }
0x1223   :  { %7433 = vmatpush1.bf16.msra.mxu0 %v12979_v15  ;;  %7474 = vmatpush1.bf16.msra.mxu1 %v12986_v32 }
0x1224   :  { %7434 = vmatprep.subr.bf16.mxu0 %v12993_v17  ;;  %7475 = vmatprep.subr.bf16.mxu1 %v12995_v51 }
0x1227   :  { %7435 = vmatpush1.bf16.msra.mxu0 %v12991_v24  ;;  %7476 = vmatpush1.bf16.msra.mxu1 %v12998_v31 }
0x1228   :  { %7436 = vmatprep.subr.bf16.mxu0 %v13000_v43  ;;  %7477 = vmatprep.subr.bf16.mxu1 %v13003_v25 }
0x122b   :  { %7437 = vmatpush1.bf16.msra.mxu0 %v13007_v4  ;;  %7478 = vmatpush1.bf16.msra.mxu1 %v13009_v19 }
0x122c   :  { %7438 = vmatprep.subr.bf16.mxu0 %v13013_v48  ;;  %7479 = vmatprep.subr.bf16.mxu1 %v13021_v16 }
0x122f   :  { %7439 = vmatpush1.bf16.msra.mxu0 %v13017_v22  ;;  %7480 = vmatpush1.bf16.msra.mxu1 %v13019_v33 }
0x1230   :  { %7440 = vmatprep.subr.bf16.mxu0 %v13024_v39  ;;  %7481 = vmatprep.subr.bf16.mxu1 %v13026_v40 }
0x1233   :  { %7441 = vmatpush1.bf16.msra.mxu0 %v13031_v6  ;;  %7482 = vmatpush1.bf16.msra.mxu1 %v13033_v52 }
0x1234   :  { %7738 = vmatprep.subr.bf16.mxu0 %v12943_v42  ;;  %7779 = vmatprep.subr.bf16.mxu1 %v12945_v11  ;;  %v6536_v11 = vadd.f32 %v13099_v20, %v13165_v55 }
0x12d6   :  { %v7148_v2 = vpop.f32.mrf.mxu0  ;;  %v7189_v45 = vpop.f32.mrf.mxu1 }
0x12d7   :  { %v7196_v5 = vadd.f32 %v7148_v2, %v6463_v13  ;;  %v7198_v49 = vadd.f32 %v7189_v45, %v6536_v11 }
0x12d8   :  { %v7150_v30 = vpop.f32.mrf.mxu0  ;;  %v7191_v53 = vpop.f32.mrf.mxu1 }
0x12d9   :  { %v10114_v57 = vmul.f32 -1.442695, %v7196_v5  ;;  %v7197_v0 = vadd.f32 %v7150_v30, %v6465_v3  ;;  %v10116_v23 = vmul.f32 -1.442695, %v7198_v49  ;;  %v7199_v59 = vadd.f32 %v7191_v53, %v6538_v37 }
0x12da   :  { %v7152_v50 = vpop.f32.mrf.mxu0  ;;  %v7193_v8 = vpop.f32.mrf.mxu1 }
0x12db   :  { %11143 = vpow2.f32 %v10114_v57  ;;  %v10115_v41 = vmul.f32 -1.442695, %v7197_v0  ;;  %v13227_v8 = vadd.f32 %v13175_v35, %v12913_v56 }
0x12dc   :  { %v7153_v42 = vpop.f32.mrf.mxu0  ;;  %v7194_v7 = vpop.f32.mrf.mxu1 }
0x12dd   :  { %11145 = vpow2.f32 %v10115_v41 }
0x12de   :  { %11147 = vpow2.f32 %v10116_v23 }
0x12df   :  { %11149 = vtanh.f32 %v7199_v59  ;;  %v13284_v59 = vld [vmem:[#allocation21 + $0xe4] ss:$16 sps:$4 sm:$0xff]  }
0x12e8   :  { %v11144_v47 = vpop.eup %11143 }
0x12e9   :  { %v7209_v12 = vadd.f32 1.0, %v11144_v47  ;;  %v13286_v47 = vld [vmem:[#allocation21 + $0xec] ss:$16 sps:$4 sm:$0xff]  }
0x12ea   :  { %v11146_v28 = vpop.eup %11145 }
0x12eb   :  { %11151 = vrcp.f32 %v7209_v12  ;;  %v7210_v26 = vadd.f32 1.0, %v11146_v28  ;;  %v11148_v13 = vpop.eup %11147  ;;  %v13288_v12 = vld [vmem:[#allocation21 + $0xe0] ss:$16 sps:$4 sm:$0xff]   ;;  %v13290_v28 = vld [vmem:[#allocation21 + $0xe8] ss:$16 sps:$4 sm:$0xff]  }
0x12ec   :  { %v11150_v2 = vpop.eup %11149  ;;  %v7211_v20 = vadd.f32 1.0, %v11148_v13  ;;  %v13298_v13 = vld [vmem:[#allocation21 + $0xcc] ss:$16 sps:$4 sm:$0xff]  }
0x12ed   :  { %11153 = vrcp.f32 %v7210_v26  ;;  %v13296_v26 = vld [vmem:[#allocation21 + $0xc4] ss:$16 sps:$4 sm:$0xff]  }
0x12ee   :  { %11155 = vrcp.f32 %v7211_v20  ;;  %v13312_v20 = vld [vmem:[#allocation21 + $0xa0] ss:$16 sps:$4 sm:$0xff]  }
0x12f8   :  { %v11152_v3 = vpop.eup %11151 }
0x12f9   :  { %v7221_v5 = vmul.f32 %v11152_v3, %v11150_v2  ;;  %v13300_v2 = vld [vmem:[#allocation21 + $0xc0] ss:$16 sps:$4 sm:$0xff]   ;;  %v13302_v3 = vld [vmem:[#allocation21 + $0xc8] ss:$16 sps:$4 sm:$0xff]  }
0x12fa   :  { %v11154_v30 = vpop.eup %11153 }
0x12fb   :  { %v7220_v45 = vmul.f32 %v11154_v30, %v13172_v60  ;;  %v11156_v21 = vpop.eup %11155  ;;  %v13310_v30 = vld [vmem:[#allocation21 + $0xac] ss:$16 sps:$4 sm:$0xff]  }
0x12fd   :  { %v13222_v57 = vadd.f32 %v7221_v5, %v7220_v45  ;;  %v13308_v5 = vld [vmem:[#allocation21 + $0xa4] ss:$16 sps:$4 sm:$0xff]   ;;  %v13314_v45 = vld [vmem:[#allocation21 + $0xa8] ss:$16 sps:$4 sm:$0xff]  }
0x12ff   :  { %11157 = vtanh.f32 %v13222_v57 }
0x130c   :  { %v11158_v53 = vpop.eup %11157 }
0x130d   :  { %v7224_v0 = vmul.f32 %v11158_v53, %v11156_v21  ;;  %v13322_v21 = vld [vmem:[#allocation21 + $0x8c] ss:$16 sps:$4 sm:$0xff]   ;;  %v13324_v53 = vld [vmem:[#allocation21 + $0x80] ss:$16 sps:$4 sm:$0xff]  }
0x130f   :  { %v7233_v50 = vpack.c.bf16 %v7224_v0, %v7224_v0  ;;  %v13230_v41 = vadd.f32 %v7224_v0, %v12909_v1  ;;  %v13754_v1 = vld [vmem:[#allocation43_spill] sm:$0xff] }
0x1310   :  { %v6469_v56 = vadd.f32 %v13754_v1, %v13149_v62  ;;  %v13326_v0 = vld [vmem:[#allocation21 + $0x88] ss:$16 sps:$4 sm:$0xff]   ;;  %v13332_v1 = vld [vmem:[#allocation21 + $0x6c] ss:$16 sps:$4 sm:$0xff]  }
0x1311   :  { %7459 = vmatmul.mubr.bf16.vlgmr.msra.gmra.mxu0 %v7233_v50  ;;  %7500 = vmatmul.mubr.bf16.vlgmr.msra.gmra.mxu1 %v7233_v50  ;;  %v9140_v60 = vpack.c.bf16 %v13230_v41, %v13227_v8  ;;  %v13330_v50 = vld [vmem:[#allocation21 + $0x64] ss:$16 sps:$4 sm:$0xff]  }
0x1312   :  { %7739 = vmatpush1.bf16.msra.mxu0 %v12947_v10  ;;  %7780 = vmatpush1.bf16.msra.mxu1 %v12949_v38  ;;  %v13779_v41 = vld [vmem:[#allocation64_spill] sm:$0xff] }
0x1313   :  { %7740 = vmatprep.subr.bf16.mxu0 %v12957_v44  ;;  %7781 = vmatprep.subr.bf16.mxu1 %v12959_v46 }
0x1314   :  { %7770 = vmatprep.mubr.bf16.mxu0 %v13644_v18  ;;  %7811 = vmatprep.mubr.bf16.mxu1 %v13644_v18 }
0x1316   :  { %7741 = vmatpush1.bf16.msra.mxu0 %v12955_v36  ;;  %7782 = vmatpush1.bf16.msra.mxu1 %v12962_v14  ;;  %v13755_v36 = vld [vmem:[#allocation52_spill] sm:$0xff] }
0x1317   :  { %7742 = vmatprep.subr.bf16.mxu0 %v12969_v63  ;;  %7783 = vmatprep.subr.bf16.mxu1 %v12971_v9  ;;  %v6471_v44 = vadd.f32 %v13755_v36, %v13156_v58  ;;  %v13344_v36 = vld [vmem:[#allocation21 + $0x4c] ss:$16 sps:$4 sm:$0xff]  }
0x131a   :  { %7743 = vmatpush1.bf16.msra.mxu0 %v12967_v27  ;;  %7784 = vmatpush1.bf16.msra.mxu1 %v12974_v61 }
0x131b   :  { %7744 = vmatprep.subr.bf16.mxu0 %v12981_v34  ;;  %7785 = vmatprep.subr.bf16.mxu1 %v12983_v29 }
0x131e   :  { %7745 = vmatpush1.bf16.msra.mxu0 %v12979_v15  ;;  %7786 = vmatpush1.bf16.msra.mxu1 %v12986_v32 }
0x131f   :  { %7746 = vmatprep.subr.bf16.mxu0 %v12993_v17  ;;  %7787 = vmatprep.subr.bf16.mxu1 %v12995_v51 }
0x1322   :  { %7747 = vmatpush1.bf16.msra.mxu0 %v12991_v24  ;;  %7788 = vmatpush1.bf16.msra.mxu1 %v12998_v31  ;;  %v13756_v24 = vld [vmem:[#allocation50_spill] sm:$0xff]  ;;  %v13757_v31 = vld [vmem:[#allocation51_spill] sm:$0xff] }
0x1323   :  { %7748 = vmatprep.subr.bf16.mxu0 %v13000_v43  ;;  %7789 = vmatprep.subr.bf16.mxu1 %v13003_v25  ;;  %v6542_v17 = vadd.f32 %v13756_v24, %v13165_v55  ;;  %v6544_v43 = vadd.f32 %v13757_v31, %v13169_v54  ;;  %v13759_v31 = vld [vmem:[#allocation56_spill] sm:$0xff] }
0x1326   :  { %7749 = vmatpush1.bf16.msra.mxu0 %v13007_v4  ;;  %7790 = vmatpush1.bf16.msra.mxu1 %v13009_v19 }
0x1327   :  { %7750 = vmatprep.subr.bf16.mxu0 %v13013_v48  ;;  %7791 = vmatprep.subr.bf16.mxu1 %v13021_v16 }
0x132a   :  { %7751 = vmatpush1.bf16.msra.mxu0 %v13017_v22  ;;  %7792 = vmatpush1.bf16.msra.mxu1 %v13019_v33 }
0x132b   :  { %7752 = vmatprep.subr.bf16.mxu0 %v13024_v39  ;;  %7793 = vmatprep.subr.bf16.mxu1 %v13026_v40 }
0x132e   :  { %7753 = vmatpush1.bf16.msra.mxu0 %v13031_v6  ;;  %7794 = vmatpush1.bf16.msra.mxu1 %v13033_v52 }
0x132f   :  { %8050 = vmatprep.subr.bf16.mxu0 %v13284_v59  ;;  %8091 = vmatprep.subr.bf16.mxu1 %v13286_v47 }
0x13d1   :  { %v7460_v10 = vpop.f32.mrf.mxu0  ;;  %v7501_v38 = vpop.f32.mrf.mxu1 }
0x13d2   :  { %v7508_v46 = vadd.f32 %v7460_v10, %v6469_v56  ;;  %v7510_v51 = vadd.f32 %v7501_v38, %v6542_v17  ;;  %v13336_v56 = vld [vmem:[#allocation21 + $0x60] ss:$16 sps:$4 sm:$0xff]   ;;  %v13338_v10 = vld [vmem:[#allocation21 + $0x68] ss:$16 sps:$4 sm:$0xff]   ;;  %v13342_v38 = vld [vmem:[#allocation21 + $0x44] ss:$16 sps:$4 sm:$0xff]  }
0x13d3   :  { %v7462_v14 = vpop.f32.mrf.mxu0  ;;  %v7503_v27 = vpop.f32.mrf.mxu1 }
0x13d4   :  { %v10149_v63 = vmul.f32 -1.442695, %v7508_v46  ;;  %v7509_v9 = vadd.f32 %v7462_v14, %v6471_v44  ;;  %v10151_v25 = vmul.f32 -1.442695, %v7510_v51  ;;  %v7511_v4 = vadd.f32 %v7503_v27, %v6544_v43  ;;  %v13348_v44 = vld [vmem:[#allocation21 + $0x40] ss:$16 sps:$4 sm:$0xff]  }
0x13d5   :  { %v7464_v61 = vpop.f32.mrf.mxu0  ;;  %v7505_v15 = vpop.f32.mrf.mxu1  ;;  %v13350_v46 = vld [vmem:[#allocation21 + $0x48] ss:$16 sps:$4 sm:$0xff]   ;;  %v13354_v14 = vld [vmem:[#allocation21 + $0x24] ss:$16 sps:$4 sm:$0xff]   ;;  %v13356_v27 = vld [vmem:[#allocation21 + $0x2c] ss:$16 sps:$4 sm:$0xff]   ;;  %v6475_v43 = vadd.f32 %v13759_v31, %v13156_v58 }
0x13d6   :  { %11159 = vpow2.f32 %v10149_v63  ;;  %v10150_v34 = vmul.f32 -1.442695, %v7509_v9  ;;  %v13360_v63 = vld [vmem:[#allocation21 + $0x20] ss:$16 sps:$4 sm:$0xff]   ;;  %v13362_v9 = vld [vmem:[#allocation21 + $0x28] ss:$16 sps:$4 sm:$0xff]  }
0x13d7   :  { %v7465_v29 = vpop.f32.mrf.mxu0  ;;  %v7506_v32 = vpop.f32.mrf.mxu1  ;;  %v13366_v61 = vld [vmem:[#allocation21 + $0x4] ss:$16 sps:$4 sm:$0xff]   ;;  %v13368_v15 = vld [vmem:[#allocation21 + $0xc] ss:$16 sps:$4 sm:$0xff]  }
0x13d8   :  { %11161 = vpow2.f32 %v10150_v34  ;;  %v13372_v34 = vld [vmem:[#allocation21] ss:$16 sps:$4 sm:$0xff]   ;;  %v13374_v29 = vld [vmem:[#allocation21 + $0x8] ss:$16 sps:$4 sm:$0xff]  }
0x13d9   :  { %11163 = vpow2.f32 %v10151_v25  ;;  %v13758_v32 = vld [vmem:[#allocation53_spill] sm:$0xff] }
0x13da   :  { %11165 = vtanh.f32 %v7511_v4  ;;  %v6473_v24 = vadd.f32 %v13758_v32, %v13149_v62 }
0x13e3   :  { %v11160_v19 = vpop.eup %11159 }
0x13e4   :  { %v7521_v48 = vadd.f32 1.0, %v11160_v19 }
0x13e5   :  { %v11162_v22 = vpop.eup %11161 }
0x13e6   :  { %11167 = vrcp.f32 %v7521_v48  ;;  %v7522_v33 = vadd.f32 1.0, %v11162_v22  ;;  %v11164_v16 = vpop.eup %11163 }
0x13e7   :  { %v11166_v39 = vpop.eup %11165  ;;  %v7523_v35 = vadd.f32 1.0, %v11164_v16 }
0x13e8   :  { %11169 = vrcp.f32 %v7522_v33 }
0x13e9   :  { %11171 = vrcp.f32 %v7523_v35 }
0x13f3   :  { %v11168_v40 = vpop.eup %11167 }
0x13f4   :  { %v7533_v6 = vmul.f32 %v11168_v40, %v11166_v39 }
0x13f5   :  { %v11170_v52 = vpop.eup %11169 }
0x13f6   :  { %v7532_v42 = vmul.f32 %v11170_v52, %v13222_v57  ;;  %v11172_v11 = vpop.eup %11171  ;;  %v13320_v57 = vld [vmem:[#allocation21 + $0x84] ss:$16 sps:$4 sm:$0xff]  }
0x13f7   :  { %v13760_v52 = vld [vmem:[#allocation54_spill] sm:$0xff] }
0x13f8   :  { %v13275_v7 = vadd.f32 %v7533_v6, %v7532_v42  ;;  %v6546_v35 = vadd.f32 %v13760_v52, %v13165_v55  ;;  %v13762_v52 = vld [vmem:[#allocation40_spill] sm:$0xff] }
0x13fa   :  { %11173 = vtanh.f32 %v13275_v7 }
0x1407   :  { %v11174_v49 = vpop.eup %11173 }
0x1408   :  { %v13278_v37 = vmul.f32 %v11174_v49, %v11172_v11  ;;  %v13761_v11 = vld [vmem:[#allocation55_spill] sm:$0xff] }
0x1409   :  { %v6548_v49 = vadd.f32 %v13761_v11, %v13169_v54  ;;  %v13763_v11 = vld [vmem:[#allocation38_spill] sm:$0xff] }
0x140a   :  { %v7545_v23 = vpack.c.bf16 %v13278_v37, %v13278_v37 }
0x140c   :  { %7771 = vmatmul.mubr.bf16.vlgmr.msra.gmra.mxu0 %v7545_v23  ;;  %7812 = vmatmul.mubr.bf16.vlgmr.msra.gmra.mxu1 %v7545_v23 }
0x140d   :  { %8082 = vmatprep.mubr.bf16.mxu0 %v13644_v18  ;;  %8123 = vmatprep.mubr.bf16.mxu1 %v13644_v18 }
0x140e   :  { %8051 = vmatpush1.bf16.msra.mxu0 %v13288_v12  ;;  %8092 = vmatpush1.bf16.msra.mxu1 %v13290_v28 }
0x140f   :  { %8052 = vmatprep.subr.bf16.mxu0 %v13296_v26  ;;  %8093 = vmatprep.subr.bf16.mxu1 %v13298_v13 }
0x1412   :  { %8053 = vmatpush1.bf16.msra.mxu0 %v13300_v2  ;;  %8094 = vmatpush1.bf16.msra.mxu1 %v13302_v3 }
0x1413   :  { %8054 = vmatprep.subr.bf16.mxu0 %v13308_v5  ;;  %8095 = vmatprep.subr.bf16.mxu1 %v13310_v30 }
0x1416   :  { %8055 = vmatpush1.bf16.msra.mxu0 %v13312_v20  ;;  %8096 = vmatpush1.bf16.msra.mxu1 %v13314_v45 }
0x1417   :  { %8056 = vmatprep.subr.bf16.mxu0 %v13320_v57  ;;  %8097 = vmatprep.subr.bf16.mxu1 %v13322_v21 }
0x141a   :  { %8057 = vmatpush1.bf16.msra.mxu0 %v13324_v53  ;;  %8098 = vmatpush1.bf16.msra.mxu1 %v13326_v0 }
0x141b   :  { %8058 = vmatprep.subr.bf16.mxu0 %v13330_v50  ;;  %8099 = vmatprep.subr.bf16.mxu1 %v13332_v1 }
0x141e   :  { %8059 = vmatpush1.bf16.msra.mxu0 %v13336_v56  ;;  %8100 = vmatpush1.bf16.msra.mxu1 %v13338_v10 }
0x141f   :  { %8060 = vmatprep.subr.bf16.mxu0 %v13342_v38  ;;  %8101 = vmatprep.subr.bf16.mxu1 %v13344_v36 }
0x1422   :  { %8061 = vmatpush1.bf16.msra.mxu0 %v13348_v44  ;;  %8102 = vmatpush1.bf16.msra.mxu1 %v13350_v46 }
0x1423   :  { %8062 = vmatprep.subr.bf16.mxu0 %v13354_v14  ;;  %8103 = vmatprep.subr.bf16.mxu1 %v13356_v27 }
0x1426   :  { %8063 = vmatpush1.bf16.msra.mxu0 %v13360_v63  ;;  %8104 = vmatpush1.bf16.msra.mxu1 %v13362_v9 }
0x1427   :  { %8064 = vmatprep.subr.bf16.mxu0 %v13366_v61  ;;  %8105 = vmatprep.subr.bf16.mxu1 %v13368_v15 }
0x142a   :  { %8065 = vmatpush1.bf16.msra.mxu0 %v13372_v34  ;;  %8106 = vmatpush1.bf16.msra.mxu1 %v13374_v29 }
0x142b   :  { %8362 = vmatprep.subr.bf16.mxu0 %v13284_v59  ;;  %8403 = vmatprep.subr.bf16.mxu1 %v13286_v47 }
0x14cc   :  { %v7772_v17 = vpop.f32.mrf.mxu0  ;;  %v7813_v51 = vpop.f32.mrf.mxu1 }
0x14cd   :  { %v7820_v25 = vadd.f32 %v7772_v17, %v6473_v24  ;;  %v7822_v42 = vadd.f32 %v7813_v51, %v6546_v35  ;;  %v13396_v35 = vadd.f32 %v13278_v37, %v13762_v52  ;;  %v13764_v37 = vld [vmem:[#allocation57_spill] sm:$0xff] }
0x14ce   :  { %v7774_v4 = vpop.f32.mrf.mxu0  ;;  %v7815_v19 = vpop.f32.mrf.mxu1 }
0x14cf   :  { %v10184_v48 = vmul.f32 -1.442695, %v7820_v25  ;;  %v7821_v22 = vadd.f32 %v7774_v4, %v6475_v43  ;;  %v10186_v23 = vmul.f32 -1.442695, %v7822_v42  ;;  %v7823_v32 = vadd.f32 %v7815_v19, %v6548_v49 }
0x14d0   :  { %v7776_v33 = vpop.f32.mrf.mxu0  ;;  %v7817_v16 = vpop.f32.mrf.mxu1 }
0x14d1   :  { %11175 = vpow2.f32 %v10184_v48  ;;  %v10185_v39 = vmul.f32 -1.442695, %v7821_v22 }
0x14d2   :  { %v7777_v40 = vpop.f32.mrf.mxu0  ;;  %v7818_v6 = vpop.f32.mrf.mxu1 }
0x14d3   :  { %11177 = vpow2.f32 %v10185_v39 }
0x14d4   :  { %11179 = vpow2.f32 %v10186_v23  ;;  %v6479_v23 = vadd.f32 %v13764_v37, %v13149_v62 }
0x14d5   :  { %11181 = vtanh.f32 %v7823_v32 }
0x14de   :  { %v11176_v24 = vpop.eup %11175 }
0x14df   :  { %v7833_v17 = vadd.f32 1.0, %v11176_v24 }
0x14e0   :  { %v11178_v31 = vpop.eup %11177 }
0x14e1   :  { %11183 = vrcp.f32 %v7833_v17  ;;  %v7834_v43 = vadd.f32 1.0, %v11178_v31  ;;  %v11180_v25 = vpop.eup %11179  ;;  %v13765_v17 = vld [vmem:[#allocation60_spill] sm:$0xff] }
0x14e2   :  { %v11182_v4 = vpop.eup %11181  ;;  %v7835_v16 = vadd.f32 1.0, %v11180_v25  ;;  %v6481_v31 = vadd.f32 %v13765_v17, %v13156_v58 }
0x14e3   :  { %11185 = vrcp.f32 %v7834_v43 }
0x14e4   :  { %11187 = vrcp.f32 %v7835_v16 }
0x14ee   :  { %v11184_v48 = vpop.eup %11183 }
0x14ef   :  { %v7845_v22 = vmul.f32 %v11184_v48, %v11182_v4 }
0x14f0   :  { %v11186_v33 = vpop.eup %11185 }
0x14f1   :  { %v7844_v51 = vmul.f32 %v11186_v33, %v13275_v7  ;;  %v11188_v19 = vpop.eup %11187 }
0x14f3   :  { %v13391_v39 = vadd.f32 %v7845_v22, %v7844_v51 }
0x14f5   :  { %11189 = vtanh.f32 %v13391_v39 }
0x1502   :  { %v11190_v40 = vpop.eup %11189 }
0x1503   :  { %v7848_v6 = vmul.f32 %v11190_v40, %v11188_v19 }
0x1505   :  { %v7857_v42 = vpack.c.bf16 %v7848_v6, %v7848_v6  ;;  %v13399_v49 = vadd.f32 %v7848_v6, %v13763_v11  ;;  %v13766_v6 = vld [vmem:[#allocation58_spill] sm:$0xff]  ;;  %v13767_v11 = vld [vmem:[#allocation59_spill] sm:$0xff] }
0x1506   :  { %v6552_v52 = vadd.f32 %v13766_v6, %v13165_v55  ;;  %v6554_v37 = vadd.f32 %v13767_v11, %v13169_v54 }
0x1507   :  { %8083 = vmatmul.mubr.bf16.vlgmr.msra.gmra.mxu0 %v7857_v42  ;;  %8124 = vmatmul.mubr.bf16.vlgmr.msra.gmra.mxu1 %v7857_v42  ;;  %v13778_v8 = vpack.c.bf16 %v13399_v49, %v13396_v35 }
0x1508   :  { %8363 = vmatpush1.bf16.msra.mxu0 %v13288_v12  ;;  %8404 = vmatpush1.bf16.msra.mxu1 %v13290_v28 }
0x1509   :  { %8364 = vmatprep.subr.bf16.mxu0 %v13296_v26  ;;  %8405 = vmatprep.subr.bf16.mxu1 %v13298_v13 }
0x150a   :  { %8394 = vmatprep.mubr.bf16.mxu0 %v13644_v18  ;;  %8435 = vmatprep.mubr.bf16.mxu1 %v13644_v18 }
0x150c   :  { %8365 = vmatpush1.bf16.msra.mxu0 %v13300_v2  ;;  %8406 = vmatpush1.bf16.msra.mxu1 %v13302_v3 }
0x150d   :  { %8366 = vmatprep.subr.bf16.mxu0 %v13308_v5  ;;  %8407 = vmatprep.subr.bf16.mxu1 %v13310_v30 }
0x1510   :  { %8367 = vmatpush1.bf16.msra.mxu0 %v13312_v20  ;;  %8408 = vmatpush1.bf16.msra.mxu1 %v13314_v45 }
0x1511   :  { %8368 = vmatprep.subr.bf16.mxu0 %v13320_v57  ;;  %8409 = vmatprep.subr.bf16.mxu1 %v13322_v21 }
0x1514   :  { %8369 = vmatpush1.bf16.msra.mxu0 %v13324_v53  ;;  %8410 = vmatpush1.bf16.msra.mxu1 %v13326_v0 }
0x1515   :  { %8370 = vmatprep.subr.bf16.mxu0 %v13330_v50  ;;  %8411 = vmatprep.subr.bf16.mxu1 %v13332_v1 }
0x1518   :  { %8371 = vmatpush1.bf16.msra.mxu0 %v13336_v56  ;;  %8412 = vmatpush1.bf16.msra.mxu1 %v13338_v10 }
0x1519   :  { %8372 = vmatprep.subr.bf16.mxu0 %v13342_v38  ;;  %8413 = vmatprep.subr.bf16.mxu1 %v13344_v36 }
0x151c   :  { %8373 = vmatpush1.bf16.msra.mxu0 %v13348_v44  ;;  %8414 = vmatpush1.bf16.msra.mxu1 %v13350_v46 }
0x151d   :  { %8374 = vmatprep.subr.bf16.mxu0 %v13354_v14  ;;  %8415 = vmatprep.subr.bf16.mxu1 %v13356_v27 }
0x1520   :  { %8375 = vmatpush1.bf16.msra.mxu0 %v13360_v63  ;;  %8416 = vmatpush1.bf16.msra.mxu1 %v13362_v9 }
0x1521   :  { %8376 = vmatprep.subr.bf16.mxu0 %v13366_v61  ;;  %8417 = vmatprep.subr.bf16.mxu1 %v13368_v15 }
0x1524   :  { %8377 = vmatpush1.bf16.msra.mxu0 %v13372_v34  ;;  %8418 = vmatpush1.bf16.msra.mxu1 %v13374_v29 }
0x1525   :  { %8674 = vmatprep.subr.bf16.mxu0 %v13284_v59  ;;  %8715 = vmatprep.subr.bf16.mxu1 %v13286_v47 }
0x15c7   :  { %v8084_v32 = vpop.f32.mrf.mxu0  ;;  %v8125_v24 = vpop.f32.mrf.mxu1 }
0x15c8   :  { %v8132_v43 = vadd.f32 %v8084_v32, %v6479_v23  ;;  %v8134_v42 = vadd.f32 %v8125_v24, %v6552_v52 }
0x15c9   :  { %v8086_v25 = vpop.f32.mrf.mxu0  ;;  %v8127_v4 = vpop.f32.mrf.mxu1 }
0x15ca   :  { %v10219_v48 = vmul.f32 -1.442695, %v8132_v43  ;;  %v8133_v22 = vadd.f32 %v8086_v25, %v6481_v31  ;;  %v10221_v17 = vmul.f32 -1.442695, %v8134_v42  ;;  %v8135_v23 = vadd.f32 %v8127_v4, %v6554_v37  ;;  %v13769_v37 = vld [vmem:[#allocation44_spill] sm:$0xff] }
0x15cb   :  { %v8088_v33 = vpop.f32.mrf.mxu0  ;;  %v8129_v16 = vpop.f32.mrf.mxu1 }
0x15cc   :  { %11191 = vpow2.f32 %v10219_v48  ;;  %v10220_v51 = vmul.f32 -1.442695, %v8133_v22 }
0x15cd   :  { %v8089_v19 = vpop.f32.mrf.mxu0  ;;  %v8130_v40 = vpop.f32.mrf.mxu1 }
0x15ce   :  { %11193 = vpow2.f32 %v10220_v51 }
0x15cf   :  { %11195 = vpow2.f32 %v10221_v17  ;;  %v6485_v17 = vadd.f32 %v13769_v37, %v13156_v58 }
0x15d0   :  { %11197 = vtanh.f32 %v8135_v23 }
0x15d9   :  { %v11192_v32 = vpop.eup %11191 }
0x15da   :  { %v8145_v7 = vadd.f32 1.0, %v11192_v32 }
0x15db   :  { %v11194_v31 = vpop.eup %11193 }
0x15dc   :  { %11199 = vrcp.f32 %v8145_v7  ;;  %v8146_v43 = vadd.f32 1.0, %v11194_v31  ;;  %v11196_v25 = vpop.eup %11195 }
0x15dd   :  { %v11198_v48 = vpop.eup %11197  ;;  %v8147_v51 = vadd.f32 1.0, %v11196_v25 }
0x15de   :  { %11201 = vrcp.f32 %v8146_v43 }
0x15df   :  { %11203 = vrcp.f32 %v8147_v51 }
0x15e9   :  { %v11200_v22 = vpop.eup %11199 }
0x15ea   :  { %v8157_v33 = vmul.f32 %v11200_v22, %v11198_v48 }
0x15eb   :  { %v11202_v16 = vpop.eup %11201 }
0x15ec   :  { %v8156_v24 = vmul.f32 %v11202_v16, %v13391_v39  ;;  %v11204_v4 = vpop.eup %11203  ;;  %v13768_v39 = vld [vmem:[#allocation61_spill] sm:$0xff] }
0x15ed   :  { %v6483_v52 = vadd.f32 %v13768_v39, %v13149_v62 }
0x15ee   :  { %v13446_v19 = vadd.f32 %v8157_v33, %v8156_v24 }
0x15f0   :  { %11205 = vtanh.f32 %v13446_v19 }
0x15fd   :  { %v11206_v40 = vpop.eup %11205 }
0x15fe   :  { %v13449_v6 = vmul.f32 %v11206_v40, %v11204_v4  ;;  %v13771_v4 = vld [vmem:[#allocation47_spill] sm:$0xff] }
0x15ff   :  { %v6558_v40 = vadd.f32 %v13771_v4, %v13169_v54  ;;  %v13773_v4 = vld [vmem:[#allocation41_spill] sm:$0xff] }
0x1600   :  { %v8169_v7 = vpack.c.bf16 %v13449_v6, %v13449_v6 }
0x1602   :  { %8395 = vmatmul.mubr.bf16.vlgmr.msra.gmra.mxu0 %v8169_v7  ;;  %8436 = vmatmul.mubr.bf16.vlgmr.msra.gmra.mxu1 %v8169_v7 }
0x1603   :  { %8675 = vmatpush1.bf16.msra.mxu0 %v13288_v12  ;;  %8716 = vmatpush1.bf16.msra.mxu1 %v13290_v28 }
0x1604   :  { %8676 = vmatprep.subr.bf16.mxu0 %v13296_v26  ;;  %8717 = vmatprep.subr.bf16.mxu1 %v13298_v13 }
0x1605   :  { %8706 = vmatprep.mubr.bf16.mxu0 %v13644_v18  ;;  %8747 = vmatprep.mubr.bf16.mxu1 %v13644_v18 }
0x1607   :  { %8677 = vmatpush1.bf16.msra.mxu0 %v13300_v2  ;;  %8718 = vmatpush1.bf16.msra.mxu1 %v13302_v3 }
0x1608   :  { %8678 = vmatprep.subr.bf16.mxu0 %v13308_v5  ;;  %8719 = vmatprep.subr.bf16.mxu1 %v13310_v30 }
0x160b   :  { %8679 = vmatpush1.bf16.msra.mxu0 %v13312_v20  ;;  %8720 = vmatpush1.bf16.msra.mxu1 %v13314_v45 }
0x160c   :  { %8680 = vmatprep.subr.bf16.mxu0 %v13320_v57  ;;  %8721 = vmatprep.subr.bf16.mxu1 %v13322_v21 }
0x160f   :  { %8681 = vmatpush1.bf16.msra.mxu0 %v13324_v53  ;;  %8722 = vmatpush1.bf16.msra.mxu1 %v13326_v0 }
0x1610   :  { %8682 = vmatprep.subr.bf16.mxu0 %v13330_v50  ;;  %8723 = vmatprep.subr.bf16.mxu1 %v13332_v1 }
0x1613   :  { %8683 = vmatpush1.bf16.msra.mxu0 %v13336_v56  ;;  %8724 = vmatpush1.bf16.msra.mxu1 %v13338_v10 }
0x1614   :  { %8684 = vmatprep.subr.bf16.mxu0 %v13342_v38  ;;  %8725 = vmatprep.subr.bf16.mxu1 %v13344_v36 }
0x1617   :  { %8685 = vmatpush1.bf16.msra.mxu0 %v13348_v44  ;;  %8726 = vmatpush1.bf16.msra.mxu1 %v13350_v46 }
0x1618   :  { %8686 = vmatprep.subr.bf16.mxu0 %v13354_v14  ;;  %8727 = vmatprep.subr.bf16.mxu1 %v13356_v27 }
0x161b   :  { %8687 = vmatpush1.bf16.msra.mxu0 %v13360_v63  ;;  %8728 = vmatpush1.bf16.msra.mxu1 %v13362_v9 }
0x161c   :  { %8688 = vmatprep.subr.bf16.mxu0 %v13366_v61  ;;  %8729 = vmatprep.subr.bf16.mxu1 %v13368_v15 }
0x161f   :  { %8689 = vmatpush1.bf16.msra.mxu0 %v13372_v34  ;;  %8730 = vmatpush1.bf16.msra.mxu1 %v13374_v29 }
0x1620   :  { %8986 = vmatprep.subr.bf16.mxu0 %v13284_v59  ;;  %9027 = vmatprep.subr.bf16.mxu1 %v13286_v47  ;;  %v13770_v47 = vld [vmem:[#allocation45_spill] sm:$0xff] }
0x1621   :  { %v6556_v51 = vadd.f32 %v13770_v47, %v13165_v55 }
0x16c2   :  { %v8396_v42 = vpop.f32.mrf.mxu0  ;;  %v8437_v11 = vpop.f32.mrf.mxu1 }
0x16c3   :  { %v8444_v23 = vadd.f32 %v8396_v42, %v6483_v52  ;;  %v8446_v24 = vadd.f32 %v8437_v11, %v6556_v51  ;;  %v13772_v51 = vld [vmem:[#allocation37_spill] sm:$0xff] }
0x16c4   :  { %v8398_v32 = vpop.f32.mrf.mxu0  ;;  %v8439_v31 = vpop.f32.mrf.mxu1 }
0x16c5   :  { %v10254_v43 = vmul.f32 -1.442695, %v8444_v23  ;;  %v8445_v25 = vadd.f32 %v8398_v32, %v6485_v17  ;;  %v10256_v7 = vmul.f32 -1.442695, %v8446_v24  ;;  %v8447_v52 = vadd.f32 %v8439_v31, %v6558_v40 }
0x16c6   :  { %v8400_v48 = vpop.f32.mrf.mxu0  ;;  %v8441_v22 = vpop.f32.mrf.mxu1  ;;  %v13501_v24 = vadd.f32 %v13449_v6, %v13772_v51 }
0x16c7   :  { %11207 = vpow2.f32 %v10254_v43  ;;  %v10255_v33 = vmul.f32 -1.442695, %v8445_v25 }
0x16c8   :  { %v8401_v59 = vpop.f32.mrf.mxu0  ;;  %v8442_v16 = vpop.f32.mrf.mxu1 }
0x16c9   :  { %11209 = vpow2.f32 %v10255_v33 }
0x16ca   :  { %11211 = vpow2.f32 %v10256_v7 }
0x16d4   :  { %v11208_v39 = vpop.eup %11207 }
0x16d5   :  { %v8457_v42 = vadd.f32 1.0, %v11208_v39 }
0x16d6   :  { %v11210_v37 = vpop.eup %11209 }
0x16d7   :  { %11213 = vrcp.f32 %v8457_v42  ;;  %v8458_v17 = vadd.f32 1.0, %v11210_v37  ;;  %v11212_v23 = vpop.eup %11211 }
0x16d8   :  { %11215 = vtanh.f32 %v8447_v52  ;;  %v8459_v48 = vadd.f32 1.0, %v11212_v23 }
0x16d9   :  { %11217 = vrcp.f32 %v8458_v17 }
0x16da   :  { %11219 = vrcp.f32 %v8459_v48  ;;  %v10850_v48 = vld [vmem:[#allocation22 + $0x20] sm:$0xff]  }
0x16e4   :  { %v11214_v32 = vpop.eup %11213 }
0x16e5   :  { %v11216_v43 = vpop.eup %11215 }
0x16e6   :  { %v11218_v25 = vpop.eup %11217  ;;  %v8469_v22 = vmul.f32 %v11216_v43, %v11214_v32  ;;  %v10848_v43 = vld [vmem:[#allocation22 + $0x30] sm:$0xff]  }
0x16e7   :  { %v8468_v11 = vmul.f32 %v11218_v25, %v13446_v19  ;;  %v11220_v31 = vpop.eup %11219  ;;  %v10849_v25 = vld [vmem:[#allocation22 + $0x28] sm:$0xff]  }
0x16e9   :  { %v13496_v33 = vadd.f32 %v8469_v22, %v8468_v11  ;;  %v10851_v11 = vld [vmem:[#allocation22 + $0x18] sm:$0xff]   ;;  %v10852_v22 = vld [vmem:[#allocation22 + $0x10] sm:$0xff]  }
0x16eb   :  { %11221 = vtanh.f32 %v13496_v33 }
0x16f8   :  { %v11222_v59 = vpop.eup %11221 }
0x16f9   :  { %v8472_v16 = vmul.f32 %v11222_v59, %v11220_v31  ;;  %v10854_v31 = vld [vmem:[#allocation22] sm:$0xff]  }
0x16fb   :  { %v8481_v47 = vpack.c.bf16 %v8472_v16, %v8472_v16  ;;  %v13504_v40 = vadd.f32 %v8472_v16, %v13773_v4 }
0x16fd   :  { %8707 = vmatmul.mubr.bf16.vlgmr.msra.gmra.mxu0 %v8481_v47  ;;  %8748 = vmatmul.mubr.bf16.vlgmr.msra.gmra.mxu1 %v8481_v47  ;;  %v9142_v19 = vpack.c.bf16 %v13504_v40, %v13501_v24  ;;  %v13780_v47 = vld [vmem:[#allocation65_spill] sm:$0xff]  ;;  %v13781_v40 = vld [vmem:[#allocation63_spill] sm:$0xff] }
0x16fe   :  { %8987 = vmatpush1.bf16.msra.mxu0 %v13288_v12  ;;  %9028 = vmatpush1.bf16.msra.mxu1 %v13290_v28  ;;  %v13774_v12 = vld [vmem:[#allocation46_spill] sm:$0xff]  ;;  %v6495_v51 = vadd.f32 %v13780_v47, %v13156_v58 }
0x16ff   :  { %8988 = vmatprep.subr.bf16.mxu0 %v13296_v26  ;;  %9029 = vmatprep.subr.bf16.mxu1 %v13298_v13  ;;  %v6489_v28 = vadd.f32 %v13774_v12, %v13149_v62 }
0x1700   :  { %9018 = vmatprep.mubr.bf16.mxu0 %v13644_v18  ;;  %9059 = vmatprep.mubr.bf16.mxu1 %v13644_v18  ;;  %v10847_v18 = vld [vmem:[#allocation22 + $0x38] sm:$0xff]  }
0x1702   :  { %8989 = vmatpush1.bf16.msra.mxu0 %v13300_v2  ;;  %9030 = vmatpush1.bf16.msra.mxu1 %v13302_v3  ;;  %v13775_v2 = vld [vmem:[#allocation48_spill] sm:$0xff] }
0x1703   :  { %8990 = vmatprep.subr.bf16.mxu0 %v13308_v5  ;;  %9031 = vmatprep.subr.bf16.mxu1 %v13310_v30  ;;  %v6491_v3 = vadd.f32 %v13775_v2, %v13156_v58 }
0x1706   :  { %8991 = vmatpush1.bf16.msra.mxu0 %v13312_v20  ;;  %9032 = vmatpush1.bf16.msra.mxu1 %v13314_v45 }
0x1707   :  { %8992 = vmatprep.subr.bf16.mxu0 %v13320_v57  ;;  %9033 = vmatprep.subr.bf16.mxu1 %v13322_v21 }
0x170a   :  { %8993 = vmatpush1.bf16.msra.mxu0 %v13324_v53  ;;  %9034 = vmatpush1.bf16.msra.mxu1 %v13326_v0 }
0x170b   :  { %8994 = vmatprep.subr.bf16.mxu0 %v13330_v50  ;;  %9035 = vmatprep.subr.bf16.mxu1 %v13332_v1 }
0x170e   :  { %8995 = vmatpush1.bf16.msra.mxu0 %v13336_v56  ;;  %9036 = vmatpush1.bf16.msra.mxu1 %v13338_v10  ;;  %v13776_v56 = vld [vmem:[#allocation49_spill] sm:$0xff] }
0x170f   :  { %8996 = vmatprep.subr.bf16.mxu0 %v13342_v38  ;;  %9037 = vmatprep.subr.bf16.mxu1 %v13344_v36  ;;  %v6562_v10 = vadd.f32 %v13776_v56, %v13165_v55  ;;  %v13777_v36 = vld [vmem:[#allocation62_spill] sm:$0xff] }
0x1712   :  { %8997 = vmatpush1.bf16.msra.mxu0 %v13348_v44  ;;  %9038 = vmatpush1.bf16.msra.mxu1 %v13350_v46  ;;  %v6564_v44 = vadd.f32 %v13777_v36, %v13169_v54 }
0x1713   :  { %8998 = vmatprep.subr.bf16.mxu0 %v13354_v14  ;;  %9039 = vmatprep.subr.bf16.mxu1 %v13356_v27 }
0x1716   :  { %8999 = vmatpush1.bf16.msra.mxu0 %v13360_v63  ;;  %9040 = vmatpush1.bf16.msra.mxu1 %v13362_v9 }
0x1717   :  { %9000 = vmatprep.subr.bf16.mxu0 %v13366_v61  ;;  %9041 = vmatprep.subr.bf16.mxu1 %v13368_v15 }
0x171a   :  { %9001 = vmatpush1.bf16.msra.mxu0 %v13372_v34  ;;  %9042 = vmatpush1.bf16.msra.mxu1 %v13374_v29 }
0x171b   :  { %10348 = vmatprep.subr.bf16.mxu0 %v10847_v18 }
0x17bd   :  { %v8708_v26 = vpop.f32.mrf.mxu0  ;;  %v8749_v13 = vpop.f32.mrf.mxu1 }
0x17be   :  { %v8756_v5 = vadd.f32 %v8708_v26, %v6489_v28  ;;  %v8758_v38 = vadd.f32 %v8749_v13, %v6562_v10 }
0x17bf   :  { %v8710_v30 = vpop.f32.mrf.mxu0  ;;  %v8751_v20 = vpop.f32.mrf.mxu1 }
0x17c0   :  { %v10289_v45 = vmul.f32 -1.442695, %v8756_v5  ;;  %v8757_v57 = vadd.f32 %v8710_v30, %v6491_v3  ;;  %v10291_v46 = vmul.f32 -1.442695, %v8758_v38  ;;  %v8759_v14 = vadd.f32 %v8751_v20, %v6564_v44  ;;  %v13782_v3 = vld [vmem:[#allocation34_spill] sm:$0xff] }
0x17c1   :  { %v8712_v21 = vpop.f32.mrf.mxu0  ;;  %v8753_v53 = vpop.f32.mrf.mxu1  ;;  %v6568_v5 = vadd.f32 %v13782_v3, %v13169_v54 }
0x17c2   :  { %11223 = vpow2.f32 %v10289_v45  ;;  %v10290_v0 = vmul.f32 -1.442695, %v8757_v57  ;;  %v10327_v53 = vld [vmem:[%s13599_s13] ss:$0 sm:$0xff]  ;;  %s11549_s13 = smov [#allocation24]  }
0x17c3   :  { %v8713_v50 = vpop.f32.mrf.mxu0  ;;  %v8754_v1 = vpop.f32.mrf.mxu1  ;;  %s9365_s0 = sshll.u32 %s11549_s13, 4  ;;  %s9366_s0 = int_to_ptr.vmem [resolvable:$true] %s9365_s0 }
0x17c4   :  { %11225 = vpow2.f32 %v10290_v0  ;;  %s11497_s16 = scalar_lea.vmem %s9366_s0, 1024  ;;  %p11502_p9 = scmp.lt.s32.totalorder %s9366_s0, %s9366_s0 }
0x17c5   :  { %11227 = vpow2.f32 %v10291_v46  ;;  %p11498_p8 = scmp.ne.s32.totalorder %s9366_s0, %s11497_s16  ;;  %p11503_p10 = scmp.lt.s32.totalorder %s11497_s16, %s11497_s16 }
0x17c6   :  { %11229 = vtanh.f32 %v8759_v14 }
0x17c7   :  { %p11504_p11 = por %p11503_p10, %p11502_p9 }
0x17c9   :  { %p11505_p12 = pnand %p11504_p11, %p11498_p8 }
0x17cf   :  { %v11224_v27 = vpop.eup %11223 }
0x17d0   :  { %v8769_v63 = vadd.f32 1.0, %v11224_v27 }
0x17d1   :  { %v11226_v9 = vpop.eup %11225 }
0x17d2   :  { %11231 = vrcp.f32 %v8769_v63  ;;  %v8770_v61 = vadd.f32 1.0, %v11226_v9  ;;  %v11228_v15 = vpop.eup %11227 }
0x17d3   :  { %v11230_v34 = vpop.eup %11229  ;;  %v8771_v39 = vadd.f32 1.0, %v11228_v15 }
0x17d4   :  { %11233 = vrcp.f32 %v8770_v61 }
0x17d5   :  { %11235 = vrcp.f32 %v8771_v39  ;;  %v13784_v39 = vld [vmem:[#allocation36_spill] sm:$0xff] }
0x17df   :  { %v11232_v29 = vpop.eup %11231 }
0x17e0   :  { %v8781_v6 = vmul.f32 %v11232_v29, %v11230_v34 }
0x17e1   :  { %v11234_v7 = vpop.eup %11233 }
0x17e2   :  { %v8780_v52 = vmul.f32 %v11234_v7, %v13496_v33  ;;  %v11236_v37 = vpop.eup %11235  ;;  %v10853_v33 = vld [vmem:[#allocation22 + $0x8] sm:$0xff]  }
0x17e4   :  { %v13549_v42 = vadd.f32 %v8781_v6, %v8780_v52  ;;  %v13783_v6 = vld [vmem:[#allocation42_spill] sm:$0xff] }
0x17e6   :  { %11237 = vtanh.f32 %v13549_v42 }
0x17f3   :  { %v11238_v17 = vpop.eup %11237 }
0x17f4   :  { %v13552_v23 = vmul.f32 %v11238_v17, %v11236_v37 }
0x17f6   :  { %v8793_v32 = vpack.c.bf16 %v13552_v23, %v13552_v23  ;;  %v9122_v7 = vadd.f32 %v13552_v23, %v13783_v6 }
0x17f8   :  { %9019 = vmatmul.mubr.bf16.vlgmr.msra.gmra.mxu0 %v8793_v32  ;;  %9060 = vmatmul.mubr.bf16.vlgmr.msra.gmra.mxu1 %v8793_v32 }
0x17f9   :  { %10349 = vmatpush3.bf16.msra.mxu0 %v10847_v18  ;;  %10364 = vmatprep.mubr.bf16.mxu0 %v9140_v60  ;;  %v6493_v60 = vadd.f32 %v13779_v41, %v13149_v62  ;;  %v6566_v62 = vadd.f32 %v13781_v40, %v13165_v55 }
0x17fa   :  { %10350 = vmatprep.subr.bf16.mxu0 %v10848_v43 }
0x17fd   :  { %10351 = vmatpush3.bf16.msra.mxu0 %v10848_v43 }
0x17fe   :  { %10352 = vmatprep.subr.bf16.mxu0 %v10849_v25 }
0x1801   :  { %10353 = vmatpush3.bf16.msra.mxu0 %v10849_v25 }
0x1802   :  { %10354 = vmatprep.subr.bf16.mxu0 %v10850_v48 }
0x1805   :  { %10355 = vmatpush3.bf16.msra.mxu0 %v10850_v48 }
0x1806   :  { %10356 = vmatprep.subr.bf16.mxu0 %v10851_v11 }
0x1809   :  { %10357 = vmatpush3.bf16.msra.mxu0 %v10851_v11 }
0x180a   :  { %10358 = vmatprep.subr.bf16.mxu0 %v10852_v22 }
0x180d   :  { %10359 = vmatpush3.bf16.msra.mxu0 %v10852_v22 }
0x180e   :  { %10360 = vmatprep.subr.bf16.mxu0 %v10853_v33 }
0x1811   :  { %10361 = vmatpush3.bf16.msra.mxu0 %v10853_v33 }
0x1812   :  { %10362 = vmatprep.subr.bf16.mxu0 %v10854_v31 }
0x1815   :  { %10363 = vmatpush3.bf16.msra.mxu0 %v10854_v31 }
0x1818   :  { %10365 = vmatmul.mubr.bf16.vlgmr.msra.gmra.mxu0 %v13778_v8 }
0x1819   :  { %10368 = vmatprep.mubr.bf16.mxu0 %v9142_v19 }
0x18b8   :  { %v9020_v59 = vpop.f32.mrf.mxu0  ;;  %v9061_v16 = vpop.f32.mrf.mxu1 }
0x18b9   :  { %v9068_v4 = vadd.f32 %v9020_v59, %v6493_v60  ;;  %v9070_v19 = vadd.f32 %v9061_v16, %v6566_v62 }
0x18ba   :  { %v9022_v18 = vpop.f32.mrf.mxu0  ;;  %v9063_v12 = vpop.f32.mrf.mxu1 }
0x18bb   :  { %v10324_v28 = vmul.f32 -1.442695, %v9068_v4  ;;  %v9069_v26 = vadd.f32 %v9022_v18, %v6495_v51  ;;  %v10326_v58 = vmul.f32 -1.442695, %v9070_v19  ;;  %v9071_v30 = vadd.f32 %v9063_v12, %v6568_v5 }
0x18bc   :  { %v9024_v13 = vpop.f32.mrf.mxu0  ;;  %v9065_v35 = vpop.f32.mrf.mxu1 }
0x18bd   :  { %11239 = vpow2.f32 %v10324_v28  ;;  %v10325_v49 = vmul.f32 -1.442695, %v9069_v26 }
0x18be   :  { %v9025_v2 = vpop.f32.mrf.mxu0  ;;  %v9066_v24 = vpop.f32.mrf.mxu1 }
0x18bf   :  { %11241 = vpow2.f32 %v10325_v49 }
0x18c0   :  { %11243 = vpow2.f32 %v10326_v58 }
0x18c1   :  { %11245 = vtanh.f32 %v9071_v30 }
0x18ca   :  { %v11240_v20 = vpop.eup %11239 }
0x18cb   :  { %v9081_v45 = vadd.f32 1.0, %v11240_v20 }
0x18cc   :  { %v11242_v57 = vpop.eup %11241 }
0x18cd   :  { %11247 = vrcp.f32 %v9081_v45  ;;  %v9082_v21 = vadd.f32 1.0, %v11242_v57  ;;  %v11244_v0 = vpop.eup %11243 }
0x18ce   :  { %v11246_v50 = vpop.eup %11245  ;;  %v9083_v36 = vadd.f32 1.0, %v11244_v0 }
0x18cf   :  { %11249 = vrcp.f32 %v9082_v21 }
0x18d0   :  { %11251 = vrcp.f32 %v9083_v36 }
0x18d8   :  { %v10366_v55 = vpop.f32.mrf.mxu0 }
0x18d9   :  { %v9258_v1 = vadd.f32 %v10366_v55, %v10327_v53 }
0x18da   :  { %v11248_v56 = vpop.eup %11247  ;;  %v9249_v54 = vpop.f32.mrf.mxu0 }
0x18db   :  { %v9093_v10 = vmul.f32 %v11248_v56, %v11246_v50  ;;  %9284 = vmax.xlane.f32.xlu0 %v9258_v1  ;;  %v9250_v14 = vadd.f32 %v10327_v53, %v9249_v54 }
0x18dc   :  { %v11250_v38 = vpop.eup %11249  ;;  %v10367_v44 = vpop.f32.mrf.mxu0 }
0x18dd   :  { %v9092_v46 = vmul.f32 %v11250_v38, %v13549_v42  ;;  %v9261_v27 = vadd.f32 %v10367_v44, %v10327_v53  ;;  %v11252_v15 = vpop.eup %11251 }
0x18de   :  { %v9252_v63 = vpop.f32.mrf.mxu0 }
0x18df   :  { %v9094_v9 = vadd.f32 %v9093_v10, %v9092_v46  ;;  %9286 = vmax.xlane.f32.xlu1 %v9261_v27  ;;  %9280 = vmax.xlane.f32.xlu0 %v9250_v14  ;;  %v9253_v61 = vadd.f32 %v10327_v53, %v9252_v63 }
0x18e1   :  { %11253 = vtanh.f32 %v9094_v9 }
0x18e3   :  { %9282 = vmax.xlane.f32.xlu1 %v9253_v61 }
0x18ee   :  { %v11254_v34 = vpop.eup %11253 }
0x18ef   :  { %v9096_v29 = vmul.f32 %v11254_v34, %v11252_v15 }
0x18f1   :  { %v9123_v52 = vadd.f32 %v9096_v29, %v13784_v39 }
0x18f3   :  { %v9143_v37 = vpack.c.bf16 %v9123_v52, %v9122_v7 }
0x18f5   :  { %10369 = vmatmul.mubr.bf16.gmra.mxu0 %v9143_v37 }
0x1964   :  { %v9285_v42 = vpop.xlane.xlu0 %9284 }
0x1965   :  { %v9298_v48 = vsub.f32 %v9258_v1, %v9285_v42 }
0x1967   :  { %v9308_v33 = vmul.f32 1.442695, %v9298_v48 }
0x1968   :  { %v9287_v17 = vpop.xlane.xlu1 %9286  ;;  %v9281_v32 = vpop.xlane.xlu0 %9280 }
0x1969   :  { %v9296_v43 = vsub.f32 %v9250_v14, %v9281_v32  ;;  %v9299_v31 = vsub.f32 %v9261_v27, %v9287_v17 }
0x196b   :  { %v9304_v11 = vmul.f32 1.442695, %v9296_v43  ;;  %v9310_v23 = vmul.f32 1.442695, %v9299_v31 }
0x196c   :  { %v9283_v25 = vpop.xlane.xlu1 %9282 }
0x196d   :  { %v9297_v22 = vsub.f32 %v9253_v61, %v9283_v25  ;;  %11255 = vpow2.f32 %v9304_v11 }
0x196e   :  { %11257 = vpow2.f32 %v9308_v33 }
0x196f   :  { %v9306_v8 = vmul.f32 1.442695, %v9297_v22 }
0x1971   :  { %11259 = vpow2.f32 %v9306_v8 }
0x1972   :  { %11261 = vpow2.f32 %v9310_v23 }
0x197a   :  { %v11256_v12 = vpop.eup %11255 }
0x197b   :  { %v11258_v28 = vpop.eup %11257 }
0x197e   :  { %v11260_v26 = vpop.eup %11259 }
0x197f   :  { %v11262_v13 = vpop.eup %11261 }
0x19b5   :  { %v10370_v41 = vpop.f32.mrf.mxu0 }
0x19b6   :  { %v9274_v51 = vadd.f32 %v10370_v41, %v10327_v53 }
0x19b7   :  { %v9265_v60 = vpop.f32.mrf.mxu0 }
0x19b8   :  { %v9266_v59 = vadd.f32 %v10327_v53, %v9265_v60 }
0x19b9   :  { %v10371_v16 = vpop.f32.mrf.mxu0 }
0x19ba   :  { %9288 = vmax.xlane.f32.xlu0 %v9266_v59  ;;  %v9277_v18 = vadd.f32 %v10371_v16, %v10327_v53 }
0x19bb   :  { %v9268_v47 = vpop.f32.mrf.mxu0 }
0x19bc   :  { %v9269_v4 = vadd.f32 %v10327_v53, %v9268_v47 }
0x19be   :  { %9290 = vmax.xlane.f32.xlu1 %v9269_v4  ;;  %9292 = vmax.xlane.f32.xlu0 %v9274_v51 }
0x19c2   :  { %9294 = vmax.xlane.f32.xlu1 %v9277_v18  ;;  %9320 = vadd.xlane.f32.xlu0 %v11256_v12 }
0x19c6   :  { %9322 = vadd.xlane.f32.xlu1 %v11260_v26  ;;  %9324 = vadd.xlane.f32.xlu0 %v11258_v28 }
0x19ca   :  { %9326 = vadd.xlane.f32.xlu1 %v11262_v13 }
0x1a43   :  { %v9289_v35 = vpop.xlane.xlu0 %9288 }
0x1a44   :  { %v9300_v49 = vsub.f32 %v9266_v59, %v9289_v35 }
0x1a46   :  { %v9312_v2 = vmul.f32 1.442695, %v9300_v49 }
0x1a47   :  { %v9291_v24 = vpop.xlane.xlu1 %9290  ;;  %v9293_v40 = vpop.xlane.xlu0 %9292 }
0x1a48   :  { %11263 = vpow2.f32 %v9312_v2  ;;  %v9301_v62 = vsub.f32 %v9269_v4, %v9291_v24  ;;  %v9302_v19 = vsub.f32 %v9274_v51, %v9293_v40 }
0x1a4a   :  { %v9314_v3 = vmul.f32 1.442695, %v9301_v62  ;;  %v9316_v5 = vmul.f32 1.442695, %v9302_v19 }
0x1a4b   :  { %v9295_v58 = vpop.xlane.xlu1 %9294  ;;  %v9321_v30 = vpop.xlane.xlu0 %9320 }
0x1a4c   :  { %11265 = vpow2.f32 %v9314_v3  ;;  %v9303_v20 = vsub.f32 %v9277_v18, %v9295_v58 }
0x1a4d   :  { %11267 = vpow2.f32 %v9316_v5 }
0x1a4e   :  { %v9318_v45 = vmul.f32 1.442695, %v9303_v20  ;;  %11269 = vrcp.f32 %v9321_v30 }
0x1a4f   :  { %v9323_v57 = vpop.xlane.xlu1 %9322  ;;  %v9325_v21 = vpop.xlane.xlu0 %9324 }
0x1a50   :  { %11271 = vpow2.f32 %v9318_v45 }
0x1a51   :  { %11273 = vrcp.f32 %v9323_v57 }
0x1a52   :  { %11275 = vrcp.f32 %v9325_v21 }
0x1a53   :  { %v9327_v53 = vpop.xlane.xlu1 %9326 }
0x1a54   :  { %11277 = vrcp.f32 %v9327_v53 }
0x1a55   :  { %v11264_v0 = vpop.eup %11263 }
0x1a56   :  { %9328 = vadd.xlane.f32.xlu0 %v11264_v0 }
0x1a59   :  { %v11266_v55 = vpop.eup %11265 }
0x1a5a   :  { %v11268_v50 = vpop.eup %11267  ;;  %9330 = vadd.xlane.f32.xlu1 %v11266_v55 }
0x1a5b   :  { %v11270_v1 = vpop.eup %11269  ;;  %9332 = vadd.xlane.f32.xlu0 %v11268_v50 }
0x1a5c   :  { %v9337_v56 = vmul.f32 %v11270_v1, %v11256_v12 }
0x1a5d   :  { %v11272_v54 = vpop.eup %11271 }
0x1a5e   :  { %v11274_v10 = vpop.eup %11273  ;;  %9352 = vst [vmem:[#allocation24] sm:$0xff] %v9337_v56  ;;  %9334 = vadd.xlane.f32.xlu1 %v11272_v54 }
0x1a5f   :  { %v11276_v38 = vpop.eup %11275  ;;  %v9339_v36 = vmul.f32 %v11274_v10, %v11260_v26 }
0x1a60   :  { %v9341_v44 = vmul.f32 %v11276_v38, %v11258_v28 }
0x1a61   :  { %v11278_v46 = vpop.eup %11277  ;;  %9353 = vst [vmem:[#allocation24 + $0x8] sm:$0xff] %v9339_v36 }
0x1a62   :  { %9354 = vst [vmem:[#allocation24 + $0x10] sm:$0xff] %v9341_v44  ;;  %v9343_v14 = vmul.f32 %v11278_v46, %v11262_v13 }
0x1a64   :  { %9355 = vst [vmem:[#allocation24 + $0x18] sm:$0xff] %v9343_v14 }
0x1adf   :  { %v9329_v27 = vpop.xlane.xlu0 %9328 }
0x1ae0   :  { %11279 = vrcp.f32 %v9329_v27 }
0x1ae3   :  { %v9331_v63 = vpop.xlane.xlu1 %9330 }
0x1ae4   :  { %11281 = vrcp.f32 %v9331_v63  ;;  %v9333_v9 = vpop.xlane.xlu0 %9332 }
0x1ae5   :  { %11283 = vrcp.f32 %v9333_v9 }
0x1ae7   :  { %v9335_v61 = vpop.xlane.xlu1 %9334 }
0x1ae8   :  { %11285 = vrcp.f32 %v9335_v61 }
0x1aed   :  { %v11280_v15 = vpop.eup %11279 }
0x1aee   :  { %v9345_v34 = vmul.f32 %v11280_v15, %v11264_v0 }
0x1af0   :  { %9356 = vst [vmem:[#allocation24 + $0x20] sm:$0xff] %v9345_v34 }
0x1af1   :  { %v11282_v29 = vpop.eup %11281 }
0x1af2   :  { %v11284_v6 = vpop.eup %11283  ;;  %v9347_v7 = vmul.f32 %v11282_v29, %v11266_v55 }
0x1af3   :  { %v9349_v39 = vmul.f32 %v11284_v6, %v11268_v50 }
0x1af4   :  { %9357 = vst [vmem:[#allocation24 + $0x28] sm:$0xff] %v9347_v7 }
0x1af5   :  { %v11286_v52 = vpop.eup %11285  ;;  %9358 = vst [vmem:[#allocation24 + $0x30] sm:$0xff] %v9349_v39 }
0x1af6   :  { %v9351_v37 = vmul.f32 %v11286_v52, %v11272_v54 }
0x1af8   :  { %9359 = vst [vmem:[#allocation24 + $0x38] sm:$0xff] %v9351_v37 }
0x1af9   :  { %11508 = shalt.err (!%p11505_p12)
}
0x1afa   :  { %9371 = dma.vmem_to_hbm [thread:$0]  %s9366_s0, 1024, %s13600_s14, [#allocation9], %s11538_s6, %s11538_s6, %s11539_s21  }
0x1afb   :  { %11529 = dma.done.wait [#allocation9], 1024  }
0x1afc   :  { %11530 = vsyncadd [#allocation9], 4294966272 }
0x1afd   :  { %9375 = vsyncpa [#allocation8], 1 }
0x1afe   :  { %9376 = vsyncpa [#allocation11], 1 }
0x1aff   :  { %9377 = vsyncpa [#allocation14], 1 }
0x1b00   :  { %9378 = vsyncpa [#allocation17], 1 }
0x1b01   :  { %9379 = vsyncpa [#allocation20], 1 }
0x1b02   :  { %9380 = vsyncpa [#allocation23], 1 }
0x1b03   :  { %9381 = vsyncpa [#allocation9], 1 }

</bundles_post_ra>
